<compile_context>
chip_gen: v7x
topology: tpu7x:2x2x1
jax: 0.10.0
libtpu: 0.0.40
codegen_flags: <defaults>
</compile_context>

<pallas_src>
import functools

import jax
import jax.numpy as jnp
from jax.experimental import pallas as pl
from jax.experimental.pallas import tpu as pltpu


TF_KEYS = ('wqkv_t', 'bqkv', 'wo_t', 'bo', 'ln1_g', 'ln1_b',
           'w1_t', 'b1', 'w2_t', 'b2', 'ln2_g', 'ln2_b')
TAC_KEYS = ('w1_t', 'b1', 'w2_t', 'b2', 'w3_t', 'b3', 'gn_g', 'gn_b')
N_TF_W = len(TF_KEYS)      # 12
N_TAC_W = len(TAC_KEYS)    # 8

VMEM_LIMIT_BYTES = 48 * 1024 * 1024   # above v5e/v6e scoped defaults, below v7x's 64 MiB physical


def _bf16(x):
    return x.astype(jnp.bfloat16)


# ----------------------------- in-kernel helpers -----------------------------

def _layer_norm(x, g, b, eps):
    mu = jnp.mean(x, axis=-1, keepdims=True)
    var = jnp.mean((x - mu) ** 2, axis=-1, keepdims=True)
    return (x - mu) * jax.lax.rsqrt(var + eps) * g + b


def _prelu(x, a):
    return jnp.where(x >= 0, x, a * x)


def _tf_encoder(xf, w_refs, seq_len, n_head, eps):
    """Post-norm nn.TransformerEncoderLayer on a flat (R, C) f32 slab.

    Consecutive groups of `seq_len` rows form one sequence; self-attention is computed
    per sequence with batched einsums (no dense block-diagonal mask).  Matmul operands
    are bf16, accumulation is f32; LN/softmax statistics stay in f32.
    """
    (wqkv_r, bqkv_r, wo_r, bo_r, g1_r, b1_r,
     w1_r, bf1_r, w2_r, bf2_r, g2_r, b2_r) = w_refs
    R, C = xf.shape
    hd = C // n_head
    n_seq = R // seq_len
    scale = 1.0 / float(hd) ** 0.5

    qkv = jnp.dot(_bf16(xf), _bf16(wqkv_r[...]),
                  preferred_element_type=jnp.float32) + bqkv_r[...]
    q2 = _bf16(qkv[:, :C] * scale)
    k2 = _bf16(qkv[:, C:2 * C])
    v2 = _bf16(qkv[:, 2 * C:])
    wo = _bf16(wo_r[...])

    attn = jnp.zeros((R, C), jnp.float32)
    for h in range(n_head):
        sl = slice(h * hd, (h + 1) * hd)
        qh = q2[:, sl].reshape(n_seq, seq_len, hd)
        kh = k2[:, sl].reshape(n_seq, seq_len, hd)
        vh = v2[:, sl].reshape(n_seq, seq_len, hd)
        s = jnp.einsum('bqd,bkd->bqk', qh, kh,
                       preferred_element_type=jnp.float32)            # (n_seq, L, L) f32
        s = s - jnp.max(s, axis=-1, keepdims=True)
        p = jnp.exp(s)
        p = p * pl.reciprocal(jnp.sum(p, axis=-1, keepdims=True), approx=True)
        ctx = jnp.einsum('bqk,bkd->bqd', _bf16(p), vh,
                         preferred_element_type=jnp.float32)           # (n_seq, L, hd)
        # Fold the head straight into the output projection: lane-dense (R, C) accumulate,
        # never a narrow hd-wide store.
        attn = attn + jnp.dot(_bf16(ctx.reshape(R, hd)), wo[sl, :],
                              preferred_element_type=jnp.float32)
    attn = attn + bo_r[...]

    h1 = _layer_norm(xf + attn, g1_r[...], b1_r[...], eps)
    ff = jnp.maximum(jnp.dot(_bf16(h1), _bf16(w1_r[...]),
                             preferred_element_type=jnp.float32) + bf1_r[...], 0.0)
    ff = jnp.dot(_bf16(ff), _bf16(w2_r[...]),
                 preferred_element_type=jnp.float32) + bf2_r[...]
    return _layer_norm(h1 + ff, g2_r[...], b2_r[...], eps)


def _tac(hf, w_refs, a1, a2, a3, n_mic, eps):
    """FaSNet-style TAC.  hf: (n_mic * L, C) f32, mics are contiguous row blocks."""
    (w1_r, b1_r, w2_r, b2_r, w3_r, b3_r, gng_r, gnb_r) = w_refs
    C = hf.shape[-1]
    L = hf.shape[0] // n_mic
    C3 = w1_r.shape[1]

    # per-mic Linear(C->3C)+PReLU done as one big batched matmul.
    y = _prelu(jnp.dot(_bf16(hf), _bf16(w1_r[...]),
                       preferred_element_type=jnp.float32) + b1_r[...], a1)     # (n_mic*L, 3C)
    y_mean = jnp.mean(y.reshape(n_mic, L, C3), axis=0)                          # (L, 3C)
    z = _prelu(jnp.dot(_bf16(y_mean), _bf16(w2_r[...]),
                       preferred_element_type=jnp.float32) + b2_r[...], a2)

    w3 = _bf16(w3_r[...])
    y_part = jnp.dot(_bf16(y), w3[:C3, :], preferred_element_type=jnp.float32)  # (n_mic*L, C)
    z_part = jnp.dot(_bf16(z), w3[C3:, :], preferred_element_type=jnp.float32)  # (L, C)
    out = _prelu(y_part.reshape(n_mic, L, C) + z_part[None, :, :] + b3_r[...], a3)

    # GroupNorm(1, C) per mic over its (L, C) slab, per-channel affine.
    mu = jnp.mean(jnp.mean(out, axis=2, keepdims=True), axis=1, keepdims=True)
    d = out - mu
    var = jnp.mean(jnp.mean(d * d, axis=2, keepdims=True), axis=1, keepdims=True)
    out = d * jax.lax.rsqrt(var + eps) * gng_r[...] + gnb_r[...]
    return hf + out.reshape(n_mic * L, C)


# ------------------------- fused per-layer kernel -----------------------------

def fused_layer_kernel(prelu_ref, x_ref, *rest, n_mic, S, T, n_head, eps):
    """One full RESepFormer layer (intra TF -> TAC -> inter TF + broadcast residual)
    for one mic group.  x_ref block: (n_mic*S*T, C), mic-major / then s / then t."""
    w_refs, o_ref = rest[:-1], rest[-1]
    intra_w = w_refs[:N_TF_W]
    tac_w = w_refs[N_TF_W:N_TF_W + N_TAC_W]
    inter_w = w_refs[N_TF_W + N_TAC_W:]
    a1, a2, a3 = prelu_ref[0], prelu_ref[1], prelu_ref[2]

    R, C = x_ref.shape                                  # R = n_mic * S * T
    x = x_ref[...].astype(jnp.float32)

    # intra-chunk transformer: n_mic*S sequences of length T, batched.
    h = _tf_encoder(x, intra_w, T, n_head, eps)
    # TAC across mics on the (n_mic, S*T, C) view.
    h = _tac(h, tac_w, a1, a2, a3, n_mic, eps)
    # inter-chunk transformer on per-(mic, s) means over T, + broadcast residual.
    hm = jnp.mean(h.reshape(n_mic * S, T, C), axis=1)   # (n_mic*S, C)
    hm = _tf_encoder(hm, inter_w, S, n_head, eps)       # n_mic sequences of length S
    out = h.reshape(n_mic * S, T, C) + hm[:, None, :]
    o_ref[...] = out.reshape(R, C).astype(o_ref.dtype)


def _weight_spec(a):
    # TODO(synk): pipeline_mode=pl.Buffered(1) would single-buffer these grid-constant
    # weights and halve their VMEM footprint at production d_model.
    nd = a.ndim
    return pl.BlockSpec(a.shape, lambda *_: (0,) * nd)


def _cast_weights(d, keys):
    # 2-D matmul weights go to bf16 (MXU operands); biases / LN params stay f32.
    return tuple(_bf16(d[k]) if k.endswith('_t') else d[k] for k in keys)


def fused_layer(hf, layer_params, *, n_mic, S, T, n_head, eps=1e-5):
    rows, C = hf.shape
    R = n_mic * S * T
    G = rows // R
    weights = (_cast_weights(layer_params['intra'], TF_KEYS)
               + _cast_weights(layer_params['tac'], TAC_KEYS)
               + _cast_weights(layer_params['inter'], TF_KEYS))
    prelu = layer_params['tac']['prelu']
    kernel = functools.partial(fused_layer_kernel, n_mic=n_mic, S=S, T=T,
                               n_head=n_head, eps=eps)
    return pl.pallas_call(
        kernel,
        out_shape=jax.ShapeDtypeStruct((rows, C), hf.dtype),
        grid=(G,),
        in_specs=[pl.BlockSpec(memory_space=pltpu.MemorySpace.SMEM),   # PReLU scalars
                  pl.BlockSpec((R, C), lambda g: (g, 0))]
                 + [_weight_spec(a) for a in weights],
        out_specs=pl.BlockSpec((R, C), lambda g: (g, 0)),
        compiler_params=pltpu.CompilerParams(
            dimension_semantics=("parallel",),
            vmem_limit_bytes=VMEM_LIMIT_BYTES),
    )(prelu, hf, *weights)


# ----------------------- last transformer + GroupNorm -------------------------

def final_kernel(x_ref, *rest, S, T, n_head, eps):
    """Last intra transformer + GroupNorm(1, C) for one batch item.  Block: (S*T, C)."""
    w_refs, o_ref = rest[:-1], rest[-1]
    tf_w = w_refs[:N_TF_W]

    R, C = x_ref.shape                                   # R = S * T
    x = x_ref[...].astype(jnp.float32)
    h = _tf_encoder(x, tf_w, T, n_head, eps)             # S sequences of length T

    # GroupNorm(1, C): normalize over all S*T*C elements of this batch item.
    mu = jnp.mean(h)
    var = jnp.mean((h - mu) ** 2)
    h = (h - mu) * jax.lax.rsqrt(var + eps) * w_refs[N_TF_W][...] + w_refs[N_TF_W + 1][...]
    o_ref[...] = h.astype(o_ref.dtype)


def final_block(hf, tf_params, gln_params, *, S, T, n_head, out_dtype, eps=1e-5):
    rows, C = hf.shape
    R = S * T
    B = rows // R
    weights = _cast_weights(tf_params, TF_KEYS) + (gln_params['g'], gln_params['b'])
    kernel = functools.partial(final_kernel, S=S, T=T, n_head=n_head, eps=eps)
    return pl.pallas_call(
        kernel,
        out_shape=jax.ShapeDtypeStruct((rows, C), out_dtype),
        grid=(B,),
        in_specs=[pl.BlockSpec((R, C), lambda b: (b, 0))]
                 + [_weight_spec(a) for a in weights],
        out_specs=pl.BlockSpec((R, C), lambda b: (b, 0)),
        compiler_params=pltpu.CompilerParams(
            dimension_semantics=("parallel",),
            vmem_limit_bytes=VMEM_LIMIT_BYTES),
    )(hf, *weights)


# ----------------------------- full forward pass ------------------------------

def resepformer_forward(x, params, n_mic, n_head):
    B, S, T, C = x.shape
    assert B % n_mic == 0
    # Wrapper-side layout plumbing (free): one flat (rows, C) slab, rows = B*S*T with
    # mic-major ordering inside each group; inter-layer activations carried in bf16.
    h = _bf16(x.reshape(B * S * T, C))
    for layer in params['layers']:
        h = fused_layer(h, layer, n_mic=n_mic, S=S, T=T, n_head=n_head)
    out = final_block(h, params['last'], params['gln'], S=S, T=T, n_head=n_head,
                      out_dtype=x.dtype)
    return out.reshape(B, S, T, C)


# --------------------------- deterministic parameters --------------------------

def _init_tf_layer(key, d_model, dim_ff, scale=0.05):
    ks = jax.random.split(key, 8)
    f32 = jnp.float32
    return dict(
        wqkv_t=scale * jax.random.normal(ks[0], (d_model, 3 * d_model), f32),
        bqkv=scale * jax.random.normal(ks[1], (1, 3 * d_model), f32),
        wo_t=scale * jax.random.normal(ks[2], (d_model, d_model), f32),
        bo=scale * jax.random.normal(ks[3], (1, d_model), f32),
        ln1_g=jnp.ones((1, d_model), f32),
        ln1_b=jnp.zeros((1, d_model), f32),
        w1_t=scale * jax.random.normal(ks[4], (d_model, dim_ff), f32),
        b1=scale * jax.random.normal(ks[5], (1, dim_ff), f32),
        w2_t=scale * jax.random.normal(ks[6], (dim_ff, d_model), f32),
        b2=scale * jax.random.normal(ks[7], (1, d_model), f32),
        ln2_g=jnp.ones((1, d_model), f32),
        ln2_b=jnp.zeros((1, d_model), f32),
    )


def _init_tac(key, d_model, scale=0.05):
    ks = jax.random.split(key, 6)
    f32 = jnp.float32
    C3 = 3 * d_model
    return dict(
        w1_t=scale * jax.random.normal(ks[0], (d_model, C3), f32),
        b1=scale * jax.random.normal(ks[1], (1, C3), f32),
        w2_t=scale * jax.random.normal(ks[2], (C3, C3), f32),
        b2=scale * jax.random.normal(ks[3], (1, C3), f32),
        w3_t=scale * jax.random.normal(ks[4], (2 * C3, d_model), f32),
        b3=scale * jax.random.normal(ks[5], (1, d_model), f32),
        prelu=jnp.full((3,), 0.25, f32),            # (a1, a2, a3) -> SMEM
        gn_g=jnp.ones((1, d_model), f32),
        gn_b=jnp.zeros((1, d_model), f32),
    )


def init_params(key, n_layers, d_model, dim_ff):
    keys = jax.random.split(key, 3 * n_layers + 1)
    layers = []
    for i in range(n_layers):
        layers.append(dict(
            intra=_init_tf_layer(keys[3 * i + 0], d_model, dim_ff),
            inter=_init_tf_layer(keys[3 * i + 1], d_model, dim_ff),
            tac=_init_tac(keys[3 * i + 2], d_model),
        ))
    return dict(
        layers=layers,
        last=_init_tf_layer(keys[-1], d_model, dim_ff),
        gln=dict(g=jnp.ones((1, d_model), jnp.float32),
                 b=jnp.zeros((1, d_model), jnp.float32)),
    )


# ------------------------------------ main ------------------------------------

if __name__ == "__main__":
    n_layers, d_model, n_head, dim_ff = 2, 32, 4, 64
    B, S, T = 4, 4, 8          # B = 4, n_mic = 2 -> G = 2 parallel grid points (v7x megacore)
    n_mic = 2

    key = jax.random.PRNGKey(0)
    k_x, k_p = jax.random.split(key)
    x = jax.random.normal(k_x, (B, S, T, d_model), jnp.float32)
    params = init_params(k_p, n_layers, d_model, dim_ff)

    fwd = jax.jit(resepformer_forward, static_argnames=("n_mic", "n_head"))
    out = jax.block_until_ready(fwd(x, params, n_mic=n_mic, n_head=n_head))

    assert out.shape == (B, S, T, d_model), out.shape
    assert bool(jnp.all(jnp.isfinite(out)))
    print("KERNEL_OK")
</pallas_src>

<mosaic_0001>
module attributes {stable_mosaic.version = 11 : i64} {
  func.func @final_kernel(%arg0: i32, %arg1: memref<32x32xbf16, #tpu.memory_space<vmem>>, %arg2: memref<32x96xbf16, #tpu.memory_space<vmem>>, %arg3: memref<1x96xf32, #tpu.memory_space<vmem>>, %arg4: memref<32x32xbf16, #tpu.memory_space<vmem>>, %arg5: memref<1x32xf32, #tpu.memory_space<vmem>>, %arg6: memref<1x32xf32, #tpu.memory_space<vmem>>, %arg7: memref<1x32xf32, #tpu.memory_space<vmem>>, %arg8: memref<32x64xbf16, #tpu.memory_space<vmem>>, %arg9: memref<1x64xf32, #tpu.memory_space<vmem>>, %arg10: memref<64x32xbf16, #tpu.memory_space<vmem>>, %arg11: memref<1x32xf32, #tpu.memory_space<vmem>>, %arg12: memref<1x32xf32, #tpu.memory_space<vmem>>, %arg13: memref<1x32xf32, #tpu.memory_space<vmem>>, %arg14: memref<1x32xf32, #tpu.memory_space<vmem>>, %arg15: memref<1x32xf32, #tpu.memory_space<vmem>>, %arg16: memref<32x32xf32, #tpu.memory_space<vmem>>) attributes {dimension_semantics = [#tpu.dimension_semantics<parallel>], iteration_bounds = array<i64: 4>, scalar_prefetch = 0 : i64, scratch_operands = 0 : i64, tpu.core_type = #tpu.core_type<tc>, window_params = [{transform_indices = @transform_0, window_bounds = array<i64: 32, 32>}, {pipeline_mode = #tpu.pipeline_mode<synchronous>, transform_indices = @transform_1, window_bounds = array<i64: 32, 96>}, {pipeline_mode = #tpu.pipeline_mode<synchronous>, transform_indices = @transform_2, window_bounds = array<i64: 1, 96>}, {pipeline_mode = #tpu.pipeline_mode<synchronous>, transform_indices = @transform_3, window_bounds = array<i64: 32, 32>}, {pipeline_mode = #tpu.pipeline_mode<synchronous>, transform_indices = @transform_4, window_bounds = array<i64: 1, 32>}, {pipeline_mode = #tpu.pipeline_mode<synchronous>, transform_indices = @transform_5, window_bounds = array<i64: 1, 32>}, {pipeline_mode = #tpu.pipeline_mode<synchronous>, transform_indices = @transform_6, window_bounds = array<i64: 1, 32>}, {pipeline_mode = #tpu.pipeline_mode<synchronous>, transform_indices = @transform_7, window_bounds = array<i64: 32, 64>}, {pipeline_mode = #tpu.pipeline_mode<synchronous>, transform_indices = @transform_8, window_bounds = array<i64: 1, 64>}, {pipeline_mode = #tpu.pipeline_mode<synchronous>, transform_indices = @transform_9, window_bounds = array<i64: 64, 32>}, {pipeline_mode = #tpu.pipeline_mode<synchronous>, transform_indices = @transform_10, window_bounds = array<i64: 1, 32>}, {pipeline_mode = #tpu.pipeline_mode<synchronous>, transform_indices = @transform_11, window_bounds = array<i64: 1, 32>}, {pipeline_mode = #tpu.pipeline_mode<synchronous>, transform_indices = @transform_12, window_bounds = array<i64: 1, 32>}, {pipeline_mode = #tpu.pipeline_mode<synchronous>, transform_indices = @transform_13, window_bounds = array<i64: 1, 32>}, {pipeline_mode = #tpu.pipeline_mode<synchronous>, transform_indices = @transform_14, window_bounds = array<i64: 1, 32>}, {transform_indices = @transform_15, window_bounds = array<i64: 32, 32>}]} {
    %c0 = arith.constant 0 : index
    %c0_0 = arith.constant 0 : index
    %0 = vector.load %arg1[%c0, %c0_0] : memref<32x32xbf16, #tpu.memory_space<vmem>>, vector<32x32xbf16>
    %1 = arith.extf %0 : vector<32x32xbf16> to vector<32x32xf32>
    %2 = arith.truncf %1 : vector<32x32xf32> to vector<32x32xbf16>
    %c0_1 = arith.constant 0 : index
    %c0_2 = arith.constant 0 : index
    %3 = vector.load %arg2[%c0_1, %c0_2] : memref<32x96xbf16, #tpu.memory_space<vmem>>, vector<32x96xbf16>
    %cst = arith.constant dense<0.000000e+00> : vector<32x96xf32>
    %4 = tpu.matmul %2, %3, %cst {dimension_numbers = #tpu.dot_dimension_numbers<[1], [0], [0], [1], [0, 0, 1, 1], [], []>} : vector<32x32xbf16>, vector<32x96xbf16>, vector<32x96xf32> -> vector<32x96xf32>
    %c0_3 = arith.constant 0 : index
    %c0_4 = arith.constant 0 : index
    %5 = vector.load %arg3[%c0_3, %c0_4] : memref<1x96xf32, #tpu.memory_space<vmem>>, vector<1x96xf32>
    %6 = vector.broadcast %5 : vector<1x96xf32> to vector<32x96xf32>
    %7 = arith.addf %4, %6 : vector<32x96xf32>
    %8 = vector.extract_strided_slice %7 {offsets = [0, 0], sizes = [32, 32], strides = [1, 1]} : vector<32x96xf32> to vector<32x32xf32>
    %cst_5 = arith.constant 0.353553385 : f32
    %9 = vector.broadcast %cst_5 : f32 to vector<32x32xf32>
    %10 = arith.mulf %8, %9 : vector<32x32xf32>
    %11 = arith.truncf %10 : vector<32x32xf32> to vector<32x32xbf16>
    %12 = vector.extract_strided_slice %7 {offsets = [0, 32], sizes = [32, 32], strides = [1, 1]} : vector<32x96xf32> to vector<32x32xf32>
    %13 = arith.truncf %12 : vector<32x32xf32> to vector<32x32xbf16>
    %14 = vector.extract_strided_slice %7 {offsets = [0, 64], sizes = [32, 32], strides = [1, 1]} : vector<32x96xf32> to vector<32x32xf32>
    %15 = arith.truncf %14 : vector<32x32xf32> to vector<32x32xbf16>
    %c0_6 = arith.constant 0 : index
    %c0_7 = arith.constant 0 : index
    %16 = vector.load %arg4[%c0_6, %c0_7] : memref<32x32xbf16, #tpu.memory_space<vmem>>, vector<32x32xbf16>
    %cst_8 = arith.constant 0.000000e+00 : f32
    %17 = vector.broadcast %cst_8 : f32 to vector<32x32xf32>
    %18 = vector.extract_strided_slice %11 {offsets = [0, 0], sizes = [32, 8], strides = [1, 1]} : vector<32x32xbf16> to vector<32x8xbf16>
    %19 = vector.shape_cast %18 : vector<32x8xbf16> to vector<4x8x8xbf16>
    %20 = vector.extract_strided_slice %13 {offsets = [0, 0], sizes = [32, 8], strides = [1, 1]} : vector<32x32xbf16> to vector<32x8xbf16>
    %21 = vector.shape_cast %20 : vector<32x8xbf16> to vector<4x8x8xbf16>
    %22 = vector.extract_strided_slice %15 {offsets = [0, 0], sizes = [32, 8], strides = [1, 1]} : vector<32x32xbf16> to vector<32x8xbf16>
    %23 = vector.shape_cast %22 : vector<32x8xbf16> to vector<4x8x8xbf16>
    "tpu.trace_start"() <{level = 10 : i32, message = "bqd,bkd->bqk"}> : () -> ()
    %cst_9 = arith.constant dense<0.000000e+00> : vector<4x8x8xf32>
    %24 = tpu.matmul %19, %21, %cst_9 {dimension_numbers = #tpu.dot_dimension_numbers<[2], [2], [1], [1], [0, 0, 0, 1, 1, 1], [0], [0]>} : vector<4x8x8xbf16>, vector<4x8x8xbf16>, vector<4x8x8xf32> -> vector<4x8x8xf32>
    "tpu.trace_stop"() : () -> ()
    %cst_10 = arith.constant dense<0xFF800000> : vector<4x8xf32>
    %25 = vector.multi_reduction <maximumf>, %24, %cst_10 [2] : vector<4x8x8xf32> to vector<4x8xf32>
    %26 = vector.shape_cast %25 : vector<4x8xf32> to vector<4x8x1xf32>
    %27 = vector.broadcast %26 : vector<4x8x1xf32> to vector<4x8x8xf32>
    %28 = arith.subf %24, %27 : vector<4x8x8xf32>
    %29 = math.exp %28 : vector<4x8x8xf32>
    %cst_11 = arith.constant dense<0.000000e+00> : vector<4x8xf32>
    %30 = vector.multi_reduction <add>, %29, %cst_11 [2] : vector<4x8x8xf32> to vector<4x8xf32>
    %31 = vector.shape_cast %30 : vector<4x8xf32> to vector<4x8x1xf32>
    %32 = tpu.reciprocal %31 {approx = true} : vector<4x8x1xf32> -> vector<4x8x1xf32>
    %33 = vector.broadcast %32 : vector<4x8x1xf32> to vector<4x8x8xf32>
    %34 = arith.mulf %29, %33 : vector<4x8x8xf32>
    %35 = arith.truncf %34 : vector<4x8x8xf32> to vector<4x8x8xbf16>
    "tpu.trace_start"() <{level = 10 : i32, message = "bqk,bkd->bqd"}> : () -> ()
    %cst_12 = arith.constant dense<0.000000e+00> : vector<4x8x8xf32>
    %36 = tpu.matmul %35, %23, %cst_12 {dimension_numbers = #tpu.dot_dimension_numbers<[2], [1], [1], [2], [0, 0, 0, 1, 1, 2], [0], [0]>} : vector<4x8x8xbf16>, vector<4x8x8xbf16>, vector<4x8x8xf32> -> vector<4x8x8xf32>
    "tpu.trace_stop"() : () -> ()
    %37 = vector.shape_cast %36 : vector<4x8x8xf32> to vector<32x8xf32>
    %38 = arith.truncf %37 : vector<32x8xf32> to vector<32x8xbf16>
    %39 = vector.extract_strided_slice %16 {offsets = [0, 0], sizes = [8, 32], strides = [1, 1]} : vector<32x32xbf16> to vector<8x32xbf16>
    %cst_13 = arith.constant dense<0.000000e+00> : vector<32x32xf32>
    %40 = tpu.matmul %38, %39, %cst_13 {dimension_numbers = #tpu.dot_dimension_numbers<[1], [0], [0], [1], [0, 0, 1, 1], [], []>} : vector<32x8xbf16>, vector<8x32xbf16>, vector<32x32xf32> -> vector<32x32xf32>
    %41 = arith.addf %17, %40 : vector<32x32xf32>
    %42 = vector.extract_strided_slice %11 {offsets = [0, 8], sizes = [32, 8], strides = [1, 1]} : vector<32x32xbf16> to vector<32x8xbf16>
    %43 = vector.shape_cast %42 : vector<32x8xbf16> to vector<4x8x8xbf16>
    %44 = vector.extract_strided_slice %13 {offsets = [0, 8], sizes = [32, 8], strides = [1, 1]} : vector<32x32xbf16> to vector<32x8xbf16>
    %45 = vector.shape_cast %44 : vector<32x8xbf16> to vector<4x8x8xbf16>
    %46 = vector.extract_strided_slice %15 {offsets = [0, 8], sizes = [32, 8], strides = [1, 1]} : vector<32x32xbf16> to vector<32x8xbf16>
    %47 = vector.shape_cast %46 : vector<32x8xbf16> to vector<4x8x8xbf16>
    "tpu.trace_start"() <{level = 10 : i32, message = "bqd,bkd->bqk"}> : () -> ()
    %cst_14 = arith.constant dense<0.000000e+00> : vector<4x8x8xf32>
    %48 = tpu.matmul %43, %45, %cst_14 {dimension_numbers = #tpu.dot_dimension_numbers<[2], [2], [1], [1], [0, 0, 0, 1, 1, 1], [0], [0]>} : vector<4x8x8xbf16>, vector<4x8x8xbf16>, vector<4x8x8xf32> -> vector<4x8x8xf32>
    "tpu.trace_stop"() : () -> ()
    %cst_15 = arith.constant dense<0xFF800000> : vector<4x8xf32>
    %49 = vector.multi_reduction <maximumf>, %48, %cst_15 [2] : vector<4x8x8xf32> to vector<4x8xf32>
    %50 = vector.shape_cast %49 : vector<4x8xf32> to vector<4x8x1xf32>
    %51 = vector.broadcast %50 : vector<4x8x1xf32> to vector<4x8x8xf32>
    %52 = arith.subf %48, %51 : vector<4x8x8xf32>
    %53 = math.exp %52 : vector<4x8x8xf32>
    %cst_16 = arith.constant dense<0.000000e+00> : vector<4x8xf32>
    %54 = vector.multi_reduction <add>, %53, %cst_16 [2] : vector<4x8x8xf32> to vector<4x8xf32>
    %55 = vector.shape_cast %54 : vector<4x8xf32> to vector<4x8x1xf32>
    %56 = tpu.reciprocal %55 {approx = true} : vector<4x8x1xf32> -> vector<4x8x1xf32>
    %57 = vector.broadcast %56 : vector<4x8x1xf32> to vector<4x8x8xf32>
    %58 = arith.mulf %53, %57 : vector<4x8x8xf32>
    %59 = arith.truncf %58 : vector<4x8x8xf32> to vector<4x8x8xbf16>
    "tpu.trace_start"() <{level = 10 : i32, message = "bqk,bkd->bqd"}> : () -> ()
    %cst_17 = arith.constant dense<0.000000e+00> : vector<4x8x8xf32>
    %60 = tpu.matmul %59, %47, %cst_17 {dimension_numbers = #tpu.dot_dimension_numbers<[2], [1], [1], [2], [0, 0, 0, 1, 1, 2], [0], [0]>} : vector<4x8x8xbf16>, vector<4x8x8xbf16>, vector<4x8x8xf32> -> vector<4x8x8xf32>
    "tpu.trace_stop"() : () -> ()
    %61 = vector.shape_cast %60 : vector<4x8x8xf32> to vector<32x8xf32>
    %62 = arith.truncf %61 : vector<32x8xf32> to vector<32x8xbf16>
    %63 = vector.extract_strided_slice %16 {offsets = [8, 0], sizes = [8, 32], strides = [1, 1]} : vector<32x32xbf16> to vector<8x32xbf16>
    %cst_18 = arith.constant dense<0.000000e+00> : vector<32x32xf32>
    %64 = tpu.matmul %62, %63, %cst_18 {dimension_numbers = #tpu.dot_dimension_numbers<[1], [0], [0], [1], [0, 0, 1, 1], [], []>} : vector<32x8xbf16>, vector<8x32xbf16>, vector<32x32xf32> -> vector<32x32xf32>
    %65 = arith.addf %41, %64 : vector<32x32xf32>
    %66 = vector.extract_strided_slice %11 {offsets = [0, 16], sizes = [32, 8], strides = [1, 1]} : vector<32x32xbf16> to vector<32x8xbf16>
    %67 = vector.shape_cast %66 : vector<32x8xbf16> to vector<4x8x8xbf16>
    %68 = vector.extract_strided_slice %13 {offsets = [0, 16], sizes = [32, 8], strides = [1, 1]} : vector<32x32xbf16> to vector<32x8xbf16>
    %69 = vector.shape_cast %68 : vector<32x8xbf16> to vector<4x8x8xbf16>
    %70 = vector.extract_strided_slice %15 {offsets = [0, 16], sizes = [32, 8], strides = [1, 1]} : vector<32x32xbf16> to vector<32x8xbf16>
    %71 = vector.shape_cast %70 : vector<32x8xbf16> to vector<4x8x8xbf16>
    "tpu.trace_start"() <{level = 10 : i32, message = "bqd,bkd->bqk"}> : () -> ()
    %cst_19 = arith.constant dense<0.000000e+00> : vector<4x8x8xf32>
    %72 = tpu.matmul %67, %69, %cst_19 {dimension_numbers = #tpu.dot_dimension_numbers<[2], [2], [1], [1], [0, 0, 0, 1, 1, 1], [0], [0]>} : vector<4x8x8xbf16>, vector<4x8x8xbf16>, vector<4x8x8xf32> -> vector<4x8x8xf32>
    "tpu.trace_stop"() : () -> ()
    %cst_20 = arith.constant dense<0xFF800000> : vector<4x8xf32>
    %73 = vector.multi_reduction <maximumf>, %72, %cst_20 [2] : vector<4x8x8xf32> to vector<4x8xf32>
    %74 = vector.shape_cast %73 : vector<4x8xf32> to vector<4x8x1xf32>
    %75 = vector.broadcast %74 : vector<4x8x1xf32> to vector<4x8x8xf32>
    %76 = arith.subf %72, %75 : vector<4x8x8xf32>
    %77 = math.exp %76 : vector<4x8x8xf32>
    %cst_21 = arith.constant dense<0.000000e+00> : vector<4x8xf32>
    %78 = vector.multi_reduction <add>, %77, %cst_21 [2] : vector<4x8x8xf32> to vector<4x8xf32>
    %79 = vector.shape_cast %78 : vector<4x8xf32> to vector<4x8x1xf32>
    %80 = tpu.reciprocal %79 {approx = true} : vector<4x8x1xf32> -> vector<4x8x1xf32>
    %81 = vector.broadcast %80 : vector<4x8x1xf32> to vector<4x8x8xf32>
    %82 = arith.mulf %77, %81 : vector<4x8x8xf32>
    %83 = arith.truncf %82 : vector<4x8x8xf32> to vector<4x8x8xbf16>
    "tpu.trace_start"() <{level = 10 : i32, message = "bqk,bkd->bqd"}> : () -> ()
    %cst_22 = arith.constant dense<0.000000e+00> : vector<4x8x8xf32>
    %84 = tpu.matmul %83, %71, %cst_22 {dimension_numbers = #tpu.dot_dimension_numbers<[2], [1], [1], [2], [0, 0, 0, 1, 1, 2], [0], [0]>} : vector<4x8x8xbf16>, vector<4x8x8xbf16>, vector<4x8x8xf32> -> vector<4x8x8xf32>
    "tpu.trace_stop"() : () -> ()
    %85 = vector.shape_cast %84 : vector<4x8x8xf32> to vector<32x8xf32>
    %86 = arith.truncf %85 : vector<32x8xf32> to vector<32x8xbf16>
    %87 = vector.extract_strided_slice %16 {offsets = [16, 0], sizes = [8, 32], strides = [1, 1]} : vector<32x32xbf16> to vector<8x32xbf16>
    %cst_23 = arith.constant dense<0.000000e+00> : vector<32x32xf32>
    %88 = tpu.matmul %86, %87, %cst_23 {dimension_numbers = #tpu.dot_dimension_numbers<[1], [0], [0], [1], [0, 0, 1, 1], [], []>} : vector<32x8xbf16>, vector<8x32xbf16>, vector<32x32xf32> -> vector<32x32xf32>
    %89 = arith.addf %65, %88 : vector<32x32xf32>
    %90 = vector.extract_strided_slice %11 {offsets = [0, 24], sizes = [32, 8], strides = [1, 1]} : vector<32x32xbf16> to vector<32x8xbf16>
    %91 = vector.shape_cast %90 : vector<32x8xbf16> to vector<4x8x8xbf16>
    %92 = vector.extract_strided_slice %13 {offsets = [0, 24], sizes = [32, 8], strides = [1, 1]} : vector<32x32xbf16> to vector<32x8xbf16>
    %93 = vector.shape_cast %92 : vector<32x8xbf16> to vector<4x8x8xbf16>
    %94 = vector.extract_strided_slice %15 {offsets = [0, 24], sizes = [32, 8], strides = [1, 1]} : vector<32x32xbf16> to vector<32x8xbf16>
    %95 = vector.shape_cast %94 : vector<32x8xbf16> to vector<4x8x8xbf16>
    "tpu.trace_start"() <{level = 10 : i32, message = "bqd,bkd->bqk"}> : () -> ()
    %cst_24 = arith.constant dense<0.000000e+00> : vector<4x8x8xf32>
    %96 = tpu.matmul %91, %93, %cst_24 {dimension_numbers = #tpu.dot_dimension_numbers<[2], [2], [1], [1], [0, 0, 0, 1, 1, 1], [0], [0]>} : vector<4x8x8xbf16>, vector<4x8x8xbf16>, vector<4x8x8xf32> -> vector<4x8x8xf32>
    "tpu.trace_stop"() : () -> ()
    %cst_25 = arith.constant dense<0xFF800000> : vector<4x8xf32>
    %97 = vector.multi_reduction <maximumf>, %96, %cst_25 [2] : vector<4x8x8xf32> to vector<4x8xf32>
    %98 = vector.shape_cast %97 : vector<4x8xf32> to vector<4x8x1xf32>
    %99 = vector.broadcast %98 : vector<4x8x1xf32> to vector<4x8x8xf32>
    %100 = arith.subf %96, %99 : vector<4x8x8xf32>
    %101 = math.exp %100 : vector<4x8x8xf32>
    %cst_26 = arith.constant dense<0.000000e+00> : vector<4x8xf32>
    %102 = vector.multi_reduction <add>, %101, %cst_26 [2] : vector<4x8x8xf32> to vector<4x8xf32>
    %103 = vector.shape_cast %102 : vector<4x8xf32> to vector<4x8x1xf32>
    %104 = tpu.reciprocal %103 {approx = true} : vector<4x8x1xf32> -> vector<4x8x1xf32>
    %105 = vector.broadcast %104 : vector<4x8x1xf32> to vector<4x8x8xf32>
    %106 = arith.mulf %101, %105 : vector<4x8x8xf32>
    %107 = arith.truncf %106 : vector<4x8x8xf32> to vector<4x8x8xbf16>
    "tpu.trace_start"() <{level = 10 : i32, message = "bqk,bkd->bqd"}> : () -> ()
    %cst_27 = arith.constant dense<0.000000e+00> : vector<4x8x8xf32>
    %108 = tpu.matmul %107, %95, %cst_27 {dimension_numbers = #tpu.dot_dimension_numbers<[2], [1], [1], [2], [0, 0, 0, 1, 1, 2], [0], [0]>} : vector<4x8x8xbf16>, vector<4x8x8xbf16>, vector<4x8x8xf32> -> vector<4x8x8xf32>
    "tpu.trace_stop"() : () -> ()
    %109 = vector.shape_cast %108 : vector<4x8x8xf32> to vector<32x8xf32>
    %110 = arith.truncf %109 : vector<32x8xf32> to vector<32x8xbf16>
    %111 = vector.extract_strided_slice %16 {offsets = [24, 0], sizes = [8, 32], strides = [1, 1]} : vector<32x32xbf16> to vector<8x32xbf16>
    %cst_28 = arith.constant dense<0.000000e+00> : vector<32x32xf32>
    %112 = tpu.matmul %110, %111, %cst_28 {dimension_numbers = #tpu.dot_dimension_numbers<[1], [0], [0], [1], [0, 0, 1, 1], [], []>} : vector<32x8xbf16>, vector<8x32xbf16>, vector<32x32xf32> -> vector<32x32xf32>
    %113 = arith.addf %89, %112 : vector<32x32xf32>
    %c0_29 = arith.constant 0 : index
    %c0_30 = arith.constant 0 : index
    %114 = vector.load %arg5[%c0_29, %c0_30] : memref<1x32xf32, #tpu.memory_space<vmem>>, vector<1x32xf32>
    %115 = vector.broadcast %114 : vector<1x32xf32> to vector<32x32xf32>
    %116 = arith.addf %113, %115 : vector<32x32xf32>
    %117 = arith.addf %1, %116 : vector<32x32xf32>
    %c0_31 = arith.constant 0 : index
    %c0_32 = arith.constant 0 : index
    %118 = vector.load %arg6[%c0_31, %c0_32] : memref<1x32xf32, #tpu.memory_space<vmem>>, vector<1x32xf32>
    %c0_33 = arith.constant 0 : index
    %c0_34 = arith.constant 0 : index
    %119 = vector.load %arg7[%c0_33, %c0_34] : memref<1x32xf32, #tpu.memory_space<vmem>>, vector<1x32xf32>
    %cst_35 = arith.constant dense<0.000000e+00> : vector<32xf32>
    %120 = vector.multi_reduction <add>, %117, %cst_35 [1] : vector<32x32xf32> to vector<32xf32>
    %121 = vector.shape_cast %120 : vector<32xf32> to vector<32x1xf32>
    %cst_36 = arith.constant 3.200000e+01 : f32
    %122 = vector.broadcast %cst_36 : f32 to vector<32x1xf32>
    %123 = arith.divf %121, %122 : vector<32x1xf32>
    %124 = vector.broadcast %123 : vector<32x1xf32> to vector<32x32xf32>
    %125 = arith.subf %117, %124 : vector<32x32xf32>
    %126 = arith.mulf %125, %125 : vector<32x32xf32>
    %cst_37 = arith.constant dense<0.000000e+00> : vector<32xf32>
    %127 = vector.multi_reduction <add>, %126, %cst_37 [1] : vector<32x32xf32> to vector<32xf32>
    %128 = vector.shape_cast %127 : vector<32xf32> to vector<32x1xf32>
    %cst_38 = arith.constant 3.200000e+01 : f32
    %129 = vector.broadcast %cst_38 : f32 to vector<32x1xf32>
    %130 = arith.divf %128, %129 : vector<32x1xf32>
    %131 = vector.broadcast %123 : vector<32x1xf32> to vector<32x32xf32>
    %132 = arith.subf %117, %131 : vector<32x32xf32>
    %cst_39 = arith.constant 9.99999974E-6 : f32
    %133 = vector.broadcast %cst_39 : f32 to vector<32x1xf32>
    %134 = arith.addf %130, %133 : vector<32x1xf32>
    %135 = math.rsqrt %134 : vector<32x1xf32>
    %136 = vector.broadcast %135 : vector<32x1xf32> to vector<32x32xf32>
    %137 = arith.mulf %132, %136 : vector<32x32xf32>
    %138 = vector.broadcast %118 : vector<1x32xf32> to vector<32x32xf32>
    %139 = arith.mulf %137, %138 : vector<32x32xf32>
    %140 = vector.broadcast %119 : vector<1x32xf32> to vector<32x32xf32>
    %141 = arith.addf %139, %140 : vector<32x32xf32>
    %142 = arith.truncf %141 : vector<32x32xf32> to vector<32x32xbf16>
    %c0_40 = arith.constant 0 : index
    %c0_41 = arith.constant 0 : index
    %143 = vector.load %arg8[%c0_40, %c0_41] : memref<32x64xbf16, #tpu.memory_space<vmem>>, vector<32x64xbf16>
    %cst_42 = arith.constant dense<0.000000e+00> : vector<32x64xf32>
    %144 = tpu.matmul %142, %143, %cst_42 {dimension_numbers = #tpu.dot_dimension_numbers<[1], [0], [0], [1], [0, 0, 1, 1], [], []>} : vector<32x32xbf16>, vector<32x64xbf16>, vector<32x64xf32> -> vector<32x64xf32>
    %c0_43 = arith.constant 0 : index
    %c0_44 = arith.constant 0 : index
    %145 = vector.load %arg9[%c0_43, %c0_44] : memref<1x64xf32, #tpu.memory_space<vmem>>, vector<1x64xf32>
    %146 = vector.broadcast %145 : vector<1x64xf32> to vector<32x64xf32>
    %147 = arith.addf %144, %146 : vector<32x64xf32>
    %cst_45 = arith.constant 0.000000e+00 : f32
    %148 = vector.broadcast %cst_45 : f32 to vector<32x64xf32>
    %149 = arith.maximumf %147, %148 : vector<32x64xf32>
    %150 = arith.truncf %149 : vector<32x64xf32> to vector<32x64xbf16>
    %c0_46 = arith.constant 0 : index
    %c0_47 = arith.constant 0 : index
    %151 = vector.load %arg10[%c0_46, %c0_47] : memref<64x32xbf16, #tpu.memory_space<vmem>>, vector<64x32xbf16>
    %cst_48 = arith.constant dense<0.000000e+00> : vector<32x32xf32>
    %152 = tpu.matmul %150, %151, %cst_48 {dimension_numbers = #tpu.dot_dimension_numbers<[1], [0], [0], [1], [0, 0, 1, 1], [], []>} : vector<32x64xbf16>, vector<64x32xbf16>, vector<32x32xf32> -> vector<32x32xf32>
    %c0_49 = arith.constant 0 : index
    %c0_50 = arith.constant 0 : index
    %153 = vector.load %arg11[%c0_49, %c0_50] : memref<1x32xf32, #tpu.memory_space<vmem>>, vector<1x32xf32>
    %154 = vector.broadcast %153 : vector<1x32xf32> to vector<32x32xf32>
    %155 = arith.addf %152, %154 : vector<32x32xf32>
    %156 = arith.addf %141, %155 : vector<32x32xf32>
    %c0_51 = arith.constant 0 : index
    %c0_52 = arith.constant 0 : index
    %157 = vector.load %arg12[%c0_51, %c0_52] : memref<1x32xf32, #tpu.memory_space<vmem>>, vector<1x32xf32>
    %c0_53 = arith.constant 0 : index
    %c0_54 = arith.constant 0 : index
    %158 = vector.load %arg13[%c0_53, %c0_54] : memref<1x32xf32, #tpu.memory_space<vmem>>, vector<1x32xf32>
    %cst_55 = arith.constant dense<0.000000e+00> : vector<32xf32>
    %159 = vector.multi_reduction <add>, %156, %cst_55 [1] : vector<32x32xf32> to vector<32xf32>
    %160 = vector.shape_cast %159 : vector<32xf32> to vector<32x1xf32>
    %cst_56 = arith.constant 3.200000e+01 : f32
    %161 = vector.broadcast %cst_56 : f32 to vector<32x1xf32>
    %162 = arith.divf %160, %161 : vector<32x1xf32>
    %163 = vector.broadcast %162 : vector<32x1xf32> to vector<32x32xf32>
    %164 = arith.subf %156, %163 : vector<32x32xf32>
    %165 = arith.mulf %164, %164 : vector<32x32xf32>
    %cst_57 = arith.constant dense<0.000000e+00> : vector<32xf32>
    %166 = vector.multi_reduction <add>, %165, %cst_57 [1] : vector<32x32xf32> to vector<32xf32>
    %167 = vector.shape_cast %166 : vector<32xf32> to vector<32x1xf32>
    %cst_58 = arith.constant 3.200000e+01 : f32
    %168 = vector.broadcast %cst_58 : f32 to vector<32x1xf32>
    %169 = arith.divf %167, %168 : vector<32x1xf32>
    %170 = vector.broadcast %162 : vector<32x1xf32> to vector<32x32xf32>
    %171 = arith.subf %156, %170 : vector<32x32xf32>
    %cst_59 = arith.constant 9.99999974E-6 : f32
    %172 = vector.broadcast %cst_59 : f32 to vector<32x1xf32>
    %173 = arith.addf %169, %172 : vector<32x1xf32>
    %174 = math.rsqrt %173 : vector<32x1xf32>
    %175 = vector.broadcast %174 : vector<32x1xf32> to vector<32x32xf32>
    %176 = arith.mulf %171, %175 : vector<32x32xf32>
    %177 = vector.broadcast %157 : vector<1x32xf32> to vector<32x32xf32>
    %178 = arith.mulf %176, %177 : vector<32x32xf32>
    %179 = vector.broadcast %158 : vector<1x32xf32> to vector<32x32xf32>
    %180 = arith.addf %178, %179 : vector<32x32xf32>
    %181 = vector.shape_cast %180 : vector<32x32xf32> to vector<1x32x32xf32>
    %cst_60 = arith.constant dense<0.000000e+00> : vector<1xf32>
    %182 = vector.multi_reduction <add>, %181, %cst_60 [1, 2] : vector<1x32x32xf32> to vector<1xf32>
    %183 = vector.shape_cast %182 : vector<1xf32> to vector<1x1x1xf32>
    %184 = vector.extract %183[0, 0, 0] : f32 from vector<1x1x1xf32>
    %cst_61 = arith.constant 1.024000e+03 : f32
    %185 = arith.divf %184, %cst_61 : f32
    %186 = vector.broadcast %185 : f32 to vector<32x32xf32>
    %187 = arith.subf %180, %186 : vector<32x32xf32>
    %188 = arith.mulf %187, %187 : vector<32x32xf32>
    %189 = vector.shape_cast %188 : vector<32x32xf32> to vector<1x32x32xf32>
    %cst_62 = arith.constant dense<0.000000e+00> : vector<1xf32>
    %190 = vector.multi_reduction <add>, %189, %cst_62 [1, 2] : vector<1x32x32xf32> to vector<1xf32>
    %191 = vector.shape_cast %190 : vector<1xf32> to vector<1x1x1xf32>
    %192 = vector.extract %191[0, 0, 0] : f32 from vector<1x1x1xf32>
    %cst_63 = arith.constant 1.024000e+03 : f32
    %193 = arith.divf %192, %cst_63 : f32
    %194 = vector.broadcast %185 : f32 to vector<32x32xf32>
    %195 = arith.subf %180, %194 : vector<32x32xf32>
    %cst_64 = arith.constant 9.99999974E-6 : f32
    %196 = arith.addf %193, %cst_64 : f32
    %197 = math.rsqrt %196 : f32
    %198 = vector.broadcast %197 : f32 to vector<32x32xf32>
    %199 = arith.mulf %195, %198 : vector<32x32xf32>
    %c0_65 = arith.constant 0 : index
    %c0_66 = arith.constant 0 : index
    %200 = vector.load %arg14[%c0_65, %c0_66] : memref<1x32xf32, #tpu.memory_space<vmem>>, vector<1x32xf32>
    %201 = vector.broadcast %200 : vector<1x32xf32> to vector<32x32xf32>
    %202 = arith.mulf %199, %201 : vector<32x32xf32>
    %c0_67 = arith.constant 0 : index
    %c0_68 = arith.constant 0 : index
    %203 = vector.load %arg15[%c0_67, %c0_68] : memref<1x32xf32, #tpu.memory_space<vmem>>, vector<1x32xf32>
    %204 = vector.broadcast %203 : vector<1x32xf32> to vector<32x32xf32>
    %205 = arith.addf %202, %204 : vector<32x32xf32>
    %c0_69 = arith.constant 0 : index
    %c0_70 = arith.constant 0 : index
    %206 = vector.load %arg16[%c0_69, %c0_70] : memref<32x32xf32, #tpu.memory_space<vmem>>, vector<32x32xf32>
    tpu.vector_store %arg16[%c0_69, %c0_70], %205 {strides = array<i32>} : memref<32x32xf32, #tpu.memory_space<vmem>>, vector<32x32xf32>,
    return
  }
  func.func @transform_0(%arg0: i32) -> (i32, i32) {
    %c0_i32 = arith.constant 0 : i32
    %c0_i32_0 = arith.constant 0 : i32
    return %arg0, %c0_i32 : i32, i32
  }
  func.func @transform_1(%arg0: i32) -> (i32, i32) {
    %c0_i32 = arith.constant 0 : i32
    %c0_i32_0 = arith.constant 0 : i32
    %c0_i32_1 = arith.constant 0 : i32
    return %c0_i32, %c0_i32_0 : i32, i32
  }
  func.func @transform_2(%arg0: i32) -> (i32, i32) {
    %c0_i32 = arith.constant 0 : i32
    %c0_i32_0 = arith.constant 0 : i32
    %c0_i32_1 = arith.constant 0 : i32
    return %c0_i32, %c0_i32_0 : i32, i32
  }
  func.func @transform_3(%arg0: i32) -> (i32, i32) {
    %c0_i32 = arith.constant 0 : i32
    %c0_i32_0 = arith.constant 0 : i32
    %c0_i32_1 = arith.constant 0 : i32
    return %c0_i32, %c0_i32_0 : i32, i32
  }
  func.func @transform_4(%arg0: i32) -> (i32, i32) {
    %c0_i32 = arith.constant 0 : i32
    %c0_i32_0 = arith.constant 0 : i32
    %c0_i32_1 = arith.constant 0 : i32
    return %c0_i32, %c0_i32_0 : i32, i32
  }
  func.func @transform_5(%arg0: i32) -> (i32, i32) {
    %c0_i32 = arith.constant 0 : i32
    %c0_i32_0 = arith.constant 0 : i32
    %c0_i32_1 = arith.constant 0 : i32
    return %c0_i32, %c0_i32_0 : i32, i32
  }
  func.func @transform_6(%arg0: i32) -> (i32, i32) {
    %c0_i32 = arith.constant 0 : i32
    %c0_i32_0 = arith.constant 0 : i32
    %c0_i32_1 = arith.constant 0 : i32
    return %c0_i32, %c0_i32_0 : i32, i32
  }
  func.func @transform_7(%arg0: i32) -> (i32, i32) {
    %c0_i32 = arith.constant 0 : i32
    %c0_i32_0 = arith.constant 0 : i32
    %c0_i32_1 = arith.constant 0 : i32
    return %c0_i32, %c0_i32_0 : i32, i32
  }
  func.func @transform_8(%arg0: i32) -> (i32, i32) {
    %c0_i32 = arith.constant 0 : i32
    %c0_i32_0 = arith.constant 0 : i32
    %c0_i32_1 = arith.constant 0 : i32
    return %c0_i32, %c0_i32_0 : i32, i32
  }
  func.func @transform_9(%arg0: i32) -> (i32, i32) {
    %c0_i32 = arith.constant 0 : i32
    %c0_i32_0 = arith.constant 0 : i32
    %c0_i32_1 = arith.constant 0 : i32
    return %c0_i32, %c0_i32_0 : i32, i32
  }
  func.func @transform_10(%arg0: i32) -> (i32, i32) {
    %c0_i32 = arith.constant 0 : i32
    %c0_i32_0 = arith.constant 0 : i32
    %c0_i32_1 = arith.constant 0 : i32
    return %c0_i32, %c0_i32_0 : i32, i32
  }
  func.func @transform_11(%arg0: i32) -> (i32, i32) {
    %c0_i32 = arith.constant 0 : i32
    %c0_i32_0 = arith.constant 0 : i32
    %c0_i32_1 = arith.constant 0 : i32
    return %c0_i32, %c0_i32_0 : i32, i32
  }
  func.func @transform_12(%arg0: i32) -> (i32, i32) {
    %c0_i32 = arith.constant 0 : i32
    %c0_i32_0 = arith.constant 0 : i32
    %c0_i32_1 = arith.constant 0 : i32
    return %c0_i32, %c0_i32_0 : i32, i32
  }
  func.func @transform_13(%arg0: i32) -> (i32, i32) {
    %c0_i32 = arith.constant 0 : i32
    %c0_i32_0 = arith.constant 0 : i32
    %c0_i32_1 = arith.constant 0 : i32
    return %c0_i32, %c0_i32_0 : i32, i32
  }
  func.func @transform_14(%arg0: i32) -> (i32, i32) {
    %c0_i32 = arith.constant 0 : i32
    %c0_i32_0 = arith.constant 0 : i32
    %c0_i32_1 = arith.constant 0 : i32
    return %c0_i32, %c0_i32_0 : i32, i32
  }
  func.func @transform_15(%arg0: i32) -> (i32, i32) {
    %c0_i32 = arith.constant 0 : i32
    %c0_i32_0 = arith.constant 0 : i32
    return %arg0, %c0_i32 : i32, i32
  }
}

module attributes {stable_mosaic.version = 11 : i64} {
  func.func @fused_layer_kernel(%arg0: i32, %arg1: memref<3xf32, #tpu.memory_space<smem>>, %arg2: memref<64x32xbf16, #tpu.memory_space<vmem>>, %arg3: memref<32x96xbf16, #tpu.memory_space<vmem>>, %arg4: memref<1x96xf32, #tpu.memory_space<vmem>>, %arg5: memref<32x32xbf16, #tpu.memory_space<vmem>>, %arg6: memref<1x32xf32, #tpu.memory_space<vmem>>, %arg7: memref<1x32xf32, #tpu.memory_space<vmem>>, %arg8: memref<1x32xf32, #tpu.memory_space<vmem>>, %arg9: memref<32x64xbf16, #tpu.memory_space<vmem>>, %arg10: memref<1x64xf32, #tpu.memory_space<vmem>>, %arg11: memref<64x32xbf16, #tpu.memory_space<vmem>>, %arg12: memref<1x32xf32, #tpu.memory_space<vmem>>, %arg13: memref<1x32xf32, #tpu.memory_space<vmem>>, %arg14: memref<1x32xf32, #tpu.memory_space<vmem>>, %arg15: memref<32x96xbf16, #tpu.memory_space<vmem>>, %arg16: memref<1x96xf32, #tpu.memory_space<vmem>>, %arg17: memref<96x96xbf16, #tpu.memory_space<vmem>>, %arg18: memref<1x96xf32, #tpu.memory_space<vmem>>, %arg19: memref<192x32xbf16, #tpu.memory_space<vmem>>, %arg20: memref<1x32xf32, #tpu.memory_space<vmem>>, %arg21: memref<1x32xf32, #tpu.memory_space<vmem>>, %arg22: memref<1x32xf32, #tpu.memory_space<vmem>>, %arg23: memref<32x96xbf16, #tpu.memory_space<vmem>>, %arg24: memref<1x96xf32, #tpu.memory_space<vmem>>, %arg25: memref<32x32xbf16, #tpu.memory_space<vmem>>, %arg26: memref<1x32xf32, #tpu.memory_space<vmem>>, %arg27: memref<1x32xf32, #tpu.memory_space<vmem>>, %arg28: memref<1x32xf32, #tpu.memory_space<vmem>>, %arg29: memref<32x64xbf16, #tpu.memory_space<vmem>>, %arg30: memref<1x64xf32, #tpu.memory_space<vmem>>, %arg31: memref<64x32xbf16, #tpu.memory_space<vmem>>, %arg32: memref<1x32xf32, #tpu.memory_space<vmem>>, %arg33: memref<1x32xf32, #tpu.memory_space<vmem>>, %arg34: memref<1x32xf32, #tpu.memory_space<vmem>>, %arg35: memref<64x32xbf16, #tpu.memory_space<vmem>>) attributes {dimension_semantics = [#tpu.dimension_semantics<parallel>], iteration_bounds = array<i64: 2>, scalar_prefetch = 0 : i64, scratch_operands = 0 : i64, tpu.core_type = #tpu.core_type<tc>, window_params = [{transform_indices = @transform_0, window_bounds = array<i64: 3>}, {transform_indices = @transform_1, window_bounds = array<i64: 64, 32>}, {pipeline_mode = #tpu.pipeline_mode<synchronous>, transform_indices = @transform_2, window_bounds = array<i64: 32, 96>}, {pipeline_mode = #tpu.pipeline_mode<synchronous>, transform_indices = @transform_3, window_bounds = array<i64: 1, 96>}, {pipeline_mode = #tpu.pipeline_mode<synchronous>, transform_indices = @transform_4, window_bounds = array<i64: 32, 32>}, {pipeline_mode = #tpu.pipeline_mode<synchronous>, transform_indices = @transform_5, window_bounds = array<i64: 1, 32>}, {pipeline_mode = #tpu.pipeline_mode<synchronous>, transform_indices = @transform_6, window_bounds = array<i64: 1, 32>}, {pipeline_mode = #tpu.pipeline_mode<synchronous>, transform_indices = @transform_7, window_bounds = array<i64: 1, 32>}, {pipeline_mode = #tpu.pipeline_mode<synchronous>, transform_indices = @transform_8, window_bounds = array<i64: 32, 64>}, {pipeline_mode = #tpu.pipeline_mode<synchronous>, transform_indices = @transform_9, window_bounds = array<i64: 1, 64>}, {pipeline_mode = #tpu.pipeline_mode<synchronous>, transform_indices = @transform_10, window_bounds = array<i64: 64, 32>}, {pipeline_mode = #tpu.pipeline_mode<synchronous>, transform_indices = @transform_11, window_bounds = array<i64: 1, 32>}, {pipeline_mode = #tpu.pipeline_mode<synchronous>, transform_indices = @transform_12, window_bounds = array<i64: 1, 32>}, {pipeline_mode = #tpu.pipeline_mode<synchronous>, transform_indices = @transform_13, window_bounds = array<i64: 1, 32>}, {pipeline_mode = #tpu.pipeline_mode<synchronous>, transform_indices = @transform_14, window_bounds = array<i64: 32, 96>}, {pipeline_mode = #tpu.pipeline_mode<synchronous>, transform_indices = @transform_15, window_bounds = array<i64: 1, 96>}, {pipeline_mode = #tpu.pipeline_mode<synchronous>, transform_indices = @transform_16, window_bounds = array<i64: 96, 96>}, {pipeline_mode = #tpu.pipeline_mode<synchronous>, transform_indices = @transform_17, window_bounds = array<i64: 1, 96>}, {pipeline_mode = #tpu.pipeline_mode<synchronous>, transform_indices = @transform_18, window_bounds = array<i64: 192, 32>}, {pipeline_mode = #tpu.pipeline_mode<synchronous>, transform_indices = @transform_19, window_bounds = array<i64: 1, 32>}, {pipeline_mode = #tpu.pipeline_mode<synchronous>, transform_indices = @transform_20, window_bounds = array<i64: 1, 32>}, {pipeline_mode = #tpu.pipeline_mode<synchronous>, transform_indices = @transform_21, window_bounds = array<i64: 1, 32>}, {pipeline_mode = #tpu.pipeline_mode<synchronous>, transform_indices = @transform_22, window_bounds = array<i64: 32, 96>}, {pipeline_mode = #tpu.pipeline_mode<synchronous>, transform_indices = @transform_23, window_bounds = array<i64: 1, 96>}, {pipeline_mode = #tpu.pipeline_mode<synchronous>, transform_indices = @transform_24, window_bounds = array<i64: 32, 32>}, {pipeline_mode = #tpu.pipeline_mode<synchronous>, transform_indices = @transform_25, window_bounds = array<i64: 1, 32>}, {pipeline_mode = #tpu.pipeline_mode<synchronous>, transform_indices = @transform_26, window_bounds = array<i64: 1, 32>}, {pipeline_mode = #tpu.pipeline_mode<synchronous>, transform_indices = @transform_27, window_bounds = array<i64: 1, 32>}, {pipeline_mode = #tpu.pipeline_mode<synchronous>, transform_indices = @transform_28, window_bounds = array<i64: 32, 64>}, {pipeline_mode = #tpu.pipeline_mode<synchronous>, transform_indices = @transform_29, window_bounds = array<i64: 1, 64>}, {pipeline_mode = #tpu.pipeline_mode<synchronous>, transform_indices = @transform_30, window_bounds = array<i64: 64, 32>}, {pipeline_mode = #tpu.pipeline_mode<synchronous>, transform_indices = @transform_31, window_bounds = array<i64: 1, 32>}, {pipeline_mode = #tpu.pipeline_mode<synchronous>, transform_indices = @transform_32, window_bounds = array<i64: 1, 32>}, {pipeline_mode = #tpu.pipeline_mode<synchronous>, transform_indices = @transform_33, window_bounds = array<i64: 1, 32>}, {transform_indices = @transform_34, window_bounds = array<i64: 64, 32>}]} {
    %c0 = arith.constant 0 : index
    %0 = memref.load %arg1[%c0] : memref<3xf32, #tpu.memory_space<smem>>
    %c1 = arith.constant 1 : index
    %1 = memref.load %arg1[%c1] : memref<3xf32, #tpu.memory_space<smem>>
    %c2 = arith.constant 2 : index
    %2 = memref.load %arg1[%c2] : memref<3xf32, #tpu.memory_space<smem>>
    %c0_0 = arith.constant 0 : index
    %c0_1 = arith.constant 0 : index
    %3 = vector.load %arg2[%c0_0, %c0_1] : memref<64x32xbf16, #tpu.memory_space<vmem>>, vector<64x32xbf16>
    %4 = arith.extf %3 : vector<64x32xbf16> to vector<64x32xf32>
    %5 = arith.truncf %4 : vector<64x32xf32> to vector<64x32xbf16>
    %c0_2 = arith.constant 0 : index
    %c0_3 = arith.constant 0 : index
    %6 = vector.load %arg3[%c0_2, %c0_3] : memref<32x96xbf16, #tpu.memory_space<vmem>>, vector<32x96xbf16>
    %cst = arith.constant dense<0.000000e+00> : vector<64x96xf32>
    %7 = tpu.matmul %5, %6, %cst {dimension_numbers = #tpu.dot_dimension_numbers<[1], [0], [0], [1], [0, 0, 1, 1], [], []>} : vector<64x32xbf16>, vector<32x96xbf16>, vector<64x96xf32> -> vector<64x96xf32>
    %c0_4 = arith.constant 0 : index
    %c0_5 = arith.constant 0 : index
    %8 = vector.load %arg4[%c0_4, %c0_5] : memref<1x96xf32, #tpu.memory_space<vmem>>, vector<1x96xf32>
    %9 = vector.broadcast %8 : vector<1x96xf32> to vector<64x96xf32>
    %10 = arith.addf %7, %9 : vector<64x96xf32>
    %11 = vector.extract_strided_slice %10 {offsets = [0, 0], sizes = [64, 32], strides = [1, 1]} : vector<64x96xf32> to vector<64x32xf32>
    %cst_6 = arith.constant 0.353553385 : f32
    %12 = vector.broadcast %cst_6 : f32 to vector<64x32xf32>
    %13 = arith.mulf %11, %12 : vector<64x32xf32>
    %14 = arith.truncf %13 : vector<64x32xf32> to vector<64x32xbf16>
    %15 = vector.extract_strided_slice %10 {offsets = [0, 32], sizes = [64, 32], strides = [1, 1]} : vector<64x96xf32> to vector<64x32xf32>
    %16 = arith.truncf %15 : vector<64x32xf32> to vector<64x32xbf16>
    %17 = vector.extract_strided_slice %10 {offsets = [0, 64], sizes = [64, 32], strides = [1, 1]} : vector<64x96xf32> to vector<64x32xf32>
    %18 = arith.truncf %17 : vector<64x32xf32> to vector<64x32xbf16>
    %c0_7 = arith.constant 0 : index
    %c0_8 = arith.constant 0 : index
    %19 = vector.load %arg5[%c0_7, %c0_8] : memref<32x32xbf16, #tpu.memory_space<vmem>>, vector<32x32xbf16>
    %cst_9 = arith.constant 0.000000e+00 : f32
    %20 = vector.broadcast %cst_9 : f32 to vector<64x32xf32>
    %21 = vector.extract_strided_slice %14 {offsets = [0, 0], sizes = [64, 8], strides = [1, 1]} : vector<64x32xbf16> to vector<64x8xbf16>
    %22 = vector.shape_cast %21 : vector<64x8xbf16> to vector<8x8x8xbf16>
    %23 = vector.extract_strided_slice %16 {offsets = [0, 0], sizes = [64, 8], strides = [1, 1]} : vector<64x32xbf16> to vector<64x8xbf16>
    %24 = vector.shape_cast %23 : vector<64x8xbf16> to vector<8x8x8xbf16>
    %25 = vector.extract_strided_slice %18 {offsets = [0, 0], sizes = [64, 8], strides = [1, 1]} : vector<64x32xbf16> to vector<64x8xbf16>
    %26 = vector.shape_cast %25 : vector<64x8xbf16> to vector<8x8x8xbf16>
    "tpu.trace_start"() <{level = 10 : i32, message = "bqd,bkd->bqk"}> : () -> ()
    %cst_10 = arith.constant dense<0.000000e+00> : vector<8x8x8xf32>
    %27 = tpu.matmul %22, %24, %cst_10 {dimension_numbers = #tpu.dot_dimension_numbers<[2], [2], [1], [1], [0, 0, 0, 1, 1, 1], [0], [0]>} : vector<8x8x8xbf16>, vector<8x8x8xbf16>, vector<8x8x8xf32> -> vector<8x8x8xf32>
    "tpu.trace_stop"() : () -> ()
    %cst_11 = arith.constant dense<0xFF800000> : vector<8x8xf32>
    %28 = vector.multi_reduction <maximumf>, %27, %cst_11 [2] : vector<8x8x8xf32> to vector<8x8xf32>
    %29 = vector.shape_cast %28 : vector<8x8xf32> to vector<8x8x1xf32>
    %30 = vector.broadcast %29 : vector<8x8x1xf32> to vector<8x8x8xf32>
    %31 = arith.subf %27, %30 : vector<8x8x8xf32>
    %32 = math.exp %31 : vector<8x8x8xf32>
    %cst_12 = arith.constant dense<0.000000e+00> : vector<8x8xf32>
    %33 = vector.multi_reduction <add>, %32, %cst_12 [2] : vector<8x8x8xf32> to vector<8x8xf32>
    %34 = vector.shape_cast %33 : vector<8x8xf32> to vector<8x8x1xf32>
    %35 = tpu.reciprocal %34 {approx = true} : vector<8x8x1xf32> -> vector<8x8x1xf32>
    %36 = vector.broadcast %35 : vector<8x8x1xf32> to vector<8x8x8xf32>
    %37 = arith.mulf %32, %36 : vector<8x8x8xf32>
    %38 = arith.truncf %37 : vector<8x8x8xf32> to vector<8x8x8xbf16>
    "tpu.trace_start"() <{level = 10 : i32, message = "bqk,bkd->bqd"}> : () -> ()
    %cst_13 = arith.constant dense<0.000000e+00> : vector<8x8x8xf32>
    %39 = tpu.matmul %38, %26, %cst_13 {dimension_numbers = #tpu.dot_dimension_numbers<[2], [1], [1], [2], [0, 0, 0, 1, 1, 2], [0], [0]>} : vector<8x8x8xbf16>, vector<8x8x8xbf16>, vector<8x8x8xf32> -> vector<8x8x8xf32>
    "tpu.trace_stop"() : () -> ()
    %40 = vector.shape_cast %39 : vector<8x8x8xf32> to vector<64x8xf32>
    %41 = arith.truncf %40 : vector<64x8xf32> to vector<64x8xbf16>
    %42 = vector.extract_strided_slice %19 {offsets = [0, 0], sizes = [8, 32], strides = [1, 1]} : vector<32x32xbf16> to vector<8x32xbf16>
    %cst_14 = arith.constant dense<0.000000e+00> : vector<64x32xf32>
    %43 = tpu.matmul %41, %42, %cst_14 {dimension_numbers = #tpu.dot_dimension_numbers<[1], [0], [0], [1], [0, 0, 1, 1], [], []>} : vector<64x8xbf16>, vector<8x32xbf16>, vector<64x32xf32> -> vector<64x32xf32>
    %44 = arith.addf %20, %43 : vector<64x32xf32>
    %45 = vector.extract_strided_slice %14 {offsets = [0, 8], sizes = [64, 8], strides = [1, 1]} : vector<64x32xbf16> to vector<64x8xbf16>
    %46 = vector.shape_cast %45 : vector<64x8xbf16> to vector<8x8x8xbf16>
    %47 = vector.extract_strided_slice %16 {offsets = [0, 8], sizes = [64, 8], strides = [1, 1]} : vector<64x32xbf16> to vector<64x8xbf16>
    %48 = vector.shape_cast %47 : vector<64x8xbf16> to vector<8x8x8xbf16>
    %49 = vector.extract_strided_slice %18 {offsets = [0, 8], sizes = [64, 8], strides = [1, 1]} : vector<64x32xbf16> to vector<64x8xbf16>
    %50 = vector.shape_cast %49 : vector<64x8xbf16> to vector<8x8x8xbf16>
    "tpu.trace_start"() <{level = 10 : i32, message = "bqd,bkd->bqk"}> : () -> ()
    %cst_15 = arith.constant dense<0.000000e+00> : vector<8x8x8xf32>
    %51 = tpu.matmul %46, %48, %cst_15 {dimension_numbers = #tpu.dot_dimension_numbers<[2], [2], [1], [1], [0, 0, 0, 1, 1, 1], [0], [0]>} : vector<8x8x8xbf16>, vector<8x8x8xbf16>, vector<8x8x8xf32> -> vector<8x8x8xf32>
    "tpu.trace_stop"() : () -> ()
    %cst_16 = arith.constant dense<0xFF800000> : vector<8x8xf32>
    %52 = vector.multi_reduction <maximumf>, %51, %cst_16 [2] : vector<8x8x8xf32> to vector<8x8xf32>
    %53 = vector.shape_cast %52 : vector<8x8xf32> to vector<8x8x1xf32>
    %54 = vector.broadcast %53 : vector<8x8x1xf32> to vector<8x8x8xf32>
    %55 = arith.subf %51, %54 : vector<8x8x8xf32>
    %56 = math.exp %55 : vector<8x8x8xf32>
    %cst_17 = arith.constant dense<0.000000e+00> : vector<8x8xf32>
    %57 = vector.multi_reduction <add>, %56, %cst_17 [2] : vector<8x8x8xf32> to vector<8x8xf32>
    %58 = vector.shape_cast %57 : vector<8x8xf32> to vector<8x8x1xf32>
    %59 = tpu.reciprocal %58 {approx = true} : vector<8x8x1xf32> -> vector<8x8x1xf32>
    %60 = vector.broadcast %59 : vector<8x8x1xf32> to vector<8x8x8xf32>
    %61 = arith.mulf %56, %60 : vector<8x8x8xf32>
    %62 = arith.truncf %61 : vector<8x8x8xf32> to vector<8x8x8xbf16>
    "tpu.trace_start"() <{level = 10 : i32, message = "bqk,bkd->bqd"}> : () -> ()
    %cst_18 = arith.constant dense<0.000000e+00> : vector<8x8x8xf32>
    %63 = tpu.matmul %62, %50, %cst_18 {dimension_numbers = #tpu.dot_dimension_numbers<[2], [1], [1], [2], [0, 0, 0, 1, 1, 2], [0], [0]>} : vector<8x8x8xbf16>, vector<8x8x8xbf16>, vector<8x8x8xf32> -> vector<8x8x8xf32>
    "tpu.trace_stop"() : () -> ()
    %64 = vector.shape_cast %63 : vector<8x8x8xf32> to vector<64x8xf32>
    %65 = arith.truncf %64 : vector<64x8xf32> to vector<64x8xbf16>
    %66 = vector.extract_strided_slice %19 {offsets = [8, 0], sizes = [8, 32], strides = [1, 1]} : vector<32x32xbf16> to vector<8x32xbf16>
    %cst_19 = arith.constant dense<0.000000e+00> : vector<64x32xf32>
    %67 = tpu.matmul %65, %66, %cst_19 {dimension_numbers = #tpu.dot_dimension_numbers<[1], [0], [0], [1], [0, 0, 1, 1], [], []>} : vector<64x8xbf16>, vector<8x32xbf16>, vector<64x32xf32> -> vector<64x32xf32>
    %68 = arith.addf %44, %67 : vector<64x32xf32>
    %69 = vector.extract_strided_slice %14 {offsets = [0, 16], sizes = [64, 8], strides = [1, 1]} : vector<64x32xbf16> to vector<64x8xbf16>
    %70 = vector.shape_cast %69 : vector<64x8xbf16> to vector<8x8x8xbf16>
    %71 = vector.extract_strided_slice %16 {offsets = [0, 16], sizes = [64, 8], strides = [1, 1]} : vector<64x32xbf16> to vector<64x8xbf16>
    %72 = vector.shape_cast %71 : vector<64x8xbf16> to vector<8x8x8xbf16>
    %73 = vector.extract_strided_slice %18 {offsets = [0, 16], sizes = [64, 8], strides = [1, 1]} : vector<64x32xbf16> to vector<64x8xbf16>
    %74 = vector.shape_cast %73 : vector<64x8xbf16> to vector<8x8x8xbf16>
    "tpu.trace_start"() <{level = 10 : i32, message = "bqd,bkd->bqk"}> : () -> ()
    %cst_20 = arith.constant dense<0.000000e+00> : vector<8x8x8xf32>
    %75 = tpu.matmul %70, %72, %cst_20 {dimension_numbers = #tpu.dot_dimension_numbers<[2], [2], [1], [1], [0, 0, 0, 1, 1, 1], [0], [0]>} : vector<8x8x8xbf16>, vector<8x8x8xbf16>, vector<8x8x8xf32> -> vector<8x8x8xf32>
    "tpu.trace_stop"() : () -> ()
    %cst_21 = arith.constant dense<0xFF800000> : vector<8x8xf32>
    %76 = vector.multi_reduction <maximumf>, %75, %cst_21 [2] : vector<8x8x8xf32> to vector<8x8xf32>
    %77 = vector.shape_cast %76 : vector<8x8xf32> to vector<8x8x1xf32>
    %78 = vector.broadcast %77 : vector<8x8x1xf32> to vector<8x8x8xf32>
    %79 = arith.subf %75, %78 : vector<8x8x8xf32>
    %80 = math.exp %79 : vector<8x8x8xf32>
    %cst_22 = arith.constant dense<0.000000e+00> : vector<8x8xf32>
    %81 = vector.multi_reduction <add>, %80, %cst_22 [2] : vector<8x8x8xf32> to vector<8x8xf32>
    %82 = vector.shape_cast %81 : vector<8x8xf32> to vector<8x8x1xf32>
    %83 = tpu.reciprocal %82 {approx = true} : vector<8x8x1xf32> -> vector<8x8x1xf32>
    %84 = vector.broadcast %83 : vector<8x8x1xf32> to vector<8x8x8xf32>
    %85 = arith.mulf %80, %84 : vector<8x8x8xf32>
    %86 = arith.truncf %85 : vector<8x8x8xf32> to vector<8x8x8xbf16>
    "tpu.trace_start"() <{level = 10 : i32, message = "bqk,bkd->bqd"}> : () -> ()
    %cst_23 = arith.constant dense<0.000000e+00> : vector<8x8x8xf32>
    %87 = tpu.matmul %86, %74, %cst_23 {dimension_numbers = #tpu.dot_dimension_numbers<[2], [1], [1], [2], [0, 0, 0, 1, 1, 2], [0], [0]>} : vector<8x8x8xbf16>, vector<8x8x8xbf16>, vector<8x8x8xf32> -> vector<8x8x8xf32>
    "tpu.trace_stop"() : () -> ()
    %88 = vector.shape_cast %87 : vector<8x8x8xf32> to vector<64x8xf32>
    %89 = arith.truncf %88 : vector<64x8xf32> to vector<64x8xbf16>
    %90 = vector.extract_strided_slice %19 {offsets = [16, 0], sizes = [8, 32], strides = [1, 1]} : vector<32x32xbf16> to vector<8x32xbf16>
    %cst_24 = arith.constant dense<0.000000e+00> : vector<64x32xf32>
    %91 = tpu.matmul %89, %90, %cst_24 {dimension_numbers = #tpu.dot_dimension_numbers<[1], [0], [0], [1], [0, 0, 1, 1], [], []>} : vector<64x8xbf16>, vector<8x32xbf16>, vector<64x32xf32> -> vector<64x32xf32>
    %92 = arith.addf %68, %91 : vector<64x32xf32>
    %93 = vector.extract_strided_slice %14 {offsets = [0, 24], sizes = [64, 8], strides = [1, 1]} : vector<64x32xbf16> to vector<64x8xbf16>
    %94 = vector.shape_cast %93 : vector<64x8xbf16> to vector<8x8x8xbf16>
    %95 = vector.extract_strided_slice %16 {offsets = [0, 24], sizes = [64, 8], strides = [1, 1]} : vector<64x32xbf16> to vector<64x8xbf16>
    %96 = vector.shape_cast %95 : vector<64x8xbf16> to vector<8x8x8xbf16>
    %97 = vector.extract_strided_slice %18 {offsets = [0, 24], sizes = [64, 8], strides = [1, 1]} : vector<64x32xbf16> to vector<64x8xbf16>
    %98 = vector.shape_cast %97 : vector<64x8xbf16> to vector<8x8x8xbf16>
    "tpu.trace_start"() <{level = 10 : i32, message = "bqd,bkd->bqk"}> : () -> ()
    %cst_25 = arith.constant dense<0.000000e+00> : vector<8x8x8xf32>
    %99 = tpu.matmul %94, %96, %cst_25 {dimension_numbers = #tpu.dot_dimension_numbers<[2], [2], [1], [1], [0, 0, 0, 1, 1, 1], [0], [0]>} : vector<8x8x8xbf16>, vector<8x8x8xbf16>, vector<8x8x8xf32> -> vector<8x8x8xf32>
    "tpu.trace_stop"() : () -> ()
    %cst_26 = arith.constant dense<0xFF800000> : vector<8x8xf32>
    %100 = vector.multi_reduction <maximumf>, %99, %cst_26 [2] : vector<8x8x8xf32> to vector<8x8xf32>
    %101 = vector.shape_cast %100 : vector<8x8xf32> to vector<8x8x1xf32>
    %102 = vector.broadcast %101 : vector<8x8x1xf32> to vector<8x8x8xf32>
    %103 = arith.subf %99, %102 : vector<8x8x8xf32>
    %104 = math.exp %103 : vector<8x8x8xf32>
    %cst_27 = arith.constant dense<0.000000e+00> : vector<8x8xf32>
    %105 = vector.multi_reduction <add>, %104, %cst_27 [2] : vector<8x8x8xf32> to vector<8x8xf32>
    %106 = vector.shape_cast %105 : vector<8x8xf32> to vector<8x8x1xf32>
    %107 = tpu.reciprocal %106 {approx = true} : vector<8x8x1xf32> -> vector<8x8x1xf32>
    %108 = vector.broadcast %107 : vector<8x8x1xf32> to vector<8x8x8xf32>
    %109 = arith.mulf %104, %108 : vector<8x8x8xf32>
    %110 = arith.truncf %109 : vector<8x8x8xf32> to vector<8x8x8xbf16>
    "tpu.trace_start"() <{level = 10 : i32, message = "bqk,bkd->bqd"}> : () -> ()
    %cst_28 = arith.constant dense<0.000000e+00> : vector<8x8x8xf32>
    %111 = tpu.matmul %110, %98, %cst_28 {dimension_numbers = #tpu.dot_dimension_numbers<[2], [1], [1], [2], [0, 0, 0, 1, 1, 2], [0], [0]>} : vector<8x8x8xbf16>, vector<8x8x8xbf16>, vector<8x8x8xf32> -> vector<8x8x8xf32>
    "tpu.trace_stop"() : () -> ()
    %112 = vector.shape_cast %111 : vector<8x8x8xf32> to vector<64x8xf32>
    %113 = arith.truncf %112 : vector<64x8xf32> to vector<64x8xbf16>
    %114 = vector.extract_strided_slice %19 {offsets = [24, 0], sizes = [8, 32], strides = [1, 1]} : vector<32x32xbf16> to vector<8x32xbf16>
    %cst_29 = arith.constant dense<0.000000e+00> : vector<64x32xf32>
    %115 = tpu.matmul %113, %114, %cst_29 {dimension_numbers = #tpu.dot_dimension_numbers<[1], [0], [0], [1], [0, 0, 1, 1], [], []>} : vector<64x8xbf16>, vector<8x32xbf16>, vector<64x32xf32> -> vector<64x32xf32>
    %116 = arith.addf %92, %115 : vector<64x32xf32>
    %c0_30 = arith.constant 0 : index
    %c0_31 = arith.constant 0 : index
    %117 = vector.load %arg6[%c0_30, %c0_31] : memref<1x32xf32, #tpu.memory_space<vmem>>, vector<1x32xf32>
    %118 = vector.broadcast %117 : vector<1x32xf32> to vector<64x32xf32>
    %119 = arith.addf %116, %118 : vector<64x32xf32>
    %120 = arith.addf %4, %119 : vector<64x32xf32>
    %c0_32 = arith.constant 0 : index
    %c0_33 = arith.constant 0 : index
    %121 = vector.load %arg7[%c0_32, %c0_33] : memref<1x32xf32, #tpu.memory_space<vmem>>, vector<1x32xf32>
    %c0_34 = arith.constant 0 : index
    %c0_35 = arith.constant 0 : index
    %122 = vector.load %arg8[%c0_34, %c0_35] : memref<1x32xf32, #tpu.memory_space<vmem>>, vector<1x32xf32>
    %cst_36 = arith.constant dense<0.000000e+00> : vector<64xf32>
    %123 = vector.multi_reduction <add>, %120, %cst_36 [1] : vector<64x32xf32> to vector<64xf32>
    %124 = vector.shape_cast %123 : vector<64xf32> to vector<64x1xf32>
    %cst_37 = arith.constant 3.200000e+01 : f32
    %125 = vector.broadcast %cst_37 : f32 to vector<64x1xf32>
    %126 = arith.divf %124, %125 : vector<64x1xf32>
    %127 = vector.broadcast %126 : vector<64x1xf32> to vector<64x32xf32>
    %128 = arith.subf %120, %127 : vector<64x32xf32>
    %129 = arith.mulf %128, %128 : vector<64x32xf32>
    %cst_38 = arith.constant dense<0.000000e+00> : vector<64xf32>
    %130 = vector.multi_reduction <add>, %129, %cst_38 [1] : vector<64x32xf32> to vector<64xf32>
    %131 = vector.shape_cast %130 : vector<64xf32> to vector<64x1xf32>
    %cst_39 = arith.constant 3.200000e+01 : f32
    %132 = vector.broadcast %cst_39 : f32 to vector<64x1xf32>
    %133 = arith.divf %131, %132 : vector<64x1xf32>
    %134 = vector.broadcast %126 : vector<64x1xf32> to vector<64x32xf32>
    %135 = arith.subf %120, %134 : vector<64x32xf32>
    %cst_40 = arith.constant 9.99999974E-6 : f32
    %136 = vector.broadcast %cst_40 : f32 to vector<64x1xf32>
    %137 = arith.addf %133, %136 : vector<64x1xf32>
    %138 = math.rsqrt %137 : vector<64x1xf32>
    %139 = vector.broadcast %138 : vector<64x1xf32> to vector<64x32xf32>
    %140 = arith.mulf %135, %139 : vector<64x32xf32>
    %141 = vector.broadcast %121 : vector<1x32xf32> to vector<64x32xf32>
    %142 = arith.mulf %140, %141 : vector<64x32xf32>
    %143 = vector.broadcast %122 : vector<1x32xf32> to vector<64x32xf32>
    %144 = arith.addf %142, %143 : vector<64x32xf32>
    %145 = arith.truncf %144 : vector<64x32xf32> to vector<64x32xbf16>
    %c0_41 = arith.constant 0 : index
    %c0_42 = arith.constant 0 : index
    %146 = vector.load %arg9[%c0_41, %c0_42] : memref<32x64xbf16, #tpu.memory_space<vmem>>, vector<32x64xbf16>
    %cst_43 = arith.constant dense<0.000000e+00> : vector<64x64xf32>
    %147 = tpu.matmul %145, %146, %cst_43 {dimension_numbers = #tpu.dot_dimension_numbers<[1], [0], [0], [1], [0, 0, 1, 1], [], []>} : vector<64x32xbf16>, vector<32x64xbf16>, vector<64x64xf32> -> vector<64x64xf32>
    %c0_44 = arith.constant 0 : index
    %c0_45 = arith.constant 0 : index
    %148 = vector.load %arg10[%c0_44, %c0_45] : memref<1x64xf32, #tpu.memory_space<vmem>>, vector<1x64xf32>
    %149 = vector.broadcast %148 : vector<1x64xf32> to vector<64x64xf32>
    %150 = arith.addf %147, %149 : vector<64x64xf32>
    %cst_46 = arith.constant 0.000000e+00 : f32
    %151 = vector.broadcast %cst_46 : f32 to vector<64x64xf32>
    %152 = arith.maximumf %150, %151 : vector<64x64xf32>
    %153 = arith.truncf %152 : vector<64x64xf32> to vector<64x64xbf16>
    %c0_47 = arith.constant 0 : index
    %c0_48 = arith.constant 0 : index
    %154 = vector.load %arg11[%c0_47, %c0_48] : memref<64x32xbf16, #tpu.memory_space<vmem>>, vector<64x32xbf16>
    %cst_49 = arith.constant dense<0.000000e+00> : vector<64x32xf32>
    %155 = tpu.matmul %153, %154, %cst_49 {dimension_numbers = #tpu.dot_dimension_numbers<[1], [0], [0], [1], [0, 0, 1, 1], [], []>} : vector<64x64xbf16>, vector<64x32xbf16>, vector<64x32xf32> -> vector<64x32xf32>
    %c0_50 = arith.constant 0 : index
    %c0_51 = arith.constant 0 : index
    %156 = vector.load %arg12[%c0_50, %c0_51] : memref<1x32xf32, #tpu.memory_space<vmem>>, vector<1x32xf32>
    %157 = vector.broadcast %156 : vector<1x32xf32> to vector<64x32xf32>
    %158 = arith.addf %155, %157 : vector<64x32xf32>
    %159 = arith.addf %144, %158 : vector<64x32xf32>
    %c0_52 = arith.constant 0 : index
    %c0_53 = arith.constant 0 : index
    %160 = vector.load %arg13[%c0_52, %c0_53] : memref<1x32xf32, #tpu.memory_space<vmem>>, vector<1x32xf32>
    %c0_54 = arith.constant 0 : index
    %c0_55 = arith.constant 0 : index
    %161 = vector.load %arg14[%c0_54, %c0_55] : memref<1x32xf32, #tpu.memory_space<vmem>>, vector<1x32xf32>
    %cst_56 = arith.constant dense<0.000000e+00> : vector<64xf32>
    %162 = vector.multi_reduction <add>, %159, %cst_56 [1] : vector<64x32xf32> to vector<64xf32>
    %163 = vector.shape_cast %162 : vector<64xf32> to vector<64x1xf32>
    %cst_57 = arith.constant 3.200000e+01 : f32
    %164 = vector.broadcast %cst_57 : f32 to vector<64x1xf32>
    %165 = arith.divf %163, %164 : vector<64x1xf32>
    %166 = vector.broadcast %165 : vector<64x1xf32> to vector<64x32xf32>
    %167 = arith.subf %159, %166 : vector<64x32xf32>
    %168 = arith.mulf %167, %167 : vector<64x32xf32>
    %cst_58 = arith.constant dense<0.000000e+00> : vector<64xf32>
    %169 = vector.multi_reduction <add>, %168, %cst_58 [1] : vector<64x32xf32> to vector<64xf32>
    %170 = vector.shape_cast %169 : vector<64xf32> to vector<64x1xf32>
    %cst_59 = arith.constant 3.200000e+01 : f32
    %171 = vector.broadcast %cst_59 : f32 to vector<64x1xf32>
    %172 = arith.divf %170, %171 : vector<64x1xf32>
    %173 = vector.broadcast %165 : vector<64x1xf32> to vector<64x32xf32>
    %174 = arith.subf %159, %173 : vector<64x32xf32>
    %cst_60 = arith.constant 9.99999974E-6 : f32
    %175 = vector.broadcast %cst_60 : f32 to vector<64x1xf32>
    %176 = arith.addf %172, %175 : vector<64x1xf32>
    %177 = math.rsqrt %176 : vector<64x1xf32>
    %178 = vector.broadcast %177 : vector<64x1xf32> to vector<64x32xf32>
    %179 = arith.mulf %174, %178 : vector<64x32xf32>
    %180 = vector.broadcast %160 : vector<1x32xf32> to vector<64x32xf32>
    %181 = arith.mulf %179, %180 : vector<64x32xf32>
    %182 = vector.broadcast %161 : vector<1x32xf32> to vector<64x32xf32>
    %183 = arith.addf %181, %182 : vector<64x32xf32>
    %184 = arith.truncf %183 : vector<64x32xf32> to vector<64x32xbf16>
    %c0_61 = arith.constant 0 : index
    %c0_62 = arith.constant 0 : index
    %185 = vector.load %arg15[%c0_61, %c0_62] : memref<32x96xbf16, #tpu.memory_space<vmem>>, vector<32x96xbf16>
    %cst_63 = arith.constant dense<0.000000e+00> : vector<64x96xf32>
    %186 = tpu.matmul %184, %185, %cst_63 {dimension_numbers = #tpu.dot_dimension_numbers<[1], [0], [0], [1], [0, 0, 1, 1], [], []>} : vector<64x32xbf16>, vector<32x96xbf16>, vector<64x96xf32> -> vector<64x96xf32>
    %c0_64 = arith.constant 0 : index
    %c0_65 = arith.constant 0 : index
    %187 = vector.load %arg16[%c0_64, %c0_65] : memref<1x96xf32, #tpu.memory_space<vmem>>, vector<1x96xf32>
    %188 = vector.broadcast %187 : vector<1x96xf32> to vector<64x96xf32>
    %189 = arith.addf %186, %188 : vector<64x96xf32>
    %cst_66 = arith.constant 0.000000e+00 : f32
    %190 = vector.broadcast %cst_66 : f32 to vector<64x96xf32>
    %191 = arith.cmpf oge, %189, %190 : vector<64x96xf32>
    %192 = vector.broadcast %0 : f32 to vector<64x96xf32>
    %193 = arith.mulf %192, %189 : vector<64x96xf32>
    %194 = arith.select %191, %189, %193 : vector<64x96xi1>, vector<64x96xf32>
    %195 = vector.shape_cast %194 : vector<64x96xf32> to vector<2x32x96xf32>
    %cst_67 = arith.constant dense<0.000000e+00> : vector<32x96xf32>
    %196 = vector.multi_reduction <add>, %195, %cst_67 [0] : vector<2x32x96xf32> to vector<32x96xf32>
    %cst_68 = arith.constant 2.000000e+00 : f32
    %197 = vector.broadcast %cst_68 : f32 to vector<32x96xf32>
    %198 = arith.divf %196, %197 : vector<32x96xf32>
    %199 = arith.truncf %198 : vector<32x96xf32> to vector<32x96xbf16>
    %c0_69 = arith.constant 0 : index
    %c0_70 = arith.constant 0 : index
    %200 = vector.load %arg17[%c0_69, %c0_70] : memref<96x96xbf16, #tpu.memory_space<vmem>>, vector<96x96xbf16>
    %cst_71 = arith.constant dense<0.000000e+00> : vector<32x96xf32>
    %201 = tpu.matmul %199, %200, %cst_71 {dimension_numbers = #tpu.dot_dimension_numbers<[1], [0], [0], [1], [0, 0, 1, 1], [], []>} : vector<32x96xbf16>, vector<96x96xbf16>, vector<32x96xf32> -> vector<32x96xf32>
    %c0_72 = arith.constant 0 : index
    %c0_73 = arith.constant 0 : index
    %202 = vector.load %arg18[%c0_72, %c0_73] : memref<1x96xf32, #tpu.memory_space<vmem>>, vector<1x96xf32>
    %203 = vector.broadcast %202 : vector<1x96xf32> to vector<32x96xf32>
    %204 = arith.addf %201, %203 : vector<32x96xf32>
    %cst_74 = arith.constant 0.000000e+00 : f32
    %205 = vector.broadcast %cst_74 : f32 to vector<32x96xf32>
    %206 = arith.cmpf oge, %204, %205 : vector<32x96xf32>
    %207 = vector.broadcast %1 : f32 to vector<32x96xf32>
    %208 = arith.mulf %207, %204 : vector<32x96xf32>
    %209 = arith.select %206, %204, %208 : vector<32x96xi1>, vector<32x96xf32>
    %c0_75 = arith.constant 0 : index
    %c0_76 = arith.constant 0 : index
    %210 = vector.load %arg19[%c0_75, %c0_76] : memref<192x32xbf16, #tpu.memory_space<vmem>>, vector<192x32xbf16>
    %211 = arith.truncf %194 : vector<64x96xf32> to vector<64x96xbf16>
    %212 = vector.extract_strided_slice %210 {offsets = [0, 0], sizes = [96, 32], strides = [1, 1]} : vector<192x32xbf16> to vector<96x32xbf16>
    %cst_77 = arith.constant dense<0.000000e+00> : vector<64x32xf32>
    %213 = tpu.matmul %211, %212, %cst_77 {dimension_numbers = #tpu.dot_dimension_numbers<[1], [0], [0], [1], [0, 0, 1, 1], [], []>} : vector<64x96xbf16>, vector<96x32xbf16>, vector<64x32xf32> -> vector<64x32xf32>
    %214 = arith.truncf %209 : vector<32x96xf32> to vector<32x96xbf16>
    %215 = vector.extract_strided_slice %210 {offsets = [96, 0], sizes = [96, 32], strides = [1, 1]} : vector<192x32xbf16> to vector<96x32xbf16>
    %cst_78 = arith.constant dense<0.000000e+00> : vector<32x32xf32>
    %216 = tpu.matmul %214, %215, %cst_78 {dimension_numbers = #tpu.dot_dimension_numbers<[1], [0], [0], [1], [0, 0, 1, 1], [], []>} : vector<32x96xbf16>, vector<96x32xbf16>, vector<32x32xf32> -> vector<32x32xf32>
    %217 = vector.shape_cast %213 : vector<64x32xf32> to vector<2x32x32xf32>
    %218 = vector.shape_cast %216 : vector<32x32xf32> to vector<1x32x32xf32>
    %219 = vector.broadcast %218 : vector<1x32x32xf32> to vector<2x32x32xf32>
    %220 = arith.addf %217, %219 : vector<2x32x32xf32>
    %c0_79 = arith.constant 0 : index
    %c0_80 = arith.constant 0 : index
    %221 = vector.load %arg20[%c0_79, %c0_80] : memref<1x32xf32, #tpu.memory_space<vmem>>, vector<1x32xf32>
    %222 = vector.shape_cast %221 : vector<1x32xf32> to vector<1x1x32xf32>
    %223 = vector.broadcast %222 : vector<1x1x32xf32> to vector<2x32x32xf32>
    %224 = arith.addf %220, %223 : vector<2x32x32xf32>
    %cst_81 = arith.constant 0.000000e+00 : f32
    %225 = vector.broadcast %cst_81 : f32 to vector<2x32x32xf32>
    %226 = arith.cmpf oge, %224, %225 : vector<2x32x32xf32>
    %227 = vector.broadcast %2 : f32 to vector<2x32x32xf32>
    %228 = arith.mulf %227, %224 : vector<2x32x32xf32>
    %229 = arith.select %226, %224, %228 : vector<2x32x32xi1>, vector<2x32x32xf32>
    %cst_82 = arith.constant dense<0.000000e+00> : vector<2x32xf32>
    %230 = vector.multi_reduction <add>, %229, %cst_82 [2] : vector<2x32x32xf32> to vector<2x32xf32>
    %231 = vector.shape_cast %230 : vector<2x32xf32> to vector<2x32x1xf32>
    %cst_83 = arith.constant 3.200000e+01 : f32
    %232 = vector.broadcast %cst_83 : f32 to vector<2x32x1xf32>
    %233 = arith.divf %231, %232 : vector<2x32x1xf32>
    %cst_84 = arith.constant dense<0.000000e+00> : vector<2x1xf32>
    %234 = vector.multi_reduction <add>, %233, %cst_84 [1] : vector<2x32x1xf32> to vector<2x1xf32>
    %235 = vector.shape_cast %234 : vector<2x1xf32> to vector<2x1x1xf32>
    %cst_85 = arith.constant 3.200000e+01 : f32
    %236 = vector.broadcast %cst_85 : f32 to vector<2x1x1xf32>
    %237 = arith.divf %235, %236 : vector<2x1x1xf32>
    %238 = vector.broadcast %237 : vector<2x1x1xf32> to vector<2x32x32xf32>
    %239 = arith.subf %229, %238 : vector<2x32x32xf32>
    %240 = arith.mulf %239, %239 : vector<2x32x32xf32>
    %cst_86 = arith.constant dense<0.000000e+00> : vector<2x32xf32>
    %241 = vector.multi_reduction <add>, %240, %cst_86 [2] : vector<2x32x32xf32> to vector<2x32xf32>
    %242 = vector.shape_cast %241 : vector<2x32xf32> to vector<2x32x1xf32>
    %cst_87 = arith.constant 3.200000e+01 : f32
    %243 = vector.broadcast %cst_87 : f32 to vector<2x32x1xf32>
    %244 = arith.divf %242, %243 : vector<2x32x1xf32>
    %cst_88 = arith.constant dense<0.000000e+00> : vector<2x1xf32>
    %245 = vector.multi_reduction <add>, %244, %cst_88 [1] : vector<2x32x1xf32> to vector<2x1xf32>
    %246 = vector.shape_cast %245 : vector<2x1xf32> to vector<2x1x1xf32>
    %cst_89 = arith.constant 3.200000e+01 : f32
    %247 = vector.broadcast %cst_89 : f32 to vector<2x1x1xf32>
    %248 = arith.divf %246, %247 : vector<2x1x1xf32>
    %cst_90 = arith.constant 9.99999974E-6 : f32
    %249 = vector.broadcast %cst_90 : f32 to vector<2x1x1xf32>
    %250 = arith.addf %248, %249 : vector<2x1x1xf32>
    %251 = math.rsqrt %250 : vector<2x1x1xf32>
    %252 = vector.broadcast %251 : vector<2x1x1xf32> to vector<2x32x32xf32>
    %253 = arith.mulf %239, %252 : vector<2x32x32xf32>
    %c0_91 = arith.constant 0 : index
    %c0_92 = arith.constant 0 : index
    %254 = vector.load %arg21[%c0_91, %c0_92] : memref<1x32xf32, #tpu.memory_space<vmem>>, vector<1x32xf32>
    %255 = vector.shape_cast %254 : vector<1x32xf32> to vector<1x1x32xf32>
    %256 = vector.broadcast %255 : vector<1x1x32xf32> to vector<2x32x32xf32>
    %257 = arith.mulf %253, %256 : vector<2x32x32xf32>
    %c0_93 = arith.constant 0 : index
    %c0_94 = arith.constant 0 : index
    %258 = vector.load %arg22[%c0_93, %c0_94] : memref<1x32xf32, #tpu.memory_space<vmem>>, vector<1x32xf32>
    %259 = vector.shape_cast %258 : vector<1x32xf32> to vector<1x1x32xf32>
    %260 = vector.broadcast %259 : vector<1x1x32xf32> to vector<2x32x32xf32>
    %261 = arith.addf %257, %260 : vector<2x32x32xf32>
    %262 = vector.shape_cast %261 : vector<2x32x32xf32> to vector<64x32xf32>
    %263 = arith.addf %183, %262 : vector<64x32xf32>
    %264 = vector.shape_cast %263 : vector<64x32xf32> to vector<8x8x32xf32>
    %cst_95 = arith.constant dense<0.000000e+00> : vector<8x32xf32>
    %265 = vector.multi_reduction <add>, %264, %cst_95 [1] : vector<8x8x32xf32> to vector<8x32xf32>
    %cst_96 = arith.constant 8.000000e+00 : f32
    %266 = vector.broadcast %cst_96 : f32 to vector<8x32xf32>
    %267 = arith.divf %265, %266 : vector<8x32xf32>
    %268 = arith.truncf %267 : vector<8x32xf32> to vector<8x32xbf16>
    %c0_97 = arith.constant 0 : index
    %c0_98 = arith.constant 0 : index
    %269 = vector.load %arg23[%c0_97, %c0_98] : memref<32x96xbf16, #tpu.memory_space<vmem>>, vector<32x96xbf16>
    %cst_99 = arith.constant dense<0.000000e+00> : vector<8x96xf32>
    %270 = tpu.matmul %268, %269, %cst_99 {dimension_numbers = #tpu.dot_dimension_numbers<[1], [0], [0], [1], [0, 0, 1, 1], [], []>} : vector<8x32xbf16>, vector<32x96xbf16>, vector<8x96xf32> -> vector<8x96xf32>
    %c0_100 = arith.constant 0 : index
    %c0_101 = arith.constant 0 : index
    %271 = vector.load %arg24[%c0_100, %c0_101] : memref<1x96xf32, #tpu.memory_space<vmem>>, vector<1x96xf32>
    %272 = vector.broadcast %271 : vector<1x96xf32> to vector<8x96xf32>
    %273 = arith.addf %270, %272 : vector<8x96xf32>
    %274 = vector.extract_strided_slice %273 {offsets = [0, 0], sizes = [8, 32], strides = [1, 1]} : vector<8x96xf32> to vector<8x32xf32>
    %cst_102 = arith.constant 0.353553385 : f32
    %275 = vector.broadcast %cst_102 : f32 to vector<8x32xf32>
    %276 = arith.mulf %274, %275 : vector<8x32xf32>
    %277 = arith.truncf %276 : vector<8x32xf32> to vector<8x32xbf16>
    %278 = vector.extract_strided_slice %273 {offsets = [0, 32], sizes = [8, 32], strides = [1, 1]} : vector<8x96xf32> to vector<8x32xf32>
    %279 = arith.truncf %278 : vector<8x32xf32> to vector<8x32xbf16>
    %280 = vector.extract_strided_slice %273 {offsets = [0, 64], sizes = [8, 32], strides = [1, 1]} : vector<8x96xf32> to vector<8x32xf32>
    %281 = arith.truncf %280 : vector<8x32xf32> to vector<8x32xbf16>
    %c0_103 = arith.constant 0 : index
    %c0_104 = arith.constant 0 : index
    %282 = vector.load %arg25[%c0_103, %c0_104] : memref<32x32xbf16, #tpu.memory_space<vmem>>, vector<32x32xbf16>
    %cst_105 = arith.constant 0.000000e+00 : f32
    %283 = vector.broadcast %cst_105 : f32 to vector<8x32xf32>
    %284 = vector.extract_strided_slice %277 {offsets = [0, 0], sizes = [8, 8], strides = [1, 1]} : vector<8x32xbf16> to vector<8x8xbf16>
    %285 = vector.shape_cast %284 : vector<8x8xbf16> to vector<2x4x8xbf16>
    %286 = vector.extract_strided_slice %279 {offsets = [0, 0], sizes = [8, 8], strides = [1, 1]} : vector<8x32xbf16> to vector<8x8xbf16>
    %287 = vector.shape_cast %286 : vector<8x8xbf16> to vector<2x4x8xbf16>
    %288 = vector.extract_strided_slice %281 {offsets = [0, 0], sizes = [8, 8], strides = [1, 1]} : vector<8x32xbf16> to vector<8x8xbf16>
    %289 = vector.shape_cast %288 : vector<8x8xbf16> to vector<2x4x8xbf16>
    "tpu.trace_start"() <{level = 10 : i32, message = "bqd,bkd->bqk"}> : () -> ()
    %cst_106 = arith.constant dense<0.000000e+00> : vector<2x4x4xf32>
    %290 = tpu.matmul %285, %287, %cst_106 {dimension_numbers = #tpu.dot_dimension_numbers<[2], [2], [1], [1], [0, 0, 0, 1, 1, 1], [0], [0]>} : vector<2x4x8xbf16>, vector<2x4x8xbf16>, vector<2x4x4xf32> -> vector<2x4x4xf32>
    "tpu.trace_stop"() : () -> ()
    %cst_107 = arith.constant dense<0xFF800000> : vector<2x4xf32>
    %291 = vector.multi_reduction <maximumf>, %290, %cst_107 [2] : vector<2x4x4xf32> to vector<2x4xf32>
    %292 = vector.shape_cast %291 : vector<2x4xf32> to vector<2x4x1xf32>
    %293 = vector.broadcast %292 : vector<2x4x1xf32> to vector<2x4x4xf32>
    %294 = arith.subf %290, %293 : vector<2x4x4xf32>
    %295 = math.exp %294 : vector<2x4x4xf32>
    %cst_108 = arith.constant dense<0.000000e+00> : vector<2x4xf32>
    %296 = vector.multi_reduction <add>, %295, %cst_108 [2] : vector<2x4x4xf32> to vector<2x4xf32>
    %297 = vector.shape_cast %296 : vector<2x4xf32> to vector<2x4x1xf32>
    %298 = tpu.reciprocal %297 {approx = true} : vector<2x4x1xf32> -> vector<2x4x1xf32>
    %299 = vector.broadcast %298 : vector<2x4x1xf32> to vector<2x4x4xf32>
    %300 = arith.mulf %295, %299 : vector<2x4x4xf32>
    %301 = arith.truncf %300 : vector<2x4x4xf32> to vector<2x4x4xbf16>
    "tpu.trace_start"() <{level = 10 : i32, message = "bqk,bkd->bqd"}> : () -> ()
    %cst_109 = arith.constant dense<0.000000e+00> : vector<2x4x8xf32>
    %302 = tpu.matmul %301, %289, %cst_109 {dimension_numbers = #tpu.dot_dimension_numbers<[2], [1], [1], [2], [0, 0, 0, 1, 1, 2], [0], [0]>} : vector<2x4x4xbf16>, vector<2x4x8xbf16>, vector<2x4x8xf32> -> vector<2x4x8xf32>
    "tpu.trace_stop"() : () -> ()
    %303 = vector.shape_cast %302 : vector<2x4x8xf32> to vector<8x8xf32>
    %304 = arith.truncf %303 : vector<8x8xf32> to vector<8x8xbf16>
    %305 = vector.extract_strided_slice %282 {offsets = [0, 0], sizes = [8, 32], strides = [1, 1]} : vector<32x32xbf16> to vector<8x32xbf16>
    %cst_110 = arith.constant dense<0.000000e+00> : vector<8x32xf32>
    %306 = tpu.matmul %304, %305, %cst_110 {dimension_numbers = #tpu.dot_dimension_numbers<[1], [0], [0], [1], [0, 0, 1, 1], [], []>} : vector<8x8xbf16>, vector<8x32xbf16>, vector<8x32xf32> -> vector<8x32xf32>
    %307 = arith.addf %283, %306 : vector<8x32xf32>
    %308 = vector.extract_strided_slice %277 {offsets = [0, 8], sizes = [8, 8], strides = [1, 1]} : vector<8x32xbf16> to vector<8x8xbf16>
    %309 = vector.shape_cast %308 : vector<8x8xbf16> to vector<2x4x8xbf16>
    %310 = vector.extract_strided_slice %279 {offsets = [0, 8], sizes = [8, 8], strides = [1, 1]} : vector<8x32xbf16> to vector<8x8xbf16>
    %311 = vector.shape_cast %310 : vector<8x8xbf16> to vector<2x4x8xbf16>
    %312 = vector.extract_strided_slice %281 {offsets = [0, 8], sizes = [8, 8], strides = [1, 1]} : vector<8x32xbf16> to vector<8x8xbf16>
    %313 = vector.shape_cast %312 : vector<8x8xbf16> to vector<2x4x8xbf16>
    "tpu.trace_start"() <{level = 10 : i32, message = "bqd,bkd->bqk"}> : () -> ()
    %cst_111 = arith.constant dense<0.000000e+00> : vector<2x4x4xf32>
    %314 = tpu.matmul %309, %311, %cst_111 {dimension_numbers = #tpu.dot_dimension_numbers<[2], [2], [1], [1], [0, 0, 0, 1, 1, 1], [0], [0]>} : vector<2x4x8xbf16>, vector<2x4x8xbf16>, vector<2x4x4xf32> -> vector<2x4x4xf32>
    "tpu.trace_stop"() : () -> ()
    %cst_112 = arith.constant dense<0xFF800000> : vector<2x4xf32>
    %315 = vector.multi_reduction <maximumf>, %314, %cst_112 [2] : vector<2x4x4xf32> to vector<2x4xf32>
    %316 = vector.shape_cast %315 : vector<2x4xf32> to vector<2x4x1xf32>
    %317 = vector.broadcast %316 : vector<2x4x1xf32> to vector<2x4x4xf32>
    %318 = arith.subf %314, %317 : vector<2x4x4xf32>
    %319 = math.exp %318 : vector<2x4x4xf32>
    %cst_113 = arith.constant dense<0.000000e+00> : vector<2x4xf32>
    %320 = vector.multi_reduction <add>, %319, %cst_113 [2] : vector<2x4x4xf32> to vector<2x4xf32>
    %321 = vector.shape_cast %320 : vector<2x4xf32> to vector<2x4x1xf32>
    %322 = tpu.reciprocal %321 {approx = true} : vector<2x4x1xf32> -> vector<2x4x1xf32>
    %323 = vector.broadcast %322 : vector<2x4x1xf32> to vector<2x4x4xf32>
    %324 = arith.mulf %319, %323 : vector<2x4x4xf32>
    %325 = arith.truncf %324 : vector<2x4x4xf32> to vector<2x4x4xbf16>
    "tpu.trace_start"() <{level = 10 : i32, message = "bqk,bkd->bqd"}> : () -> ()
    %cst_114 = arith.constant dense<0.000000e+00> : vector<2x4x8xf32>
    %326 = tpu.matmul %325, %313, %cst_114 {dimension_numbers = #tpu.dot_dimension_numbers<[2], [1], [1], [2], [0, 0, 0, 1, 1, 2], [0], [0]>} : vector<2x4x4xbf16>, vector<2x4x8xbf16>, vector<2x4x8xf32> -> vector<2x4x8xf32>
    "tpu.trace_stop"() : () -> ()
    %327 = vector.shape_cast %326 : vector<2x4x8xf32> to vector<8x8xf32>
    %328 = arith.truncf %327 : vector<8x8xf32> to vector<8x8xbf16>
    %329 = vector.extract_strided_slice %282 {offsets = [8, 0], sizes = [8, 32], strides = [1, 1]} : vector<32x32xbf16> to vector<8x32xbf16>
    %cst_115 = arith.constant dense<0.000000e+00> : vector<8x32xf32>
    %330 = tpu.matmul %328, %329, %cst_115 {dimension_numbers = #tpu.dot_dimension_numbers<[1], [0], [0], [1], [0, 0, 1, 1], [], []>} : vector<8x8xbf16>, vector<8x32xbf16>, vector<8x32xf32> -> vector<8x32xf32>
    %331 = arith.addf %307, %330 : vector<8x32xf32>
    %332 = vector.extract_strided_slice %277 {offsets = [0, 16], sizes = [8, 8], strides = [1, 1]} : vector<8x32xbf16> to vector<8x8xbf16>
    %333 = vector.shape_cast %332 : vector<8x8xbf16> to vector<2x4x8xbf16>
    %334 = vector.extract_strided_slice %279 {offsets = [0, 16], sizes = [8, 8], strides = [1, 1]} : vector<8x32xbf16> to vector<8x8xbf16>
    %335 = vector.shape_cast %334 : vector<8x8xbf16> to vector<2x4x8xbf16>
    %336 = vector.extract_strided_slice %281 {offsets = [0, 16], sizes = [8, 8], strides = [1, 1]} : vector<8x32xbf16> to vector<8x8xbf16>
    %337 = vector.shape_cast %336 : vector<8x8xbf16> to vector<2x4x8xbf16>
    "tpu.trace_start"() <{level = 10 : i32, message = "bqd,bkd->bqk"}> : () -> ()
    %cst_116 = arith.constant dense<0.000000e+00> : vector<2x4x4xf32>
    %338 = tpu.matmul %333, %335, %cst_116 {dimension_numbers = #tpu.dot_dimension_numbers<[2], [2], [1], [1], [0, 0, 0, 1, 1, 1], [0], [0]>} : vector<2x4x8xbf16>, vector<2x4x8xbf16>, vector<2x4x4xf32> -> vector<2x4x4xf32>
    "tpu.trace_stop"() : () -> ()
    %cst_117 = arith.constant dense<0xFF800000> : vector<2x4xf32>
    %339 = vector.multi_reduction <maximumf>, %338, %cst_117 [2] : vector<2x4x4xf32> to vector<2x4xf32>
    %340 = vector.shape_cast %339 : vector<2x4xf32> to vector<2x4x1xf32>
    %341 = vector.broadcast %340 : vector<2x4x1xf32> to vector<2x4x4xf32>
    %342 = arith.subf %338, %341 : vector<2x4x4xf32>
    %343 = math.exp %342 : vector<2x4x4xf32>
    %cst_118 = arith.constant dense<0.000000e+00> : vector<2x4xf32>
    %344 = vector.multi_reduction <add>, %343, %cst_118 [2] : vector<2x4x4xf32> to vector<2x4xf32>
    %345 = vector.shape_cast %344 : vector<2x4xf32> to vector<2x4x1xf32>
    %346 = tpu.reciprocal %345 {approx = true} : vector<2x4x1xf32> -> vector<2x4x1xf32>
    %347 = vector.broadcast %346 : vector<2x4x1xf32> to vector<2x4x4xf32>
    %348 = arith.mulf %343, %347 : vector<2x4x4xf32>
    %349 = arith.truncf %348 : vector<2x4x4xf32> to vector<2x4x4xbf16>
    "tpu.trace_start"() <{level = 10 : i32, message = "bqk,bkd->bqd"}> : () -> ()
    %cst_119 = arith.constant dense<0.000000e+00> : vector<2x4x8xf32>
    %350 = tpu.matmul %349, %337, %cst_119 {dimension_numbers = #tpu.dot_dimension_numbers<[2], [1], [1], [2], [0, 0, 0, 1, 1, 2], [0], [0]>} : vector<2x4x4xbf16>, vector<2x4x8xbf16>, vector<2x4x8xf32> -> vector<2x4x8xf32>
    "tpu.trace_stop"() : () -> ()
    %351 = vector.shape_cast %350 : vector<2x4x8xf32> to vector<8x8xf32>
    %352 = arith.truncf %351 : vector<8x8xf32> to vector<8x8xbf16>
    %353 = vector.extract_strided_slice %282 {offsets = [16, 0], sizes = [8, 32], strides = [1, 1]} : vector<32x32xbf16> to vector<8x32xbf16>
    %cst_120 = arith.constant dense<0.000000e+00> : vector<8x32xf32>
    %354 = tpu.matmul %352, %353, %cst_120 {dimension_numbers = #tpu.dot_dimension_numbers<[1], [0], [0], [1], [0, 0, 1, 1], [], []>} : vector<8x8xbf16>, vector<8x32xbf16>, vector<8x32xf32> -> vector<8x32xf32>
    %355 = arith.addf %331, %354 : vector<8x32xf32>
    %356 = vector.extract_strided_slice %277 {offsets = [0, 24], sizes = [8, 8], strides = [1, 1]} : vector<8x32xbf16> to vector<8x8xbf16>
    %357 = vector.shape_cast %356 : vector<8x8xbf16> to vector<2x4x8xbf16>
    %358 = vector.extract_strided_slice %279 {offsets = [0, 24], sizes = [8, 8], strides = [1, 1]} : vector<8x32xbf16> to vector<8x8xbf16>
    %359 = vector.shape_cast %358 : vector<8x8xbf16> to vector<2x4x8xbf16>
    %360 = vector.extract_strided_slice %281 {offsets = [0, 24], sizes = [8, 8], strides = [1, 1]} : vector<8x32xbf16> to vector<8x8xbf16>
    %361 = vector.shape_cast %360 : vector<8x8xbf16> to vector<2x4x8xbf16>
    "tpu.trace_start"() <{level = 10 : i32, message = "bqd,bkd->bqk"}> : () -> ()
    %cst_121 = arith.constant dense<0.000000e+00> : vector<2x4x4xf32>
    %362 = tpu.matmul %357, %359, %cst_121 {dimension_numbers = #tpu.dot_dimension_numbers<[2], [2], [1], [1], [0, 0, 0, 1, 1, 1], [0], [0]>} : vector<2x4x8xbf16>, vector<2x4x8xbf16>, vector<2x4x4xf32> -> vector<2x4x4xf32>
    "tpu.trace_stop"() : () -> ()
    %cst_122 = arith.constant dense<0xFF800000> : vector<2x4xf32>
    %363 = vector.multi_reduction <maximumf>, %362, %cst_122 [2] : vector<2x4x4xf32> to vector<2x4xf32>
    %364 = vector.shape_cast %363 : vector<2x4xf32> to vector<2x4x1xf32>
    %365 = vector.broadcast %364 : vector<2x4x1xf32> to vector<2x4x4xf32>
    %366 = arith.subf %362, %365 : vector<2x4x4xf32>
    %367 = math.exp %366 : vector<2x4x4xf32>
    %cst_123 = arith.constant dense<0.000000e+00> : vector<2x4xf32>
    %368 = vector.multi_reduction <add>, %367, %cst_123 [2] : vector<2x4x4xf32> to vector<2x4xf32>
    %369 = vector.shape_cast %368 : vector<2x4xf32> to vector<2x4x1xf32>
    %370 = tpu.reciprocal %369 {approx = true} : vector<2x4x1xf32> -> vector<2x4x1xf32>
    %371 = vector.broadcast %370 : vector<2x4x1xf32> to vector<2x4x4xf32>
    %372 = arith.mulf %367, %371 : vector<2x4x4xf32>
    %373 = arith.truncf %372 : vector<2x4x4xf32> to vector<2x4x4xbf16>
    "tpu.trace_start"() <{level = 10 : i32, message = "bqk,bkd->bqd"}> : () -> ()
    %cst_124 = arith.constant dense<0.000000e+00> : vector<2x4x8xf32>
    %374 = tpu.matmul %373, %361, %cst_124 {dimension_numbers = #tpu.dot_dimension_numbers<[2], [1], [1], [2], [0, 0, 0, 1, 1, 2], [0], [0]>} : vector<2x4x4xbf16>, vector<2x4x8xbf16>, vector<2x4x8xf32> -> vector<2x4x8xf32>
    "tpu.trace_stop"() : () -> ()
    %375 = vector.shape_cast %374 : vector<2x4x8xf32> to vector<8x8xf32>
    %376 = arith.truncf %375 : vector<8x8xf32> to vector<8x8xbf16>
    %377 = vector.extract_strided_slice %282 {offsets = [24, 0], sizes = [8, 32], strides = [1, 1]} : vector<32x32xbf16> to vector<8x32xbf16>
    %cst_125 = arith.constant dense<0.000000e+00> : vector<8x32xf32>
    %378 = tpu.matmul %376, %377, %cst_125 {dimension_numbers = #tpu.dot_dimension_numbers<[1], [0], [0], [1], [0, 0, 1, 1], [], []>} : vector<8x8xbf16>, vector<8x32xbf16>, vector<8x32xf32> -> vector<8x32xf32>
    %379 = arith.addf %355, %378 : vector<8x32xf32>
    %c0_126 = arith.constant 0 : index
    %c0_127 = arith.constant 0 : index
    %380 = vector.load %arg26[%c0_126, %c0_127] : memref<1x32xf32, #tpu.memory_space<vmem>>, vector<1x32xf32>
    %381 = vector.broadcast %380 : vector<1x32xf32> to vector<8x32xf32>
    %382 = arith.addf %379, %381 : vector<8x32xf32>
    %383 = arith.addf %267, %382 : vector<8x32xf32>
    %c0_128 = arith.constant 0 : index
    %c0_129 = arith.constant 0 : index
    %384 = vector.load %arg27[%c0_128, %c0_129] : memref<1x32xf32, #tpu.memory_space<vmem>>, vector<1x32xf32>
    %c0_130 = arith.constant 0 : index
    %c0_131 = arith.constant 0 : index
    %385 = vector.load %arg28[%c0_130, %c0_131] : memref<1x32xf32, #tpu.memory_space<vmem>>, vector<1x32xf32>
    %cst_132 = arith.constant dense<0.000000e+00> : vector<8xf32>
    %386 = vector.multi_reduction <add>, %383, %cst_132 [1] : vector<8x32xf32> to vector<8xf32>
    %387 = vector.shape_cast %386 : vector<8xf32> to vector<8x1xf32>
    %cst_133 = arith.constant 3.200000e+01 : f32
    %388 = vector.broadcast %cst_133 : f32 to vector<8x1xf32>
    %389 = arith.divf %387, %388 : vector<8x1xf32>
    %390 = vector.broadcast %389 : vector<8x1xf32> to vector<8x32xf32>
    %391 = arith.subf %383, %390 : vector<8x32xf32>
    %392 = arith.mulf %391, %391 : vector<8x32xf32>
    %cst_134 = arith.constant dense<0.000000e+00> : vector<8xf32>
    %393 = vector.multi_reduction <add>, %392, %cst_134 [1] : vector<8x32xf32> to vector<8xf32>
    %394 = vector.shape_cast %393 : vector<8xf32> to vector<8x1xf32>
    %cst_135 = arith.constant 3.200000e+01 : f32
    %395 = vector.broadcast %cst_135 : f32 to vector<8x1xf32>
    %396 = arith.divf %394, %395 : vector<8x1xf32>
    %397 = vector.broadcast %389 : vector<8x1xf32> to vector<8x32xf32>
    %398 = arith.subf %383, %397 : vector<8x32xf32>
    %cst_136 = arith.constant 9.99999974E-6 : f32
    %399 = vector.broadcast %cst_136 : f32 to vector<8x1xf32>
    %400 = arith.addf %396, %399 : vector<8x1xf32>
    %401 = math.rsqrt %400 : vector<8x1xf32>
    %402 = vector.broadcast %401 : vector<8x1xf32> to vector<8x32xf32>
    %403 = arith.mulf %398, %402 : vector<8x32xf32>
    %404 = vector.broadcast %384 : vector<1x32xf32> to vector<8x32xf32>
    %405 = arith.mulf %403, %404 : vector<8x32xf32>
    %406 = vector.broadcast %385 : vector<1x32xf32> to vector<8x32xf32>
    %407 = arith.addf %405, %406 : vector<8x32xf32>
    %408 = arith.truncf %407 : vector<8x32xf32> to vector<8x32xbf16>
    %c0_137 = arith.constant 0 : index
    %c0_138 = arith.constant 0 : index
    %409 = vector.load %arg29[%c0_137, %c0_138] : memref<32x64xbf16, #tpu.memory_space<vmem>>, vector<32x64xbf16>
    %cst_139 = arith.constant dense<0.000000e+00> : vector<8x64xf32>
    %410 = tpu.matmul %408, %409, %cst_139 {dimension_numbers = #tpu.dot_dimension_numbers<[1], [0], [0], [1], [0, 0, 1, 1], [], []>} : vector<8x32xbf16>, vector<32x64xbf16>, vector<8x64xf32> -> vector<8x64xf32>
    %c0_140 = arith.constant 0 : index
    %c0_141 = arith.constant 0 : index
    %411 = vector.load %arg30[%c0_140, %c0_141] : memref<1x64xf32, #tpu.memory_space<vmem>>, vector<1x64xf32>
    %412 = vector.broadcast %411 : vector<1x64xf32> to vector<8x64xf32>
    %413 = arith.addf %410, %412 : vector<8x64xf32>
    %cst_142 = arith.constant 0.000000e+00 : f32
    %414 = vector.broadcast %cst_142 : f32 to vector<8x64xf32>
    %415 = arith.maximumf %413, %414 : vector<8x64xf32>
    %416 = arith.truncf %415 : vector<8x64xf32> to vector<8x64xbf16>
    %c0_143 = arith.constant 0 : index
    %c0_144 = arith.constant 0 : index
    %417 = vector.load %arg31[%c0_143, %c0_144] : memref<64x32xbf16, #tpu.memory_space<vmem>>, vector<64x32xbf16>
    %cst_145 = arith.constant dense<0.000000e+00> : vector<8x32xf32>
    %418 = tpu.matmul %416, %417, %cst_145 {dimension_numbers = #tpu.dot_dimension_numbers<[1], [0], [0], [1], [0, 0, 1, 1], [], []>} : vector<8x64xbf16>, vector<64x32xbf16>, vector<8x32xf32> -> vector<8x32xf32>
    %c0_146 = arith.constant 0 : index
    %c0_147 = arith.constant 0 : index
    %419 = vector.load %arg32[%c0_146, %c0_147] : memref<1x32xf32, #tpu.memory_space<vmem>>, vector<1x32xf32>
    %420 = vector.broadcast %419 : vector<1x32xf32> to vector<8x32xf32>
    %421 = arith.addf %418, %420 : vector<8x32xf32>
    %422 = arith.addf %407, %421 : vector<8x32xf32>
    %c0_148 = arith.constant 0 : index
    %c0_149 = arith.constant 0 : index
    %423 = vector.load %arg33[%c0_148, %c0_149] : memref<1x32xf32, #tpu.memory_space<vmem>>, vector<1x32xf32>
    %c0_150 = arith.constant 0 : index
    %c0_151 = arith.constant 0 : index
    %424 = vector.load %arg34[%c0_150, %c0_151] : memref<1x32xf32, #tpu.memory_space<vmem>>, vector<1x32xf32>
    %cst_152 = arith.constant dense<0.000000e+00> : vector<8xf32>
    %425 = vector.multi_reduction <add>, %422, %cst_152 [1] : vector<8x32xf32> to vector<8xf32>
    %426 = vector.shape_cast %425 : vector<8xf32> to vector<8x1xf32>
    %cst_153 = arith.constant 3.200000e+01 : f32
    %427 = vector.broadcast %cst_153 : f32 to vector<8x1xf32>
    %428 = arith.divf %426, %427 : vector<8x1xf32>
    %429 = vector.broadcast %428 : vector<8x1xf32> to vector<8x32xf32>
    %430 = arith.subf %422, %429 : vector<8x32xf32>
    %431 = arith.mulf %430, %430 : vector<8x32xf32>
    %cst_154 = arith.constant dense<0.000000e+00> : vector<8xf32>
    %432 = vector.multi_reduction <add>, %431, %cst_154 [1] : vector<8x32xf32> to vector<8xf32>
    %433 = vector.shape_cast %432 : vector<8xf32> to vector<8x1xf32>
    %cst_155 = arith.constant 3.200000e+01 : f32
    %434 = vector.broadcast %cst_155 : f32 to vector<8x1xf32>
    %435 = arith.divf %433, %434 : vector<8x1xf32>
    %436 = vector.broadcast %428 : vector<8x1xf32> to vector<8x32xf32>
    %437 = arith.subf %422, %436 : vector<8x32xf32>
    %cst_156 = arith.constant 9.99999974E-6 : f32
    %438 = vector.broadcast %cst_156 : f32 to vector<8x1xf32>
    %439 = arith.addf %435, %438 : vector<8x1xf32>
    %440 = math.rsqrt %439 : vector<8x1xf32>
    %441 = vector.broadcast %440 : vector<8x1xf32> to vector<8x32xf32>
    %442 = arith.mulf %437, %441 : vector<8x32xf32>
    %443 = vector.broadcast %423 : vector<1x32xf32> to vector<8x32xf32>
    %444 = arith.mulf %442, %443 : vector<8x32xf32>
    %445 = vector.broadcast %424 : vector<1x32xf32> to vector<8x32xf32>
    %446 = arith.addf %444, %445 : vector<8x32xf32>
    %447 = vector.shape_cast %263 : vector<64x32xf32> to vector<8x8x32xf32>
    %448 = vector.shape_cast %446 : vector<8x32xf32> to vector<8x1x32xf32>
    %449 = vector.broadcast %448 : vector<8x1x32xf32> to vector<8x8x32xf32>
    %450 = arith.addf %447, %449 : vector<8x8x32xf32>
    %451 = vector.shape_cast %450 : vector<8x8x32xf32> to vector<64x32xf32>
    %452 = arith.truncf %451 : vector<64x32xf32> to vector<64x32xbf16>
    %c0_157 = arith.constant 0 : index
    %c0_158 = arith.constant 0 : index
    %453 = vector.load %arg35[%c0_157, %c0_158] : memref<64x32xbf16, #tpu.memory_space<vmem>>, vector<64x32xbf16>
    tpu.vector_store %arg35[%c0_157, %c0_158], %452 {strides = array<i32>} : memref<64x32xbf16, #tpu.memory_space<vmem>>, vector<64x32xbf16>,
    return
  }
  func.func @transform_0(%arg0: i32) -> i32 {
    %c0_i32 = arith.constant 0 : i32
    %c0_i32_0 = arith.constant 0 : i32
    return %c0_i32 : i32
  }
  func.func @transform_1(%arg0: i32) -> (i32, i32) {
    %c0_i32 = arith.constant 0 : i32
    %c0_i32_0 = arith.constant 0 : i32
    return %arg0, %c0_i32 : i32, i32
  }
  func.func @transform_2(%arg0: i32) -> (i32, i32) {
    %c0_i32 = arith.constant 0 : i32
    %c0_i32_0 = arith.constant 0 : i32
    %c0_i32_1 = arith.constant 0 : i32
    return %c0_i32, %c0_i32_0 : i32, i32
  }
  func.func @transform_3(%arg0: i32) -> (i32, i32) {
    %c0_i32 = arith.constant 0 : i32
    %c0_i32_0 = arith.constant 0 : i32
    %c0_i32_1 = arith.constant 0 : i32
    return %c0_i32, %c0_i32_0 : i32, i32
  }
  func.func @transform_4(%arg0: i32) -> (i32, i32) {
    %c0_i32 = arith.constant 0 : i32
    %c0_i32_0 = arith.constant 0 : i32
    %c0_i32_1 = arith.constant 0 : i32
    return %c0_i32, %c0_i32_0 : i32, i32
  }
  func.func @transform_5(%arg0: i32) -> (i32, i32) {
    %c0_i32 = arith.constant 0 : i32
    %c0_i32_0 = arith.constant 0 : i32
    %c0_i32_1 = arith.constant 0 : i32
    return %c0_i32, %c0_i32_0 : i32, i32
  }
  func.func @transform_6(%arg0: i32) -> (i32, i32) {
    %c0_i32 = arith.constant 0 : i32
    %c0_i32_0 = arith.constant 0 : i32
    %c0_i32_1 = arith.constant 0 : i32
    return %c0_i32, %c0_i32_0 : i32, i32
  }
  func.func @transform_7(%arg0: i32) -> (i32, i32) {
    %c0_i32 = arith.constant 0 : i32
    %c0_i32_0 = arith.constant 0 : i32
    %c0_i32_1 = arith.constant 0 : i32
    return %c0_i32, %c0_i32_0 : i32, i32
  }
  func.func @transform_8(%arg0: i32) -> (i32, i32) {
    %c0_i32 = arith.constant 0 : i32
    %c0_i32_0 = arith.constant 0 : i32
    %c0_i32_1 = arith.constant 0 : i32
    return %c0_i32, %c0_i32_0 : i32, i32
  }
  func.func @transform_9(%arg0: i32) -> (i32, i32) {
    %c0_i32 = arith.constant 0 : i32
    %c0_i32_0 = arith.constant 0 : i32
    %c0_i32_1 = arith.constant 0 : i32
    return %c0_i32, %c0_i32_0 : i32, i32
  }
  func.func @transform_10(%arg0: i32) -> (i32, i32) {
    %c0_i32 = arith.constant 0 : i32
    %c0_i32_0 = arith.constant 0 : i32
    %c0_i32_1 = arith.constant 0 : i32
    return %c0_i32, %c0_i32_0 : i32, i32
  }
  func.func @transform_11(%arg0: i32) -> (i32, i32) {
    %c0_i32 = arith.constant 0 : i32
    %c0_i32_0 = arith.constant 0 : i32
    %c0_i32_1 = arith.constant 0 : i32
    return %c0_i32, %c0_i32_0 : i32, i32
  }
  func.func @transform_12(%arg0: i32) -> (i32, i32) {
    %c0_i32 = arith.constant 0 : i32
    %c0_i32_0 = arith.constant 0 : i32
    %c0_i32_1 = arith.constant 0 : i32
    return %c0_i32, %c0_i32_0 : i32, i32
  }
  func.func @transform_13(%arg0: i32) -> (i32, i32) {
    %c0_i32 = arith.constant 0 : i32
    %c0_i32_0 = arith.constant 0 : i32
    %c0_i32_1 = arith.constant 0 : i32
    return %c0_i32, %c0_i32_0 : i32, i32
  }
  func.func @transform_14(%arg0: i32) -> (i32, i32) {
    %c0_i32 = arith.constant 0 : i32
    %c0_i32_0 = arith.constant 0 : i32
    %c0_i32_1 = arith.constant 0 : i32
    return %c0_i32, %c0_i32_0 : i32, i32
  }
  func.func @transform_15(%arg0: i32) -> (i32, i32) {
    %c0_i32 = arith.constant 0 : i32
    %c0_i32_0 = arith.constant 0 : i32
    %c0_i32_1 = arith.constant 0 : i32
    return %c0_i32, %c0_i32_0 : i32, i32
  }
  func.func @transform_16(%arg0: i32) -> (i32, i32) {
    %c0_i32 = arith.constant 0 : i32
    %c0_i32_0 = arith.constant 0 : i32
    %c0_i32_1 = arith.constant 0 : i32
    return %c0_i32, %c0_i32_0 : i32, i32
  }
  func.func @transform_17(%arg0: i32) -> (i32, i32) {
    %c0_i32 = arith.constant 0 : i32
    %c0_i32_0 = arith.constant 0 : i32
    %c0_i32_1 = arith.constant 0 : i32
    return %c0_i32, %c0_i32_0 : i32, i32
  }
  func.func @transform_18(%arg0: i32) -> (i32, i32) {
    %c0_i32 = arith.constant 0 : i32
    %c0_i32_0 = arith.constant 0 : i32
    %c0_i32_1 = arith.constant 0 : i32
    return %c0_i32, %c0_i32_0 : i32, i32
  }
  func.func @transform_19(%arg0: i32) -> (i32, i32) {
    %c0_i32 = arith.constant 0 : i32
    %c0_i32_0 = arith.constant 0 : i32
    %c0_i32_1 = arith.constant 0 : i32
    return %c0_i32, %c0_i32_0 : i32, i32
  }
  func.func @transform_20(%arg0: i32) -> (i32, i32) {
    %c0_i32 = arith.constant 0 : i32
    %c0_i32_0 = arith.constant 0 : i32
    %c0_i32_1 = arith.constant 0 : i32
    return %c0_i32, %c0_i32_0 : i32, i32
  }
  func.func @transform_21(%arg0: i32) -> (i32, i32) {
    %c0_i32 = arith.constant 0 : i32
    %c0_i32_0 = arith.constant 0 : i32
    %c0_i32_1 = arith.constant 0 : i32
    return %c0_i32, %c0_i32_0 : i32, i32
  }
  func.func @transform_22(%arg0: i32) -> (i32, i32) {
    %c0_i32 = arith.constant 0 : i32
    %c0_i32_0 = arith.constant 0 : i32
    %c0_i32_1 = arith.constant 0 : i32
    return %c0_i32, %c0_i32_0 : i32, i32
  }
  func.func @transform_23(%arg0: i32) -> (i32, i32) {
    %c0_i32 = arith.constant 0 : i32
    %c0_i32_0 = arith.constant 0 : i32
    %c0_i32_1 = arith.constant 0 : i32
    return %c0_i32, %c0_i32_0 : i32, i32
  }
  func.func @transform_24(%arg0: i32) -> (i32, i32) {
    %c0_i32 = arith.constant 0 : i32
    %c0_i32_0 = arith.constant 0 : i32
    %c0_i32_1 = arith.constant 0 : i32
    return %c0_i32, %c0_i32_0 : i32, i32
  }
  func.func @transform_25(%arg0: i32) -> (i32, i32) {
    %c0_i32 = arith.constant 0 : i32
    %c0_i32_0 = arith.constant 0 : i32
    %c0_i32_1 = arith.constant 0 : i32
    return %c0_i32, %c0_i32_0 : i32, i32
  }
  func.func @transform_26(%arg0: i32) -> (i32, i32) {
    %c0_i32 = arith.constant 0 : i32
    %c0_i32_0 = arith.constant 0 : i32
    %c0_i32_1 = arith.constant 0 : i32
    return %c0_i32, %c0_i32_0 : i32, i32
  }
  func.func @transform_27(%arg0: i32) -> (i32, i32) {
    %c0_i32 = arith.constant 0 : i32
    %c0_i32_0 = arith.constant 0 : i32
    %c0_i32_1 = arith.constant 0 : i32
    return %c0_i32, %c0_i32_0 : i32, i32
  }
  func.func @transform_28(%arg0: i32) -> (i32, i32) {
    %c0_i32 = arith.constant 0 : i32
    %c0_i32_0 = arith.constant 0 : i32
    %c0_i32_1 = arith.constant 0 : i32
    return %c0_i32, %c0_i32_0 : i32, i32
  }
  func.func @transform_29(%arg0: i32) -> (i32, i32) {
    %c0_i32 = arith.constant 0 : i32
    %c0_i32_0 = arith.constant 0 : i32
    %c0_i32_1 = arith.constant 0 : i32
    return %c0_i32, %c0_i32_0 : i32, i32
  }
  func.func @transform_30(%arg0: i32) -> (i32, i32) {
    %c0_i32 = arith.constant 0 : i32
    %c0_i32_0 = arith.constant 0 : i32
    %c0_i32_1 = arith.constant 0 : i32
    return %c0_i32, %c0_i32_0 : i32, i32
  }
  func.func @transform_31(%arg0: i32) -> (i32, i32) {
    %c0_i32 = arith.constant 0 : i32
    %c0_i32_0 = arith.constant 0 : i32
    %c0_i32_1 = arith.constant 0 : i32
    return %c0_i32, %c0_i32_0 : i32, i32
  }
  func.func @transform_32(%arg0: i32) -> (i32, i32) {
    %c0_i32 = arith.constant 0 : i32
    %c0_i32_0 = arith.constant 0 : i32
    %c0_i32_1 = arith.constant 0 : i32
    return %c0_i32, %c0_i32_0 : i32, i32
  }
  func.func @transform_33(%arg0: i32) -> (i32, i32) {
    %c0_i32 = arith.constant 0 : i32
    %c0_i32_0 = arith.constant 0 : i32
    %c0_i32_1 = arith.constant 0 : i32
    return %c0_i32, %c0_i32_0 : i32, i32
  }
  func.func @transform_34(%arg0: i32) -> (i32, i32) {
    %c0_i32 = arith.constant 0 : i32
    %c0_i32_0 = arith.constant 0 : i32
    return %arg0, %c0_i32 : i32, i32
  }
}

</mosaic_0001>

<bundles_post_ra>
// kernel: resepformer_forward.5
= control target key start
LH: loop header
LB: loop body
LE: loop exit
PB: predicated region body
PF: predicated region fallthrough
CT: control target
= control target key end

     0   :  { %s4404_s0 = inlined_call_operand.vmem [shape: bf16[128,32], index: 0, kind: input, shape index: {}]   ;;  %s4405_s1 = inlined_call_operand.vmem [shape: bf16[32,96], index: 1, kind: input, shape index: {}]   ;;  %s4406_s2 = inlined_call_operand.vmem [shape: f32[1,96], index: 2, kind: input, shape index: {}]   ;;  %s4407_s3 = inlined_call_operand.vmem [shape: bf16[32,32], index: 3, kind: input, shape index: {}]   ;;  %s4408_s4 = inlined_call_operand.vmem [shape: f32[1,32], index: 4, kind: input, shape index: {}]   ;;  %s4409_s5 = inlined_call_operand.vmem [shape: f32[1,32], index: 5, kind: input, shape index: {}]   ;;  %s4410_s6 = inlined_call_operand.vmem [shape: f32[1,32], index: 6, kind: input, shape index: {}]   ;;  %s4411_s7 = inlined_call_operand.vmem [shape: bf16[32,64], index: 7, kind: input, shape index: {}]   ;;  %s4412_s8 = inlined_call_operand.vmem [shape: f32[1,64], index: 8, kind: input, shape index: {}]   ;;  %s4413_s9 = inlined_call_operand.vmem [shape: bf16[64,32], index: 9, kind: input, shape index: {}]   ;;  %s4414_s10 = inlined_call_operand.vmem [shape: f32[1,32], index: 10, kind: input, shape index: {}]   ;;  %s4415_s11 = inlined_call_operand.vmem [shape: f32[1,32], index: 11, kind: input, shape index: {}]   ;;  %s4416_s12 = inlined_call_operand.vmem [shape: f32[1,32], index: 12, kind: input, shape index: {}]   ;;  %s4417_s13 = inlined_call_operand.vmem [shape: f32[1,32], index: 13, kind: input, shape index: {}]   ;;  %s4418_s14 = inlined_call_operand.vmem [shape: f32[1,32], index: 14, kind: input, shape index: {}]   ;;  %s4419_s15 = inlined_call_operand.hbm [shape: f32[128,32], index: 15, kind: output, shape index: {}]  }
   0x1   :  { %4423 = sst [smem:[#allocation8_spill]] %s4404_s0 }
   0x2   :  { %4424 = sst [smem:[#allocation9_spill]] %s4405_s1 }
   0x3   :  { %20 = vsyncpa [#allocation3], 0 }
   0x4   :  { %22 = vsyncpa [#allocation3 + $0x1], 0  ;;  %s3896_s18 = smov 0   ;;  %s3898_s19 = smov 0  }
   0x5   :  { %s3900_s20 = smov 0   ;;  %s3902_s21 = smov 0  }
   0x6 LB: > { %4425 = sst [smem:[#allocation5_spill]] %s3794_s20  ;;  %s3917_s22 = sadd.s32 4294967295, %s3798_s21   ;;  %s3798_s21 = sphi %s3902_s21, %s4432_s21   ;;  %s3794_s20 = sphi %s3900_s20, %s4434_s20   ;;  %s3790_s19 = sphi %s3898_s19, %s4436_s19   ;;  %s3786_s18 = sphi %s3896_s18, %s4435_s18  }
   0x7   : > { %s3135_s23 = sadd.s32 4294967294, %s3798_s21   ;;  %s3921_s24 = sadd.s32 1, %s3798_s21  }
   0x8   : > { %4426 = sst [smem:[#allocation6_spill]] %s3921_s24  ;;  %s355_s25 = sadd.s32 1, %s3794_s20 }
   0x9   : > { %s352_s26 = ssub.s32 %s3798_s21, %s3921_s24  ;;  %p365_p0 = scmp.ne.s32.totalorder %s3794_s20, %s3790_s19 }
   0xa   : > { %p353_p1 = scmp.eq.s32.totalorder %s352_s26, 0  ;;  %p366_p2 = scmp.eq.s32.totalorder %s3917_s22, 3 }
   0xb   : > { %p371_p3 = scmp.ne.s32.totalorder %s3790_s19, %s3786_s18  ;;  %p372_p4 = scmp.eq.s32.totalorder %s3135_s23, 3 }
   0xc   : > { %s3932_s27 = scalar_select %p353_p1, %s3794_s20, %s355_s25  }
   0xd   : > { %p3934_p5 = por %p366_p2, %p365_p0  ;;  %p3938_p6 = por %p372_p4, %p371_p3 }
   0xe   : > { %4427 = sst [smem:[#allocation7_spill]] %s3932_s27  ;;  %p3138_p7 = scmp.ge.s32.totalorder %s3798_s21, 1 }
   0xf   : > { %p441_p8 = scmp.lt.s32.totalorder %s3798_s21, 5 }
  0x11   : > { %p442_p9 = pnand %p3138_p7, %p441_p8 }
  0x12   : > { %s4430_s1 = sld [smem:[#allocation9_spill]] (!%p442_p9)  ;;  %s3140_s17 = sshll.u32 (!%p442_p9), %s3917_s22, 2  ;;  %vm538_vm0 = vcmask (!%p442_p9), 261120   ;;  %v3800_v4 = vmov (!%p442_p9), 0.0   ;;  %v3142_v5 = vld [vmem:[%s4406_s2] ss:$0 sm:$0xff] (!%p442_p9) }
  0x13   : > { %445 = sbr.rel (%p442_p9) target bundleno = 5060 (0x13c4), region = 80  ;;  %p490_p10 = scmp.lt.s32.totalorder (!%p442_p9), %s3140_s17, 15  ;;  %3334 = vmatprep.subr.bf16.mxu0 (!%p442_p9), %v3800_v4  ;;  %vm3801_vm1 = vmmov (!%p442_p9), 0   ;;  %vm625_vm2 = vcmask (!%p442_p9), 64512   ;;  %vm872_vm3 = vcmask (!%p442_p9), 1043456   ;;  %vm2843_vm4 = vcmask (!%p442_p9), 523264  }
  0x14   : > { %s4431_s0 = sld [smem:[#allocation8_spill]] (!%p442_p9)  ;;  %3336 = vmatprep.mubr.msk.bf16.mxu0 (!%p442_p9), %vm3801_vm1, %v3800_v4  ;;  %s3802_s20 = smov (!%p442_p9), 96  }
  0x15   : > { %s3803_s27 = smov (!%p442_p9), 64   ;;  %s3805_s23 = smov (!%p442_p9), 120  }
  0x16   : > { %s3806_s25 = smov (!%p442_p9), 56   ;;  %s3808_s30 = smov (!%p442_p9), 80  }
  0x18   : > { %v3640_v0 = vld [vmem:[%s4430_s1] sm:$0xff] (!%p442_p9)   ;;  %v3641_v1 = vld [vmem:[%s4430_s1 + $0x8] sm:$0xff] (!%p442_p9)  }
  0x19   : > { %3320 = vmatprep.subr.bf16.mxu1 (!%p442_p9), %v3640_v0 }
  0x1a   : > { %3321 = vmatpush3.bf16.msra.mxu1 %v3640_v0  ;;  %s4438_s17 = smov (!%p490_p10, %s3140_s17), 15 }
  0x1b   : > { %3322 = vmatprep.subr.bf16.mxu1 %v3641_v1  ;;  %s3141_s26 = sshll.u32 %s4438_s17, 2  ;;  %s3804_s17 = smov 88  }
  0x1c   : > { %s3954_s24 = scalar_lea.vmem %s4431_s0, %s3141_s26  ;;  %s3807_s26 = smov 112  }
  0x1d   : > { %v497_v2 = vld [vmem:[%s3954_s24] sm:$0xff]   ;;  %v499_v3 = vld [vmem:[%s3954_s24 + $0x8] sm:$0xff]  }
  0x1e   : > { %3323 = vmatpush3.bf16.msra.mxu1 %v3641_v1  ;;  %3324 = vmatprep.mubr.msk.bf16.mxu1 %vm538_vm0, %v497_v2 }
  0x1f   : > { %3328 = vmatprep.subr.bf16.mxu1 %v3800_v4 }
  0x21   : > { %3325 = vmatmul.mubr.msk.bf16.vlgmr.msra.gmra.mrb[0].mxu1 %vm538_vm0, %v499_v3 }
  0x22   : > { %3330 = vmatprep.mubr.msk.bf16.mxu1 %vm3801_vm1, %v3800_v4 }
  0xf4   : > { %v3326_v6 = vpop.f32.mrb[0].mxu1 }
  0xf5   : > { %v588_v7 = vadd.f32 %v3326_v6, %v3142_v5  ;;  %v579_v8 = vpop.f32.mrb[1].mxu1 }
  0xf6   : > { %v580_v9 = vadd.f32 %v3142_v5, %v579_v8  ;;  %v3327_v10 = vpop.f32.mrb[2].mxu1 }
  0xf7   : > { %v3969_v11 = vpack.c.bf16 %v588_v7, %v588_v7  ;;  %v591_v12 = vadd.f32 %v3327_v10, %v3142_v5  ;;  %v582_v13 = vpop.f32.mrb[3].mxu1  ;;  %v596_v28 = vmul.f32 0.35355338, %v588_v7 }
  0xf8   : > { %v3971_v14 = vpack.c.bf16 %v580_v9, %v580_v9  ;;  %v583_v15 = vadd.f32 %v3142_v5, %v582_v13  ;;  %v594_v20 = vmul.f32 0.35355338, %v580_v9 }
  0xf9   : > { %722 = vrot.lane.b32.xlu1 %v3969_v11, %s3802_s20  ;;  %v3975_v16 = vpack.c.bf16 %v591_v12, %v591_v12  ;;  %v4000_v31 = vpack.c.bf16 %v596_v28, %v596_v28  ;;  %v597_v32 = vmul.f32 0.35355338, %v591_v12 }
  0xfa   : > { %623 = vrot.lane.b32.xlu0 %v3971_v14, %s3802_s20  ;;  %v3977_v17 = vpack.c.bf16 %v583_v15, %v583_v15  ;;  %v3984_v24 = vpack.c.bf16 %v594_v20, %v594_v20  ;;  %v595_v25 = vmul.f32 0.35355338, %v583_v15 }
  0xfb   : > { %v4007_v33 = vpack.c.bf16 %v597_v32, %v597_v32 }
  0xfc   : > { %v3992_v29 = vpack.c.bf16 %v595_v25, %v595_v25 }
  0xfd   : > { %771 = vrot.lane.b32.xlu1 %v3975_v16, %s3802_s20 }
  0xfe   : > { %673 = vrot.lane.b32.xlu0 %v3977_v17, %s3802_s20  ;;  %s3812_s20 = smov 40  }
 0x16b   : > { %v723_v21 = vpop.permute.xlu1 %722 }
 0x16c   : > { %v624_v18 = vpop.permute.xlu0 %623  ;;  %v728_v26 = vsel %vm625_vm2, %v723_v21, 0 }
 0x16d   : > { %v630_v19 = vsel %vm625_vm2, %v624_v18, 0 }
 0x16e   : > { %3329 = vmatpush3.bf16.xpose.msra.mxu1 %v630_v19 }
 0x16f   : > { %3340 = vmatprep.subr.bf16.mxu1 %v3800_v4  ;;  %v772_v27 = vpop.permute.xlu1 %771 }
 0x170   : > { %v674_v22 = vpop.permute.xlu0 %673  ;;  %v777_v30 = vsel %vm625_vm2, %v772_v27, 0 }
 0x171   : > { %v679_v23 = vsel %vm625_vm2, %v674_v22, 0 }
 0x172   : > { %3335 = vmatpush3.bf16.xpose.msra.mxu0 %v679_v23 }
 0x173   : > { %3346 = vmatprep.subr.bf16.mxu0 %v3800_v4 }
 0x175   : > { %3331 = vmatmul.mubr.msk.bf16.vlgmr.msra.gmra.mrb[4].mxu1 %vm625_vm2, %v3984_v24 }
 0x176   : > { %3341 = vmatpush3.bf16.xpose.msra.mxu1 %v728_v26  ;;  %3342 = vmatprep.mubr.msk.bf16.mxu1 %vm3801_vm1, %v3800_v4 }
 0x177   : > { %3352 = vmatprep.subr.bf16.mxu1 %v3800_v4 }
 0x179   : > { %3337 = vmatmul.mubr.msk.bf16.vlgmr.msra.gmra.mrb[0].mxu0 %vm625_vm2, %v3992_v29 }
 0x17a   : > { %3347 = vmatpush3.bf16.xpose.msra.mxu0 %v777_v30  ;;  %3348 = vmatprep.mubr.msk.bf16.mxu0 %vm3801_vm1, %v3800_v4 }
 0x17b   : > { %3358 = vmatprep.subr.bf16.mxu0 %v3800_v4 }
 0x17d   : > { %3343 = vmatmul.mubr.msk.bf16.vlgmr.msra.gmra.mrb[8].mxu1 %vm625_vm2, %v4000_v31 }
 0x17e   : > { %3354 = vmatprep.mubr.msk.bf16.mxu1 %vm3801_vm1, %v3800_v4 }
 0x181   : > { %3349 = vmatmul.mubr.msk.bf16.vlgmr.msra.gmra.mrb[4].mxu0 %vm625_vm2, %v4007_v33 }
 0x182   : > { %3360 = vmatprep.mubr.msk.bf16.mxu0 %vm3801_vm1, %v3800_v4 }
 0x248   : > { %v666_v34 = vpop.f32.mrb[4].mxu1 }
 0x249   : > { %v3332_v35 = vpop.f32.mrb[5].mxu1  ;;  %v819_v36 = vsel %vm625_vm2, %v666_v34, -inf }
 0x24a   : > { %820 = vmax.xlane.f32.xlu0 %v819_v36  ;;  %v669_v37 = vpop.f32.mrb[6].mxu1 }
 0x24b   : > { %v3333_v38 = vpop.f32.mrb[7].mxu1 }
 0x24c   : > { %v715_v39 = vpop.f32.mrb[0].mxu0 }
 0x24d   : > { %v3338_v40 = vpop.f32.mrb[1].mxu0  ;;  %v822_v41 = vsel %vm625_vm2, %v715_v39, -inf }
 0x24e   : > { %823 = vmax.xlane.f32.xlu1 %v822_v41  ;;  %v718_v42 = vpop.f32.mrb[2].mxu0 }
 0x24f   : > { %v3339_v43 = vpop.f32.mrb[3].mxu0 }
 0x250   : > { %v764_v44 = vpop.f32.mrb[8].mxu1 }
 0x251   : > { %v3344_v45 = vpop.f32.mrb[9].mxu1  ;;  %v825_v46 = vsel %vm625_vm2, %v764_v44, -inf }
 0x252   : > { %826 = vmax.xlane.f32.xlu0 %v825_v46  ;;  %v767_v47 = vpop.f32.mrb[10].mxu1 }
 0x253   : > { %v3345_v48 = vpop.f32.mrb[11].mxu1 }
 0x254   : > { %v813_v49 = vpop.f32.mrb[4].mxu0 }
 0x255   : > { %v3350_v50 = vpop.f32.mrb[5].mxu0  ;;  %v828_v51 = vsel %vm625_vm2, %v813_v49, -inf }
 0x256   : > { %v816_v52 = vpop.f32.mrb[6].mxu0  ;;  %829 = vmax.xlane.f32.xlu0 %v828_v51 }
 0x257   : > { %v3351_v53 = vpop.f32.mrb[7].mxu0 }
 0x25f   : > { %867 = vrot.lane.b32.xlu1 %v3971_v14, %s3803_s27 }
 0x2d7   : > { %v821_v54 = vpop.xlane.xlu0 %820 }
 0x2d8   : > { %v831_v55 = vsub.f32 %v666_v34, %v821_v54 }
 0x2da   : > { %v835_v56 = vmul.f32 1.442695, %v831_v55 }
 0x2db   : > { %v824_v57 = vpop.xlane.xlu1 %823 }
 0x2dc   : > { %3652 = vpow2.f32 %v835_v56  ;;  %v832_v58 = vsub.f32 %v715_v39, %v824_v57 }
 0x2de   : > { %v837_v59 = vmul.f32 1.442695, %v832_v58 }
 0x2df   : > { %v868_v60 = vpop.permute.xlu1 %867  ;;  %v827_v2 = vpop.xlane.xlu0 %826 }
 0x2e0   : > { %3654 = vpow2.f32 %v837_v59  ;;  %v874_v61 = vsel %vm872_vm3, %v868_v60, 0  ;;  %v833_v5 = vsub.f32 %v764_v44, %v827_v2 }
 0x2e1   : > { %3353 = vmatpush3.bf16.msra.mxu1 %v874_v61 }
 0x2e2   : > { %3364 = vmatprep.subr.bf16.mxu1 %v3800_v4  ;;  %v839_v7 = vmul.f32 1.442695, %v833_v5 }
 0x2e3   : > { %v830_v3 = vpop.xlane.xlu0 %829 }
 0x2e4   : > { %v834_v6 = vsub.f32 %v813_v49, %v830_v3  ;;  %3656 = vpow2.f32 %v839_v7 }
 0x2e6   : > { %v3653_v62 = vpop.eup %3652  ;;  %v841_v8 = vmul.f32 1.442695, %v834_v6 }
 0x2e7   : > { %v843_v63 = vsel %vm625_vm2, %v3653_v62, 0.0 }
 0x2e8   : > { %844 = vadd.xlane.f32.xlu1 %v843_v63  ;;  %3658 = vpow2.f32 %v841_v8 }
 0x2ea   : > { %v3655_v0 = vpop.eup %3654 }
 0x2eb   : > { %v846_v1 = vsel %vm625_vm2, %v3655_v0, 0.0 }
 0x2ec   : > { %847 = vadd.xlane.f32.xlu0 %v846_v1 }
 0x2ee   : > { %v3657_v9 = vpop.eup %3656 }
 0x2ef   : > { %v849_v12 = vsel %vm625_vm2, %v3657_v9, 0.0 }
 0x2f2   : > { %v3659_v10 = vpop.eup %3658 }
 0x2f3   : > { %v852_v13 = vsel %vm625_vm2, %v3659_v10, 0.0 }
 0x2f9   : > { %964 = vrot.lane.b32.xlu1 %v3969_v11, %s3803_s27 }
 0x2fd   : > { %1012 = vrot.lane.b32.xlu1 %v3975_v16, %s3803_s27 }
 0x302   : > { %916 = vrot.lane.b32.xlu0 %v3977_v17, %s3803_s27 }
 0x321   : > { %850 = vadd.xlane.f32.xlu1 %v849_v12  ;;  %853 = vadd.xlane.f32.xlu0 %v852_v13 }
 0x332   : > { %1114 = vrot.lane.b32.xlu1 %v3977_v17, %s3804_s17 }
 0x336   : > { %1112 = vrot.lane.b32.xlu1 %v3992_v29, %s3805_s23 }
 0x337   : > { %1064 = vrot.lane.b32.xlu0 %v3971_v14, %s3804_s17 }
 0x33a   : > { %1214 = vrot.lane.b32.xlu1 %v3975_v16, %s3804_s17 }
 0x33b   : > { %1062 = vrot.lane.b32.xlu0 %v3984_v24, %s3805_s23 }
 0x33e   : > { %1212 = vrot.lane.b32.xlu1 %v4007_v33, %s3805_s23 }
 0x33f   : > { %1164 = vrot.lane.b32.xlu0 %v3969_v11, %s3804_s17 }
 0x343   : > { %1162 = vrot.lane.b32.xlu0 %v4000_v31, %s3805_s23  ;;  %s3809_s23 = smov 48  }
 0x375   : > { %v845_v15 = vpop.xlane.xlu1 %844 }
 0x376   : > { %3660 = vrcp.f32 %v845_v15 }
 0x379   : > { %v848_v18 = vpop.xlane.xlu0 %847  ;;  %v965_v22 = vpop.permute.xlu1 %964 }
 0x37a   : > { %3662 = vrcp.f32 %v848_v18  ;;  %v970_v27 = vsel %vm872_vm3, %v965_v22, 0 }
 0x37d   : > { %v917_v19 = vpop.permute.xlu0 %916  ;;  %v1013_v30 = vpop.permute.xlu1 %1012 }
 0x37e   : > { %v922_v20 = vsel %vm872_vm3, %v917_v19, 0  ;;  %v1018_v34 = vsel %vm872_vm3, %v1013_v30, 0 }
 0x37f   : > { %3359 = vmatpush3.bf16.msra.mxu0 %v922_v20 }
 0x380   : > { %v3661_v21 = vpop.eup %3660  ;;  %3370 = vmatprep.subr.bf16.mxu0 %v3800_v4 }
 0x381   : > { %v859_v23 = vmul.f32 %v3661_v21, %v3653_v62 }
 0x383   : > { %v863_v25 = vpack.c.bf16 %v859_v23, %v859_v23 }
 0x384   : > { %v3663_v26 = vpop.eup %3662 }
 0x385   : > { %v860_v28 = vmul.f32 %v3663_v26, %v3655_v0  ;;  %3355 = vmatmul.mubr.msk.bf16.vlgmr.msra.gmra.mrb[12].mxu1 %vm625_vm2, %v863_v25 }
 0x386   : > { %3365 = vmatpush3.bf16.msra.mxu1 %v970_v27  ;;  %3366 = vmatprep.mubr.msk.bf16.mxu1 %vm3801_vm1, %v3800_v4 }
 0x387   : > { %v864_v32 = vpack.c.bf16 %v860_v28, %v860_v28  ;;  %3376 = vmatprep.subr.bf16.mxu1 %v3800_v4 }
 0x389   : > { %3361 = vmatmul.mubr.msk.bf16.vlgmr.msra.gmra.mrb[8].mxu0 %vm625_vm2, %v864_v32 }
 0x38a   : > { %3371 = vmatpush3.bf16.msra.mxu0 %v1018_v34  ;;  %3372 = vmatprep.mubr.msk.bf16.mxu0 %vm3801_vm1, %v3800_v4 }
 0x38b   : > { %3382 = vmatprep.subr.bf16.mxu0 %v3800_v4 }
 0x3ae   : > { %v851_v35 = vpop.xlane.xlu1 %850  ;;  %v854_v36 = vpop.xlane.xlu0 %853 }
 0x3af   : > { %3664 = vrcp.f32 %v851_v35 }
 0x3b0   : > { %3666 = vrcp.f32 %v854_v36 }
 0x3b2   : > { %v1065_v37 = vpop.permute.xlu0 %1064  ;;  %v1115_v38 = vpop.permute.xlu1 %1114 }
 0x3b3   : > { %v1070_v46 = vsel %vm625_vm2, %v1065_v37, 0  ;;  %v1120_v48 = vsel %vm625_vm2, %v1115_v38, 0 }
 0x3b6   : > { %v1063_v44 = vpop.permute.xlu0 %1062  ;;  %v1113_v47 = vpop.permute.xlu1 %1112 }
 0x3b9   : > { %v3665_v39 = vpop.eup %3664 }
 0x3ba   : > { %v3667_v40 = vpop.eup %3666  ;;  %v861_v41 = vmul.f32 %v3665_v39, %v3657_v9  ;;  %v1165_v49 = vpop.permute.xlu0 %1164 }
 0x3bb   : > { %v862_v42 = vmul.f32 %v3667_v40, %v3659_v10  ;;  %v1215_v50 = vpop.permute.xlu1 %1214  ;;  %v1170_v51 = vsel %vm625_vm2, %v1165_v49, 0 }
 0x3bc   : > { %v865_v43 = vpack.c.bf16 %v861_v41, %v861_v41  ;;  %v1220_v52 = vsel %vm625_vm2, %v1215_v50, 0 }
 0x3bd   : > { %v866_v45 = vpack.c.bf16 %v862_v42, %v862_v42 }
 0x3be   : > { %3367 = vmatmul.mubr.msk.bf16.vlgmr.msra.gmra.mrb[16].mxu1 %vm625_vm2, %v865_v43  ;;  %v1163_v53 = vpop.permute.xlu0 %1162 }
 0x3bf   : > { %3373 = vmatmul.mubr.msk.bf16.vlgmr.msra.gmra.mrb[12].mxu0 %vm625_vm2, %v866_v45  ;;  %3377 = vmatpush3.bf16.xpose.msra.mxu1 %v1070_v46  ;;  %v1213_v54 = vpop.permute.xlu1 %1212 }
 0x3c0   : > { %3383 = vmatpush3.bf16.xpose.msra.mxu0 %v1120_v48  ;;  %3378 = vmatprep.mubr.msk.bf16.mxu1 %vm3801_vm1, %v3800_v4 }
 0x3c1   : > { %3384 = vmatprep.mubr.msk.bf16.mxu0 %vm3801_vm1, %v3800_v4  ;;  %3388 = vmatprep.subr.bf16.mxu1 %v3800_v4 }
 0x3c2   : > { %3394 = vmatprep.subr.bf16.mxu0 %v3800_v4 }
 0x3c6   : > { %3379 = vmatmul.mubr.msk.bf16.vlgmr.msra.gmra.mrb[20].mxu1 %vm625_vm2, %v1063_v44 }
 0x3c7   : > { %3385 = vmatmul.mubr.msk.bf16.vlgmr.msra.gmra.mrb[16].mxu0 %vm625_vm2, %v1113_v47  ;;  %3389 = vmatpush3.bf16.xpose.msra.mxu1 %v1170_v51 }
 0x3c8   : > { %3395 = vmatpush3.bf16.xpose.msra.mxu0 %v1220_v52  ;;  %3390 = vmatprep.mubr.msk.bf16.mxu1 %vm3801_vm1, %v3800_v4 }
 0x3c9   : > { %3396 = vmatprep.mubr.msk.bf16.mxu0 %vm3801_vm1, %v3800_v4  ;;  %3400 = vmatprep.subr.bf16.mxu1 %v3800_v4 }
 0x3ca   : > { %3406 = vmatprep.subr.bf16.mxu0 %v3800_v4 }
 0x3ce   : > { %3391 = vmatmul.mubr.msk.bf16.vlgmr.msra.gmra.mrb[24].mxu1 %vm625_vm2, %v1163_v53 }
 0x3cf   : > { %3397 = vmatmul.mubr.msk.bf16.vlgmr.msra.gmra.mrb[20].mxu0 %vm625_vm2, %v1213_v54  ;;  %3402 = vmatprep.mubr.msk.bf16.mxu1 %vm3801_vm1, %v3800_v4 }
 0x3d0   : > { %3408 = vmatprep.mubr.msk.bf16.mxu0 %vm3801_vm1, %v3800_v4 }
 0x458   : > { %v4073_v55 = vpop.f32.mrb[12].mxu1 }
 0x459   : > { %v3356_v56 = vpop.f32.mrb[13].mxu1 }
 0x45a   : > { %v913_v57 = vpop.f32.mrb[14].mxu1 }
 0x45b   : > { %v3357_v58 = vpop.f32.mrb[15].mxu1 }
 0x45c   : > { %v4075_v59 = vpop.f32.mrb[8].mxu0 }
 0x45d   : > { %v1060_v60 = vpack.c.bf16 %v4075_v59, %v4073_v55  ;;  %v3362_v61 = vpop.f32.mrb[9].mxu0 }
 0x45e   : > { %v961_v62 = vpop.f32.mrb[10].mxu0 }
 0x45f   : > { %v3363_v63 = vpop.f32.mrb[11].mxu0 }
 0x491   : > { %v4079_v0 = vpop.f32.mrb[16].mxu1 }
 0x492   : > { %v4081_v1 = vpop.f32.mrb[12].mxu0  ;;  %v3368_v2 = vpop.f32.mrb[17].mxu1 }
 0x493   : > { %v1061_v3 = vpack.c.bf16 %v4081_v1, %v4079_v0  ;;  %v3374_v5 = vpop.f32.mrb[13].mxu0  ;;  %v1009_v6 = vpop.f32.mrb[18].mxu1 }
 0x494   : > { %v1057_v7 = vpop.f32.mrb[14].mxu0  ;;  %v3369_v8 = vpop.f32.mrb[19].mxu1 }
 0x495   : > { %v3375_v9 = vpop.f32.mrb[15].mxu0 }
 0x499   : > { %v1106_v10 = vpop.f32.mrb[20].mxu1 }
 0x49a   : > { %v1156_v12 = vpop.f32.mrb[16].mxu0  ;;  %v3380_v13 = vpop.f32.mrb[21].mxu1  ;;  %v1262_v15 = vsel %vm625_vm2, %v1106_v10, -inf }
 0x49b   : > { %v3386_v18 = vpop.f32.mrb[17].mxu0  ;;  %v1265_v19 = vsel %vm625_vm2, %v1156_v12, -inf  ;;  %1263 = vmax.xlane.f32.xlu0 %v1262_v15  ;;  %v1109_v20 = vpop.f32.mrb[22].mxu1 }
 0x49c   : > { %1266 = vmax.xlane.f32.xlu1 %v1265_v19  ;;  %v1159_v21 = vpop.f32.mrb[18].mxu0  ;;  %v3381_v22 = vpop.f32.mrb[23].mxu1 }
 0x49d   : > { %v3387_v23 = vpop.f32.mrb[19].mxu0 }
 0x4a1   : > { %v1206_v25 = vpop.f32.mrb[24].mxu1 }
 0x4a2   : > { %v1256_v26 = vpop.f32.mrb[20].mxu0  ;;  %v3392_v27 = vpop.f32.mrb[25].mxu1  ;;  %v1268_v28 = vsel %vm625_vm2, %v1206_v25, -inf }
 0x4a3   : > { %v3398_v30 = vpop.f32.mrb[21].mxu0  ;;  %1269 = vmax.xlane.f32.xlu0 %v1268_v28  ;;  %v1209_v32 = vpop.f32.mrb[26].mxu1  ;;  %v1271_v37 = vsel %vm625_vm2, %v1256_v26, -inf }
 0x4a4   : > { %v1259_v34 = vpop.f32.mrb[22].mxu0  ;;  %v3393_v35 = vpop.f32.mrb[27].mxu1 }
 0x4a5   : > { %v3399_v36 = vpop.f32.mrb[23].mxu0 }
 0x4a7   : > { %1272 = vmax.xlane.f32.xlu0 %v1271_v37 }
 0x4ad   : > { %1310 = vrot.lane.b32.xlu1 %v3971_v14, %s3806_s25 }
 0x528   : > { %v1264_v38 = vpop.xlane.xlu0 %1263 }
 0x529   : > { %v1267_v39 = vpop.xlane.xlu1 %1266  ;;  %v1274_v40 = vsub.f32 %v1106_v10, %v1264_v38 }
 0x52a   : > { %v1275_v41 = vsub.f32 %v1156_v12, %v1267_v39 }
 0x52b   : > { %v1278_v42 = vmul.f32 1.442695, %v1274_v40 }
 0x52c   : > { %v1280_v43 = vmul.f32 1.442695, %v1275_v41 }
 0x52d   : > { %3668 = vpow2.f32 %v1278_v42  ;;  %v1311_v44 = vpop.permute.xlu1 %1310  ;;  %v603_v42 = vld [vmem:[%s4407_s3 + $0x4] sm:$0xf] }
 0x52e   : > { %3670 = vpow2.f32 %v1280_v43  ;;  %v1316_v45 = vsel %vm872_vm3, %v1311_v44, 0  ;;  %v1511_v43 = vsel %vm872_vm3, %v603_v42, 0  ;;  %v602_v44 = vld [vmem:[%s4407_s3] sm:$0xf] }
 0x52f   : > { %3401 = vmatpush3.bf16.msra.mxu1 %v1316_v45 }
 0x530   : > { %v1270_v46 = vpop.xlane.xlu0 %1269  ;;  %3412 = vmatprep.subr.bf16.mxu1 %v3800_v4 }
 0x531   : > { %v1276_v47 = vsub.f32 %v1206_v25, %v1270_v46 }
 0x533   : > { %v1282_v48 = vmul.f32 1.442695, %v1276_v47 }
 0x534   : > { %v1273_v49 = vpop.xlane.xlu0 %1272 }
 0x535   : > { %3672 = vpow2.f32 %v1282_v48  ;;  %v1277_v50 = vsub.f32 %v1256_v26, %v1273_v49 }
 0x537   : > { %v3669_v51 = vpop.eup %3668  ;;  %v1284_v52 = vmul.f32 1.442695, %v1277_v50 }
 0x538   : > { %v3671_v53 = vpop.eup %3670  ;;  %v1286_v54 = vsel %vm625_vm2, %v3669_v51, 0.0 }
 0x539   : > { %3674 = vpow2.f32 %v1284_v52  ;;  %1287 = vadd.xlane.f32.xlu1 %v1286_v54  ;;  %v1289_v56 = vsel %vm625_vm2, %v3671_v53, 0.0 }
 0x53a   : > { %1290 = vadd.xlane.f32.xlu0 %v1289_v56 }
 0x53f   : > { %v3673_v57 = vpop.eup %3672 }
 0x540   : > { %v1292_v58 = vsel %vm625_vm2, %v3673_v57, 0.0 }
 0x541   : > { %1293 = vadd.xlane.f32.xlu1 %v1292_v58 }
 0x543   : > { %v3675_v61 = vpop.eup %3674 }
 0x544   : > { %v1295_v62 = vsel %vm625_vm2, %v3675_v61, 0.0 }
 0x545   : > { %1296 = vadd.xlane.f32.xlu0 %v1295_v62 }
 0x552   : > { %1406 = vrot.lane.b32.xlu1 %v3969_v11, %s3806_s25 }
 0x556   : > { %1454 = vrot.lane.b32.xlu1 %v3975_v16, %s3806_s25 }
 0x55a   : > { %1620 = vrot.lane.b32.xlu1 %v3984_v24, %s3807_s26 }
 0x55b   : > { %1358 = vrot.lane.b32.xlu0 %v3977_v17, %s3806_s25  ;;  %s3810_s25 = smov 72  }
 0x55e   : > { %1670 = vrot.lane.b32.xlu1 %v3992_v29, %s3807_s26 }
 0x55f   : > { %1622 = vrot.lane.b32.xlu0 %v3971_v14, %s3808_s30 }
 0x562   : > { %1772 = vrot.lane.b32.xlu1 %v3975_v16, %s3808_s30 }
 0x563   : > { %1672 = vrot.lane.b32.xlu0 %v3977_v17, %s3808_s30 }
 0x566   : > { %1770 = vrot.lane.b32.xlu1 %v4007_v33, %s3807_s26 }
 0x567   : > { %1722 = vrot.lane.b32.xlu0 %v3969_v11, %s3808_s30  ;;  %s486_s30 = sand.u32 1, %s3790_s19  }
 0x568   : > { %s3139_s16 = sshll.u32 %s486_s30, 5  ;;  %s4363_s1 = scalar_lea.sflag [#allocation3], %s486_s30 }
 0x569   : > { %s488_s0 = scalar_lea.vmem [#allocation2], %s3139_s16  ;;  %s3813_s16 = smov [#allocation2]  }
 0x56b   : > { %1720 = vrot.lane.b32.xlu0 %v4000_v31, %s3807_s26  ;;  %s3811_s26 = smov 104  }
 0x5c6   : > { %v1288_v63 = vpop.xlane.xlu1 %1287 }
 0x5c7   : > { %3676 = vrcp.f32 %v1288_v63  ;;  %v1291_v2 = vpop.xlane.xlu0 %1290 }
 0x5c8   : > { %3678 = vrcp.f32 %v1291_v2  ;;  %v1569_v2 = vsel %vm872_vm3, %v602_v44, 0 }
 0x5ce   : > { %v1294_v5 = vpop.xlane.xlu1 %1293 }
 0x5cf   : > { %3680 = vrcp.f32 %v1294_v5 }
 0x5d1   : > { %v3677_v6 = vpop.eup %3676 }
 0x5d2   : > { %v3679_v7 = vpop.eup %3678  ;;  %v1302_v8 = vmul.f32 %v3677_v6, %v3669_v51  ;;  %v1407_v9 = vpop.permute.xlu1 %1406 }
 0x5d3   : > { %v1297_v10 = vpop.xlane.xlu0 %1296  ;;  %v1303_v13 = vmul.f32 %v3679_v7, %v3671_v53  ;;  %v1412_v15 = vsel %vm872_vm3, %v1407_v9, 0 }
 0x5d4   : > { %3682 = vrcp.f32 %v1297_v10  ;;  %v1306_v12 = vpack.c.bf16 %v1302_v8, %v1302_v8 }
 0x5d5   : > { %v1307_v22 = vpack.c.bf16 %v1303_v13, %v1303_v13 }
 0x5d6   : > { %3403 = vmatmul.mubr.msk.bf16.vlgmr.msra.gmra.mrb[28].mxu1 %vm625_vm2, %v1306_v12  ;;  %v1455_v20 = vpop.permute.xlu1 %1454 }
 0x5d7   : > { %v1359_v18 = vpop.permute.xlu0 %1358  ;;  %3413 = vmatpush3.bf16.msra.mxu1 %v1412_v15  ;;  %3414 = vmatprep.mubr.msk.bf16.mxu1 %vm3801_vm1, %v3800_v4  ;;  %v1460_v25 = vsel %vm872_vm3, %v1455_v20, 0 }
 0x5d8   : > { %v1364_v19 = vsel %vm872_vm3, %v1359_v18, 0  ;;  %3576 = vmatprep.subr.msk.bf16.mxu1 %vm872_vm3, %v603_v42 }
 0x5d9   : > { %3407 = vmatpush3.bf16.msra.mxu0 %v1364_v19  ;;  %v3681_v21 = vpop.eup %3680 }
 0x5da   : > { %3418 = vmatprep.subr.bf16.mxu0 %v3800_v4  ;;  %v1304_v23 = vmul.f32 %v3681_v21, %v3673_v57  ;;  %v1621_v35 = vpop.permute.xlu1 %1620 }
 0x5db   : > { %v1623_v32 = vpop.permute.xlu0 %1622 }
 0x5dc   : > { %3409 = vmatmul.mubr.msk.bf16.vlgmr.msra.gmra.mrb[24].mxu0 %vm625_vm2, %v1307_v22  ;;  %v1308_v26 = vpack.c.bf16 %v1304_v23, %v1304_v23  ;;  %v1628_v34 = vsel %vm625_vm2, %v1623_v32, 0 }
 0x5dd   : > { %3419 = vmatpush3.bf16.msra.mxu0 %v1460_v25  ;;  %3420 = vmatprep.mubr.msk.bf16.mxu0 %vm3801_vm1, %v3800_v4 }
 0x5de   : > { %v3683_v27 = vpop.eup %3682  ;;  %3436 = vmatprep.subr.bf16.mxu0 %v3800_v4  ;;  %3415 = vmatmul.mubr.msk.bf16.vlgmr.msra.gmra.mrb[32].mxu1 %vm625_vm2, %v1308_v26  ;;  %v1671_v37 = vpop.permute.xlu1 %1670 }
 0x5df   : > { %v1305_v28 = vmul.f32 %v3683_v27, %v3675_v61  ;;  %v1673_v36 = vpop.permute.xlu0 %1672  ;;  %3425 = vmatpush3.bf16.msra.mxu1 %v1511_v43 }
 0x5e0   : > { %v1678_v38 = vsel %vm625_vm2, %v1673_v36, 0  ;;  %3577 = vmatprep.subr.msk.bf16.mxu1 %vm872_vm3, %v602_v44 }
 0x5e1   : > { %v1309_v30 = vpack.c.bf16 %v1305_v28, %v1305_v28 }
 0x5e2   : > { %v1773_v39 = vpop.permute.xlu1 %1772 }
 0x5e3   : > { %v1778_v40 = vsel %vm625_vm2, %v1773_v39, 0  ;;  %v1723_v12 = vpop.permute.xlu0 %1722 }
 0x5e4   : > { %3421 = vmatmul.mubr.msk.bf16.vlgmr.msra.gmra.mrb[28].mxu0 %vm625_vm2, %v1309_v30  ;;  %v1728_v15 = vsel %vm625_vm2, %v1723_v12, 0 }
 0x5e5   : > { %3438 = vmatprep.mubr.msk.bf16.mxu0 %vm3801_vm1, %v3800_v4 }
 0x5e6   : > { %3437 = vmatpush3.bf16.xpose.msra.mxu0 %v1628_v34  ;;  %v1771_v41 = vpop.permute.xlu1 %1770 }
 0x5e7   : > { %3442 = vmatprep.subr.bf16.mxu0 %v3800_v4  ;;  %v1721_v20 = vpop.permute.xlu0 %1720 }
 0x5ed   : > { %3439 = vmatmul.mubr.msk.bf16.vlgmr.msra.gmra.mrb[32].mxu0 %vm625_vm2, %v1621_v35 }
 0x5ee   : > { %3443 = vmatpush3.bf16.xpose.msra.mxu0 %v1678_v38  ;;  %3444 = vmatprep.mubr.msk.bf16.mxu0 %vm3801_vm1, %v3800_v4 }
 0x5ef   : > { %3454 = vmatprep.subr.bf16.mxu0 %v3800_v4 }
 0x5f5   : > { %3445 = vmatmul.mubr.msk.bf16.vlgmr.msra.gmra.mrb[36].mxu0 %vm625_vm2, %v1671_v37 }
 0x5f6   : > { %3455 = vmatpush3.bf16.xpose.msra.mxu0 %v1778_v40  ;;  %3456 = vmatprep.mubr.msk.bf16.mxu0 %vm3801_vm1, %v3800_v4 }
 0x5f7   : > { %3466 = vmatprep.subr.bf16.mxu0 %v3800_v4 }
 0x5fd   : > { %3457 = vmatmul.mubr.msk.bf16.vlgmr.msra.gmra.mrb[40].mxu0 %vm625_vm2, %v1771_v41 }
 0x5fe   : > { %3468 = vmatprep.mubr.msk.bf16.mxu0 %vm3801_vm1, %v3800_v4 }
 0x6a9   : > { %v1352_v45 = vpop.f32.mrb[28].mxu1 }
 0x6aa   : > { %v3404_v46 = vpop.f32.mrb[29].mxu1 }
 0x6ab   : > { %v1355_v47 = vpop.f32.mrb[30].mxu1 }
 0x6ac   : > { %v3405_v48 = vpop.f32.mrb[31].mxu1 }
 0x6af   : > { %v1400_v49 = vpop.f32.mrb[24].mxu0 }
 0x6b0   : > { %v1502_v50 = vpack.c.bf16 %v1400_v49, %v1352_v45  ;;  %v3410_v51 = vpop.f32.mrb[25].mxu0 }
 0x6b1   : > { %v1403_v52 = vpop.f32.mrb[26].mxu0  ;;  %v1448_v54 = vpop.f32.mrb[32].mxu1 }
 0x6b2   : > { %v3411_v53 = vpop.f32.mrb[27].mxu0  ;;  %3426 = vmatprep.mubr.msk.bf16.mxu1 %vm625_vm2, %v1502_v50  ;;  %v3416_v56 = vpop.f32.mrb[33].mxu1 }
 0x6b3   : > { %v1451_v57 = vpop.f32.mrb[34].mxu1 }
 0x6b4   : > { %v3417_v58 = vpop.f32.mrb[35].mxu1 }
 0x6b7   : > { %v1496_v61 = vpop.f32.mrb[28].mxu0 }
 0x6b8   : > { %v1503_v62 = vpack.c.bf16 %v1496_v61, %v1448_v54  ;;  %v3422_v63 = vpop.f32.mrb[29].mxu0 }
 0x6b9   : > { %v1499_v5 = vpop.f32.mrb[30].mxu0 }
 0x6ba   : > { %v3423_v6 = vpop.f32.mrb[31].mxu0  ;;  %3427 = vmatmul.mubr.msk.bf16.vlgmr.msra.gmra.mrb[36].mxu1 %vm625_vm2, %v1503_v62 }
 0x6bb   : > { %3432 = vmatprep.mubr.msk.bf16.mxu1 %vm625_vm2, %v1060_v60  ;;  %3431 = vmatpush3.bf16.msra.mxu1 %v1569_v2 }
 0x6bc   : > { %3448 = vmatprep.subr.bf16.mxu1 %v3800_v4 }
 0x6c0   : > { %v1664_v7 = vpop.f32.mrb[32].mxu0 }
 0x6c1   : > { %v3440_v8 = vpop.f32.mrb[33].mxu0  ;;  %v1820_v9 = vsel %vm625_vm2, %v1664_v7, -inf }
 0x6c2   : > { %1821 = vmax.xlane.f32.xlu0 %v1820_v9  ;;  %v1667_v10 = vpop.f32.mrb[34].mxu0 }
 0x6c3   : > { %v3441_v13 = vpop.f32.mrb[35].mxu0 }
 0x6c6   : > { %3433 = vmatmul.mubr.msk.bf16.vlgmr.msra.gmra.mrb[36].mxu1 %vm625_vm2, %v1061_v3 }
 0x6c7   : > { %3449 = vmatpush3.bf16.xpose.msra.mxu1 %v1728_v15  ;;  %3450 = vmatprep.mubr.msk.bf16.mxu1 %vm3801_vm1, %v3800_v4 }
 0x6c8   : > { %v1714_v55 = vpop.f32.mrb[36].mxu0  ;;  %3460 = vmatprep.subr.bf16.mxu1 %v3800_v4 }
 0x6c9   : > { %v3446_v59 = vpop.f32.mrb[37].mxu0  ;;  %v1823_v60 = vsel %vm625_vm2, %v1714_v55, -inf }
 0x6ca   : > { %1824 = vmax.xlane.f32.xlu1 %v1823_v60  ;;  %v1717_v18 = vpop.f32.mrb[38].mxu0 }
 0x6cb   : > { %v3447_v19 = vpop.f32.mrb[39].mxu0 }
 0x6ce   : > { %3451 = vmatmul.mubr.msk.bf16.vlgmr.msra.gmra.mrb[40].mxu1 %vm625_vm2, %v1721_v20 }
 0x6cf   : > { %3462 = vmatprep.mubr.msk.bf16.mxu1 %vm3801_vm1, %v3800_v4 }
 0x6d0   : > { %v1814_v0 = vpop.f32.mrb[40].mxu0 }
 0x6d1   : > { %v3458_v1 = vpop.f32.mrb[41].mxu0  ;;  %v1829_v39 = vsel %vm625_vm2, %v1814_v0, -inf }
 0x6d2   : > { %v1817_v3 = vpop.f32.mrb[42].mxu0 }
 0x6d3   : > { %v3459_v21 = vpop.f32.mrb[43].mxu0 }
 0x74f   : > { %v1822_v22 = vpop.xlane.xlu0 %1821 }
 0x750   : > { %v1832_v23 = vsub.f32 %v1664_v7, %v1822_v22 }
 0x752   : > { %v1836_v25 = vmul.f32 1.442695, %v1832_v23  ;;  %v604_v23 = vld [vmem:[%s4407_s3 + $0x8] sm:$0xf] }
 0x754   : > { %3684 = vpow2.f32 %v1836_v25  ;;  %v2069_v25 = vsel %vm872_vm3, %v604_v23, 0 }
 0x757   : > { %v1825_v28 = vpop.xlane.xlu1 %1824 }
 0x758   : > { %v1833_v30 = vsub.f32 %v1714_v55, %v1825_v28 }
 0x75a   : > { %v1838_v32 = vmul.f32 1.442695, %v1833_v30 }
 0x75c   : > { %3686 = vpow2.f32 %v1838_v32 }
 0x75e   : > { %v3685_v26 = vpop.eup %3684 }
 0x75f   : > { %v1844_v27 = vsel %vm625_vm2, %v3685_v26, 0.0 }
 0x760   : > { %1845 = vadd.xlane.f32.xlu1 %v1844_v27 }
 0x766   : > { %v3687_v40 = vpop.eup %3686 }
 0x767   : > { %v1847_v41 = vsel %vm625_vm2, %v3687_v40, 0.0 }
 0x771   : > { %1868 = vrot.lane.b32.xlu1 %v3971_v14, %s3809_s23 }
 0x775   : > { %1964 = vrot.lane.b32.xlu1 %v3969_v11, %s3809_s23 }
 0x7a1   : > { %v1764_v34 = vpop.f32.mrb[40].mxu1 }
 0x7a2   : > { %v3452_v35 = vpop.f32.mrb[41].mxu1  ;;  %v1826_v36 = vsel %vm625_vm2, %v1764_v34, -inf }
 0x7a3   : > { %1827 = vmax.xlane.f32.xlu0 %v1826_v36  ;;  %v1767_v37 = vpop.f32.mrb[42].mxu1 }
 0x7a4   : > { %v3453_v38 = vpop.f32.mrb[43].mxu1 }
 0x7a7   : > { %1830 = vmax.xlane.f32.xlu0 %v1829_v39 }
 0x7ab   : > { %1848 = vadd.xlane.f32.xlu0 %v1847_v41 }
 0x7ed   : > { %v1846_v42 = vpop.xlane.xlu1 %1845 }
 0x7ee   : > { %3688 = vrcp.f32 %v1846_v42 }
 0x7f1   : > { %v1869_v43 = vpop.permute.xlu1 %1868 }
 0x7f2   : > { %v1874_v44 = vsel %vm872_vm3, %v1869_v43, 0 }
 0x7f3   : > { %3461 = vmatpush3.bf16.msra.mxu1 %v1874_v44 }
 0x7f4   : > { %3472 = vmatprep.subr.bf16.mxu1 %v3800_v4 }
 0x7f5   : > { %v1965_v47 = vpop.permute.xlu1 %1964 }
 0x7f6   : > { %v1970_v49 = vsel %vm872_vm3, %v1965_v47, 0 }
 0x7f8   : > { %v3689_v45 = vpop.eup %3688 }
 0x7f9   : > { %v1860_v46 = vmul.f32 %v3689_v45, %v3685_v26 }
 0x7fb   : > { %v1864_v48 = vpack.c.bf16 %v1860_v46, %v1860_v46 }
 0x7fd   : > { %3463 = vmatmul.mubr.msk.bf16.vlgmr.msra.gmra.mrb[44].mxu1 %vm625_vm2, %v1864_v48 }
 0x7fe   : > { %3473 = vmatpush3.bf16.msra.mxu1 %v1970_v49  ;;  %3474 = vmatprep.mubr.msk.bf16.mxu1 %vm3801_vm1, %v3800_v4 }
 0x7ff   : > { %3578 = vmatprep.subr.msk.bf16.mxu1 %vm872_vm3, %v604_v23 }
 0x830   : > { %v1828_v50 = vpop.xlane.xlu0 %1827 }
 0x831   : > { %v1834_v51 = vsub.f32 %v1764_v34, %v1828_v50 }
 0x833   : > { %v1840_v52 = vmul.f32 1.442695, %v1834_v51 }
 0x834   : > { %v1831_v53 = vpop.xlane.xlu0 %1830 }
 0x835   : > { %3690 = vpow2.f32 %v1840_v52  ;;  %v1835_v54 = vsub.f32 %v1814_v0, %v1831_v53 }
 0x837   : > { %v1842_v56 = vmul.f32 1.442695, %v1835_v54 }
 0x838   : > { %v1849_v63 = vpop.xlane.xlu0 %1848 }
 0x839   : > { %3692 = vpow2.f32 %v1842_v56 }
 0x83a   : > { %3694 = vrcp.f32 %v1849_v63 }
 0x83f   : > { %v3691_v57 = vpop.eup %3690 }
 0x840   : > { %v1850_v58 = vsel %vm625_vm2, %v3691_v57, 0.0 }
 0x841   : > { %1851 = vadd.xlane.f32.xlu1 %v1850_v58 }
 0x843   : > { %v3693_v61 = vpop.eup %3692 }
 0x844   : > { %v1853_v62 = vsel %vm625_vm2, %v3693_v61, 0.0  ;;  %v3695_v6 = vpop.eup %3694 }
 0x845   : > { %1854 = vadd.xlane.f32.xlu0 %v1853_v62  ;;  %v1861_v10 = vmul.f32 %v3695_v6, %v3687_v40 }
 0x847   : > { %v1865_v15 = vpack.c.bf16 %v1861_v10, %v1861_v10 }
 0x852   : > { %2012 = vrot.lane.b32.xlu1 %v3975_v16, %s3809_s23 }
 0x856   : > { %2176 = vrot.lane.b32.xlu1 %v3977_v17, %s3810_s25 }
 0x85a   : > { %2174 = vrot.lane.b32.xlu1 %v3992_v29, %s3811_s26 }
 0x85b   : > { %1916 = vrot.lane.b32.xlu0 %v3977_v17, %s3809_s23 }
 0x85e   : > { %2276 = vrot.lane.b32.xlu1 %v3975_v16, %s3810_s25 }
 0x85f   : > { %2126 = vrot.lane.b32.xlu0 %v3971_v14, %s3810_s25 }
 0x862   : > { %2274 = vrot.lane.b32.xlu1 %v4007_v33, %s3811_s26 }
 0x863   : > { %2124 = vrot.lane.b32.xlu0 %v3984_v24, %s3811_s26 }
 0x867   : > { %2226 = vrot.lane.b32.xlu0 %v3969_v11, %s3810_s25 }
 0x86b   : > { %2224 = vrot.lane.b32.xlu0 %v4000_v31, %s3811_s26 }
 0x8ce   : > { %v1852_v2 = vpop.xlane.xlu1 %1851 }
 0x8cf   : > { %3696 = vrcp.f32 %v1852_v2 }
 0x8d0   : > { %v1910_v29 = vpop.f32.mrb[44].mxu1 }
 0x8d1   : > { %v3464_v5 = vpop.f32.mrb[45].mxu1 }
 0x8d2   : > { %v1855_v7 = vpop.xlane.xlu0 %1854  ;;  %v1913_v8 = vpop.f32.mrb[46].mxu1 }
 0x8d3   : > { %3698 = vrcp.f32 %v1855_v7  ;;  %v3465_v9 = vpop.f32.mrb[47].mxu1  ;;  %v2013_v24 = vpop.permute.xlu1 %2012 }
 0x8d4   : > { %v2018_v55 = vsel %vm872_vm3, %v2013_v24, 0 }
 0x8d6   : > { %v1917_v12 = vpop.permute.xlu0 %1916 }
 0x8d7   : > { %v1922_v33 = vsel %vm872_vm3, %v1917_v12, 0  ;;  %v2177_v35 = vpop.permute.xlu1 %2176 }
 0x8d8   : > { %3467 = vmatpush3.bf16.msra.mxu0 %v1922_v33  ;;  %v2182_v44 = vsel %vm625_vm2, %v2177_v35, 0 }
 0x8d9   : > { %v3697_v13 = vpop.eup %3696  ;;  %3478 = vmatprep.subr.bf16.mxu0 %v3800_v4 }
 0x8da   : > { %v1862_v31 = vmul.f32 %v3697_v13, %v3691_v57  ;;  %v2127_v18 = vpop.permute.xlu0 %2126 }
 0x8db   : > { %3469 = vmatmul.mubr.msk.bf16.vlgmr.msra.gmra.mrb[44].mxu0 %vm625_vm2, %v1865_v15  ;;  %v2132_v1 = vsel %vm625_vm2, %v2127_v18, 0  ;;  %v2175_v42 = vpop.permute.xlu1 %2174 }
 0x8dc   : > { %3479 = vmatpush3.bf16.msra.mxu0 %v2018_v55  ;;  %v1866_v59 = vpack.c.bf16 %v1862_v31, %v1862_v31  ;;  %3480 = vmatprep.mubr.msk.bf16.mxu0 %vm3801_vm1, %v3800_v4 }
 0x8dd   : > { %v3699_v60 = vpop.eup %3698  ;;  %3490 = vmatprep.subr.bf16.mxu0 %v3800_v4 }
 0x8de   : > { %v1863_v19 = vmul.f32 %v3699_v60, %v3693_v61  ;;  %3475 = vmatmul.mubr.msk.bf16.vlgmr.msra.gmra.mrb[48].mxu1 %vm625_vm2, %v1866_v59  ;;  %v2125_v0 = vpop.permute.xlu0 %2124 }
 0x8df   : > { %3485 = vmatpush3.bf16.msra.mxu1 %v2069_v25  ;;  %v2277_v46 = vpop.permute.xlu1 %2276 }
 0x8e0   : > { %v1867_v20 = vpack.c.bf16 %v1863_v19, %v1863_v19  ;;  %3496 = vmatprep.subr.bf16.mxu1 %v3800_v4  ;;  %v2282_v50 = vsel %vm625_vm2, %v2277_v46, 0 }
 0x8e2   : > { %v2227_v3 = vpop.permute.xlu0 %2226 }
 0x8e3   : > { %3481 = vmatmul.mubr.msk.bf16.vlgmr.msra.gmra.mrb[48].mxu0 %vm625_vm2, %v1867_v20  ;;  %v2232_v21 = vsel %vm625_vm2, %v2227_v3, 0  ;;  %v2275_v54 = vpop.permute.xlu1 %2274 }
 0x8e4   : > { %3492 = vmatprep.mubr.msk.bf16.mxu0 %vm3801_vm1, %v3800_v4 }
 0x8e5   : > { %3491 = vmatpush3.bf16.xpose.msra.mxu0 %v2132_v1 }
 0x8e6   : > { %3502 = vmatprep.subr.bf16.mxu0 %v3800_v4  ;;  %v2225_v22 = vpop.permute.xlu0 %2224 }
 0x8ec   : > { %3493 = vmatmul.mubr.msk.bf16.vlgmr.msra.gmra.mrb[52].mxu0 %vm625_vm2, %v2125_v0 }
 0x8ed   : > { %3503 = vmatpush3.bf16.xpose.msra.mxu0 %v2232_v21  ;;  %3504 = vmatprep.mubr.msk.bf16.mxu0 %vm3801_vm1, %v3800_v4 }
 0x8ee   : > { %3514 = vmatprep.subr.bf16.mxu0 %v3800_v4 }
 0x8f4   : > { %3505 = vmatmul.mubr.msk.bf16.vlgmr.msra.gmra.mrb[56].mxu0 %vm625_vm2, %v2225_v22 }
 0x8f5   : > { %3516 = vmatprep.mubr.msk.bf16.mxu0 %vm3801_vm1, %v3800_v4 }
 0x9ae   : > { %v1958_v26 = vpop.f32.mrb[44].mxu0 }
 0x9af   : > { %v2060_v27 = vpack.c.bf16 %v1958_v26, %v1910_v29  ;;  %v3470_v28 = vpop.f32.mrb[45].mxu0 }
 0x9b0   : > { %v1961_v30 = vpop.f32.mrb[46].mxu0 }
 0x9b1   : > { %v3471_v32 = vpop.f32.mrb[47].mxu0  ;;  %v2006_v34 = vpop.f32.mrb[48].mxu1  ;;  %3486 = vmatprep.mubr.msk.bf16.mxu1 %vm625_vm2, %v2060_v27 }
 0x9b2   : > { %v3476_v36 = vpop.f32.mrb[49].mxu1 }
 0x9b3   : > { %v2009_v37 = vpop.f32.mrb[50].mxu1 }
 0x9b4   : > { %v3477_v38 = vpop.f32.mrb[51].mxu1 }
 0x9b6   : > { %v2054_v39 = vpop.f32.mrb[48].mxu0 }
 0x9b7   : > { %v2061_v40 = vpack.c.bf16 %v2054_v39, %v2006_v34  ;;  %v3482_v41 = vpop.f32.mrb[49].mxu0 }
 0x9b8   : > { %v2057_v43 = vpop.f32.mrb[50].mxu0 }
 0x9b9   : > { %v3483_v45 = vpop.f32.mrb[51].mxu0  ;;  %3487 = vmatmul.mubr.msk.bf16.vlgmr.msra.gmra.mrb[36].mxu1 %vm625_vm2, %v2061_v40 }
 0x9ba   : > { %3497 = vmatpush3.bf16.xpose.msra.mxu1 %v2182_v44  ;;  %3498 = vmatprep.mubr.msk.bf16.mxu1 %vm3801_vm1, %v3800_v4 }
 0x9bb   : > { %3508 = vmatprep.subr.bf16.mxu1 %v3800_v4 }
 0x9bf   : > { %v2168_v47 = vpop.f32.mrb[52].mxu0 }
 0x9c0   : > { %v3494_v48 = vpop.f32.mrb[53].mxu0  ;;  %v2324_v49 = vsel %vm625_vm2, %v2168_v47, -inf }
 0x9c1   : > { %2325 = vmax.xlane.f32.xlu0 %v2324_v49  ;;  %v2171_v51 = vpop.f32.mrb[54].mxu0  ;;  %3499 = vmatmul.mubr.msk.bf16.vlgmr.msra.gmra.mrb[52].mxu1 %vm625_vm2, %v2175_v42 }
 0x9c2   : > { %3509 = vmatpush3.bf16.xpose.msra.mxu1 %v2282_v50  ;;  %v3495_v52 = vpop.f32.mrb[55].mxu0  ;;  %3510 = vmatprep.mubr.msk.bf16.mxu1 %vm3801_vm1, %v3800_v4 }
 0x9c3   : > { %3520 = vmatprep.subr.bf16.mxu1 %v3800_v4 }
 0x9c7   : > { %v2268_v53 = vpop.f32.mrb[56].mxu0 }
 0x9c8   : > { %v3506_v56 = vpop.f32.mrb[57].mxu0  ;;  %v2330_v57 = vsel %vm625_vm2, %v2268_v53, -inf }
 0x9c9   : > { %2331 = vmax.xlane.f32.xlu0 %v2330_v57  ;;  %v2271_v58 = vpop.f32.mrb[58].mxu0  ;;  %3511 = vmatmul.mubr.msk.bf16.vlgmr.msra.gmra.mrb[56].mxu1 %vm625_vm2, %v2275_v54 }
 0x9ca   : > { %v3507_v61 = vpop.f32.mrb[59].mxu0  ;;  %3522 = vmatprep.mubr.msk.bf16.mxu1 %vm3801_vm1, %v3800_v4 }
 0x9cb   : > { %v605_v61 = vld [vmem:[%s4407_s3 + $0xc] sm:$0xf] }
 0xa4e   : > { %v2326_v62 = vpop.xlane.xlu0 %2325 }
 0xa4f   : > { %v2336_v63 = vsub.f32 %v2168_v47, %v2326_v62 }
 0xa51   : > { %v2340_v29 = vmul.f32 1.442695, %v2336_v63 }
 0xa53   : > { %3700 = vpow2.f32 %v2340_v29 }
 0xa56   : > { %v2332_v2 = vpop.xlane.xlu0 %2331 }
 0xa57   : > { %v2338_v5 = vsub.f32 %v2268_v53, %v2332_v2 }
 0xa59   : > { %v2344_v6 = vmul.f32 1.442695, %v2338_v5 }
 0xa5b   : > { %3702 = vpow2.f32 %v2344_v6 }
 0xa5d   : > { %v3701_v10 = vpop.eup %3700 }
 0xa5e   : > { %v2348_v24 = vsel %vm625_vm2, %v3701_v10, 0.0 }
 0xa65   : > { %v3703_v13 = vpop.eup %3702 }
 0xa66   : > { %v2354_v55 = vsel %vm625_vm2, %v3703_v13, 0.0 }
 0xa94   : > { %v2218_v7 = vpop.f32.mrb[52].mxu1 }
 0xa95   : > { %v3500_v8 = vpop.f32.mrb[53].mxu1  ;;  %v2327_v9 = vsel %vm625_vm2, %v2218_v7, -inf }
 0xa96   : > { %2328 = vmax.xlane.f32.xlu1 %v2327_v9  ;;  %v2221_v12 = vpop.f32.mrb[54].mxu1 }
 0xa97   : > { %v3501_v33 = vpop.f32.mrb[55].mxu1  ;;  %v3197_v12 = vld [vmem:[%s4408_s4] ss:$0 sm:$0xff] }
 0xa98   : > { %v3734_v33 = vld [vmem:[%s3954_s24] sm:$0xff]  }
 0xa9a   : > { %2349 = vadd.xlane.f32.xlu1 %v2348_v24  ;;  %v501_v24 = vunpack.c.l.bf16 %v3734_v33 }
 0xa9c   : > { %v2318_v15 = vpop.f32.mrb[56].mxu1 }
 0xa9d   : > { %v3512_v31 = vpop.f32.mrb[57].mxu1  ;;  %v2333_v59 = vsel %vm625_vm2, %v2318_v15, -inf }
 0xa9e   : > { %2355 = vadd.xlane.f32.xlu1 %v2354_v55  ;;  %2334 = vmax.xlane.f32.xlu0 %v2333_v59  ;;  %v2321_v60 = vpop.f32.mrb[58].mxu1  ;;  %v502_v31 = vunpack.c.h.bf16 %v3734_v33  ;;  %v3199_v33 = vld [vmem:[%s4410_s6] ss:$0 sm:$0xff] }
 0xa9f   : > { %v3513_v18 = vpop.f32.mrb[59].mxu1 }
 0xaa0   : > { %v3735_v18 = vld [vmem:[%s3954_s24 + $0x8] sm:$0xff]  }
 0xaaf   : > { %2372 = vrot.lane.b32.xlu1 %v3971_v14, %s3812_s20 }
 0xab3   : > { %2468 = vrot.lane.b32.xlu1 %v3969_v11, %s3812_s20 }
 0xab7   : > { %2516 = vrot.lane.b32.xlu1 %v3975_v16, %s3812_s20 }
 0xb23   : > { %v2329_v19 = vpop.xlane.xlu1 %2328 }
 0xb24   : > { %v2337_v20 = vsub.f32 %v2218_v7, %v2329_v19  ;;  %v503_v19 = vunpack.c.l.bf16 %v3735_v18 }
 0xb26   : > { %v2342_v0 = vmul.f32 1.442695, %v2337_v20 }
 0xb27   : > { %v2350_v1 = vpop.xlane.xlu1 %2349 }
 0xb28   : > { %3704 = vpow2.f32 %v2342_v0 }
 0xb29   : > { %3706 = vrcp.f32 %v2350_v1 }
 0xb2b   : > { %v2356_v3 = vpop.xlane.xlu1 %2355  ;;  %v2335_v21 = vpop.xlane.xlu0 %2334 }
 0xb2c   : > { %v2339_v22 = vsub.f32 %v2318_v15, %v2335_v21  ;;  %3708 = vrcp.f32 %v2356_v3  ;;  %v504_v3 = vunpack.c.h.bf16 %v3735_v18 }
 0xb2e   : > { %v2346_v23 = vmul.f32 1.442695, %v2339_v22 }
 0xb2f   : > { %v2373_v25 = vpop.permute.xlu1 %2372 }
 0xb30   : > { %3710 = vpow2.f32 %v2346_v23  ;;  %v2378_v14 = vsel %vm872_vm3, %v2373_v25, 0 }
 0xb31   : > { %3515 = vmatpush3.bf16.msra.mxu0 %v2378_v14 }
 0xb32   : > { %v3705_v11 = vpop.eup %3704  ;;  %3526 = vmatprep.subr.bf16.mxu0 %v3800_v4 }
 0xb33   : > { %v3707_v16 = vpop.eup %3706  ;;  %v2351_v26 = vsel %vm625_vm2, %v3705_v11, 0.0  ;;  %v2469_v28 = vpop.permute.xlu1 %2468 }
 0xb34   : > { %v2364_v27 = vmul.f32 %v3707_v16, %v3701_v10  ;;  %2352 = vadd.xlane.f32.xlu0 %v2351_v26  ;;  %v2474_v34 = vsel %vm872_vm3, %v2469_v28, 0 }
 0xb36   : > { %v2368_v30 = vpack.c.bf16 %v2364_v27, %v2364_v27  ;;  %v3709_v32 = vpop.eup %3708 }
 0xb37   : > { %v2366_v36 = vmul.f32 %v3709_v32, %v3703_v13  ;;  %v2517_v45 = vpop.permute.xlu1 %2516 }
 0xb38   : > { %3517 = vmatmul.mubr.msk.bf16.vlgmr.msra.gmra.mrb[60].mxu0 %vm625_vm2, %v2368_v30  ;;  %v2522_v47 = vsel %vm872_vm3, %v2517_v45, 0 }
 0xb39   : > { %3527 = vmatpush3.bf16.msra.mxu0 %v2474_v34  ;;  %3528 = vmatprep.mubr.msk.bf16.mxu0 %vm3801_vm1, %v3800_v4  ;;  %v2370_v38 = vpack.c.bf16 %v2366_v36, %v2366_v36 }
 0xb3a   : > { %v3711_v35 = vpop.eup %3710 }
 0xb3b   : > { %v2357_v37 = vsel %vm625_vm2, %v3711_v35, 0.0 }
 0xb3c   : > { %2358 = vadd.xlane.f32.xlu0 %v2357_v37 }
 0xb40   : > { %3529 = vmatmul.mubr.msk.bf16.vlgmr.msra.gmra.mrb[64].mxu0 %vm625_vm2, %v2370_v38 }
 0xb52   : > { %2420 = vrot.lane.b32.xlu0 %v3977_v17, %s3812_s20 }
 0xbc1   : > { %v2353_v39 = vpop.xlane.xlu0 %2352 }
 0xbc2   : > { %3712 = vrcp.f32 %v2353_v39 }
 0xbc9   : > { %v2359_v40 = vpop.xlane.xlu0 %2358 }
 0xbca   : > { %3714 = vrcp.f32 %v2359_v40 }
 0xbcc   : > { %v3713_v41 = vpop.eup %3712 }
 0xbcd   : > { %v2365_v42 = vmul.f32 %v3713_v41, %v3705_v11  ;;  %v2421_v43 = vpop.permute.xlu0 %2420 }
 0xbce   : > { %v2426_v44 = vsel %vm872_vm3, %v2421_v43, 0 }
 0xbcf   : > { %3521 = vmatpush3.bf16.msra.mxu1 %v2426_v44  ;;  %v2369_v46 = vpack.c.bf16 %v2365_v42, %v2365_v42 }
 0xbd0   : > { %3532 = vmatprep.subr.bf16.mxu1 %v3800_v4 }
 0xbd2   : > { %3523 = vmatmul.mubr.msk.bf16.vlgmr.msra.gmra.mrb[60].mxu1 %vm625_vm2, %v2369_v46 }
 0xbd3   : > { %3533 = vmatpush3.bf16.msra.mxu1 %v2522_v47  ;;  %3534 = vmatprep.mubr.msk.bf16.mxu1 %vm3801_vm1, %v3800_v4  ;;  %v2573_v4 = vsel %vm872_vm3, %v605_v61, 0 }
 0xbd4   : > { %v3715_v17 = vpop.eup %3714  ;;  %3579 = vmatprep.subr.msk.bf16.mxu1 %vm872_vm3, %v605_v61 }
 0xbd5   : > { %v2367_v48 = vmul.f32 %v3715_v17, %v3711_v35 }
 0xbd7   : > { %v2371_v49 = vpack.c.bf16 %v2367_v48, %v2367_v48 }
 0xbda   : > { %3535 = vmatmul.mubr.msk.bf16.vlgmr.msra.gmra.mrb[64].mxu1 %vm625_vm2, %v2371_v49  ;;  %v3644_v49 = vld [vmem:[%s4411_s7] sm:$0xff]  }
 0xbdb   : > { %3539 = vmatpush3.bf16.msra.mxu1 %v2573_v4  ;;  %3544 = vmatprep.subr.bf16.mxu0 %v3644_v49 }
 0xbdc   : > { %3545 = vmatpush3.bf16.msra.mxu0 %v3644_v49 }
 0xc0b   : > { %v2414_v50 = vpop.f32.mrb[60].mxu0 }
 0xc0c   : > { %v3518_v51 = vpop.f32.mrb[61].mxu0 }
 0xc0d   : > { %v2417_v52 = vpop.f32.mrb[62].mxu0  ;;  %v3646_v51 = vld [vmem:[%s4413_s9] sm:$0xff]  }
 0xc0e   : > { %v3519_v53 = vpop.f32.mrb[63].mxu0 }
 0xc13   : > { %v2510_v54 = vpop.f32.mrb[64].mxu0 }
 0xc14   : > { %v3530_v56 = vpop.f32.mrb[65].mxu0 }
 0xc15   : > { %v2513_v57 = vpop.f32.mrb[66].mxu0 }
 0xc16   : > { %v3531_v58 = vpop.f32.mrb[67].mxu0 }
 0xca5   : > { %v2462_v62 = vpop.f32.mrb[60].mxu1 }
 0xca6   : > { %v2564_v63 = vpack.c.bf16 %v2462_v62, %v2414_v50  ;;  %v3524_v2 = vpop.f32.mrb[61].mxu1  ;;  %v3645_v50 = vld [vmem:[%s4411_s7 + $0x8] sm:$0xff]  }
 0xca7   : > { %v2465_v29 = vpop.f32.mrb[62].mxu1  ;;  %3546 = vmatprep.subr.bf16.mxu0 %v3645_v50 }
 0xca8   : > { %v3525_v5 = vpop.f32.mrb[63].mxu1  ;;  %3540 = vmatprep.mubr.msk.bf16.mxu1 %vm625_vm2, %v2564_v63  ;;  %3547 = vmatpush3.bf16.msra.mxu0 %v3645_v50 }
 0xca9   : > { %3552 = vmatprep.subr.bf16.mxu0 %v3646_v51 }
 0xcad   : > { %v2558_v6 = vpop.f32.mrb[64].mxu1 }
 0xcae   : > { %v2565_v7 = vpack.c.bf16 %v2558_v6, %v2510_v54  ;;  %v3536_v8 = vpop.f32.mrb[65].mxu1  ;;  %v3198_v6 = vld [vmem:[%s4409_s5] ss:$0 sm:$0xff] }
 0xcaf   : > { %v2561_v9 = vpop.f32.mrb[66].mxu1 }
 0xcb0   : > { %v3537_v10 = vpop.f32.mrb[67].mxu1  ;;  %3541 = vmatmul.mubr.msk.bf16.vlgmr.msra.gmra.mrb[36].mxu1 %vm625_vm2, %v2565_v7 }
 0xd83   : > { %v3542_v13 = vpop.f32.mrb[36].mxu1 }
 0xd84   : > { %v2609_v15 = vpop.f32.mrb[37].mxu1  ;;  %v2637_v55 = vadd.f32 %v3542_v13, %v3197_v12 }
 0xd85   : > { %v2635_v59 = vadd.f32 %v3197_v12, %v2609_v15  ;;  %v3543_v60 = vpop.f32.mrb[38].mxu1 }
 0xd86   : > { %v2612_v20 = vpop.f32.mrb[39].mxu1  ;;  %v2638_v21 = vadd.f32 %v3543_v60, %v3197_v12  ;;  %v2641_v25 = vadd.f32 %v2637_v55, %v503_v19 }
 0xd87   : > { %v2636_v0 = vadd.f32 %v3197_v12, %v2612_v20  ;;  %v2639_v1 = vadd.f32 %v2635_v59, %v501_v24 }
 0xd88   : > { %v2651_v11 = vsel %vm538_vm0, %v2641_v25, 0.0  ;;  %v2642_v16 = vadd.f32 %v2638_v21, %v504_v3  ;;  %v3647_v3 = vld [vmem:[%s4413_s9 + $0x8] sm:$0xff]   ;;  %v3648_v21 = vld [vmem:[%s4413_s9 + $0x10] sm:$0xff]  }
 0xd89   : > { %v2645_v22 = vsel %vm538_vm0, %v2639_v1, 0.0  ;;  %v2640_v23 = vadd.f32 %v2636_v0, %v502_v31 }
 0xd8a   : > { %2646 = vadd.xlane.f32.xlu0 %v2645_v22  ;;  %v2654_v26 = vsel %vm538_vm0, %v2642_v16, 0.0  ;;  %v3649_v22 = vld [vmem:[%s4413_s9 + $0x18] sm:$0xff]  }
 0xd8b   : > { %v2648_v14 = vsel %vm538_vm0, %v2640_v23, 0.0 }
 0xd8c   : > { %2649 = vadd.xlane.f32.xlu1 %v2648_v14 }
 0xd8e   : > { %2652 = vadd.xlane.f32.xlu0 %v2651_v11 }
 0xd92   : > { %2655 = vadd.xlane.f32.xlu0 %v2654_v26 }
 0xe17   : > { %v2647_v27 = vpop.xlane.xlu0 %2646 }
 0xe18   : > { %v2658_v28 = vmul.f32 0.03125, %v2647_v27 }
 0xe19   : > { %v2650_v30 = vpop.xlane.xlu1 %2649 }
 0xe1a   : > { %v2662_v32 = vsub.f32 %v2639_v1, %v2658_v28  ;;  %v2659_v34 = vmul.f32 0.03125, %v2650_v30 }
 0xe1b   : > { %v2653_v35 = vpop.xlane.xlu0 %2652 }
 0xe1c   : > { %v2663_v36 = vsub.f32 %v2640_v23, %v2659_v34  ;;  %v2660_v37 = vmul.f32 0.03125, %v2653_v35  ;;  %v2666_v38 = vmul.f32 %v2662_v32, %v2662_v32  ;;  %v3200_v23 = vld [vmem:[%s4412_s8] ss:$0 sm:$0xff] }
 0xe1e   : > { %v2664_v39 = vsub.f32 %v2641_v25, %v2660_v37  ;;  %v2670_v40 = vsel %vm538_vm0, %v2666_v38, 0.0  ;;  %v2667_v41 = vmul.f32 %v2663_v36, %v2663_v36 }
 0xe1f   : > { %2671 = vadd.xlane.f32.xlu1 %v2670_v40  ;;  %v2656_v42 = vpop.xlane.xlu0 %2655 }
 0xe20   : > { %v2661_v43 = vmul.f32 0.03125, %v2656_v42  ;;  %v2673_v44 = vsel %vm538_vm0, %v2667_v41, 0.0  ;;  %v2668_v45 = vmul.f32 %v2664_v39, %v2664_v39 }
 0xe21   : > { %2674 = vadd.xlane.f32.xlu0 %v2673_v44 }
 0xe22   : > { %v2665_v46 = vsub.f32 %v2642_v16, %v2661_v43  ;;  %v2676_v47 = vsel %vm538_vm0, %v2668_v45, 0.0 }
 0xe23   : > { %2677 = vadd.xlane.f32.xlu1 %v2676_v47 }
 0xe24   : > { %v2669_v17 = vmul.f32 %v2665_v46, %v2665_v46 }
 0xe26   : > { %v2679_v48 = vsel %vm538_vm0, %v2669_v17, 0.0 }
 0xe27   : > { %2680 = vadd.xlane.f32.xlu0 %v2679_v48 }
 0xeac   : > { %v2672_v52 = vpop.xlane.xlu1 %2671 }
 0xead   : > { %v2682_v53 = vmul.f32 0.03125, %v2672_v52 }
 0xeae   : > { %v2675_v54 = vpop.xlane.xlu0 %2674 }
 0xeaf   : > { %v2686_v56 = vadd.f32 1e-05, %v2682_v53  ;;  %v2683_v57 = vmul.f32 0.03125, %v2675_v54 }
 0xeb0   : > { %v2678_v58 = vpop.xlane.xlu1 %2677 }
 0xeb1   : > { %3716 = vrsqrt.f32 %v2686_v56  ;;  %v2687_v61 = vadd.f32 1e-05, %v2683_v57  ;;  %v2684_v4 = vmul.f32 0.03125, %v2678_v58 }
 0xeb3   : > { %3718 = vrsqrt.f32 %v2687_v61  ;;  %v2688_v62 = vadd.f32 1e-05, %v2684_v4 }
 0xeb4   : > { %v2681_v63 = vpop.xlane.xlu0 %2680 }
 0xeb5   : > { %3720 = vrsqrt.f32 %v2688_v62  ;;  %v2685_v2 = vmul.f32 0.03125, %v2681_v63 }
 0xeb7   : > { %v2689_v29 = vadd.f32 1e-05, %v2685_v2 }
 0xeb9   : > { %3722 = vrsqrt.f32 %v2689_v29 }
 0xebb   : > { %v3717_v5 = vpop.eup %3716 }
 0xebc   : > { %v2694_v7 = vmul.f32 %v3717_v5, %v2662_v32 }
 0xebd   : > { %v3719_v8 = vpop.eup %3718 }
 0xebe   : > { %v2695_v9 = vmul.f32 %v3719_v8, %v2663_v36  ;;  %v2704_v10 = vmul.f32 %v3198_v6, %v2694_v7 }
 0xebf   : > { %v3721_v12 = vpop.eup %3720 }
 0xec0   : > { %v2696_v24 = vmul.f32 %v3721_v12, %v2664_v39  ;;  %v2705_v13 = vmul.f32 %v3198_v6, %v2695_v9  ;;  %v2714_v15 = vadd.f32 %v3199_v33, %v2704_v10  ;;  %v3205_v39 = vld [vmem:[%s4414_s10] ss:$0 sm:$0xff] }
 0xec2   : > { %v2715_v31 = vadd.f32 %v3199_v33, %v2705_v13  ;;  %v2706_v59 = vmul.f32 %v3198_v6, %v2696_v24 }
 0xec3   : > { %v3723_v55 = vpop.eup %3722 }
 0xec4   : > { %v2697_v60 = vmul.f32 %v3723_v55, %v2665_v46  ;;  %v2718_v18 = vpack.c.bf16 %v2715_v31, %v2714_v15  ;;  %v2716_v20 = vadd.f32 %v3199_v33, %v2706_v59 }
 0xec6   : > { %v2707_v19 = vmul.f32 %v3198_v6, %v2697_v60  ;;  %3548 = vmatprep.mubr.msk.bf16.mxu0 %vm538_vm0, %v2718_v18 }
 0xec8   : > { %v2717_v0 = vadd.f32 %v3199_v33, %v2707_v19 }
 0xeca   : > { %v2719_v1 = vpack.c.bf16 %v2717_v0, %v2716_v20 }
 0xecc   : > { %3549 = vmatmul.mubr.msk.bf16.vlgmr.msra.gmra.mrb[68].mxu0 %vm538_vm0, %v2719_v1 }
 0xecd   : > { %3553 = vmatpush3.bf16.msra.mxu0 %v3646_v51 }
 0xece   : > { %3554 = vmatprep.subr.bf16.mxu0 %v3647_v3 }
 0xed1   : > { %3555 = vmatpush3.bf16.msra.mxu0 %v3647_v3 }
 0xed2   : > { %3556 = vmatprep.subr.bf16.mxu0 %v3648_v21 }
 0xed5   : > { %3557 = vmatpush3.bf16.msra.mxu0 %v3648_v21 }
 0xed6   : > { %3558 = vmatprep.subr.bf16.mxu0 %v3649_v22 }
 0xed9   : > { %3559 = vmatpush3.bf16.msra.mxu0 %v3649_v22 }
 0xf9f   : > { %v3550_v25 = vpop.f32.mrb[68].mxu0 }
 0xfa0   : > { %v2792_v14 = vadd.f32 %v3550_v25, %v3200_v23  ;;  %v2783_v11 = vpop.f32.mrb[69].mxu0  ;;  %v3212_v25 = vld [vmem:[%s4415_s11] ss:$0 sm:$0xff] }
 0xfa1   : > { %v2784_v16 = vadd.f32 %v3200_v23, %v2783_v11  ;;  %v3551_v26 = vpop.f32.mrb[70].mxu0 }
 0xfa2   : > { %v2795_v27 = vadd.f32 %v3551_v26, %v3200_v23  ;;  %v2786_v28 = vpop.f32.mrb[71].mxu0  ;;  %v2800_v32 = vmax.f32 %v2792_v14, 0.0 }
 0xfa3   : > { %v2787_v30 = vadd.f32 %v3200_v23, %v2786_v28  ;;  %v2798_v35 = vmax.f32 %v2784_v16, 0.0  ;;  %v3213_v16 = vld [vmem:[%s4416_s12] ss:$0 sm:$0xff] }
 0xfa4   : > { %v2801_v34 = vmax.f32 %v2795_v27, 0.0 }
 0xfa5   : > { %v2799_v36 = vmax.f32 %v2787_v30, 0.0 }
 0xfa6   : > { %v2803_v37 = vpack.c.bf16 %v2801_v34, %v2800_v32 }
 0xfa7   : > { %v2802_v38 = vpack.c.bf16 %v2799_v36, %v2798_v35 }
 0xfa9   : > { %3560 = vmatprep.mubr.msk.bf16.mxu0 %vm2843_vm4, %v2802_v38 }
 0xfaa   : > { %3561 = vmatmul.mubr.msk.bf16.vlgmr.msra.gmra.mrb[72].mxu0 %vm2843_vm4, %v2803_v37 }
0x107d   : > { %v3562_v40 = vpop.f32.mrb[72].mxu0 }
0x107e   : > { %v2884_v41 = vpop.f32.mrb[73].mxu0  ;;  %v2893_v42 = vadd.f32 %v3562_v40, %v3205_v39 }
0x107f   : > { %v2885_v43 = vadd.f32 %v3205_v39, %v2884_v41  ;;  %v3563_v44 = vpop.f32.mrb[74].mxu0 }
0x1080   : > { %v2887_v45 = vpop.f32.mrb[75].mxu0  ;;  %v2896_v46 = vadd.f32 %v3563_v44, %v3205_v39  ;;  %v2901_v50 = vadd.f32 %v2893_v42, %v2716_v20 }
0x1081   : > { %v2888_v47 = vadd.f32 %v3205_v39, %v2887_v45  ;;  %v2899_v17 = vadd.f32 %v2885_v43, %v2714_v15 }
0x1082   : > { %v2902_v52 = vadd.f32 %v2896_v46, %v2717_v0  ;;  %v2911_v53 = vsel %vm538_vm0, %v2901_v50, 0.0 }
0x1083   : > { %v2905_v48 = vsel %vm538_vm0, %v2899_v17, 0.0  ;;  %v2900_v49 = vadd.f32 %v2888_v47, %v2715_v31 }
0x1084   : > { %2906 = vadd.xlane.f32.xlu1 %v2905_v48  ;;  %v2914_v54 = vsel %vm538_vm0, %v2902_v52, 0.0 }
0x1085   : > { %v2908_v51 = vsel %vm538_vm0, %v2900_v49, 0.0 }
0x1086   : > { %2909 = vadd.xlane.f32.xlu0 %v2908_v51 }
0x1088   : > { %2912 = vadd.xlane.f32.xlu1 %v2911_v53 }
0x108a   : > { %2915 = vadd.xlane.f32.xlu0 %v2914_v54 }
0x1111   : > { %v2907_v56 = vpop.xlane.xlu1 %2906 }
0x1112   : > { %v2917_v57 = vmul.f32 0.03125, %v2907_v56 }
0x1113   : > { %v2910_v58 = vpop.xlane.xlu0 %2909 }
0x1114   : > { %v2921_v61 = vsub.f32 %v2899_v17, %v2917_v57  ;;  %v2918_v4 = vmul.f32 0.03125, %v2910_v58 }
0x1115   : > { %v2913_v62 = vpop.xlane.xlu1 %2912 }
0x1116   : > { %v2922_v63 = vsub.f32 %v2900_v49, %v2918_v4  ;;  %v2919_v2 = vmul.f32 0.03125, %v2913_v62  ;;  %v2925_v29 = vmul.f32 %v2921_v61, %v2921_v61 }
0x1117   : > { %v2916_v5 = vpop.xlane.xlu0 %2915 }
0x1118   : > { %v2923_v6 = vsub.f32 %v2901_v50, %v2919_v2  ;;  %v2920_v7 = vmul.f32 0.03125, %v2916_v5  ;;  %v2929_v8 = vsel %vm538_vm0, %v2925_v29, 0.0  ;;  %v2926_v9 = vmul.f32 %v2922_v63, %v2922_v63 }
0x1119   : > { %2930 = vadd.xlane.f32.xlu1 %v2929_v8 }
0x111a   : > { %v2924_v10 = vsub.f32 %v2902_v52, %v2920_v7  ;;  %v2932_v12 = vsel %vm538_vm0, %v2926_v9, 0.0  ;;  %v2927_v33 = vmul.f32 %v2923_v6, %v2923_v6 }
0x111b   : > { %2933 = vadd.xlane.f32.xlu0 %v2932_v12 }
0x111c   : > { %v2935_v24 = vsel %vm538_vm0, %v2927_v33, 0.0  ;;  %v2928_v13 = vmul.f32 %v2924_v10, %v2924_v10 }
0x111d   : > { %2936 = vadd.xlane.f32.xlu1 %v2935_v24 }
0x111e   : > { %v2938_v15 = vsel %vm538_vm0, %v2928_v13, 0.0 }
0x111f   : > { %2939 = vadd.xlane.f32.xlu0 %v2938_v15 }
0x11a6   : > { %v2931_v31 = vpop.xlane.xlu1 %2930 }
0x11a7   : > { %v2941_v55 = vmul.f32 0.03125, %v2931_v31 }
0x11a8   : > { %v2934_v59 = vpop.xlane.xlu0 %2933 }
0x11a9   : > { %v2945_v60 = vadd.f32 1e-05, %v2941_v55  ;;  %v2942_v18 = vmul.f32 0.03125, %v2934_v59 }
0x11aa   : > { %v2937_v19 = vpop.xlane.xlu1 %2936 }
0x11ab   : > { %3724 = vrsqrt.f32 %v2945_v60  ;;  %v2946_v20 = vadd.f32 1e-05, %v2942_v18  ;;  %v2943_v0 = vmul.f32 0.03125, %v2937_v19 }
0x11ac   : > { %v2940_v1 = vpop.xlane.xlu0 %2939 }
0x11ad   : > { %3726 = vrsqrt.f32 %v2946_v20  ;;  %v2947_v3 = vadd.f32 1e-05, %v2943_v0  ;;  %v2944_v21 = vmul.f32 0.03125, %v2940_v1  ;;  %v3214_v20 = vld [vmem:[%s4417_s13] ss:$0 sm:$0xff] }
0x11af   : > { %3728 = vrsqrt.f32 %v2947_v3  ;;  %v2948_v22 = vadd.f32 1e-05, %v2944_v21 }
0x11b1   : > { %3730 = vrsqrt.f32 %v2948_v22  ;;  %v3215_v22 = vld [vmem:[%s4418_s14] ss:$0 sm:$0xff] }
0x11b5   : > { %v3725_v23 = vpop.eup %3724 }
0x11b6   : > { %v2953_v14 = vmul.f32 %v3725_v23, %v2921_v61 }
0x11b7   : > { %v3727_v11 = vpop.eup %3726 }
0x11b8   : > { %v2954_v26 = vmul.f32 %v3727_v11, %v2922_v63  ;;  %v2963_v27 = vmul.f32 %v3212_v25, %v2953_v14 }
0x11b9   : > { %v3729_v28 = vpop.eup %3728 }
0x11ba   : > { %v2955_v30 = vmul.f32 %v3729_v28, %v2923_v6  ;;  %v2964_v32 = vmul.f32 %v3212_v25, %v2954_v26  ;;  %v2973_v34 = vadd.f32 %v3213_v16, %v2963_v27 }
0x11bb   : > { %v3731_v35 = vpop.eup %3730 }
0x11bc   : > { %v2956_v36 = vmul.f32 %v3731_v35, %v2924_v10  ;;  %v2965_v37 = vmul.f32 %v3212_v25, %v2955_v30  ;;  %v2974_v38 = vadd.f32 %v3213_v16, %v2964_v32  ;;  %v2977_v41 = vsel %vm538_vm0, %v2973_v34, 0.0 }
0x11be   : > { %v2966_v39 = vmul.f32 %v3212_v25, %v2956_v36  ;;  %v2975_v40 = vadd.f32 %v3213_v16, %v2965_v37  ;;  %v2978_v42 = vsel %vm538_vm0, %v2974_v38, 0.0 }
0x11bf   : > { %v2979_v43 = vadd.f32 %v2978_v42, %v2977_v41 }
0x11c0   : > { %v2976_v44 = vadd.f32 %v3213_v16, %v2966_v39  ;;  %v2980_v45 = vsel %vm538_vm0, %v2975_v40, 0.0 }
0x11c1   : > { %v2981_v46 = vadd.f32 %v2980_v45, %v2979_v43 }
0x11c2   : > { %v2982_v47 = vsel %vm538_vm0, %v2976_v44, 0.0 }
0x11c3   : > { %v2983_v17 = vadd.f32 %v2982_v47, %v2981_v46 }
0x11c5   : > { %2984 = vadd.xlane.f32.xlu1 %v2983_v17 }
0x1252   : > { %v2985_v48 = vpop.xlane.xlu1 %2984 }
0x1253   : > { %v2986_v49 = vrot.slane %v2985_v48, 4 }
0x1255   : > { %v2987_v50 = vadd.f32 %v2986_v49, %v2985_v48 }
0x1257   : > { %v2988_v51 = vrot.slane %v2987_v50, 2 }
0x1259   : > { %v2989_v52 = vadd.f32 %v2988_v51, %v2987_v50 }
0x125b   : > { %v2990_v53 = vrot.slane %v2989_v52, 1 }
0x125d   : > { %v2991_v54 = vadd.f32 %v2990_v53, %v2989_v52 }
0x125f   : > { %3580 = vpush %v2991_v54 }
0x1290   : > { %s3581_s17 = spop %3580 }
0x1291   : > { %s2995_s23 = smul.f32 0.0009765625, %s3581_s17  ;;  %s3740_s17 = sshll.u32 %s3813_s16, 4  ;;  %s3741_s17 = int_to_ptr.vmem [resolvable:$false] %s3740_s17 }
0x1293   : > { %v2996_v56 = vstv %s2995_s23  ;;  %s3229_s23 = sshll.u32 %s3917_s22, 9 }
0x1294   : > { %v2997_v57 = vsub.f32 %v2973_v34, %v2996_v56  ;;  %v2998_v58 = vsub.f32 %v2974_v38, %v2996_v56  ;;  %v2999_v61 = vsub.f32 %v2975_v40, %v2996_v56  ;;  %v3000_v4 = vsub.f32 %v2976_v44, %v2996_v56  ;;  %s4355_s27 = scalar_lea.hbm %s4419_s15, %s3229_s23  ;;  %s3742_s23 = scalar_lea.vmem %s3741_s17, 1024 }
0x1296   : > { %v3001_v62 = vmul.f32 %v2997_v57, %v2997_v57  ;;  %v3002_v63 = vmul.f32 %v2998_v58, %v2998_v58  ;;  %v3003_v2 = vmul.f32 %v2999_v61, %v2999_v61  ;;  %v3004_v29 = vmul.f32 %v3000_v4, %v3000_v4 }
0x1298   : > { %v3005_v5 = vsel %vm538_vm0, %v3001_v62, 0.0  ;;  %v3006_v6 = vsel %vm538_vm0, %v3002_v63, 0.0  ;;  %v3008_v8 = vsel %vm538_vm0, %v3003_v2, 0.0  ;;  %v3010_v10 = vsel %vm538_vm0, %v3004_v29, 0.0 }
0x1299   : > { %v3007_v7 = vadd.f32 %v3006_v6, %v3005_v5 }
0x129b   : > { %v3009_v9 = vadd.f32 %v3008_v8, %v3007_v7 }
0x129d   : > { %v3011_v12 = vadd.f32 %v3010_v10, %v3009_v9 }
0x129f   : > { %3012 = vadd.xlane.f32.xlu0 %v3011_v12 }
0x132c   : > { %v3013_v33 = vpop.xlane.xlu0 %3012 }
0x132d   : > { %v3014_v24 = vrot.slane %v3013_v33, 4 }
0x132f   : > { %v3015_v13 = vadd.f32 %v3014_v24, %v3013_v33 }
0x1331   : > { %v3016_v15 = vrot.slane %v3015_v13, 2 }
0x1333   : > { %v3017_v31 = vadd.f32 %v3016_v15, %v3015_v13 }
0x1335   : > { %v3018_v55 = vrot.slane %v3017_v31, 1 }
0x1337   : > { %v3019_v59 = vadd.f32 %v3018_v55, %v3017_v31 }
0x1339   : > { %3582 = vpush %v3019_v59 }
0x136a   : > { %s3583_s25 = spop %3582 }
0x136b   : > { %s3023_s24 = smul.f32 0.0009765625, %s3583_s25  ;;  %s3073_s25 = sshll.u32 %s488_s0, 4  ;;  %s4357_s25 = int_to_ptr.vmem [resolvable:$true] %s3073_s25 }
0x136c   : > { %s3736_s22 = scalar_lea.vmem %s4357_s25, 512  ;;  %p3743_p0 = scmp.lt.s32.totalorder %s4357_s25, %s3741_s17 }
0x136d   : > { %s3024_s26 = sadd.f32 1e-05, %s3023_s24  ;;  %p3737_p11 = scmp.ne.s32.totalorder %s4357_s25, %s3736_s22 }
0x136e   : > { %p3744_p1 = scmp.lt.s32.totalorder %s3742_s23, %s3736_s22 }
0x136f   : > { %v3025_v60 = vstv %s3024_s26  ;;  %p3738_p12 = pnand %p3737_p11, %p3934_p5 }
0x1370   : > { %3732 = vrsqrt.f32 %v3025_v60  ;;  %p3745_p2 = por %p3744_p1, %p3743_p0 }
0x1371   : > { %p3739_p13 = pneg %p3738_p12 }
0x1373   : > { %p3746_p3 = pnand %p3745_p2, %p3739_p13 }
0x137a   : > { %v3733_v18 = vpop.eup %3732 }
0x137b   : > { %3584 = vpush %v3733_v18 }
0x13ac   : > { %s3585_s20 = spop %3584 }
0x13ad   : > { %v3028_v19 = vstv %s3585_s20 }
0x13ae   : > { %v3029_v0 = vmul.f32 %v3028_v19, %v2997_v57  ;;  %v3030_v1 = vmul.f32 %v3028_v19, %v2998_v58  ;;  %v3031_v3 = vmul.f32 %v3028_v19, %v2999_v61  ;;  %v3032_v21 = vmul.f32 %v3028_v19, %v3000_v4 }
0x13b0   : > { %v3040_v23 = vmul.f32 %v3214_v20, %v3029_v0  ;;  %v3041_v25 = vmul.f32 %v3214_v20, %v3030_v1  ;;  %v3042_v14 = vmul.f32 %v3214_v20, %v3031_v3  ;;  %v3043_v11 = vmul.f32 %v3214_v20, %v3032_v21 }
0x13b2   : > { %v3051_v16 = vadd.f32 %v3215_v22, %v3040_v23  ;;  %v3052_v26 = vadd.f32 %v3215_v22, %v3041_v25  ;;  %v3053_v27 = vadd.f32 %v3215_v22, %v3042_v14  ;;  %v3054_v28 = vadd.f32 %v3215_v22, %v3043_v11 }
0x13b4   : > { %3055 = vst.msk [vmem:[%s488_s0] sm:$0xff] %vm538_vm0, %v3051_v16  ;;  %3056 = vst.msk [vmem:[%s488_s0 + $0x8] sm:$0xff] %vm538_vm0, %v3052_v26 }
0x13b5   : > { %3057 = vst.msk [vmem:[%s488_s0 + $0x10] sm:$0xff] %vm538_vm0, %v3053_v27  ;;  %3058 = vst.msk [vmem:[%s488_s0 + $0x18] sm:$0xff] %vm538_vm0, %v3054_v28 }
0x13b6   : > { %3749 = shalt.err (!%p3746_p3)
}
0x13b7   : > { %s3750_s0 = scalar_lea.hbm %s4355_s27, 512  ;;  %s3754_s26 = scalar_lea.hbm %s4419_s15, 2048 }
0x13b8   : > { %p3751_p4 = scmp.ne.s32.totalorder %s4355_s27, %s3750_s0  ;;  %p3755_p9 = scmp.lt.u32.totalorder %s4355_s27, %s4419_s15 }
0x13b9   : > { %p3756_p10 = scmp.lt.u32.totalorder %s3754_s26, %s3750_s0  ;;  %p3758_p12 = scmp.lt.u32.totalorder %s3750_s0, %s4355_s27 }
0x13ba   : > { %p3752_p7 = pnand %p3751_p4, %p3934_p5 }
0x13bb   : > { %p3757_p11 = por %p3756_p10, %p3755_p9 }
0x13bc   : > { %p3753_p8 = pneg %p3752_p7 }
0x13bd   : > { %p3759_p13 = por %p3758_p12, %p3757_p11 }
0x13bf   : > { %p3760_p0 = pnand %p3759_p13, %p3753_p8 }
0x13c1   : > { %3763 = shalt.err (!%p3760_p0)
}
0x13c2   : > { %s3814_s22 = smov 128   ;;  %s3815_s17 = smov 8  }
0x13c3   : > { %3586 = dma.vmem_to_hbm [thread:$0]  (%p3934_p5), %s4357_s25, 512, %s4355_s27, %s4363_s1, %s3814_s22, %s3814_s22, %s3815_s17  }
0x13c4 PF: > { %p3592_p1 = scmp.ge.s32.totalorder %s3798_s21, 2  ;;  %s3088_s23 = sand.u32 1, %s3786_s18  }
0x13c5   : > { %s3089_s0 = scalar_lea.sflag [#allocation3], %s3088_s23 }
0x13c6   : > { %p3589_p2 = pnand %p3592_p1, %p3938_p6 }
0x13c8   : > { %3781 = dma.done.wait (!%p3589_p2), %s3089_s0, 512  }
0x13c9   : > { %3783 = vsyncadd (!%p3589_p2), %s3089_s0, 4294966784  ;;  %s4432_s21 = sld [smem:[#allocation6_spill]]  ;;  %s4433_s30 = sld [smem:[#allocation5_spill]] }
0x13ca   : > { %s4434_s20 = sld [smem:[#allocation7_spill]]  ;;  %s4435_s18 = smov %s3790_s19 }
0x13cf   : > { %p25_p3 = scmp.ge.s32.totalorder %s4432_s21, 6   ;;  %s4436_s19 = smov %s4433_s30 }
0x13d1   :  { %27 = sbr.rel (!%p25_p3) target bundleno = 6 (0x6), region = 115 }
0x13d8   :  { %3094 = vsyncpa [#allocation3], 1 }
0x13d9   :  { %3096 = vsyncpa [#allocation3 + $0x1], 1 }

// kernel: resepformer_forward.3
= control target key start
LH: loop header
LB: loop body
LE: loop exit
PB: predicated region body
PF: predicated region fallthrough
CT: control target
= control target key end

     0   :  { %s9948_s6 = smov 1   ;;  %s9949_s10 = smov 2   ;;  %s11782_s0 = inlined_call_operand.smem [shape: u32[35], index: -1, kind: input, shape index: {}] }
   0x1   :  { %s10005_s5 = sld [smem:[%s11782_s0]]   ;;  %s9950_s14 = smov 3  }
   0x2   :  { %s10010_s9 = sld [smem:[%s11782_s0 + %s9948_s6]]   ;;  %s9951_s18 = smov 4  }
   0x3   :  { %s10015_s13 = sld [smem:[%s11782_s0 + %s9949_s10]]   ;;  %s9952_s22 = smov 5  }
   0x4   :  { %s10020_s17 = sld [smem:[%s11782_s0 + %s9950_s14]]   ;;  %s9953_s26 = smov 6  }
   0x5   :  { %s10025_s21 = sld [smem:[%s11782_s0 + %s9951_s18]]   ;;  %s9954_s30 = smov 7  }
   0x6   :  { %s10030_s25 = sld [smem:[%s11782_s0 + %s9952_s22]]   ;;  %s9955_s4 = smov 8  }
   0x7   :  { %s10035_s29 = sld [smem:[%s11782_s0 + %s9953_s26]]   ;;  %s9956_s10 = smov 9  }
   0x8   :  { %s10040_s3 = sld [smem:[%s11782_s0 + %s9954_s30]]   ;;  %s9957_s15 = smov 10  }
   0x9   :  { %s10045_s8 = sld [smem:[%s11782_s0 + %s9955_s4]]   ;;  %s9958_s20 = smov 11  }
   0xa   :  { %s10050_s14 = sld [smem:[%s11782_s0 + %s9956_s10]]   ;;  %s9959_s26 = smov 12  }
   0xb   :  { %s10055_s19 = sld [smem:[%s11782_s0 + %s9957_s15]]   ;;  %s9960_s1 = smov 13  }
   0xc   :  { %s10060_s24 = sld [smem:[%s11782_s0 + %s9958_s20]]   ;;  %s9961_s7 = smov 14  }
   0xd   :  { %s10065_s30 = sld [smem:[%s11782_s0 + %s9959_s26]]   ;;  %s9962_s15 = smov 15  }
   0xe   :  { %s10070_s6 = sld [smem:[%s11782_s0 + %s9960_s1]]   ;;  %s9963_s22 = smov 16  }
   0xf   :  { %s10075_s12 = sld [smem:[%s11782_s0 + %s9961_s7]]   ;;  %s9964_s28 = smov 17  }
  0x10   :  { %s10080_s20 = sld [smem:[%s11782_s0 + %s9962_s15]]   ;;  %s9965_s7 = smov 18  }
  0x11   :  { %s10085_s27 = sld [smem:[%s11782_s0 + %s9963_s22]]   ;;  %s9966_s15 = smov 19  }
  0x12   :  { %s10090_s4 = sld [smem:[%s11782_s0 + %s9964_s28]]   ;;  %s9967_s22 = smov 20  }
  0x13   :  { %11797 = sst [smem:[#allocation5_spill]] %s10065_s30  ;;  %s9968_s28 = smov 21  }
  0x14   :  { %11798 = sst [smem:[#allocation6_spill]] %s10070_s6 }
  0x15   :  { %s10095_s6 = sld [smem:[%s11782_s0 + %s9965_s7]]   ;;  %s9969_s7 = smov 22  }
  0x16   :  { %11799 = sst [smem:[#allocation7_spill]] %s10080_s20 }
  0x17   :  { %11800 = sst [smem:[#allocation8_spill]] %s10085_s27 }
  0x18   :  { %11801 = sst [smem:[#allocation9_spill]] %s10090_s4 }
  0x19   :  { %s10100_s20 = sld [smem:[%s11782_s0 + %s9966_s15]]   ;;  %s9970_s15 = smov 23  }
  0x1a   :  { %s10105_s27 = sld [smem:[%s11782_s0 + %s9967_s22]]   ;;  %s9971_s22 = smov 24  }
  0x1b   :  { %s10110_s4 = sld [smem:[%s11782_s0 + %s9968_s28]]   ;;  %s9972_s28 = smov 25  }
  0x1c   :  { %s10115_s30 = sld [smem:[%s11782_s0 + %s9969_s7]]   ;;  %s9973_s7 = smov 26  }
  0x1f   :  { %11802 = sst [smem:[#allocation10_spill]] %s10100_s20 }
  0x20   :  { %11803 = sst [smem:[#allocation11_spill]] %s10105_s27 }
  0x21   :  { %11804 = sst [smem:[#allocation12_spill]] %s10110_s4 }
  0x22   :  { %11805 = sst [smem:[#allocation13_spill]] %s10115_s30 }
  0x23   :  { %s10120_s20 = sld [smem:[%s11782_s0 + %s9970_s15]]   ;;  %s9974_s15 = smov 27  }
  0x24   :  { %s10125_s27 = sld [smem:[%s11782_s0 + %s9971_s22]]   ;;  %s9975_s22 = smov 28  }
  0x25   :  { %s10130_s4 = sld [smem:[%s11782_s0 + %s9972_s28]]   ;;  %s9976_s28 = smov 29  }
  0x26   :  { %s10135_s30 = sld [smem:[%s11782_s0 + %s9973_s7]]   ;;  %s9977_s7 = smov 30  }
  0x29   :  { %11806 = sst [smem:[#allocation14_spill]] %s10120_s20 }
  0x2a   :  { %11807 = sst [smem:[#allocation15_spill]] %s10125_s27 }
  0x2b   :  { %11808 = sst [smem:[#allocation16_spill]] %s10130_s4 }
  0x2c   :  { %11809 = sst [smem:[#allocation17_spill]] %s10135_s30 }
  0x2d   :  { %s10140_s20 = sld [smem:[%s11782_s0 + %s9974_s15]]   ;;  %s9978_s15 = smov 31  }
  0x2e   :  { %s10145_s27 = sld [smem:[%s11782_s0 + %s9975_s22]]   ;;  %s9979_s22 = smov 32  }
  0x2f   :  { %s10150_s4 = sld [smem:[%s11782_s0 + %s9976_s28]]   ;;  %s9980_s28 = smov 33  }
  0x30   :  { %s10155_s30 = sld [smem:[%s11782_s0 + %s9977_s7]]   ;;  %s9981_s7 = smov 34  }
  0x33   :  { %11810 = sst [smem:[#allocation18_spill]] %s10140_s20 }
  0x34   :  { %11811 = sst [smem:[#allocation19_spill]] %s10145_s27 }
  0x35   :  { %11812 = sst [smem:[#allocation20_spill]] %s10150_s4 }
  0x36   :  { %11813 = sst [smem:[#allocation21_spill]] %s10155_s30 }
  0x37   :  { %s10160_s20 = sld [smem:[%s11782_s0 + %s9978_s15]]  }
  0x38   :  { %s10165_s27 = sld [smem:[%s11782_s0 + %s9979_s22]]  }
  0x39   :  { %s10170_s4 = sld [smem:[%s11782_s0 + %s9980_s28]]  }
  0x3a   :  { %s10175_s30 = sld [smem:[%s11782_s0 + %s9981_s7]]  }
  0x3b   :  { %74 = vsyncpa [#allocation3], 0  ;;  %s10177_s15 = smov 0  }
  0x3c LB: > { %s8396_s16 = sadd.s32 4294967295, %s9946_s15   ;;  %p8398_p0 = scmp.ge.s32.totalorder %s9946_s15, 1  ;;  %s9946_s15 = sphi %s10177_s15, %s80_s15  }
  0x3d   : > { %p830_p1 = scmp.lt.s32.totalorder %s9946_s15, 3  ;;  %s843_s18 = sshll.u32 %s10005_s5, 4  ;;  %s844_s18 = int_to_ptr.vmem [resolvable:$true] %s843_s18 }
  0x3e   : > { %p10190_p3 = scmp.eq.s32.totalorder %s8396_s16, 0  ;;  %s9921_s23 = scalar_lea.vmem %s844_s18, 16 }
  0x3f   : > { %p10186_p2 = pnand %p8398_p0, %p830_p1  ;;  %p9922_p6 = scmp.ne.s32.totalorder %s844_s18, %s9921_s23 }
  0x40   : > { %p9929_p10 = scmp.lt.s32.totalorder %s844_s18, %s844_s18  ;;  %p9930_p11 = scmp.lt.s32.totalorder %s9921_s23, %s9921_s23 }
  0x41   : > { %p9610_p4 = pneg %p10186_p2 }
  0x42   : > { %p9931_p12 = por %p9930_p11, %p9929_p10 }
  0x43   : > { %p9611_p5 = pnand %p10190_p3, %p9610_p4 }
  0x45   : > { %p9923_p7 = pneg %p9611_p5 }
  0x47   : > { %p9924_p8 = pnand %p9923_p7, %p9922_p6 }
  0x49   : > { %p9925_p9 = pneg %p9924_p8 }
  0x4b   : > { %p9932_p13 = pnand %p9931_p12, %p9925_p9 }
  0x4d   : > { %9935 = shalt.err (!%p9932_p13)
}
  0x4e   : > { %s9982_s26 = smov [#allocation2]   ;;  %961 = sbr.rel (%p10186_p2) target bundleno = 10297 (0x2839), region = 156 }
  0x4f   : > { %9613 = dma.vmem_to_smem (!%p9611_p5), %s844_s18, 16, %s9982_s26, [#allocation3]  }
  0x55   : > { %9941 = dma.done.wait (%p10190_p3), [#allocation3], 16  }
  0x56   : > { %9943 = vsyncadd (%p10190_p3), [#allocation3], 4294967280 }
  0x57   : > { %967 = sfence }
  0x58   : > { %v9673_v0 = vld [vmem:[%s10015_s13] sm:$0xff]   ;;  %s8403_s28 = sshll.u32 %s8396_s16, 3  ;;  %v9674_v1 = vld [vmem:[%s10015_s13 + $0x8] sm:$0xff]   ;;  %vm1123_vm0 = vcmask 261120   ;;  %v9983_v6 = vmov 0.0   ;;  %vm9984_vm1 = vmmov 0  }
  0x59   : > { %p1049_p0 = scmp.lt.s32.totalorder %s8403_s28, 15  ;;  %8898 = vmatprep.subr.bf16.mxu0 %v9673_v0  ;;  %9574 = vmatprep.subr.bf16.mxu1 %v9673_v0  ;;  %v8409_v7 = vld [vmem:[%s10020_s17] ss:$0 sm:$0xff]  ;;  %s9985_s7 = smov 96   ;;  %vm1256_vm2 = vcmask 64512   ;;  %vm1747_vm3 = vcmask 1043456  }
  0x5a   : > { %8899 = vmatpush3.bf16.msra.mxu0 %v9673_v0  ;;  %9576 = vmatpush3.bf16.msra.mxu1 %v9673_v0  ;;  %s9986_s10 = smov 64   ;;  %s9987_s11 = smov 88   ;;  %vm5432_vm4 = vcmask 523264   ;;  %vm5781_vm9 = vcmask 785408  }
  0x5b   : > { %s11839_s28 = smov (!%p1049_p0, %s8403_s28), 15  ;;  %8900 = vmatprep.subr.bf16.mxu0 %v9674_v1  ;;  %9575 = vmatprep.subr.bf16.mxu1 %v9674_v1  ;;  %s9988_s16 = smov 120  }
  0x5c   : > { %s11788_s1 = sshll.u32 %s11839_s28, 2  ;;  %s9989_s18 = smov 56  }
  0x5d   : > { %s10212_s2 = scalar_lea.vmem %s10010_s9, %s11788_s1  ;;  %s9990_s22 = smov 112  }
  0x5e   : > { %8901 = vmatpush3.bf16.msra.mxu0 %v9674_v1  ;;  %v1064_v2 = vld [vmem:[%s10212_s2] sm:$0xff]   ;;  %v1066_v3 = vld [vmem:[%s10212_s2 + $0x8] sm:$0xff]   ;;  %9577 = vmatpush3.bf16.msra.mxu1 %v9674_v1  ;;  %v1068_v4 = vld [vmem:[%s10212_s2 + $0x10] sm:$0xff]   ;;  %s9991_s0 = smov 80   ;;  %s11795_s23 = smov 48  }
  0x5f   : > { %v1070_v5 = vld [vmem:[%s10212_s2 + $0x18] sm:$0xff]   ;;  %8902 = vmatprep.mubr.msk.bf16.mxu0 %vm1123_vm0, %v1064_v2  ;;  %8906 = vmatprep.mubr.msk.bf16.mxu1 %vm1123_vm0, %v1068_v4  ;;  %s11793_s26 = smov 72   ;;  %s11789_s1 = smov 104  }
  0x60   : > { %8922 = vmatprep.subr.bf16.mxu0 %v9983_v6  ;;  %8910 = vmatprep.subr.bf16.mxu1 %v9983_v6 }
  0x61   : > { %8903 = vmatmul.mubr.msk.bf16.vlgmr.msra.gmra.mrb[0].mxu0 %vm1123_vm0, %v1066_v3  ;;  %8907 = vmatmul.mubr.msk.bf16.vlgmr.msra.gmra.mrb[0].mxu1 %vm1123_vm0, %v1070_v5 }
  0x62   : > { %8924 = vmatprep.mubr.msk.bf16.mxu0 %vm9984_vm1, %v9983_v6  ;;  %8912 = vmatprep.mubr.msk.bf16.mxu1 %vm9984_vm1, %v9983_v6 }
 0x134   : > { %v8904_v8 = vpop.f32.mrb[0].mxu0  ;;  %v8908_v11 = vpop.f32.mrb[0].mxu1 }
 0x135   : > { %v1179_v9 = vadd.f32 %v8904_v8, %v8409_v7  ;;  %v1170_v10 = vpop.f32.mrb[1].mxu0  ;;  %v1186_v14 = vpop.f32.mrb[1].mxu1  ;;  %v1195_v27 = vadd.f32 %v8908_v11, %v8409_v7 }
 0x136   : > { %v1171_v12 = vadd.f32 %v8409_v7, %v1170_v10  ;;  %v8905_v13 = vpop.f32.mrb[2].mxu0  ;;  %v8909_v18 = vpop.f32.mrb[2].mxu1  ;;  %v1187_v22 = vadd.f32 %v8409_v7, %v1186_v14 }
 0x137   : > { %v10229_v15 = vpack.c.bf16 %v1179_v9, %v1179_v9  ;;  %v1182_v16 = vadd.f32 %v8905_v13, %v8409_v7  ;;  %v1173_v17 = vpop.f32.mrb[3].mxu0  ;;  %v1189_v21 = vpop.f32.mrb[3].mxu1  ;;  %v10245_v26 = vadd.f32 %v8909_v18, %v8409_v7  ;;  %v10261_v31 = vpack.c.bf16 %v1195_v27, %v1195_v27 }
 0x138   : > { %v10231_v19 = vpack.c.bf16 %v1171_v12, %v1171_v12  ;;  %v1174_v20 = vadd.f32 %v8409_v7, %v1173_v17  ;;  %v10241_v25 = vadd.f32 %v8409_v7, %v1189_v21  ;;  %v10247_v28 = vpack.c.bf16 %v1187_v22, %v1187_v22 }
 0x139   : > { %1353 = vrot.lane.b32.xlu1 %v10229_v15, %s9985_s7  ;;  %v10237_v23 = vpack.c.bf16 %v1182_v16, %v1182_v16  ;;  %v10257_v30 = vpack.c.bf16 %v10245_v26, %v10245_v26  ;;  %v1203_v36 = vmul.f32 0.35355338, %v1179_v9  ;;  %v1201_v37 = vmul.f32 0.35355338, %v1171_v12 }
 0x13a   : > { %1254 = vrot.lane.b32.xlu0 %v10231_v19, %s9985_s7  ;;  %v10239_v24 = vpack.c.bf16 %v1174_v20, %v1174_v20  ;;  %v10253_v29 = vpack.c.bf16 %v10241_v25, %v10241_v25  ;;  %v1202_v44 = vmul.f32 0.35355338, %v1174_v20  ;;  %v1205_v45 = vmul.f32 0.35355338, %v1187_v22 }
 0x13b   : > { %v10273_v39 = vpack.c.bf16 %v1203_v36, %v1203_v36  ;;  %v10275_v40 = vpack.c.bf16 %v1201_v37, %v1201_v37  ;;  %v1204_v52 = vmul.f32 0.35355338, %v1182_v16  ;;  %v1207_v53 = vmul.f32 0.35355338, %v1195_v27 }
 0x13c   : > { %v10289_v48 = vpack.c.bf16 %v1202_v44, %v1202_v44  ;;  %v10291_v49 = vpack.c.bf16 %v1205_v45, %v1205_v45  ;;  %v1206_v58 = vmul.f32 0.35355338, %v10241_v25  ;;  %v1208_v62 = vmul.f32 0.35355338, %v10245_v26 }
 0x13d   : > { %1402 = vrot.lane.b32.xlu1 %v10237_v23, %s9985_s7  ;;  %v10305_v55 = vpack.c.bf16 %v1204_v52, %v1204_v52  ;;  %v10307_v56 = vpack.c.bf16 %v1207_v53, %v1207_v53 }
 0x13e   : > { %1304 = vrot.lane.b32.xlu0 %v10239_v24, %s9985_s7  ;;  %v10320_v60 = vpack.c.bf16 %v1206_v58, %v1206_v58  ;;  %v10329_v63 = vpack.c.bf16 %v1208_v62, %v1208_v62 }
 0x141   : > { %1500 = vrot.lane.b32.xlu1 %v10253_v29, %s9985_s7 }
 0x142   : > { %1451 = vrot.lane.b32.xlu0 %v10247_v28, %s9985_s7 }
 0x145   : > { %1598 = vrot.lane.b32.xlu1 %v10257_v30, %s9985_s7 }
 0x146   : > { %1549 = vrot.lane.b32.xlu0 %v10261_v31, %s9985_s7 }
 0x1ab   : > { %v1354_v32 = vpop.permute.xlu1 %1353 }
 0x1ac   : > { %v1359_v33 = vsel %vm1256_vm2, %v1354_v32, 0  ;;  %v1255_v34 = vpop.permute.xlu0 %1254 }
 0x1ad   : > { %v1261_v35 = vsel %vm1256_vm2, %v1255_v34, 0  ;;  %8923 = vmatpush3.bf16.xpose.msra.mxu0 %v1359_v33 }
 0x1ae   : > { %8911 = vmatpush3.bf16.xpose.msra.mxu1 %v1261_v35  ;;  %8934 = vmatprep.subr.bf16.mxu0 %v9983_v6 }
 0x1af   : > { %8916 = vmatprep.subr.bf16.mxu1 %v9983_v6  ;;  %v1403_v47 = vpop.permute.xlu1 %1402 }
 0x1b0   : > { %v1305_v38 = vpop.permute.xlu0 %1304  ;;  %v1408_v51 = vsel %vm1256_vm2, %v1403_v47, 0 }
 0x1b1   : > { %v1310_v42 = vsel %vm1256_vm2, %v1305_v38, 0 }
 0x1b3   : > { %v1501_v54 = vpop.permute.xlu1 %1500 }
 0x1b4   : > { %8925 = vmatmul.mubr.msk.bf16.vlgmr.msra.gmra.mrb[4].mxu0 %vm1256_vm2, %v10273_v39  ;;  %v1452_v41 = vpop.permute.xlu0 %1451  ;;  %v1506_v57 = vsel %vm1256_vm2, %v1501_v54, 0 }
 0x1b5   : > { %v1457_v43 = vsel %vm1256_vm2, %v1452_v41, 0  ;;  %8913 = vmatmul.mubr.msk.bf16.vlgmr.msra.gmra.mrb[4].mxu1 %vm1256_vm2, %v10275_v40  ;;  %8936 = vmatprep.mubr.msk.bf16.mxu0 %vm9984_vm1, %v9983_v6 }
 0x1b6   : > { %8917 = vmatpush3.bf16.xpose.msra.mxu1 %v1310_v42  ;;  %8935 = vmatpush3.bf16.xpose.msra.mxu0 %v1457_v43 }
 0x1b7   : > { %8918 = vmatprep.mubr.msk.bf16.mxu1 %vm9984_vm1, %v9983_v6  ;;  %8928 = vmatprep.subr.bf16.mxu1 %v9983_v6  ;;  %v1599_v59 = vpop.permute.xlu1 %1598 }
 0x1b8   : > { %v1550_v46 = vpop.permute.xlu0 %1549  ;;  %8946 = vmatprep.subr.bf16.mxu0 %v9983_v6  ;;  %v1604_v61 = vsel %vm1256_vm2, %v1599_v59, 0 }
 0x1b9   : > { %v1555_v50 = vsel %vm1256_vm2, %v1550_v46, 0 }
 0x1bd   : > { %8919 = vmatmul.mubr.msk.bf16.vlgmr.msra.gmra.mrb[8].mxu1 %vm1256_vm2, %v10289_v48  ;;  %8937 = vmatmul.mubr.msk.bf16.vlgmr.msra.gmra.mrb[8].mxu0 %vm1256_vm2, %v10291_v49 }
 0x1be   : > { %8929 = vmatpush3.bf16.xpose.msra.mxu1 %v1408_v51  ;;  %8947 = vmatpush3.bf16.xpose.msra.mxu0 %v1555_v50 }
 0x1bf   : > { %8930 = vmatprep.mubr.msk.bf16.mxu1 %vm9984_vm1, %v9983_v6  ;;  %8948 = vmatprep.mubr.msk.bf16.mxu0 %vm9984_vm1, %v9983_v6 }
 0x1c0   : > { %8940 = vmatprep.subr.bf16.mxu1 %v9983_v6  ;;  %8958 = vmatprep.subr.bf16.mxu0 %v9983_v6 }
 0x1c5   : > { %8931 = vmatmul.mubr.msk.bf16.vlgmr.msra.gmra.mrb[12].mxu1 %vm1256_vm2, %v10305_v55  ;;  %8949 = vmatmul.mubr.msk.bf16.vlgmr.msra.gmra.mrb[12].mxu0 %vm1256_vm2, %v10307_v56 }
 0x1c6   : > { %8941 = vmatpush3.bf16.xpose.msra.mxu1 %v1506_v57  ;;  %8942 = vmatprep.mubr.msk.bf16.mxu1 %vm9984_vm1, %v9983_v6 }
 0x1c7   : > { %8952 = vmatprep.subr.bf16.mxu1 %v9983_v6  ;;  %8960 = vmatprep.mubr.msk.bf16.mxu0 %vm9984_vm1, %v9983_v6 }
 0x1cd   : > { %8943 = vmatmul.mubr.msk.bf16.vlgmr.msra.gmra.mrb[16].mxu1 %vm1256_vm2, %v10320_v60 }
 0x1ce   : > { %8953 = vmatpush3.bf16.xpose.msra.mxu1 %v1604_v61  ;;  %8954 = vmatprep.mubr.msk.bf16.mxu1 %vm9984_vm1, %v9983_v6 }
 0x1cf   : > { %8964 = vmatprep.subr.bf16.mxu1 %v9983_v6 }
 0x1d5   : > { %8955 = vmatmul.mubr.msk.bf16.vlgmr.msra.gmra.mrb[20].mxu1 %vm1256_vm2, %v10329_v63 }
 0x1d6   : > { %8966 = vmatprep.mubr.msk.bf16.mxu1 %vm9984_vm1, %v9983_v6 }
 0x287   : > { %v1395_v0 = vpop.f32.mrb[4].mxu0 }
 0x288   : > { %v1297_v1 = vpop.f32.mrb[4].mxu1  ;;  %v8926_v2 = vpop.f32.mrb[5].mxu0  ;;  %v1652_v3 = vsel %vm1256_vm2, %v1395_v0, -inf }
 0x289   : > { %v1398_v4 = vpop.f32.mrb[6].mxu0  ;;  %1653 = vmax.xlane.f32.xlu0 %v1652_v3  ;;  %v8914_v5 = vpop.f32.mrb[5].mxu1  ;;  %v1646_v10 = vsel %vm1256_vm2, %v1297_v1, -inf }
 0x28a   : > { %v1300_v7 = vpop.f32.mrb[6].mxu1  ;;  %v8927_v8 = vpop.f32.mrb[7].mxu0 }
 0x28b   : > { %v8915_v9 = vpop.f32.mrb[7].mxu1 }
 0x28d   : > { %1647 = vmax.xlane.f32.xlu0 %v1646_v10 }
 0x290   : > { %v10337_v11 = vpop.f32.mrb[8].mxu1  ;;  %v1493_v12 = vpop.f32.mrb[8].mxu0 }
 0x291   : > { %v8920_v13 = vpop.f32.mrb[9].mxu1  ;;  %v8938_v14 = vpop.f32.mrb[9].mxu0  ;;  %v1658_v16 = vsel %vm1256_vm2, %v1493_v12, -inf  ;;  %v1649_v22 = vsel %vm1256_vm2, %v10337_v11, -inf }
 0x292   : > { %1659 = vmax.xlane.f32.xlu1 %v1658_v16  ;;  %v1349_v17 = vpop.f32.mrb[10].mxu1  ;;  %v1496_v18 = vpop.f32.mrb[10].mxu0 }
 0x293   : > { %v8921_v20 = vpop.f32.mrb[11].mxu1  ;;  %v8939_v21 = vpop.f32.mrb[11].mxu0 }
 0x296   : > { %1650 = vmax.xlane.f32.xlu1 %v1649_v22 }
 0x298   : > { %v10342_v25 = vpop.f32.mrb[12].mxu1  ;;  %v10344_v26 = vpop.f32.mrb[12].mxu0 }
 0x299   : > { %v8932_v27 = vpop.f32.mrb[13].mxu1  ;;  %v8950_v32 = vpop.f32.mrb[13].mxu0  ;;  %v1655_v47 = vsel %vm1256_vm2, %v10342_v25, -inf  ;;  %v1664_v52 = vsel %vm1256_vm2, %v10344_v26, -inf }
 0x29a   : > { %v1447_v33 = vpop.f32.mrb[14].mxu1  ;;  %v1594_v34 = vpop.f32.mrb[14].mxu0 }
 0x29b   : > { %v8933_v35 = vpop.f32.mrb[15].mxu1  ;;  %v8951_v36 = vpop.f32.mrb[15].mxu0 }
 0x2a0   : > { %v10346_v37 = vpop.f32.mrb[16].mxu1 }
 0x2a1   : > { %v8944_v38 = vpop.f32.mrb[17].mxu1  ;;  %v1661_v50 = vsel %vm1256_vm2, %v10346_v37, -inf }
 0x2a2   : > { %v1545_v41 = vpop.f32.mrb[18].mxu1 }
 0x2a3   : > { %1791 = vrot.lane.b32.xlu0 %v10239_v24, %s9986_s10  ;;  %v8945_v42 = vpop.f32.mrb[19].mxu1 }
 0x2a7   : > { %1742 = vrot.lane.b32.xlu1 %v10231_v19, %s9986_s10 }
 0x2a8   : > { %v10352_v43 = vpop.f32.mrb[20].mxu1 }
 0x2a9   : > { %v8956_v44 = vpop.f32.mrb[21].mxu1  ;;  %v1667_v51 = vsel %vm1256_vm2, %v10352_v43, -inf }
 0x2aa   : > { %v1643_v45 = vpop.f32.mrb[22].mxu1 }
 0x2ab   : > { %v8957_v46 = vpop.f32.mrb[23].mxu1 }
 0x2c2   : > { %1656 = vmax.xlane.f32.xlu0 %v1655_v47 }
 0x2c6   : > { %1662 = vmax.xlane.f32.xlu0 %v1661_v50 }
 0x2ca   : > { %1668 = vmax.xlane.f32.xlu0 %v1667_v51 }
 0x2cb   : > { %1665 = vmax.xlane.f32.xlu1 %v1664_v52 }
 0x2dc   : > { %1839 = vrot.lane.b32.xlu1 %v10229_v15, %s9986_s10 }
 0x2e0   : > { %1887 = vrot.lane.b32.xlu1 %v10237_v23, %s9986_s10  ;;  %1935 = vrot.lane.b32.xlu0 %v10247_v28, %s9986_s10 }
 0x2e4   : > { %1983 = vrot.lane.b32.xlu1 %v10253_v29, %s9986_s10 }
 0x316   : > { %v1654_v53 = vpop.xlane.xlu0 %1653 }
 0x317   : > { %v1672_v54 = vsub.f32 %v1395_v0, %v1654_v53 }
 0x319   : > { %v1682_v57 = vmul.f32 1.442695, %v1672_v54 }
 0x31a   : > { %v1648_v58 = vpop.xlane.xlu0 %1647 }
 0x31b   : > { %9717 = vpow2.f32 %v1682_v57  ;;  %v1670_v59 = vsub.f32 %v1297_v1, %v1648_v58 }
 0x31d   : > { %v1678_v61 = vmul.f32 1.442695, %v1670_v59 }
 0x31e   : > { %v1792_v62 = vpop.permute.xlu0 %1791 }
 0x31f   : > { %9719 = vpow2.f32 %v1678_v61  ;;  %v1797_v2 = vsel %vm1747_vm3, %v1792_v62, 0  ;;  %v1660_v3 = vpop.xlane.xlu1 %1659 }
 0x320   : > { %v1674_v4 = vsub.f32 %v1493_v12, %v1660_v3  ;;  %8965 = vmatpush3.bf16.msra.mxu1 %v1797_v2 }
 0x321   : > { %8976 = vmatprep.subr.bf16.mxu1 %v9983_v6 }
 0x322   : > { %v1686_v5 = vmul.f32 1.442695, %v1674_v4 }
 0x323   : > { %v1651_v7 = vpop.xlane.xlu1 %1650 }
 0x324   : > { %9721 = vpow2.f32 %v1686_v5  ;;  %v1671_v0 = vsub.f32 %v10337_v11, %v1651_v7 }
 0x325   : > { %v10373_v8 = vpop.eup %9717 }
 0x326   : > { %v1680_v9 = vmul.f32 1.442695, %v1671_v0  ;;  %v1700_v1 = vsel %vm1256_vm2, %v10373_v8, 0.0 }
 0x327   : > { %1701 = vadd.xlane.f32.xlu1 %v1700_v1  ;;  %v1743_v10 = vpop.permute.xlu1 %1742 }
 0x328   : > { %9723 = vpow2.f32 %v1680_v9  ;;  %v1749_v13 = vsel %vm1747_vm3, %v1743_v10, 0 }
 0x329   : > { %v10378_v12 = vpop.eup %9719  ;;  %8959 = vmatpush3.bf16.msra.mxu0 %v1749_v13 }
 0x32a   : > { %v1694_v14 = vsel %vm1256_vm2, %v10378_v12, 0.0  ;;  %8970 = vmatprep.subr.bf16.mxu0 %v9983_v6 }
 0x32b   : > { %1695 = vadd.xlane.f32.xlu1 %v1694_v14 }
 0x32e   : > { %v10383_v11 = vpop.eup %9721 }
 0x32f   : > { %v1706_v16 = vsel %vm1256_vm2, %v10383_v11, 0.0 }
 0x330   : > { %1707 = vadd.xlane.f32.xlu1 %v1706_v16 }
 0x332   : > { %v10387_v17 = vpop.eup %9723 }
 0x333   : > { %v1697_v18 = vsel %vm1256_vm2, %v10387_v17, 0.0 }
 0x334   : > { %1698 = vadd.xlane.f32.xlu0 %v1697_v18 }
 0x34f   : > { %v1657_v20 = vpop.xlane.xlu0 %1656 }
 0x350   : > { %v1673_v21 = vsub.f32 %v10342_v25, %v1657_v20 }
 0x352   : > { %v1684_v22 = vmul.f32 1.442695, %v1673_v21 }
 0x353   : > { %v1663_v27 = vpop.xlane.xlu0 %1662 }
 0x354   : > { %9725 = vpow2.f32 %v1684_v22  ;;  %v1675_v32 = vsub.f32 %v10346_v37, %v1663_v27 }
 0x356   : > { %v1688_v33 = vmul.f32 1.442695, %v1675_v32 }
 0x358   : > { %9727 = vpow2.f32 %v1688_v33  ;;  %v1666_v34 = vpop.xlane.xlu1 %1665 }
 0x359   : > { %v1676_v35 = vsub.f32 %v10344_v26, %v1666_v34  ;;  %v1669_v26 = vpop.xlane.xlu0 %1668 }
 0x35a   : > { %v1677_v45 = vsub.f32 %v10352_v43, %v1669_v26 }
 0x35b   : > { %v1690_v36 = vmul.f32 1.442695, %v1676_v35 }
 0x35c   : > { %v1692_v46 = vmul.f32 1.442695, %v1677_v45  ;;  %v1840_v50 = vpop.permute.xlu1 %1839 }
 0x35d   : > { %9729 = vpow2.f32 %v1690_v36  ;;  %v1936_v57 = vpop.permute.xlu0 %1935  ;;  %v1845_v4 = vsel %vm1747_vm3, %v1840_v50, 0 }
 0x35e   : > { %v10394_v38 = vpop.eup %9725  ;;  %9731 = vpow2.f32 %v1692_v46  ;;  %v1941_v13 = vsel %vm1747_vm3, %v1936_v57, 0 }
 0x35f   : > { %v1703_v41 = vsel %vm1256_vm2, %v10394_v38, 0.0 }
 0x360   : > { %1704 = vadd.xlane.f32.xlu0 %v1703_v41  ;;  %v1888_v51 = vpop.permute.xlu1 %1887 }
 0x362   : > { %v10398_v42 = vpop.eup %9727 }
 0x363   : > { %v1709_v25 = vsel %vm1256_vm2, %v10398_v42, 0.0 }
 0x364   : > { %1710 = vadd.xlane.f32.xlu0 %v1709_v25  ;;  %v1984_v52 = vpop.permute.xlu1 %1983 }
 0x365   : > { %v1989_v33 = vsel %vm1747_vm3, %v1984_v52, 0 }
 0x367   : > { %v10402_v37 = vpop.eup %9729 }
 0x368   : > { %v1712_v44 = vsel %vm1256_vm2, %v10402_v37, 0.0  ;;  %v10423_v47 = vpop.eup %9731 }
 0x369   : > { %1713 = vadd.xlane.f32.xlu1 %v1712_v44  ;;  %v1715_v43 = vsel %vm1256_vm2, %v10423_v47, 0.0 }
 0x37a   : > { %2079 = vrot.lane.b32.xlu1 %v10257_v30, %s9986_s10  ;;  %2031 = vrot.lane.b32.xlu0 %v10261_v31, %s9986_s10 }
 0x37e   : > { %2183 = vrot.lane.b32.xlu1 %v10239_v24, %s9987_s11 }
 0x382   : > { %2181 = vrot.lane.b32.xlu1 %v10289_v48, %s9988_s16 }
 0x386   : > { %2283 = vrot.lane.b32.xlu1 %v10237_v23, %s9987_s11 }
 0x38a   : > { %2281 = vrot.lane.b32.xlu1 %v10305_v55, %s9988_s16 }
 0x38e   : > { %2383 = vrot.lane.b32.xlu1 %v10253_v29, %s9987_s11 }
 0x392   : > { %2381 = vrot.lane.b32.xlu1 %v10320_v60, %s9988_s16 }
 0x396   : > { %2483 = vrot.lane.b32.xlu1 %v10257_v30, %s9987_s11 }
 0x399   : > { %1716 = vadd.xlane.f32.xlu0 %v1715_v43 }
 0x39a   : > { %2481 = vrot.lane.b32.xlu1 %v10329_v63, %s9988_s16 }
 0x39e   : > { %2627 = vrot.lane.b32.xlu1 %v10231_v19, %s9989_s18 }
 0x3af   : > { %2133 = vrot.lane.b32.xlu0 %v10231_v19, %s9987_s11 }
 0x3b3   : > { %2131 = vrot.lane.b32.xlu0 %v10275_v40, %s9988_s16 }
 0x3b4   : > { %v1702_v53 = vpop.xlane.xlu1 %1701 }
 0x3b7   : > { %2233 = vrot.lane.b32.xlu0 %v10229_v15, %s9987_s11 }
 0x3b8   : > { %v1696_v54 = vpop.xlane.xlu1 %1695 }
 0x3b9   : > { %9733 = vrcp.f32 %v1696_v54 }
 0x3ba   : > { %9735 = vrcp.f32 %v1702_v53 }
 0x3bb   : > { %2231 = vrot.lane.b32.xlu0 %v10273_v39, %s9988_s16 }
 0x3bd   : > { %v1708_v59 = vpop.xlane.xlu1 %1707 }
 0x3bf   : > { %2333 = vrot.lane.b32.xlu0 %v10247_v28, %s9987_s11 }
 0x3c1   : > { %v1699_v58 = vpop.xlane.xlu0 %1698 }
 0x3c2   : > { %9737 = vrcp.f32 %v1699_v58 }
 0x3c3   : > { %v9734_v61 = vpop.eup %9733  ;;  %2331 = vrot.lane.b32.xlu0 %v10291_v49, %s9988_s16  ;;  %9739 = vrcp.f32 %v1708_v59 }
 0x3c4   : > { %v1726_v62 = vmul.f32 %v9734_v61, %v10378_v12  ;;  %v9736_v3 = vpop.eup %9735  ;;  %v1893_v12 = vsel %vm1747_vm3, %v1888_v51, 0 }
 0x3c5   : > { %v1728_v5 = vmul.f32 %v9736_v3, %v10373_v8 }
 0x3c6   : > { %v1734_v2 = vpack.c.bf16 %v1726_v62, %v1726_v62 }
 0x3c7   : > { %2433 = vrot.lane.b32.xlu0 %v10261_v31, %s9987_s11  ;;  %v1736_v9 = vpack.c.bf16 %v1728_v5, %v1728_v5 }
 0x3c8   : > { %8961 = vmatmul.mubr.msk.bf16.vlgmr.msra.gmra.mrb[16].mxu0 %vm1256_vm2, %v1734_v2 }
 0x3c9   : > { %8971 = vmatpush3.bf16.msra.mxu0 %v1845_v4  ;;  %8972 = vmatprep.mubr.msk.bf16.mxu0 %vm9984_vm1, %v9983_v6 }
 0x3ca   : > { %8982 = vmatprep.subr.bf16.mxu0 %v9983_v6 }
 0x3cb   : > { %2431 = vrot.lane.b32.xlu0 %v10307_v56, %s9988_s16 }
 0x3cc   : > { %v9738_v7 = vpop.eup %9737 }
 0x3cd   : > { %v1727_v0 = vmul.f32 %v9738_v7, %v10387_v17  ;;  %v9740_v1 = vpop.eup %9739 }
 0x3ce   : > { %v1730_v8 = vmul.f32 %v9740_v1, %v10383_v11 }
 0x3cf   : > { %v1735_v10 = vpack.c.bf16 %v1727_v0, %v1727_v0 }
 0x3d0   : > { %8973 = vmatmul.mubr.msk.bf16.vlgmr.msra.gmra.mrb[20].mxu0 %vm1256_vm2, %v1736_v9  ;;  %v1738_v14 = vpack.c.bf16 %v1730_v8, %v1730_v8 }
 0x3d1   : > { %8983 = vmatpush3.bf16.msra.mxu0 %v1941_v13  ;;  %8967 = vmatmul.mubr.msk.bf16.vlgmr.msra.gmra.mrb[24].mxu1 %vm1256_vm2, %v1735_v10 }
 0x3d2   : > { %8977 = vmatpush3.bf16.msra.mxu1 %v1893_v12  ;;  %8984 = vmatprep.mubr.msk.bf16.mxu0 %vm9984_vm1, %v9983_v6 }
 0x3d3   : > { %8994 = vmatprep.subr.bf16.mxu0 %v9983_v6  ;;  %8978 = vmatprep.mubr.msk.bf16.mxu1 %vm9984_vm1, %v9983_v6 }
 0x3d4   : > { %8988 = vmatprep.subr.bf16.mxu1 %v9983_v6 }
 0x3d8   : > { %8985 = vmatmul.mubr.msk.bf16.vlgmr.msra.gmra.mrb[24].mxu0 %vm1256_vm2, %v1738_v14 }
 0x3d9   : > { %8996 = vmatprep.mubr.msk.bf16.mxu0 %vm9984_vm1, %v9983_v6 }
 0x3ed   : > { %v1705_v16 = vpop.xlane.xlu0 %1704 }
 0x3ee   : > { %9741 = vrcp.f32 %v1705_v16 }
 0x3f1   : > { %v1711_v17 = vpop.xlane.xlu0 %1710 }
 0x3f2   : > { %9743 = vrcp.f32 %v1711_v17 }
 0x3f5   : > { %v2032_v18 = vpop.permute.xlu0 %2031 }
 0x3f6   : > { %v2037_v11 = vsel %vm1747_vm3, %v2032_v18, 0  ;;  %v1714_v20 = vpop.xlane.xlu1 %1713 }
 0x3f7   : > { %9745 = vrcp.f32 %v1714_v20  ;;  %8995 = vmatpush3.bf16.msra.mxu0 %v2037_v11 }
 0x3f8   : > { %v9742_v21 = vpop.eup %9741  ;;  %9006 = vmatprep.subr.bf16.mxu0 %v9983_v6 }
 0x3f9   : > { %v1729_v22 = vmul.f32 %v9742_v21, %v10394_v38 }
 0x3fa   : > { %v2080_v36 = vpop.permute.xlu1 %2079 }
 0x3fb   : > { %v1737_v27 = vpack.c.bf16 %v1729_v22, %v1729_v22  ;;  %v2085_v44 = vsel %vm1747_vm3, %v2080_v36, 0 }
 0x3fc   : > { %v9744_v32 = vpop.eup %9743 }
 0x3fd   : > { %8979 = vmatmul.mubr.msk.bf16.vlgmr.msra.gmra.mrb[28].mxu1 %vm1256_vm2, %v1737_v27  ;;  %v1731_v34 = vmul.f32 %v9744_v32, %v10398_v42 }
 0x3fe   : > { %8989 = vmatpush3.bf16.msra.mxu1 %v1989_v33  ;;  %8990 = vmatprep.mubr.msk.bf16.mxu1 %vm9984_vm1, %v9983_v6  ;;  %v2184_v42 = vpop.permute.xlu1 %2183 }
 0x3ff   : > { %9000 = vmatprep.subr.bf16.mxu1 %v9983_v6  ;;  %v1739_v25 = vpack.c.bf16 %v1731_v34, %v1731_v34  ;;  %v2189_v61 = vsel %vm1256_vm2, %v2184_v42, 0 }
 0x401   : > { %v9746_v35 = vpop.eup %9745 }
 0x402   : > { %v1732_v41 = vmul.f32 %v9746_v35, %v10402_v37  ;;  %v2182_v26 = vpop.permute.xlu1 %2181 }
 0x404   : > { %v1740_v38 = vpack.c.bf16 %v1732_v41, %v1732_v41 }
 0x405   : > { %8991 = vmatmul.mubr.msk.bf16.vlgmr.msra.gmra.mrb[32].mxu1 %vm1256_vm2, %v1739_v25 }
 0x406   : > { %9001 = vmatpush3.bf16.msra.mxu1 %v2085_v44  ;;  %8997 = vmatmul.mubr.msk.bf16.vlgmr.msra.gmra.mrb[28].mxu0 %vm1256_vm2, %v1740_v38  ;;  %v2284_v37 = vpop.permute.xlu1 %2283 }
 0x407   : > { %9008 = vmatprep.mubr.msk.bf16.mxu0 %vm9984_vm1, %v9983_v6  ;;  %9002 = vmatprep.mubr.msk.bf16.mxu1 %vm9984_vm1, %v9983_v6  ;;  %v2289_v5 = vsel %vm1256_vm2, %v2284_v37, 0 }
 0x408   : > { %9012 = vmatprep.subr.bf16.mxu1 %v9983_v6 }
 0x40a   : > { %v2282_v46 = vpop.permute.xlu1 %2281 }
 0x40e   : > { %v2384_v52 = vpop.permute.xlu1 %2383 }
 0x40f   : > { %v2389_v10 = vsel %vm1256_vm2, %v2384_v52, 0 }
 0x412   : > { %v2382_v62 = vpop.permute.xlu1 %2381 }
 0x416   : > { %v2484_v4 = vpop.permute.xlu1 %2483 }
 0x417   : > { %v2489_v14 = vsel %vm1256_vm2, %v2484_v4, 0 }
 0x41a   : > { %v2482_v0 = vpop.permute.xlu1 %2481 }
 0x41e   : > { %v2628_v13 = vpop.permute.xlu1 %2627 }
 0x41f   : > { %v2633_v8 = vsel %vm1747_vm3, %v2628_v13, 0 }
 0x426   : > { %v1717_v45 = vpop.xlane.xlu0 %1716 }
 0x427   : > { %9747 = vrcp.f32 %v1717_v45 }
 0x42a   : > { %v2134_v43 = vpop.permute.xlu0 %2133 }
 0x42b   : > { %v2139_v50 = vsel %vm1256_vm2, %v2134_v43, 0 }
 0x42c   : > { %9007 = vmatpush3.bf16.xpose.msra.mxu0 %v2139_v50 }
 0x42d   : > { %9018 = vmatprep.subr.bf16.mxu0 %v9983_v6 }
 0x42e   : > { %v2132_v51 = vpop.permute.xlu0 %2131 }
 0x431   : > { %v9748_v53 = vpop.eup %9747 }
 0x432   : > { %v2234_v54 = vpop.permute.xlu0 %2233  ;;  %v1733_v57 = vmul.f32 %v9748_v53, %v10423_v47 }
 0x433   : > { %v2239_v58 = vsel %vm1256_vm2, %v2234_v54, 0  ;;  %9009 = vmatmul.mubr.msk.bf16.vlgmr.msra.gmra.mrb[32].mxu0 %vm1256_vm2, %v2132_v51 }
 0x434   : > { %9019 = vmatpush3.bf16.xpose.msra.mxu0 %v2239_v58  ;;  %v1741_v59 = vpack.c.bf16 %v1733_v57, %v1733_v57  ;;  %9020 = vmatprep.mubr.msk.bf16.mxu0 %vm9984_vm1, %v9983_v6 }
 0x435   : > { %9030 = vmatprep.subr.bf16.mxu0 %v9983_v6 }
 0x436   : > { %9003 = vmatmul.mubr.msk.bf16.vlgmr.msra.gmra.mrb[36].mxu1 %vm1256_vm2, %v1741_v59  ;;  %v2232_v2 = vpop.permute.xlu0 %2231 }
 0x437   : > { %9013 = vmatpush3.bf16.xpose.msra.mxu1 %v2189_v61  ;;  %9014 = vmatprep.mubr.msk.bf16.mxu1 %vm9984_vm1, %v9983_v6 }
 0x438   : > { %9024 = vmatprep.subr.bf16.mxu1 %v9983_v6 }
 0x43a   : > { %v2334_v47 = vpop.permute.xlu0 %2333 }
 0x43b   : > { %v2339_v3 = vsel %vm1256_vm2, %v2334_v47, 0  ;;  %9021 = vmatmul.mubr.msk.bf16.vlgmr.msra.gmra.mrb[36].mxu0 %vm1256_vm2, %v2232_v2 }
 0x43c   : > { %9031 = vmatpush3.bf16.xpose.msra.mxu0 %v2339_v3  ;;  %9032 = vmatprep.mubr.msk.bf16.mxu0 %vm9984_vm1, %v9983_v6 }
 0x43d   : > { %9042 = vmatprep.subr.bf16.mxu0 %v9983_v6 }
 0x43e   : > { %9015 = vmatmul.mubr.msk.bf16.vlgmr.msra.gmra.mrb[40].mxu1 %vm1256_vm2, %v2182_v26  ;;  %v2332_v7 = vpop.permute.xlu0 %2331 }
 0x43f   : > { %9025 = vmatpush3.bf16.xpose.msra.mxu1 %v2289_v5  ;;  %9026 = vmatprep.mubr.msk.bf16.mxu1 %vm9984_vm1, %v9983_v6 }
 0x440   : > { %9036 = vmatprep.subr.bf16.mxu1 %v9983_v6 }
 0x442   : > { %v2434_v9 = vpop.permute.xlu0 %2433 }
 0x443   : > { %v2439_v1 = vsel %vm1256_vm2, %v2434_v9, 0  ;;  %9033 = vmatmul.mubr.msk.bf16.vlgmr.msra.gmra.mrb[40].mxu0 %vm1256_vm2, %v2332_v7 }
 0x444   : > { %9043 = vmatpush3.bf16.xpose.msra.mxu0 %v2439_v1  ;;  %9044 = vmatprep.mubr.msk.bf16.mxu0 %vm9984_vm1, %v9983_v6 }
 0x445   : > { %9054 = vmatprep.subr.bf16.mxu0 %v9983_v6 }
 0x446   : > { %9027 = vmatmul.mubr.msk.bf16.vlgmr.msra.gmra.mrb[44].mxu1 %vm1256_vm2, %v2282_v46  ;;  %v2432_v12 = vpop.permute.xlu0 %2431 }
 0x447   : > { %9037 = vmatpush3.bf16.xpose.msra.mxu1 %v2389_v10  ;;  %9038 = vmatprep.mubr.msk.bf16.mxu1 %vm9984_vm1, %v9983_v6 }
 0x448   : > { %9048 = vmatprep.subr.bf16.mxu1 %v9983_v6 }
 0x44b   : > { %9045 = vmatmul.mubr.msk.bf16.vlgmr.msra.gmra.mrb[44].mxu0 %vm1256_vm2, %v2432_v12 }
 0x44c   : > { %9055 = vmatpush3.bf16.msra.mxu0 %v2633_v8  ;;  %9056 = vmatprep.mubr.msk.bf16.mxu0 %vm9984_vm1, %v9983_v6 }
 0x44d   : > { %9066 = vmatprep.subr.bf16.mxu0 %v9983_v6 }
 0x44e   : > { %9039 = vmatmul.mubr.msk.bf16.vlgmr.msra.gmra.mrb[48].mxu1 %vm1256_vm2, %v2382_v62 }
 0x44f   : > { %9049 = vmatpush3.bf16.xpose.msra.mxu1 %v2489_v14  ;;  %9050 = vmatprep.mubr.msk.bf16.mxu1 %vm9984_vm1, %v9983_v6 }
 0x450   : > { %9060 = vmatprep.subr.bf16.mxu1 %v9983_v6 }
 0x456   : > { %9051 = vmatmul.mubr.msk.bf16.vlgmr.msra.gmra.mrb[52].mxu1 %vm1256_vm2, %v2482_v0 }
 0x457   : > { %9062 = vmatprep.mubr.msk.bf16.mxu1 %vm9984_vm1, %v9983_v6 }
 0x49b   : > { %v10535_v16 = vpop.f32.mrb[16].mxu0 }
 0x49c   : > { %v8962_v17 = vpop.f32.mrb[17].mxu0 }
 0x49d   : > { %v1788_v18 = vpop.f32.mrb[18].mxu0 }
 0x49e   : > { %v8963_v11 = vpop.f32.mrb[19].mxu0 }
 0x4a3   : > { %v10537_v20 = vpop.f32.mrb[20].mxu0 }
 0x4a4   : > { %v10539_v21 = vpop.f32.mrb[24].mxu1  ;;  %v8974_v22 = vpop.f32.mrb[21].mxu0 }
 0x4a5   : > { %v2127_v27 = vpack.c.bf16 %v10539_v21, %v10535_v16  ;;  %v8968_v32 = vpop.f32.mrb[25].mxu1  ;;  %v1884_v33 = vpop.f32.mrb[22].mxu0 }
 0x4a6   : > { %v1836_v34 = vpop.f32.mrb[26].mxu1  ;;  %v8975_v35 = vpop.f32.mrb[23].mxu0 }
 0x4a7   : > { %v8969_v36 = vpop.f32.mrb[27].mxu1 }
 0x4ab   : > { %v10543_v41 = vpop.f32.mrb[24].mxu0 }
 0x4ac   : > { %v8986_v25 = vpop.f32.mrb[25].mxu0 }
 0x4ad   : > { %v1980_v38 = vpop.f32.mrb[26].mxu0 }
 0x4ae   : > { %v8987_v44 = vpop.f32.mrb[27].mxu0 }
 0x4d0   : > { %v10545_v42 = vpop.f32.mrb[28].mxu1 }
 0x4d1   : > { %v2128_v26 = vpack.c.bf16 %v10545_v42, %v10537_v20  ;;  %v8980_v37 = vpop.f32.mrb[29].mxu1 }
 0x4d2   : > { %v1932_v45 = vpop.f32.mrb[30].mxu1 }
 0x4d3   : > { %v8981_v46 = vpop.f32.mrb[31].mxu1 }
 0x4d8   : > { %v10549_v43 = vpop.f32.mrb[32].mxu1 }
 0x4d9   : > { %v2129_v50 = vpack.c.bf16 %v10549_v43, %v10543_v41  ;;  %v8992_v51 = vpop.f32.mrb[33].mxu1  ;;  %v10553_v52 = vpop.f32.mrb[28].mxu0 }
 0x4da   : > { %v2028_v53 = vpop.f32.mrb[34].mxu1  ;;  %v8998_v54 = vpop.f32.mrb[29].mxu0 }
 0x4db   : > { %v8993_v57 = vpop.f32.mrb[35].mxu1  ;;  %v2076_v58 = vpop.f32.mrb[30].mxu0 }
 0x4dc   : > { %v8999_v59 = vpop.f32.mrb[31].mxu0 }
 0x506   : > { %v2175_v61 = vpop.f32.mrb[32].mxu0 }
 0x507   : > { %v9010_v62 = vpop.f32.mrb[33].mxu0  ;;  %v2531_v2 = vsel %vm1256_vm2, %v2175_v61, -inf }
 0x508   : > { %2532 = vmax.xlane.f32.xlu0 %v2531_v2  ;;  %v2178_v47 = vpop.f32.mrb[34].mxu0 }
 0x509   : > { %v10556_v3 = vpop.f32.mrb[36].mxu1  ;;  %v9011_v4 = vpop.f32.mrb[35].mxu0 }
 0x50a   : > { %v2130_v5 = vpack.c.bf16 %v10556_v3, %v10553_v52  ;;  %v9004_v7 = vpop.f32.mrb[37].mxu1 }
 0x50b   : > { %v2124_v0 = vpop.f32.mrb[38].mxu1 }
 0x50c   : > { %v9005_v9 = vpop.f32.mrb[39].mxu1 }
 0x50e   : > { %v2275_v1 = vpop.f32.mrb[36].mxu0 }
 0x50f   : > { %v9022_v10 = vpop.f32.mrb[37].mxu0  ;;  %v2537_v13 = vsel %vm1256_vm2, %v2275_v1, -inf }
 0x510   : > { %2538 = vmax.xlane.f32.xlu0 %v2537_v13  ;;  %v2278_v12 = vpop.f32.mrb[38].mxu0 }
 0x511   : > { %v2225_v8 = vpop.f32.mrb[40].mxu1  ;;  %v9023_v14 = vpop.f32.mrb[39].mxu0 }
 0x512   : > { %v9016_v17 = vpop.f32.mrb[41].mxu1  ;;  %v2534_v18 = vsel %vm1256_vm2, %v2225_v8, -inf }
 0x513   : > { %2535 = vmax.xlane.f32.xlu1 %v2534_v18  ;;  %v2228_v11 = vpop.f32.mrb[42].mxu1 }
 0x514   : > { %v9017_v22 = vpop.f32.mrb[43].mxu1 }
 0x516   : > { %v10562_v32 = vpop.f32.mrb[40].mxu0 }
 0x517   : > { %v9034_v33 = vpop.f32.mrb[41].mxu0  ;;  %v2543_v34 = vsel %vm1256_vm2, %v10562_v32, -inf }
 0x518   : > { %v2378_v35 = vpop.f32.mrb[42].mxu0  ;;  %2544 = vmax.xlane.f32.xlu1 %v2543_v34 }
 0x519   : > { %v2325_v36 = vpop.f32.mrb[44].mxu1  ;;  %v9035_v25 = vpop.f32.mrb[43].mxu0 }
 0x51a   : > { %v9028_v38 = vpop.f32.mrb[45].mxu1  ;;  %v2540_v44 = vsel %vm1256_vm2, %v2325_v36, -inf }
 0x51b   : > { %2541 = vmax.xlane.f32.xlu0 %v2540_v44  ;;  %v2328_v37 = vpop.f32.mrb[46].mxu1 }
 0x51c   : > { %v9029_v45 = vpop.f32.mrb[47].mxu1 }
 0x51e   : > { %v10567_v46 = vpop.f32.mrb[44].mxu0 }
 0x51f   : > { %v9046_v51 = vpop.f32.mrb[45].mxu0  ;;  %v2549_v53 = vsel %vm1256_vm2, %v10567_v46, -inf }
 0x520   : > { %v2478_v54 = vpop.f32.mrb[46].mxu0  ;;  %2550 = vmax.xlane.f32.xlu1 %v2549_v53 }
 0x521   : > { %v2425_v57 = vpop.f32.mrb[48].mxu1  ;;  %v9047_v58 = vpop.f32.mrb[47].mxu0 }
 0x522   : > { %v9040_v59 = vpop.f32.mrb[49].mxu1  ;;  %v2546_v62 = vsel %vm1256_vm2, %v2425_v57, -inf }
 0x523   : > { %2547 = vmax.xlane.f32.xlu0 %v2546_v62  ;;  %v2428_v2 = vpop.f32.mrb[50].mxu1 }
 0x524   : > { %v9041_v47 = vpop.f32.mrb[51].mxu1 }
 0x529   : > { %v2525_v4 = vpop.f32.mrb[52].mxu1 }
 0x52a   : > { %v9052_v7 = vpop.f32.mrb[53].mxu1  ;;  %v2552_v0 = vsel %vm1256_vm2, %v2525_v4, -inf }
 0x52b   : > { %2553 = vmax.xlane.f32.xlu0 %v2552_v0  ;;  %v2528_v9 = vpop.f32.mrb[54].mxu1 }
 0x52c   : > { %v9053_v10 = vpop.f32.mrb[55].mxu1 }
 0x531   : > { %2723 = vrot.lane.b32.xlu1 %v10229_v15, %s9989_s18 }
 0x535   : > { %2771 = vrot.lane.b32.xlu1 %v10237_v23, %s9989_s18 }
 0x541   : > { %2675 = vrot.lane.b32.xlu0 %v10239_v24, %s9989_s18 }
 0x595   : > { %v2533_v13 = vpop.xlane.xlu0 %2532 }
 0x596   : > { %v2555_v12 = vsub.f32 %v2175_v61, %v2533_v13 }
 0x598   : > { %v2563_v14 = vmul.f32 1.442695, %v2555_v12 }
 0x59a   : > { %9749 = vpow2.f32 %v2563_v14 }
 0x59d   : > { %v2539_v17 = vpop.xlane.xlu0 %2538 }
 0x59e   : > { %v2557_v18 = vsub.f32 %v2275_v1, %v2539_v17 }
 0x5a0   : > { %v2567_v11 = vmul.f32 1.442695, %v2557_v18  ;;  %v2536_v22 = vpop.xlane.xlu1 %2535 }
 0x5a1   : > { %v2556_v33 = vsub.f32 %v2225_v8, %v2536_v22 }
 0x5a2   : > { %9751 = vpow2.f32 %v2567_v11 }
 0x5a3   : > { %v2565_v34 = vmul.f32 1.442695, %v2556_v33 }
 0x5a4   : > { %v10579_v35 = vpop.eup %9749 }
 0x5a5   : > { %9753 = vpow2.f32 %v2565_v34  ;;  %v2579_v25 = vsel %vm1256_vm2, %v10579_v35, 0.0  ;;  %v2545_v62 = vpop.xlane.xlu1 %2544 }
 0x5a6   : > { %2580 = vadd.xlane.f32.xlu1 %v2579_v25  ;;  %v2559_v2 = vsub.f32 %v10562_v32, %v2545_v62 }
 0x5a8   : > { %v2542_v38 = vpop.xlane.xlu0 %2541  ;;  %v2571_v7 = vmul.f32 1.442695, %v2559_v2 }
 0x5a9   : > { %v2558_v44 = vsub.f32 %v2325_v36, %v2542_v38 }
 0x5ab   : > { %v2569_v37 = vmul.f32 1.442695, %v2558_v44 }
 0x5ac   : > { %v10583_v61 = vpop.eup %9751 }
 0x5ad   : > { %9755 = vpow2.f32 %v2569_v37  ;;  %v2585_v1 = vsel %vm1256_vm2, %v10583_v61, 0.0  ;;  %v2551_v47 = vpop.xlane.xlu1 %2550 }
 0x5ae   : > { %2586 = vadd.xlane.f32.xlu1 %v2585_v1  ;;  %v2561_v0 = vsub.f32 %v10567_v46, %v2551_v47  ;;  %9757 = vpow2.f32 %v2571_v7 }
 0x5af   : > { %v10587_v8 = vpop.eup %9753 }
 0x5b0   : > { %v2582_v45 = vsel %vm1256_vm2, %v10587_v8, 0.0  ;;  %v2548_v51 = vpop.xlane.xlu0 %2547  ;;  %v2575_v9 = vmul.f32 1.442695, %v2561_v0 }
 0x5b1   : > { %2583 = vadd.xlane.f32.xlu0 %v2582_v45  ;;  %v2560_v10 = vsub.f32 %v2425_v57, %v2548_v51  ;;  %v2724_v33 = vpop.permute.xlu1 %2723 }
 0x5b2   : > { %9759 = vpow2.f32 %v2575_v9  ;;  %v2729_v51 = vsel %vm1747_vm3, %v2724_v33, 0 }
 0x5b3   : > { %v2573_v13 = vmul.f32 1.442695, %v2560_v10 }
 0x5b5   : > { %9761 = vpow2.f32 %v2573_v13  ;;  %v2772_v34 = vpop.permute.xlu1 %2771 }
 0x5b6   : > { %v2777_v0 = vsel %vm1747_vm3, %v2772_v34, 0 }
 0x5b7   : > { %v10591_v53 = vpop.eup %9755 }
 0x5b8   : > { %v2554_v54 = vpop.xlane.xlu0 %2553  ;;  %v2588_v36 = vsel %vm1256_vm2, %v10591_v53, 0.0  ;;  %v10603_v14 = vpop.eup %9757 }
 0x5b9   : > { %2589 = vadd.xlane.f32.xlu0 %v2588_v36  ;;  %v2562_v12 = vsub.f32 %v2525_v4, %v2554_v54  ;;  %v2591_v32 = vsel %vm1256_vm2, %v10603_v14, 0.0 }
 0x5bb   : > { %v2577_v17 = vmul.f32 1.442695, %v2562_v12 }
 0x5bc   : > { %v2676_v58 = vpop.permute.xlu0 %2675  ;;  %v10607_v18 = vpop.eup %9759 }
 0x5bd   : > { %v2681_v59 = vsel %vm1747_vm3, %v2676_v58, 0  ;;  %9763 = vpow2.f32 %v2577_v17  ;;  %v2597_v46 = vsel %vm1256_vm2, %v10607_v18, 0.0 }
 0x5be   : > { %9061 = vmatpush3.bf16.msra.mxu1 %v2681_v59 }
 0x5bf   : > { %2867 = vrot.lane.b32.xlu1 %v10253_v29, %s9989_s18  ;;  %9072 = vmatprep.subr.bf16.mxu1 %v9983_v6  ;;  %v10611_v11 = vpop.eup %9761 }
 0x5c0   : > { %v2594_v57 = vsel %vm1256_vm2, %v10611_v11, 0.0 }
 0x5c7   : > { %v10615_v4 = vpop.eup %9763 }
 0x5c8   : > { %v2600_v22 = vsel %vm1256_vm2, %v10615_v4, 0.0 }
 0x5cf   : > { %2819 = vrot.lane.b32.xlu0 %v10247_v28, %s9989_s18 }
 0x5e3   : > { %2592 = vadd.xlane.f32.xlu1 %v2591_v32 }
 0x5e7   : > { %2598 = vadd.xlane.f32.xlu1 %v2597_v46 }
 0x5ee   : > { %2595 = vadd.xlane.f32.xlu0 %v2594_v57 }
 0x5f2   : > { %2601 = vadd.xlane.f32.xlu0 %v2600_v22 }
 0x5f8   : > { %2963 = vrot.lane.b32.xlu1 %v10257_v30, %s9989_s18 }
 0x5fc   : > { %3175 = vrot.lane.b32.xlu1 %v10275_v40, %s9990_s22 }
 0x600   : > { %3225 = vrot.lane.b32.xlu1 %v10289_v48, %s9990_s22 }
 0x604   : > { %3275 = vrot.lane.b32.xlu1 %v10273_v39, %s9990_s22 }
 0x608   : > { %3325 = vrot.lane.b32.xlu1 %v10305_v55, %s9990_s22  ;;  %2915 = vrot.lane.b32.xlu0 %v10261_v31, %s9989_s18 }
 0x60c   : > { %3427 = vrot.lane.b32.xlu1 %v10253_v29, %s9991_s0  ;;  %3177 = vrot.lane.b32.xlu0 %v10231_v19, %s9991_s0 }
 0x610   : > { %3425 = vrot.lane.b32.xlu1 %v10320_v60, %s9990_s22  ;;  %3227 = vrot.lane.b32.xlu0 %v10239_v24, %s9991_s0 }
 0x614   : > { %3527 = vrot.lane.b32.xlu1 %v10257_v30, %s9991_s0  ;;  %3277 = vrot.lane.b32.xlu0 %v10229_v15, %s9991_s0 }
 0x618   : > { %3525 = vrot.lane.b32.xlu1 %v10329_v63, %s9990_s22  ;;  %3327 = vrot.lane.b32.xlu0 %v10237_v23, %s9991_s0 }
 0x61c   : > { %3377 = vrot.lane.b32.xlu0 %v10247_v28, %s9991_s0 }
 0x620   : > { %3375 = vrot.lane.b32.xlu0 %v10291_v49, %s9990_s22 }
 0x624   : > { %3477 = vrot.lane.b32.xlu0 %v10261_v31, %s9991_s0 }
 0x628   : > { %3475 = vrot.lane.b32.xlu0 %v10307_v56, %s9990_s22 }
 0x633   : > { %v2581_v25 = vpop.xlane.xlu1 %2580 }
 0x634   : > { %9765 = vrcp.f32 %v2581_v25 }
 0x63b   : > { %v2587_v38 = vpop.xlane.xlu1 %2586 }
 0x63c   : > { %9767 = vrcp.f32 %v2587_v38 }
 0x63e   : > { %v9766_v44 = vpop.eup %9765  ;;  %v2584_v37 = vpop.xlane.xlu0 %2583 }
 0x63f   : > { %9769 = vrcp.f32 %v2584_v37  ;;  %v2611_v1 = vmul.f32 %v9766_v44, %v10579_v35  ;;  %v2868_v9 = vpop.permute.xlu1 %2867 }
 0x640   : > { %v2873_v13 = vsel %vm1747_vm3, %v2868_v9, 0 }
 0x641   : > { %v2619_v45 = vpack.c.bf16 %v2611_v1, %v2611_v1 }
 0x643   : > { %9057 = vmatmul.mubr.msk.bf16.vlgmr.msra.gmra.mrb[48].mxu0 %vm1256_vm2, %v2619_v45 }
 0x644   : > { %9067 = vmatpush3.bf16.msra.mxu0 %v2729_v51  ;;  %9068 = vmatprep.mubr.msk.bf16.mxu0 %vm9984_vm1, %v9983_v6 }
 0x645   : > { %9078 = vmatprep.subr.bf16.mxu0 %v9983_v6 }
 0x646   : > { %v9768_v54 = vpop.eup %9767  ;;  %v2590_v36 = vpop.xlane.xlu0 %2589 }
 0x647   : > { %9771 = vrcp.f32 %v2590_v36  ;;  %v2613_v58 = vmul.f32 %v9768_v54, %v10583_v61 }
 0x649   : > { %v9770_v59 = vpop.eup %9769  ;;  %v2621_v62 = vpack.c.bf16 %v2613_v58, %v2613_v58 }
 0x64a   : > { %v2820_v2 = vpop.permute.xlu0 %2819  ;;  %v2612_v35 = vmul.f32 %v9770_v59, %v10587_v8 }
 0x64b   : > { %v2825_v47 = vsel %vm1747_vm3, %v2820_v2, 0  ;;  %9069 = vmatmul.mubr.msk.bf16.vlgmr.msra.gmra.mrb[52].mxu0 %vm1256_vm2, %v2621_v62 }
 0x64c   : > { %9079 = vmatpush3.bf16.msra.mxu0 %v2825_v47  ;;  %v2620_v7 = vpack.c.bf16 %v2612_v35, %v2612_v35  ;;  %9080 = vmatprep.mubr.msk.bf16.mxu0 %vm9984_vm1, %v9983_v6 }
 0x64d   : > { %9090 = vmatprep.subr.bf16.mxu0 %v9983_v6 }
 0x64e   : > { %9063 = vmatmul.mubr.msk.bf16.vlgmr.msra.gmra.mrb[56].mxu1 %vm1256_vm2, %v2620_v7 }
 0x64f   : > { %9073 = vmatpush3.bf16.msra.mxu1 %v2777_v0  ;;  %9074 = vmatprep.mubr.msk.bf16.mxu1 %vm9984_vm1, %v9983_v6  ;;  %v1218_v0 = vld [vmem:[%s10025_s21 + $0x4] sm:$0xf] }
 0x650   : > { %9084 = vmatprep.subr.bf16.mxu1 %v9983_v6  ;;  %v3028_v9 = vsel %vm1747_vm3, %v1218_v0, 0 }
 0x651   : > { %v9772_v61 = vpop.eup %9771 }
 0x652   : > { %v2614_v8 = vmul.f32 %v9772_v61, %v10591_v53 }
 0x654   : > { %v2622_v10 = vpack.c.bf16 %v2614_v8, %v2614_v8 }
 0x656   : > { %9075 = vmatmul.mubr.msk.bf16.vlgmr.msra.gmra.mrb[60].mxu1 %vm1256_vm2, %v2622_v10 }
 0x657   : > { %9085 = vmatpush3.bf16.msra.mxu1 %v2873_v13  ;;  %9086 = vmatprep.mubr.msk.bf16.mxu1 %vm9984_vm1, %v9983_v6 }
 0x658   : > { %9096 = vmatprep.subr.bf16.mxu1 %v9983_v6 }
 0x670   : > { %v2593_v12 = vpop.xlane.xlu1 %2592 }
 0x671   : > { %9773 = vrcp.f32 %v2593_v12 }
 0x674   : > { %v2599_v17 = vpop.xlane.xlu1 %2598 }
 0x675   : > { %9775 = vrcp.f32 %v2599_v17 }
 0x67b   : > { %v9774_v32 = vpop.eup %9773  ;;  %v2596_v46 = vpop.xlane.xlu0 %2595 }
 0x67c   : > { %9777 = vrcp.f32 %v2596_v46  ;;  %v2615_v53 = vmul.f32 %v9774_v32, %v10603_v14  ;;  %v2964_v14 = vpop.permute.xlu1 %2963 }
 0x67d   : > { %v2969_v54 = vsel %vm1747_vm3, %v2964_v14, 0 }
 0x67e   : > { %v2623_v57 = vpack.c.bf16 %v2615_v53, %v2615_v53 }
 0x67f   : > { %v9776_v22 = vpop.eup %9775  ;;  %v2602_v33 = vpop.xlane.xlu0 %2601 }
 0x680   : > { %9779 = vrcp.f32 %v2602_v33  ;;  %9081 = vmatmul.mubr.msk.bf16.vlgmr.msra.gmra.mrb[56].mxu0 %vm1256_vm2, %v2623_v57  ;;  %v2617_v34 = vmul.f32 %v9776_v22, %v10607_v18  ;;  %v3176_v59 = vpop.permute.xlu1 %3175  ;;  %v1217_v57 = vld [vmem:[%s10025_s21] sm:$0xf] }
 0x681   : > { %9092 = vmatprep.mubr.msk.bf16.mxu0 %vm9984_vm1, %v9983_v6 }
 0x682   : > { %v2625_v37 = vpack.c.bf16 %v2617_v34, %v2617_v34 }
 0x683   : > { %v2916_v25 = vpop.permute.xlu0 %2915 }
 0x684   : > { %v2921_v38 = vsel %vm1747_vm3, %v2916_v25, 0  ;;  %v3226_v2 = vpop.permute.xlu1 %3225 }
 0x685   : > { %9091 = vmatpush3.bf16.msra.mxu0 %v2921_v38 }
 0x686   : > { %v9778_v44 = vpop.eup %9777  ;;  %9602 = vmatprep.subr.msk.bf16.mxu0 %vm1747_vm3, %v1218_v0 }
 0x687   : > { %v2616_v1 = vmul.f32 %v9778_v44, %v10611_v11  ;;  %v3178_v36 = vpop.permute.xlu0 %3177 }
 0x688   : > { %9093 = vmatmul.mubr.msk.bf16.vlgmr.msra.gmra.mrb[60].mxu0 %vm1256_vm2, %v2625_v37  ;;  %v3183_v11 = vsel %vm1256_vm2, %v3178_v36, 0  ;;  %v3276_v35 = vpop.permute.xlu1 %3275 }
 0x689   : > { %v2624_v45 = vpack.c.bf16 %v2616_v1, %v2616_v1  ;;  %9103 = vmatpush3.bf16.msra.mxu0 %v3028_v9 }
 0x68a   : > { %v9780_v51 = vpop.eup %9779  ;;  %9603 = vmatprep.subr.msk.bf16.mxu0 %vm1747_vm3, %v1217_v57 }
 0x68b   : > { %9087 = vmatmul.mubr.msk.bf16.vlgmr.msra.gmra.mrb[64].mxu1 %vm1256_vm2, %v2624_v45  ;;  %v2618_v18 = vmul.f32 %v9780_v51, %v10615_v4  ;;  %v3228_v62 = vpop.permute.xlu0 %3227 }
 0x68c   : > { %9097 = vmatpush3.bf16.msra.mxu1 %v2969_v54  ;;  %9098 = vmatprep.mubr.msk.bf16.mxu1 %vm9984_vm1, %v9983_v6  ;;  %v3233_v4 = vsel %vm1256_vm2, %v3228_v62, 0  ;;  %v3326_v61 = vpop.permute.xlu1 %3325 }
 0x68d   : > { %9122 = vmatprep.subr.bf16.mxu1 %v9983_v6  ;;  %v2626_v58 = vpack.c.bf16 %v2618_v18, %v2618_v18 }
 0x68f   : > { %v3278_v47 = vpop.permute.xlu0 %3277 }
 0x690   : > { %v3283_v7 = vsel %vm1256_vm2, %v3278_v47, 0  ;;  %v3428_v13 = vpop.permute.xlu1 %3427 }
 0x691   : > { %v3433_v17 = vsel %vm1256_vm2, %v3428_v13, 0 }
 0x693   : > { %9099 = vmatmul.mubr.msk.bf16.vlgmr.msra.gmra.mrb[68].mxu1 %vm1256_vm2, %v2626_v58  ;;  %v3328_v8 = vpop.permute.xlu0 %3327 }
 0x694   : > { %9124 = vmatprep.mubr.msk.bf16.mxu1 %vm9984_vm1, %v9983_v6  ;;  %v3333_v10 = vsel %vm1256_vm2, %v3328_v8, 0  ;;  %v3426_v12 = vpop.permute.xlu1 %3425 }
 0x695   : > { %9123 = vmatpush3.bf16.xpose.msra.mxu1 %v3183_v11 }
 0x696   : > { %9128 = vmatprep.subr.bf16.mxu1 %v9983_v6 }
 0x698   : > { %v3528_v32 = vpop.permute.xlu1 %3527 }
 0x699   : > { %v3533_v46 = vsel %vm1256_vm2, %v3528_v32, 0 }
 0x69c   : > { %9125 = vmatmul.mubr.msk.bf16.vlgmr.msra.gmra.mrb[72].mxu1 %vm1256_vm2, %v3176_v59  ;;  %v3526_v53 = vpop.permute.xlu1 %3525  ;;  %v3108_v59 = vsel %vm1747_vm3, %v1217_v57, 0 }
 0x69d   : > { %9129 = vmatpush3.bf16.xpose.msra.mxu1 %v3233_v4  ;;  %9130 = vmatprep.mubr.msk.bf16.mxu1 %vm9984_vm1, %v9983_v6 }
 0x69e   : > { %9134 = vmatprep.subr.bf16.mxu1 %v9983_v6 }
 0x6a4   : > { %9131 = vmatmul.mubr.msk.bf16.vlgmr.msra.gmra.mrb[76].mxu1 %vm1256_vm2, %v3226_v2 }
 0x6a5   : > { %9135 = vmatpush3.bf16.xpose.msra.mxu1 %v3283_v7  ;;  %9136 = vmatprep.mubr.msk.bf16.mxu1 %vm9984_vm1, %v9983_v6 }
 0x6a6   : > { %9140 = vmatprep.subr.bf16.mxu1 %v9983_v6 }
 0x6ac   : > { %9137 = vmatmul.mubr.msk.bf16.vlgmr.msra.gmra.mrb[80].mxu1 %vm1256_vm2, %v3276_v35 }
 0x6ad   : > { %9141 = vmatpush3.bf16.xpose.msra.mxu1 %v3333_v10  ;;  %9142 = vmatprep.mubr.msk.bf16.mxu1 %vm9984_vm1, %v9983_v6 }
 0x6ae   : > { %9152 = vmatprep.subr.bf16.mxu1 %v9983_v6 }
 0x6b4   : > { %9143 = vmatmul.mubr.msk.bf16.vlgmr.msra.gmra.mrb[84].mxu1 %vm1256_vm2, %v3326_v61 }
 0x6b5   : > { %9153 = vmatpush3.bf16.xpose.msra.mxu1 %v3433_v17  ;;  %9154 = vmatprep.mubr.msk.bf16.mxu1 %vm9984_vm1, %v9983_v6 }
 0x6b6   : > { %9164 = vmatprep.subr.bf16.mxu1 %v9983_v6 }
 0x6bc   : > { %9155 = vmatmul.mubr.msk.bf16.vlgmr.msra.gmra.mrb[88].mxu1 %vm1256_vm2, %v3426_v12 }
 0x6bd   : > { %9165 = vmatpush3.bf16.xpose.msra.mxu1 %v3533_v46  ;;  %9166 = vmatprep.mubr.msk.bf16.mxu1 %vm9984_vm1, %v9983_v6 }
 0x6be   : > { %9176 = vmatprep.subr.bf16.mxu1 %v9983_v6 }
 0x6c4   : > { %9167 = vmatmul.mubr.msk.bf16.vlgmr.msra.gmra.mrb[92].mxu1 %vm1256_vm2, %v3526_v53 }
 0x6c5   : > { %9178 = vmatprep.mubr.msk.bf16.mxu1 %vm9984_vm1, %v9983_v6 }
 0x716   : > { %v2669_v22 = vpop.f32.mrb[48].mxu0 }
 0x717   : > { %v9058_v33 = vpop.f32.mrb[49].mxu0 }
 0x718   : > { %v2672_v34 = vpop.f32.mrb[50].mxu0 }
 0x719   : > { %v9059_v25 = vpop.f32.mrb[51].mxu0  ;;  %v3378_v34 = vpop.permute.xlu0 %3377 }
 0x71d   : > { %v3376_v21 = vpop.permute.xlu0 %3375 }
 0x71e   : > { %v2765_v38 = vpop.f32.mrb[52].mxu0 }
 0x71f   : > { %v9070_v44 = vpop.f32.mrb[53].mxu0 }
 0x720   : > { %v2768_v37 = vpop.f32.mrb[54].mxu0 }
 0x721   : > { %v2717_v1 = vpop.f32.mrb[56].mxu1  ;;  %v9071_v14 = vpop.f32.mrb[55].mxu0  ;;  %v3383_v37 = vsel %vm1256_vm2, %v3378_v34, 0 }
 0x722   : > { %v3011_v45 = vpack.c.bf16 %v2717_v1, %v2669_v22  ;;  %v9064_v51 = vpop.f32.mrb[57].mxu1  ;;  %v3478_v41 = vpop.permute.xlu0 %3477 }
 0x723   : > { %v2720_v54 = vpop.f32.mrb[58].mxu1 }
 0x724   : > { %v9065_v18 = vpop.f32.mrb[59].mxu1  ;;  %9104 = vmatprep.mubr.msk.bf16.mxu0 %vm1256_vm2, %v3011_v45 }
 0x729   : > { %v2813_v36 = vpop.f32.mrb[60].mxu1 }
 0x72a   : > { %v3012_v58 = vpack.c.bf16 %v2813_v36, %v2765_v38  ;;  %v9076_v11 = vpop.f32.mrb[61].mxu1 }
 0x72b   : > { %v2816_v62 = vpop.f32.mrb[62].mxu1 }
 0x72c   : > { %v9077_v2 = vpop.f32.mrb[63].mxu1  ;;  %9105 = vmatmul.mubr.msk.bf16.vlgmr.msra.gmra.mrb[64].mxu0 %vm1256_vm2, %v3012_v58 }
 0x72d   : > { %9113 = vmatpush3.bf16.msra.mxu0 %v3108_v59 }
 0x72e   : > { %9146 = vmatprep.subr.bf16.mxu0 %v9983_v6 }
 0x753   : > { %v2861_v4 = vpop.f32.mrb[56].mxu0 }
 0x754   : > { %v9082_v35 = vpop.f32.mrb[57].mxu0 }
 0x755   : > { %v2864_v47 = vpop.f32.mrb[58].mxu0 }
 0x756   : > { %v9083_v7 = vpop.f32.mrb[59].mxu0 }
 0x75b   : > { %v2957_v0 = vpop.f32.mrb[60].mxu0 }
 0x75c   : > { %v9094_v61 = vpop.f32.mrb[61].mxu0 }
 0x75d   : > { %v2960_v8 = vpop.f32.mrb[62].mxu0 }
 0x75e   : > { %v2909_v9 = vpop.f32.mrb[64].mxu1  ;;  %v9095_v10 = vpop.f32.mrb[63].mxu0 }
 0x75f   : > { %v3013_v13 = vpack.c.bf16 %v2909_v9, %v2861_v4  ;;  %v9088_v12 = vpop.f32.mrb[65].mxu1 }
 0x760   : > { %v2912_v17 = vpop.f32.mrb[66].mxu1 }
 0x761   : > { %v9089_v32 = vpop.f32.mrb[67].mxu1  ;;  %9108 = vmatprep.mubr.msk.bf16.mxu0 %vm1256_vm2, %v3013_v13 }
 0x766   : > { %v3005_v46 = vpop.f32.mrb[68].mxu1 }
 0x767   : > { %v3014_v53 = vpack.c.bf16 %v3005_v46, %v2957_v0  ;;  %v9100_v57 = vpop.f32.mrb[69].mxu1 }
 0x768   : > { %v3008_v22 = vpop.f32.mrb[70].mxu1 }
 0x769   : > { %v9101_v33 = vpop.f32.mrb[71].mxu1  ;;  %9109 = vmatmul.mubr.msk.bf16.gmra.mrb[68].mxu0 %vm1256_vm2, %v3014_v53 }
 0x76a   : > { %9114 = vmatprep.mubr.msk.bf16.mxu0 %vm1256_vm2, %v2127_v27 }
 0x76f   : > { %v10741_v25 = vpop.f32.mrb[72].mxu1 }
 0x770   : > { %v9126_v38 = vpop.f32.mrb[73].mxu1  ;;  %v3575_v44 = vsel %vm1256_vm2, %v10741_v25, -inf }
 0x771   : > { %3576 = vmax.xlane.f32.xlu0 %v3575_v44  ;;  %v3222_v1 = vpop.f32.mrb[74].mxu1  ;;  %9115 = vmatmul.mubr.msk.bf16.vlgmr.msra.gmra.mrb[64].mxu0 %vm1256_vm2, %v2128_v26 }
 0x772   : > { %v9127_v14 = vpop.f32.mrb[75].mxu1  ;;  %9147 = vmatpush3.bf16.xpose.msra.mxu0 %v3383_v37  ;;  %9118 = vmatprep.mubr.msk.bf16.mxu0 %vm1256_vm2, %v2129_v50  ;;  %v3483_v50 = vsel %vm1256_vm2, %v3478_v41, 0 }
 0x773   : > { %9158 = vmatprep.subr.bf16.mxu0 %v9983_v6 }
 0x777   : > { %v3269_v16 = vpop.f32.mrb[76].mxu1 }
 0x778   : > { %v9132_v27 = vpop.f32.mrb[77].mxu1  ;;  %v3578_v45 = vsel %vm1256_vm2, %v3269_v16, -inf }
 0x779   : > { %3579 = vmax.xlane.f32.xlu1 %v3578_v45  ;;  %v3272_v51 = vpop.f32.mrb[78].mxu1  ;;  %9119 = vmatmul.mubr.msk.bf16.gmra.mrb[68].mxu0 %vm1256_vm2, %v2130_v5  ;;  %v3476_v5 = vpop.permute.xlu0 %3475 }
 0x77a   : > { %v9133_v20 = vpop.f32.mrb[79].mxu1  ;;  %9148 = vmatprep.mubr.msk.bf16.mxu0 %vm9984_vm1, %v9983_v6 }
 0x77f   : > { %v10762_v42 = vpop.f32.mrb[80].mxu1 }
 0x780   : > { %v9138_v26 = vpop.f32.mrb[81].mxu1  ;;  %v3581_v43 = vsel %vm1256_vm2, %v10762_v42, -inf }
 0x781   : > { %3582 = vmax.xlane.f32.xlu0 %v3581_v43  ;;  %v3322_v54 = vpop.f32.mrb[82].mxu1  ;;  %9149 = vmatmul.mubr.msk.bf16.vlgmr.msra.gmra.mrb[72].mxu0 %vm1256_vm2, %v3376_v21 }
 0x782   : > { %v9139_v52 = vpop.f32.mrb[83].mxu1  ;;  %9159 = vmatpush3.bf16.xpose.msra.mxu0 %v3483_v50  ;;  %9160 = vmatprep.mubr.msk.bf16.mxu0 %vm9984_vm1, %v9983_v6 }
 0x783   : > { %9170 = vmatprep.subr.bf16.mxu0 %v9983_v6 }
 0x787   : > { %v3369_v3 = vpop.f32.mrb[84].mxu1 }
 0x788   : > { %v9144_v18 = vpop.f32.mrb[85].mxu1  ;;  %v3584_v36 = vsel %vm1256_vm2, %v3369_v3, -inf }
 0x789   : > { %3585 = vmax.xlane.f32.xlu0 %v3584_v36  ;;  %v3372_v58 = vpop.f32.mrb[86].mxu1  ;;  %9161 = vmatmul.mubr.msk.bf16.vlgmr.msra.gmra.mrb[76].mxu0 %vm1256_vm2, %v3476_v5 }
 0x78a   : > { %v9145_v11 = vpop.f32.mrb[87].mxu1  ;;  %9172 = vmatprep.mubr.msk.bf16.mxu0 %vm9984_vm1, %v9983_v6 }
 0x78f   : > { %v3469_v59 = vpop.f32.mrb[88].mxu1 }
 0x790   : > { %v9156_v62 = vpop.f32.mrb[89].mxu1  ;;  %v3590_v2 = vsel %vm1256_vm2, %v3469_v59, -inf }
 0x791   : > { %3591 = vmax.xlane.f32.xlu0 %v3590_v2  ;;  %v3472_v4 = vpop.f32.mrb[90].mxu1 }
 0x792   : > { %v9157_v35 = vpop.f32.mrb[91].mxu1 }
 0x797   : > { %v3569_v47 = vpop.f32.mrb[92].mxu1 }
 0x798   : > { %v9168_v7 = vpop.f32.mrb[93].mxu1  ;;  %v3596_v0 = vsel %vm1256_vm2, %v3569_v47, -inf }
 0x799   : > { %3597 = vmax.xlane.f32.xlu0 %v3596_v0  ;;  %v3572_v61 = vpop.f32.mrb[94].mxu1 }
 0x79a   : > { %v9169_v8 = vpop.f32.mrb[95].mxu1 }
 0x7fe   : > { %v3577_v12 = vpop.xlane.xlu0 %3576 }
 0x7ff   : > { %v3599_v20 = vsub.f32 %v10741_v25, %v3577_v12 }
 0x801   : > { %v3607_v41 = vmul.f32 1.442695, %v3599_v20 }
 0x806   : > { %v3580_v9 = vpop.xlane.xlu1 %3579 }
 0x807   : > { %v3600_v10 = vsub.f32 %v3269_v16, %v3580_v9 }
 0x809   : > { %v3609_v13 = vmul.f32 1.442695, %v3600_v10 }
 0x80b   : > { %9781 = vpow2.f32 %v3609_v13 }
 0x80e   : > { %v3583_v17 = vpop.xlane.xlu0 %3582 }
 0x80f   : > { %v3601_v26 = vsub.f32 %v10762_v42, %v3583_v17 }
 0x811   : > { %v3611_v43 = vmul.f32 1.442695, %v3601_v26 }
 0x815   : > { %v10777_v32 = vpop.eup %9781 }
 0x816   : > { %v3586_v46 = vpop.xlane.xlu0 %3585  ;;  %v3626_v53 = vsel %vm1256_vm2, %v10777_v32, 0.0 }
 0x817   : > { %v3602_v57 = vsub.f32 %v3369_v3, %v3586_v46  ;;  %3627 = vadd.xlane.f32.xlu0 %v3626_v53 }
 0x819   : > { %v3613_v22 = vmul.f32 1.442695, %v3602_v57 }
 0x81b   : > { %9783 = vpow2.f32 %v3613_v22 }
 0x81e   : > { %v3592_v33 = vpop.xlane.xlu0 %3591 }
 0x81f   : > { %v3604_v34 = vsub.f32 %v3469_v59, %v3592_v33 }
 0x821   : > { %v3617_v38 = vmul.f32 1.442695, %v3604_v34 }
 0x823   : > { %9785 = vpow2.f32 %v3617_v38 }
 0x825   : > { %v10781_v44 = vpop.eup %9783 }
 0x826   : > { %v3598_v37 = vpop.xlane.xlu0 %3597  ;;  %v3632_v1 = vsel %vm1256_vm2, %v10781_v44, 0.0 }
 0x827   : > { %v3606_v14 = vsub.f32 %v3569_v47, %v3598_v37  ;;  %3633 = vadd.xlane.f32.xlu0 %v3632_v1 }
 0x829   : > { %v3621_v16 = vmul.f32 1.442695, %v3606_v14 }
 0x82b   : > { %9787 = vpow2.f32 %v3621_v16 }
 0x82c   : > { %9789 = vpow2.f32 %v3607_v41 }
 0x82d   : > { %v10785_v21 = vpop.eup %9785  ;;  %9791 = vpow2.f32 %v3611_v43 }
 0x82e   : > { %v3638_v27 = vsel %vm1256_vm2, %v10785_v21, 0.0 }
 0x82f   : > { %3639 = vadd.xlane.f32.xlu0 %v3638_v27 }
 0x835   : > { %v10789_v45 = vpop.eup %9787 }
 0x836   : > { %v3644_v51 = vsel %vm1256_vm2, %v10789_v45, 0.0  ;;  %v9790_v36 = vpop.eup %9789 }
 0x837   : > { %3645 = vadd.xlane.f32.xlu0 %v3644_v51  ;;  %v3623_v59 = vsel %vm1256_vm2, %v9790_v36, 0.0  ;;  %v10810_v62 = vpop.eup %9791 }
 0x838   : > { %v3629_v2 = vsel %vm1256_vm2, %v10810_v62, 0.0 }
 0x84d   : > { %3719 = vrot.lane.b32.xlu0 %v10239_v24, %s11795_s23 }
 0x851   : > { %3863 = vrot.lane.b32.xlu0 %v10247_v28, %s11795_s23 }
 0x854   : > { %v3419_v50 = vpop.f32.mrb[72].mxu0 }
 0x855   : > { %3959 = vrot.lane.b32.xlu0 %v10261_v31, %s11795_s23  ;;  %v9150_v54 = vpop.f32.mrb[73].mxu0  ;;  %v3587_v52 = vsel %vm1256_vm2, %v3419_v50, -inf }
 0x856   : > { %v3422_v25 = vpop.f32.mrb[74].mxu0  ;;  %3588 = vmax.xlane.f32.xlu1 %v3587_v52 }
 0x857   : > { %v9151_v3 = vpop.f32.mrb[75].mxu0 }
 0x859   : > { %4149 = vrot.lane.b32.xlu0 %v10231_v19, %s11793_s26 }
 0x85c   : > { %v3519_v42 = vpop.f32.mrb[76].mxu0 }
 0x85d   : > { %4199 = vrot.lane.b32.xlu0 %v10239_v24, %s11793_s26  ;;  %v9162_v5 = vpop.f32.mrb[77].mxu0  ;;  %v3593_v18 = vsel %vm1256_vm2, %v3519_v42, -inf }
 0x85e   : > { %v3522_v58 = vpop.f32.mrb[78].mxu0  ;;  %3594 = vmax.xlane.f32.xlu1 %v3593_v18 }
 0x85f   : > { %v9163_v11 = vpop.f32.mrb[79].mxu0 }
 0x861   : > { %4249 = vrot.lane.b32.xlu0 %v10229_v15, %s11793_s26 }
 0x862   : > { %3624 = vadd.xlane.f32.xlu1 %v3623_v59 }
 0x865   : > { %4247 = vrot.lane.b32.xlu0 %v10273_v39, %s11789_s1 }
 0x866   : > { %3630 = vadd.xlane.f32.xlu1 %v3629_v2 }
 0x869   : > { %4349 = vrot.lane.b32.xlu0 %v10247_v28, %s11793_s26 }
 0x86d   : > { %4347 = vrot.lane.b32.xlu0 %v10291_v49, %s11789_s1 }
 0x871   : > { %4449 = vrot.lane.b32.xlu0 %v10261_v31, %s11793_s26 }
 0x875   : > { %4447 = vrot.lane.b32.xlu0 %v10307_v56, %s11789_s1 }
 0x877   : > { %3671 = vrot.lane.b32.xlu1 %v10231_v19, %s11795_s23 }
 0x87b   : > { %3767 = vrot.lane.b32.xlu1 %v10229_v15, %s11795_s23 }
 0x87f   : > { %3815 = vrot.lane.b32.xlu1 %v10237_v23, %s11795_s23 }
 0x883   : > { %3911 = vrot.lane.b32.xlu1 %v10253_v29, %s11795_s23 }
 0x8a4   : > { %v3628_v39 = vpop.xlane.xlu0 %3627 }
 0x8a5   : > { %9793 = vrcp.f32 %v3628_v39 }
 0x8af   : > { %v9794_v35 = vpop.eup %9793 }
 0x8b0   : > { %v3656_v56 = vmul.f32 %v9794_v35, %v10777_v32 }
 0x8b2   : > { %v3664_v61 = vpack.c.bf16 %v3656_v56, %v3656_v56 }
 0x8b4   : > { %v3634_v49 = vpop.xlane.xlu0 %3633 }
 0x8bc   : > { %v3640_v4 = vpop.xlane.xlu0 %3639 }
 0x8c4   : > { %v10832_v47 = vpop.xlane.xlu0 %3645 }
 0x8c8   : > { %v3720_v7 = vpop.permute.xlu0 %3719 }
 0x8c9   : > { %v3725_v0 = vsel %vm1747_vm3, %v3720_v7, 0 }
 0x8ca   : > { %9177 = vmatpush3.bf16.msra.mxu1 %v3725_v0 }
 0x8cb   : > { %9188 = vmatprep.subr.bf16.mxu1 %v9983_v6 }
 0x8cc   : > { %v3864_v3 = vpop.permute.xlu0 %3863 }
 0x8cd   : > { %9179 = vmatmul.mubr.msk.bf16.vlgmr.msra.gmra.mrb[96].mxu1 %vm1256_vm2, %v3664_v61  ;;  %v3869_v18 = vsel %vm1747_vm3, %v3864_v3, 0 }
 0x8ce   : > { %9190 = vmatprep.mubr.msk.bf16.mxu1 %vm9984_vm1, %v9983_v6 }
 0x8d0   : > { %v3960_v59 = vpop.permute.xlu0 %3959 }
 0x8d1   : > { %v3965_v39 = vsel %vm1747_vm3, %v3960_v59, 0 }
 0x8d4   : > { %v4150_v35 = vpop.permute.xlu0 %4149 }
 0x8d5   : > { %v4155_v7 = vsel %vm1256_vm2, %v4150_v35, 0 }
 0x8e3   : > { %v3589_v8 = vpop.xlane.xlu1 %3588 }
 0x8e4   : > { %v3603_v9 = vsub.f32 %v3419_v50, %v3589_v8  ;;  %v4200_v8 = vpop.permute.xlu0 %4199 }
 0x8e6   : > { %v3615_v10 = vmul.f32 1.442695, %v3603_v9 }
 0x8e8   : > { %9795 = vpow2.f32 %v3615_v10  ;;  %v4205_v10 = vsel %vm1256_vm2, %v4200_v8, 0 }
 0x8e9   : > { %9797 = vrcp.f32 %v3634_v49 }
 0x8eb   : > { %v3595_v13 = vpop.xlane.xlu1 %3594 }
 0x8ec   : > { %v3605_v12 = vsub.f32 %v3519_v42, %v3595_v13 }
 0x8ee   : > { %v3619_v17 = vmul.f32 1.442695, %v3605_v12 }
 0x8ef   : > { %v3625_v32 = vpop.xlane.xlu1 %3624 }
 0x8f0   : > { %9799 = vpow2.f32 %v3619_v17 }
 0x8f1   : > { %9801 = vrcp.f32 %v3625_v32 }
 0x8f2   : > { %v10840_v46 = vpop.eup %9795 }
 0x8f3   : > { %v3631_v53 = vpop.xlane.xlu1 %3630  ;;  %v3635_v57 = vsel %vm1256_vm2, %v10840_v46, 0.0  ;;  %v9798_v34 = vpop.eup %9797 }
 0x8f4   : > { %3636 = vadd.xlane.f32.xlu1 %v3635_v57  ;;  %9803 = vrcp.f32 %v3631_v53  ;;  %v3658_v51 = vmul.f32 %v9798_v34, %v10781_v44 }
 0x8f5   : > { %9805 = vrcp.f32 %v3640_v4  ;;  %v1219_v4 = vld [vmem:[%s10025_s21 + $0x8] sm:$0xf] }
 0x8f6   : > { %v3666_v50 = vpack.c.bf16 %v3658_v51, %v3658_v51  ;;  %9807 = vrcp.f32 %v10832_v47  ;;  %v4072_v61 = vsel %vm1747_vm3, %v1219_v4, 0 }
 0x8f7   : > { %v3672_v22 = vpop.permute.xlu1 %3671 }
 0x8f8   : > { %v3677_v33 = vsel %vm1747_vm3, %v3672_v22, 0 }
 0x8f9   : > { %9171 = vmatpush3.bf16.msra.mxu0 %v3677_v33 }
 0x8fa   : > { %v10845_v38 = vpop.eup %9799  ;;  %9182 = vmatprep.subr.bf16.mxu0 %v9983_v6 }
 0x8fb   : > { %v9802_v37 = vpop.eup %9801  ;;  %v3768_v1 = vpop.permute.xlu1 %3767  ;;  %v3641_v14 = vsel %vm1256_vm2, %v10845_v38, 0.0 }
 0x8fc   : > { %3642 = vadd.xlane.f32.xlu1 %v3641_v14  ;;  %v3655_v16 = vmul.f32 %v9802_v37, %v9790_v36  ;;  %v3773_v26 = vsel %vm1747_vm3, %v3768_v1, 0 }
 0x8fe   : > { %v3663_v27 = vpack.c.bf16 %v3655_v16, %v3655_v16  ;;  %v9804_v20 = vpop.eup %9803 }
 0x8ff   : > { %v3816_v41 = vpop.permute.xlu1 %3815  ;;  %v3657_v54 = vmul.f32 %v9804_v20, %v10810_v62  ;;  %v9806_v52 = vpop.eup %9805 }
 0x900   : > { %9173 = vmatmul.mubr.msk.bf16.vlgmr.msra.gmra.mrb[80].mxu0 %vm1256_vm2, %v3663_v27  ;;  %v3821_v43 = vsel %vm1747_vm3, %v3816_v41, 0  ;;  %v3660_v5 = vmul.f32 %v9806_v52, %v10785_v21 }
 0x901   : > { %9183 = vmatpush3.bf16.msra.mxu0 %v3773_v26  ;;  %9189 = vmatpush3.bf16.msra.mxu1 %v3821_v43  ;;  %v3665_v42 = vpack.c.bf16 %v3657_v54, %v3657_v54 }
 0x902   : > { %9200 = vmatprep.subr.bf16.mxu1 %v9983_v6  ;;  %9184 = vmatprep.mubr.msk.bf16.mxu0 %vm9984_vm1, %v9983_v6  ;;  %v3668_v36 = vpack.c.bf16 %v3660_v5, %v3660_v5 }
 0x903   : > { %v3912_v44 = vpop.permute.xlu1 %3911  ;;  %9194 = vmatprep.subr.bf16.mxu0 %v9983_v6 }
 0x904   : > { %v3917_v25 = vsel %vm1747_vm3, %v3912_v44, 0  ;;  %9191 = vmatmul.mubr.msk.bf16.vlgmr.msra.gmra.mrb[100].mxu1 %vm1256_vm2, %v3666_v50  ;;  %v4250_v50 = vpop.permute.xlu0 %4249 }
 0x905   : > { %9201 = vmatpush3.bf16.msra.mxu1 %v3917_v25  ;;  %9202 = vmatprep.mubr.msk.bf16.mxu1 %vm9984_vm1, %v9983_v6  ;;  %v4255_v3 = vsel %vm1256_vm2, %v4250_v50, 0 }
 0x906   : > { %9212 = vmatprep.subr.bf16.mxu1 %v9983_v6 }
 0x908   : > { %9185 = vmatmul.mubr.msk.bf16.vlgmr.msra.gmra.mrb[84].mxu0 %vm1256_vm2, %v3665_v42 }
 0x909   : > { %9195 = vmatpush3.bf16.msra.mxu0 %v3869_v18  ;;  %9196 = vmatprep.mubr.msk.bf16.mxu0 %vm9984_vm1, %v9983_v6 }
 0x90a   : > { %9206 = vmatprep.subr.bf16.mxu0 %v9983_v6 }
 0x90c   : > { %9203 = vmatmul.mubr.msk.bf16.vlgmr.msra.gmra.mrb[104].mxu1 %vm1256_vm2, %v3668_v36 }
 0x90d   : > { %4007 = vrot.lane.b32.xlu1 %v10257_v30, %s11795_s23  ;;  %9214 = vmatprep.mubr.msk.bf16.mxu1 %vm9984_vm1, %v9983_v6  ;;  %s11821_s23 = sld [smem:[#allocation10_spill]] }
 0x911   : > { %4147 = vrot.lane.b32.xlu1 %v10275_v40, %s11789_s1 }
 0x915   : > { %4197 = vrot.lane.b32.xlu1 %v10289_v48, %s11789_s1  ;;  %v9808_v48 = vpop.eup %9807 }
 0x916   : > { %v3662_v58 = vmul.f32 %v9808_v48, %v10789_v45 }
 0x919   : > { %4299 = vrot.lane.b32.xlu1 %v10237_v23, %s11793_s26 }
 0x91d   : > { %4297 = vrot.lane.b32.xlu1 %v10305_v55, %s11789_s1 }
 0x921   : > { %4399 = vrot.lane.b32.xlu1 %v10253_v29, %s11793_s26 }
 0x925   : > { %4397 = vrot.lane.b32.xlu1 %v10320_v60, %s11789_s1 }
 0x929   : > { %4499 = vrot.lane.b32.xlu1 %v10257_v30, %s11793_s26  ;;  %s1061_s26 = sld [smem:[#allocation2]] }
 0x92d   : > { %4497 = vrot.lane.b32.xlu1 %v10329_v63, %s11789_s1  ;;  %v3670_v63 = vpack.c.bf16 %v3662_v58, %v3662_v58  ;;  %s11791_s1 = smov 40  }
 0x981   : > { %v3637_v40 = vpop.xlane.xlu1 %3636 }
 0x982   : > { %9809 = vrcp.f32 %v3637_v40 }
 0x989   : > { %v3643_v21 = vpop.xlane.xlu1 %3642 }
 0x98a   : > { %9811 = vrcp.f32 %v3643_v21 }
 0x98c   : > { %v9810_v55 = vpop.eup %9809 }
 0x98d   : > { %v4008_v11 = vpop.permute.xlu1 %4007  ;;  %v3659_v60 = vmul.f32 %v9810_v55, %v10840_v46 }
 0x98e   : > { %v4013_v62 = vsel %vm1747_vm3, %v4008_v11, 0 }
 0x98f   : > { %9213 = vmatpush3.bf16.msra.mxu1 %v4013_v62  ;;  %v3667_v2 = vpack.c.bf16 %v3659_v60, %v3659_v60 }
 0x990   : > { %9228 = vmatprep.subr.bf16.mxu1 %v9983_v6 }
 0x991   : > { %v4148_v49 = vpop.permute.xlu1 %4147  ;;  %9197 = vmatmul.mubr.msk.bf16.vlgmr.msra.gmra.mrb[88].mxu0 %vm1256_vm2, %v3667_v2 }
 0x992   : > { %9207 = vmatpush3.bf16.msra.mxu0 %v3965_v39  ;;  %9215 = vmatmul.mubr.msk.bf16.vlgmr.msra.gmra.mrb[108].mxu1 %vm1256_vm2, %v3670_v63  ;;  %v4248_v63 = vpop.permute.xlu0 %4247 }
 0x993   : > { %9208 = vmatprep.mubr.msk.bf16.mxu0 %vm9984_vm1, %v9983_v6  ;;  %9230 = vmatprep.mubr.msk.bf16.mxu1 %vm9984_vm1, %v9983_v6 }
 0x994   : > { %v9812_v45 = vpop.eup %9811  ;;  %9604 = vmatprep.subr.msk.bf16.mxu0 %vm1747_vm3, %v1219_v4 }
 0x995   : > { %v3661_v47 = vmul.f32 %v9812_v45, %v10845_v38  ;;  %v4198_v56 = vpop.permute.xlu1 %4197 }
 0x997   : > { %v3669_v0 = vpack.c.bf16 %v3661_v47, %v3661_v47  ;;  %v4350_v47 = vpop.permute.xlu0 %4349 }
 0x998   : > { %9229 = vmatpush3.bf16.xpose.msra.mxu1 %v4155_v7 }
 0x999   : > { %9209 = vmatmul.mubr.msk.bf16.vlgmr.msra.gmra.mrb[92].mxu0 %vm1256_vm2, %v3669_v0  ;;  %9234 = vmatprep.subr.bf16.mxu1 %v9983_v6  ;;  %v4300_v9 = vpop.permute.xlu1 %4299 }
 0x99a   : > { %9219 = vmatpush3.bf16.msra.mxu0 %v4072_v61  ;;  %v4305_v53 = vsel %vm1256_vm2, %v4300_v9, 0 }
 0x99b   : > { %9240 = vmatprep.subr.bf16.mxu0 %v9983_v6  ;;  %v4348_v9 = vpop.permute.xlu0 %4347 }
 0x99d   : > { %v4298_v17 = vpop.permute.xlu1 %4297 }
 0x99f   : > { %9231 = vmatmul.mubr.msk.bf16.vlgmr.msra.gmra.mrb[112].mxu1 %vm1256_vm2, %v4148_v49 }
 0x9a0   : > { %v3761_v13 = vpop.f32.mrb[96].mxu1  ;;  %9235 = vmatpush3.bf16.xpose.msra.mxu1 %v4205_v10  ;;  %9236 = vmatprep.mubr.msk.bf16.mxu1 %vm9984_vm1, %v9983_v6  ;;  %v4355_v10 = vsel %vm1256_vm2, %v4350_v47, 0 }
 0x9a1   : > { %v9180_v12 = vpop.f32.mrb[97].mxu1  ;;  %9246 = vmatprep.subr.bf16.mxu1 %v9983_v6  ;;  %v4400_v57 = vpop.permute.xlu1 %4399 }
 0x9a2   : > { %v3764_v32 = vpop.f32.mrb[98].mxu1  ;;  %v4405_v33 = vsel %vm1256_vm2, %v4400_v57, 0 }
 0x9a3   : > { %v9181_v46 = vpop.f32.mrb[99].mxu1  ;;  %v4450_v32 = vpop.permute.xlu0 %4449 }
 0x9a4   : > { %v4455_v57 = vsel %vm1256_vm2, %v4450_v32, 0 }
 0x9a5   : > { %v4398_v22 = vpop.permute.xlu1 %4397 }
 0x9a7   : > { %9237 = vmatmul.mubr.msk.bf16.vlgmr.msra.gmra.mrb[116].mxu1 %vm1256_vm2, %v4198_v56 }
 0x9a8   : > { %9247 = vmatpush3.bf16.xpose.msra.mxu1 %v4305_v53  ;;  %9248 = vmatprep.mubr.msk.bf16.mxu1 %vm9984_vm1, %v9983_v6 }
 0x9a9   : > { %9258 = vmatprep.subr.bf16.mxu1 %v9983_v6  ;;  %v4500_v34 = vpop.permute.xlu1 %4499 }
 0x9aa   : > { %v4505_v38 = vsel %vm1256_vm2, %v4500_v34, 0 }
 0x9ad   : > { %v4498_v37 = vpop.permute.xlu1 %4497 }
 0x9af   : > { %9249 = vmatmul.mubr.msk.bf16.vlgmr.msra.gmra.mrb[120].mxu1 %vm1256_vm2, %v4298_v17 }
 0x9b0   : > { %9259 = vmatpush3.bf16.xpose.msra.mxu1 %v4405_v33  ;;  %9260 = vmatprep.mubr.msk.bf16.mxu1 %vm9984_vm1, %v9983_v6 }
 0x9b1   : > { %9270 = vmatprep.subr.bf16.mxu1 %v9983_v6 }
 0x9b7   : > { %9261 = vmatmul.mubr.msk.bf16.vlgmr.msra.gmra.mrb[124].mxu1 %vm1256_vm2, %v4398_v22 }
 0x9b8   : > { %9271 = vmatpush3.bf16.xpose.msra.mxu1 %v4505_v38  ;;  %9272 = vmatprep.mubr.msk.bf16.mxu1 %vm9984_vm1, %v9983_v6 }
 0x9b9   : > { %9282 = vmatprep.subr.bf16.mxu1 %v9983_v6 }
 0x9bf   : > { %9273 = vmatmul.mubr.msk.bf16.vlgmr.msra.gmra.mrb[128].mxu1 %vm1256_vm2, %v4498_v37  ;;  %v4448_v37 = vpop.permute.xlu0 %4447 }
 0x9c0   : > { %9284 = vmatprep.mubr.msk.bf16.mxu1 %vm9984_vm1, %v9983_v6 }
 0x9d3   : > { %v3713_v1 = vpop.f32.mrb[80].mxu0 }
 0x9d4   : > { %v4055_v14 = vpack.c.bf16 %v3761_v13, %v3713_v1  ;;  %v9174_v16 = vpop.f32.mrb[81].mxu0 }
 0x9d5   : > { %v3716_v27 = vpop.f32.mrb[82].mxu0 }
 0x9d6   : > { %v9175_v51 = vpop.f32.mrb[83].mxu0  ;;  %9220 = vmatprep.mubr.msk.bf16.mxu0 %vm1256_vm2, %v4055_v14 }
 0x9d7   : > { %v3857_v20 = vpop.f32.mrb[100].mxu1 }
 0x9d8   : > { %v9192_v41 = vpop.f32.mrb[101].mxu1 }
 0x9d9   : > { %v3860_v26 = vpop.f32.mrb[102].mxu1 }
 0x9da   : > { %v9193_v43 = vpop.f32.mrb[103].mxu1 }
 0x9db   : > { %v3809_v54 = vpop.f32.mrb[84].mxu0 }
 0x9dc   : > { %v4056_v52 = vpack.c.bf16 %v3857_v20, %v3809_v54  ;;  %v9186_v44 = vpop.f32.mrb[85].mxu0 }
 0x9dd   : > { %v3812_v25 = vpop.f32.mrb[86].mxu0 }
 0x9de   : > { %v9187_v42 = vpop.f32.mrb[87].mxu0  ;;  %9221 = vmatmul.mubr.msk.bf16.vlgmr.msra.gmra.mrb[64].mxu0 %vm1256_vm2, %v4056_v52 }
 0x9df   : > { %9241 = vmatpush3.bf16.xpose.msra.mxu0 %v4255_v3  ;;  %v3953_v5 = vpop.f32.mrb[104].mxu1 }
 0x9e0   : > { %v9204_v18 = vpop.f32.mrb[105].mxu1  ;;  %9252 = vmatprep.subr.bf16.mxu0 %v9983_v6 }
 0x9e1   : > { %v3956_v36 = vpop.f32.mrb[106].mxu1 }
 0x9e2   : > { %v9205_v40 = vpop.f32.mrb[107].mxu1 }
 0xa64   : > { %v3905_v48 = vpop.f32.mrb[88].mxu0 }
 0xa65   : > { %v4057_v21 = vpack.c.bf16 %v3953_v5, %v3905_v48  ;;  %v9198_v55 = vpop.f32.mrb[89].mxu0  ;;  %v4049_v58 = vpop.f32.mrb[108].mxu1 }
 0xa66   : > { %v3908_v11 = vpop.f32.mrb[90].mxu0  ;;  %v9216_v60 = vpop.f32.mrb[109].mxu1 }
 0xa67   : > { %v9199_v59 = vpop.f32.mrb[91].mxu0  ;;  %v4052_v62 = vpop.f32.mrb[110].mxu1  ;;  %9224 = vmatprep.mubr.msk.bf16.mxu0 %vm1256_vm2, %v4057_v21 }
 0xa68   : > { %v9217_v2 = vpop.f32.mrb[111].mxu1 }
 0xa6c   : > { %v4001_v39 = vpop.f32.mrb[92].mxu0 }
 0xa6d   : > { %v4058_v49 = vpack.c.bf16 %v4049_v58, %v4001_v39  ;;  %v9210_v4 = vpop.f32.mrb[93].mxu0 }
 0xa6e   : > { %v4004_v45 = vpop.f32.mrb[94].mxu0 }
 0xa6f   : > { %v9211_v35 = vpop.f32.mrb[95].mxu0  ;;  %9225 = vmatmul.mubr.msk.bf16.gmra.mrb[68].mxu0 %vm1256_vm2, %v4058_v49 }
 0xa70   : > { %9242 = vmatprep.mubr.msk.bf16.mxu0 %vm9984_vm1, %v9983_v6 }
 0xa72   : > { %v4191_v56 = vpop.f32.mrb[112].mxu1 }
 0xa73   : > { %v9232_v7 = vpop.f32.mrb[113].mxu1  ;;  %v4547_v0 = vsel %vm1256_vm2, %v4191_v56, -inf }
 0xa74   : > { %4548 = vmax.xlane.f32.xlu0 %v4547_v0  ;;  %v4194_v61 = vpop.f32.mrb[114].mxu1 }
 0xa75   : > { %v9233_v8 = vpop.f32.mrb[115].mxu1 }
 0xa77   : > { %9243 = vmatmul.mubr.msk.bf16.vlgmr.msra.gmra.mrb[96].mxu0 %vm1256_vm2, %v4248_v63 }
 0xa78   : > { %9253 = vmatpush3.bf16.xpose.msra.mxu0 %v4355_v10  ;;  %9254 = vmatprep.mubr.msk.bf16.mxu0 %vm9984_vm1, %v9983_v6 }
 0xa79   : > { %9264 = vmatprep.subr.bf16.mxu0 %v9983_v6 }
 0xa7a   : > { %v4241_v13 = vpop.f32.mrb[116].mxu1 }
 0xa7b   : > { %v9238_v12 = vpop.f32.mrb[117].mxu1  ;;  %v4550_v17 = vsel %vm1256_vm2, %v4241_v13, -inf }
 0xa7c   : > { %4551 = vmax.xlane.f32.xlu1 %v4550_v17  ;;  %v4244_v46 = vpop.f32.mrb[118].mxu1 }
 0xa7d   : > { %v9239_v53 = vpop.f32.mrb[119].mxu1 }
 0xa7f   : > { %9255 = vmatmul.mubr.msk.bf16.vlgmr.msra.gmra.mrb[100].mxu0 %vm1256_vm2, %v4348_v9 }
 0xa80   : > { %9265 = vmatpush3.bf16.xpose.msra.mxu0 %v4455_v57  ;;  %9266 = vmatprep.mubr.msk.bf16.mxu0 %vm9984_vm1, %v9983_v6 }
 0xa81   : > { %9276 = vmatprep.subr.bf16.mxu0 %v9983_v6 }
 0xa82   : > { %v10954_v22 = vpop.f32.mrb[120].mxu1 }
 0xa83   : > { %v9250_v33 = vpop.f32.mrb[121].mxu1  ;;  %v4556_v40 = vsel %vm1256_vm2, %v10954_v22, -inf }
 0xa84   : > { %v4344_v34 = vpop.f32.mrb[122].mxu1 }
 0xa85   : > { %v9251_v38 = vpop.f32.mrb[123].mxu1 }
 0xa87   : > { %9267 = vmatmul.mubr.msk.bf16.vlgmr.msra.gmra.mrb[104].mxu0 %vm1256_vm2, %v4448_v37 }
 0xa88   : > { %9278 = vmatprep.mubr.msk.bf16.mxu0 %vm9984_vm1, %v9983_v6 }
 0xa8a   : > { %v10959_v1 = vpop.f32.mrb[124].mxu1 }
 0xa8b   : > { %v9262_v14 = vpop.f32.mrb[125].mxu1  ;;  %v4562_v58 = vsel %vm1256_vm2, %v10959_v1, -inf }
 0xa8c   : > { %v4444_v16 = vpop.f32.mrb[126].mxu1 }
 0xa8d   : > { %v9263_v27 = vpop.f32.mrb[127].mxu1 }
 0xa92   : > { %v10961_v51 = vpop.f32.mrb[128].mxu1 }
 0xa93   : > { %v9274_v20 = vpop.f32.mrb[129].mxu1  ;;  %v4568_v59 = vsel %vm1256_vm2, %v10961_v51, -inf }
 0xa94   : > { %v4544_v41 = vpop.f32.mrb[130].mxu1 }
 0xa95   : > { %v9275_v26 = vpop.f32.mrb[131].mxu1 }
 0xb01   : > { %v4549_v54 = vpop.xlane.xlu0 %4548 }
 0xb02   : > { %v4571_v52 = vsub.f32 %v4191_v56, %v4549_v54 }
 0xb04   : > { %v4579_v36 = vmul.f32 1.442695, %v4571_v52 }
 0xb09   : > { %v4552_v43 = vpop.xlane.xlu1 %4551 }
 0xb0a   : > { %v4572_v50 = vsub.f32 %v4241_v13, %v4552_v43 }
 0xb0c   : > { %v4581_v44 = vmul.f32 1.442695, %v4572_v50 }
 0xb0e   : > { %9813 = vpow2.f32 %v4581_v44 }
 0xb0f   : > { %9815 = vpow2.f32 %v4579_v36 }
 0xb18   : > { %v10971_v62 = vpop.eup %9813 }
 0xb19   : > { %v4598_v49 = vsel %vm1256_vm2, %v10971_v62, 0.0  ;;  %v9816_v4 = vpop.eup %9815 }
 0xb1a   : > { %v4595_v47 = vsel %vm1256_vm2, %v9816_v4, 0.0 }
 0xb4a   : > { %v4291_v25 = vpop.f32.mrb[96].mxu0 }
 0xb4b   : > { %v9244_v3 = vpop.f32.mrb[97].mxu0  ;;  %v4553_v42 = vsel %vm1256_vm2, %v4291_v25, -inf }
 0xb4c   : > { %v4294_v5 = vpop.f32.mrb[98].mxu0  ;;  %4554 = vmax.xlane.f32.xlu0 %v4553_v42 }
 0xb4d   : > { %v9245_v18 = vpop.f32.mrb[99].mxu0 }
 0xb50   : > { %4557 = vmax.xlane.f32.xlu0 %v4556_v40 }
 0xb52   : > { %v4391_v48 = vpop.f32.mrb[100].mxu0 }
 0xb53   : > { %v9256_v21 = vpop.f32.mrb[101].mxu0  ;;  %v4559_v55 = vsel %vm1256_vm2, %v4391_v48, -inf }
 0xb54   : > { %v4394_v11 = vpop.f32.mrb[102].mxu0  ;;  %4560 = vmax.xlane.f32.xlu1 %v4559_v55  ;;  %4563 = vmax.xlane.f32.xlu0 %v4562_v58 }
 0xb55   : > { %v9257_v60 = vpop.f32.mrb[103].mxu0 }
 0xb58   : > { %4569 = vmax.xlane.f32.xlu0 %v4568_v59 }
 0xb5a   : > { %v4491_v2 = vpop.f32.mrb[104].mxu0 }
 0xb5b   : > { %v9268_v63 = vpop.f32.mrb[105].mxu0  ;;  %v4565_v39 = vsel %vm1256_vm2, %v4491_v2, -inf }
 0xb5c   : > { %v4494_v45 = vpop.f32.mrb[106].mxu0  ;;  %4566 = vmax.xlane.f32.xlu1 %v4565_v39  ;;  %4599 = vadd.xlane.f32.xlu0 %v4598_v49 }
 0xb5d   : > { %v9269_v35 = vpop.f32.mrb[107].mxu0 }
 0xb60   : > { %4596 = vadd.xlane.f32.xlu1 %v4595_v47 }
 0xb71   : > { %4643 = vrot.lane.b32.xlu1 %v10231_v19, %s11791_s1 }
 0xb75   : > { %4739 = vrot.lane.b32.xlu1 %v10229_v15, %s11791_s1 }
 0xb79   : > { %4787 = vrot.lane.b32.xlu1 %v10237_v23, %s11791_s1 }
 0xb7d   : > { %4883 = vrot.lane.b32.xlu1 %v10253_v29, %s11791_s1 }
 0xbd9   : > { %v4555_v56 = vpop.xlane.xlu0 %4554 }
 0xbda   : > { %v4573_v7 = vsub.f32 %v4291_v25, %v4555_v56 }
 0xbdc   : > { %v4583_v0 = vmul.f32 1.442695, %v4573_v7 }
 0xbdd   : > { %v4558_v61 = vpop.xlane.xlu0 %4557 }
 0xbde   : > { %9817 = vpow2.f32 %v4583_v0  ;;  %v4574_v8 = vsub.f32 %v10954_v22, %v4558_v61 }
 0xbe0   : > { %v4585_v9 = vmul.f32 1.442695, %v4574_v8 }
 0xbe1   : > { %v4561_v10 = vpop.xlane.xlu1 %4560  ;;  %v4564_v13 = vpop.xlane.xlu0 %4563 }
 0xbe2   : > { %9819 = vpow2.f32 %v4585_v9  ;;  %v4575_v19 = vsub.f32 %v4391_v48, %v4561_v10  ;;  %v4576_v15 = vsub.f32 %v10959_v1, %v4564_v13 }
 0xbe4   : > { %v4587_v12 = vmul.f32 1.442695, %v4575_v19  ;;  %v4589_v17 = vmul.f32 1.442695, %v4576_v15 }
 0xbe5   : > { %v4570_v23 = vpop.xlane.xlu0 %4569 }
 0xbe6   : > { %9821 = vpow2.f32 %v4587_v12  ;;  %v4578_v29 = vsub.f32 %v10961_v51, %v4570_v23 }
 0xbe7   : > { %9823 = vpow2.f32 %v4589_v17 }
 0xbe8   : > { %v9818_v32 = vpop.eup %9817  ;;  %v4593_v46 = vmul.f32 1.442695, %v4578_v29 }
 0xbe9   : > { %v4567_v53 = vpop.xlane.xlu1 %4566  ;;  %v4601_v57 = vsel %vm1256_vm2, %v9818_v32, 0.0  ;;  %v4600_v18 = vpop.xlane.xlu0 %4599 }
 0xbea   : > { %9825 = vpow2.f32 %v4593_v46  ;;  %v4577_v22 = vsub.f32 %v4491_v2, %v4567_v53  ;;  %4602 = vadd.xlane.f32.xlu1 %v4601_v57 }
 0xbec   : > { %v10989_v33 = vpop.eup %9819  ;;  %v4591_v34 = vmul.f32 1.442695, %v4577_v22 }
 0xbed   : > { %v4597_v38 = vpop.xlane.xlu1 %4596  ;;  %v4604_v37 = vsel %vm1256_vm2, %v10989_v33, 0.0 }
 0xbee   : > { %9827 = vpow2.f32 %v4591_v34  ;;  %4605 = vadd.xlane.f32.xlu0 %v4604_v37 }
 0xbef   : > { %9829 = vrcp.f32 %v4597_v38 }
 0xbf0   : > { %v9822_v1 = vpop.eup %9821 }
 0xbf1   : > { %v10993_v14 = vpop.eup %9823  ;;  %v4644_v16 = vpop.permute.xlu1 %4643  ;;  %v4607_v27 = vsel %vm1256_vm2, %v9822_v1, 0.0 }
 0xbf2   : > { %v4649_v51 = vsel %vm1747_vm3, %v4644_v16, 0  ;;  %4608 = vadd.xlane.f32.xlu1 %v4607_v27  ;;  %v4610_v20 = vsel %vm1256_vm2, %v10993_v14, 0.0 }
 0xbf3   : > { %4611 = vadd.xlane.f32.xlu0 %v4610_v20  ;;  %9277 = vmatpush3.bf16.msra.mxu0 %v4649_v51 }
 0xbf4   : > { %v10999_v41 = vpop.eup %9825  ;;  %9288 = vmatprep.subr.bf16.mxu0 %v9983_v6 }
 0xbf5   : > { %v4616_v26 = vsel %vm1256_vm2, %v10999_v41, 0.0  ;;  %v4740_v44 = vpop.permute.xlu1 %4739 }
 0xbf6   : > { %v4745_v3 = vsel %vm1747_vm3, %v4740_v44, 0 }
 0xbf7   : > { %4617 = vadd.xlane.f32.xlu0 %v4616_v26 }
 0xbf8   : > { %v11004_v43 = vpop.eup %9827 }
 0xbf9   : > { %v9830_v50 = vpop.eup %9829  ;;  %v4613_v54 = vsel %vm1256_vm2, %v11004_v43, 0.0  ;;  %v4788_v42 = vpop.permute.xlu1 %4787 }
 0xbfa   : > { %4614 = vadd.xlane.f32.xlu1 %v4613_v54  ;;  %v4627_v52 = vmul.f32 %v9830_v50, %v9816_v4  ;;  %v4793_v45 = vsel %vm1747_vm3, %v4788_v42, 0 }
 0xbfc   : > { %v4635_v25 = vpack.c.bf16 %v4627_v52, %v4627_v52 }
 0xbfd   : > { %v4884_v5 = vpop.permute.xlu1 %4883 }
 0xbfe   : > { %9279 = vmatmul.mubr.msk.bf16.vlgmr.msra.gmra.mrb[108].mxu0 %vm1256_vm2, %v4635_v25  ;;  %v4889_v10 = vsel %vm1747_vm3, %v4884_v5, 0 }
 0xbff   : > { %9289 = vmatpush3.bf16.msra.mxu0 %v4745_v3  ;;  %9290 = vmatprep.mubr.msk.bf16.mxu0 %vm9984_vm1, %v9983_v6 }
 0xc00   : > { %9300 = vmatprep.subr.bf16.mxu0 %v9983_v6 }
 0xc0b   : > { %4979 = vrot.lane.b32.xlu1 %v10257_v30, %s11791_s1 }
 0xc0d   : > { %4691 = vrot.lane.b32.xlu0 %v10239_v24, %s11791_s1 }
 0xc11   : > { %4835 = vrot.lane.b32.xlu0 %v10247_v28, %s11791_s1 }
 0xc15   : > { %4931 = vrot.lane.b32.xlu0 %v10261_v31, %s11791_s1  ;;  %s11817_s1 = sld [smem:[#allocation6_spill]] }
 0xc77   : > { %v4603_v36 = vpop.xlane.xlu1 %4602 }
 0xc78   : > { %9831 = vrcp.f32 %v4603_v36 }
 0xc79   : > { %9833 = vrcp.f32 %v4600_v18 }
 0xc7b   : > { %v4606_v40 = vpop.xlane.xlu0 %4605 }
 0xc7f   : > { %v4609_v48 = vpop.xlane.xlu1 %4608 }
 0xc80   : > { %9835 = vrcp.f32 %v4609_v48  ;;  %v4612_v21 = vpop.xlane.xlu0 %4611 }
 0xc81   : > { %9837 = vrcp.f32 %v4606_v40 }
 0xc82   : > { %v9832_v30 = vpop.eup %9831 }
 0xc83   : > { %v4629_v55 = vmul.f32 %v9832_v30, %v9818_v32  ;;  %v9834_v24 = vpop.eup %9833 }
 0xc84   : > { %v4618_v58 = vpop.xlane.xlu0 %4617  ;;  %v4628_v31 = vmul.f32 %v9834_v24, %v10971_v62 }
 0xc85   : > { %v4637_v11 = vpack.c.bf16 %v4629_v55, %v4629_v55 }
 0xc86   : > { %v4636_v39 = vpack.c.bf16 %v4628_v31, %v4628_v31 }
 0xc87   : > { %9291 = vmatmul.mubr.msk.bf16.vlgmr.msra.gmra.mrb[112].mxu0 %vm1256_vm2, %v4637_v11  ;;  %v4615_v28 = vpop.xlane.xlu1 %4614 }
 0xc88   : > { %9839 = vrcp.f32 %v4615_v28  ;;  %v4692_v60 = vpop.permute.xlu0 %4691  ;;  %9302 = vmatprep.mubr.msk.bf16.mxu0 %vm9984_vm1, %v9983_v6 }
 0xc89   : > { %v4697_v59 = vsel %vm1747_vm3, %v4692_v60, 0  ;;  %9841 = vrcp.f32 %v4612_v21 }
 0xc8a   : > { %v9836_v2 = vpop.eup %9835  ;;  %9283 = vmatpush3.bf16.msra.mxu1 %v4697_v59  ;;  %9843 = vrcp.f32 %v4618_v58  ;;  %v8516_v59 = vld [vmem:[%s10030_s25] ss:$0 sm:$0xff] }
 0xc8b   : > { %v4631_v63 = vmul.f32 %v9836_v2, %v9822_v1  ;;  %9294 = vmatprep.subr.bf16.mxu1 %v9983_v6  ;;  %v9838_v49 = vpop.eup %9837  ;;  %v4980_v15 = vpop.permute.xlu1 %4979  ;;  %v9917_v2 = vld [vmem:[%s10212_s2] sm:$0xff]  }
 0xc8c   : > { %v4836_v4 = vpop.permute.xlu0 %4835  ;;  %v4630_v47 = vmul.f32 %v9838_v49, %v10989_v33  ;;  %v4985_v23 = vsel %vm1747_vm3, %v4980_v15, 0  ;;  %v1220_v33 = vld [vmem:[%s10025_s21 + $0xc] sm:$0xf] }
 0xc8d   : > { %v4841_v62 = vsel %vm1747_vm3, %v4836_v4, 0  ;;  %9285 = vmatmul.mubr.msk.bf16.vlgmr.msra.gmra.mrb[132].mxu1 %vm1256_vm2, %v4636_v39  ;;  %v4639_v35 = vpack.c.bf16 %v4631_v63, %v4631_v63  ;;  %v5044_v34 = vsel %vm1747_vm3, %v1220_v33, 0  ;;  %v1072_v63 = vunpack.c.l.bf16 %v9917_v2 }
 0xc8e   : > { %9295 = vmatpush3.bf16.msra.mxu1 %v4793_v45  ;;  %9301 = vmatpush3.bf16.msra.mxu0 %v4841_v62  ;;  %v4638_v8 = vpack.c.bf16 %v4630_v47, %v4630_v47  ;;  %v1073_v4 = vunpack.c.h.bf16 %v9917_v2  ;;  %v9918_v45 = vld [vmem:[%s10212_s2 + $0x8] sm:$0xff]  }
 0xc8f   : > { %9312 = vmatprep.subr.bf16.mxu0 %v9983_v6  ;;  %9296 = vmatprep.mubr.msk.bf16.mxu1 %vm9984_vm1, %v9983_v6  ;;  %v1074_v62 = vunpack.c.l.bf16 %v9918_v45 }
 0xc90   : > { %v4932_v56 = vpop.permute.xlu0 %4931  ;;  %9306 = vmatprep.subr.bf16.mxu1 %v9983_v6 }
 0xc91   : > { %v4937_v7 = vsel %vm1747_vm3, %v4932_v56, 0  ;;  %9303 = vmatmul.mubr.msk.bf16.vlgmr.msra.gmra.mrb[116].mxu0 %vm1256_vm2, %v4639_v35 }
 0xc92   : > { %v9840_v0 = vpop.eup %9839  ;;  %9313 = vmatpush3.bf16.msra.mxu0 %v4937_v7  ;;  %9314 = vmatprep.mubr.msk.bf16.mxu0 %vm9984_vm1, %v9983_v6 }
 0xc93   : > { %v4633_v61 = vmul.f32 %v9840_v0, %v11004_v43  ;;  %v9842_v9 = vpop.eup %9841  ;;  %9605 = vmatprep.subr.msk.bf16.mxu0 %vm1747_vm3, %v1220_v33 }
 0xc94   : > { %v4632_v19 = vmul.f32 %v9842_v9, %v10993_v14  ;;  %v9844_v17 = vpop.eup %9843 }
 0xc95   : > { %9297 = vmatmul.mubr.msk.bf16.vlgmr.msra.gmra.mrb[136].mxu1 %vm1256_vm2, %v4638_v8  ;;  %v4641_v13 = vpack.c.bf16 %v4633_v61, %v4633_v61  ;;  %v4634_v29 = vmul.f32 %v9844_v17, %v10999_v41  ;;  %v1075_v8 = vunpack.c.h.bf16 %v9918_v45 }
 0xc96   : > { %9307 = vmatpush3.bf16.msra.mxu1 %v4889_v10  ;;  %9308 = vmatprep.mubr.msk.bf16.mxu1 %vm9984_vm1, %v9983_v6  ;;  %v4640_v12 = vpack.c.bf16 %v4632_v19, %v4632_v19 }
 0xc97   : > { %9318 = vmatprep.subr.bf16.mxu1 %v9983_v6  ;;  %v4642_v32 = vpack.c.bf16 %v4634_v29, %v4634_v29  ;;  %v9919_v29 = vld [vmem:[%s10212_s2 + $0x10] sm:$0xff]  }
 0xc99   : > { %9315 = vmatmul.mubr.msk.bf16.vlgmr.msra.gmra.mrb[120].mxu0 %vm1256_vm2, %v4641_v13 }
 0xc9a   : > { %9325 = vmatpush3.bf16.msra.mxu0 %v5044_v34 }
 0xc9d   : > { %9309 = vmatmul.mubr.msk.bf16.vlgmr.msra.gmra.mrb[140].mxu1 %vm1256_vm2, %v4640_v12 }
 0xc9e   : > { %9319 = vmatpush3.bf16.msra.mxu1 %v4985_v23  ;;  %9320 = vmatprep.mubr.msk.bf16.mxu1 %vm9984_vm1, %v9983_v6 }
 0xca5   : > { %9321 = vmatmul.mubr.msk.bf16.vlgmr.msra.gmra.mrb[144].mxu1 %vm1256_vm2, %v4642_v32  ;;  %v1076_v32 = vunpack.c.l.bf16 %v9919_v29 }
 0xcd1   : > { %v4685_v46 = vpop.f32.mrb[108].mxu0 }
 0xcd2   : > { %v9280_v53 = vpop.f32.mrb[109].mxu0 }
 0xcd3   : > { %v4688_v57 = vpop.f32.mrb[110].mxu0 }
 0xcd4   : > { %v9281_v22 = vpop.f32.mrb[111].mxu0  ;;  %v1077_v57 = vunpack.c.h.bf16 %v9919_v29  ;;  %v9680_v29 = vld [vmem:[%s10045_s8 + $0x8] sm:$0xff]  }
 0xcd5   : > { %v9920_v22 = vld [vmem:[%s10212_s2 + $0x18] sm:$0xff]   ;;  %s11816_s2 = sld [smem:[#allocation5_spill]] }
 0xcd6   : > { %v1078_v33 = vunpack.c.l.bf16 %v9920_v22 }
 0xd5a   : > { %v4781_v38 = vpop.f32.mrb[112].mxu0 }
 0xd5b   : > { %v9292_v37 = vpop.f32.mrb[113].mxu0 }
 0xd5c   : > { %v4784_v1 = vpop.f32.mrb[114].mxu0 }
 0xd5d   : > { %v9293_v14 = vpop.f32.mrb[115].mxu0 }
 0xd60   : > { %v4733_v16 = vpop.f32.mrb[132].mxu1 }
 0xd61   : > { %v5027_v27 = vpack.c.bf16 %v4733_v16, %v4685_v46  ;;  %v9286_v51 = vpop.f32.mrb[133].mxu1  ;;  %v1079_v16 = vunpack.c.h.bf16 %v9920_v22 }
 0xd62   : > { %v4736_v20 = vpop.f32.mrb[134].mxu1 }
 0xd63   : > { %v9287_v41 = vpop.f32.mrb[135].mxu1  ;;  %9326 = vmatprep.mubr.msk.bf16.mxu0 %vm1256_vm2, %v5027_v27 }
 0xd64   : > { %v4877_v26 = vpop.f32.mrb[116].mxu0 }
 0xd65   : > { %v9304_v43 = vpop.f32.mrb[117].mxu0 }
 0xd66   : > { %v4880_v50 = vpop.f32.mrb[118].mxu0 }
 0xd67   : > { %v9305_v54 = vpop.f32.mrb[119].mxu0 }
 0xd68   : > { %v4829_v52 = vpop.f32.mrb[136].mxu1 }
 0xd69   : > { %v5028_v44 = vpack.c.bf16 %v4829_v52, %v4781_v38  ;;  %v9298_v25 = vpop.f32.mrb[137].mxu1 }
 0xd6a   : > { %v4832_v3 = vpop.f32.mrb[138].mxu1 }
 0xd6b   : > { %v9299_v42 = vpop.f32.mrb[139].mxu1  ;;  %9327 = vmatmul.mubr.msk.bf16.vlgmr.msra.gmra.mrb[64].mxu0 %vm1256_vm2, %v5028_v44 }
 0xd6c   : > { %v4973_v5 = vpop.f32.mrb[120].mxu0 }
 0xd6d   : > { %v9316_v18 = vpop.f32.mrb[121].mxu0 }
 0xd6e   : > { %v4976_v36 = vpop.f32.mrb[122].mxu0 }
 0xd6f   : > { %v9317_v40 = vpop.f32.mrb[123].mxu0 }
 0xd70   : > { %v4925_v48 = vpop.f32.mrb[140].mxu1 }
 0xd71   : > { %v5029_v21 = vpack.c.bf16 %v4925_v48, %v4877_v26  ;;  %v9310_v30 = vpop.f32.mrb[141].mxu1 }
 0xd72   : > { %v4928_v55 = vpop.f32.mrb[142].mxu1 }
 0xd73   : > { %v9311_v24 = vpop.f32.mrb[143].mxu1  ;;  %9330 = vmatprep.mubr.msk.bf16.mxu0 %vm1256_vm2, %v5029_v21 }
 0xd78   : > { %v5021_v58 = vpop.f32.mrb[144].mxu1 }
 0xd79   : > { %v5030_v11 = vpack.c.bf16 %v5021_v58, %v4973_v5  ;;  %v9322_v28 = vpop.f32.mrb[145].mxu1 }
 0xd7a   : > { %v5024_v31 = vpop.f32.mrb[146].mxu1 }
 0xd7b   : > { %v9323_v60 = vpop.f32.mrb[147].mxu1  ;;  %9331 = vmatmul.mubr.msk.bf16.gmra.mrb[68].mxu0 %vm1256_vm2, %v5030_v11 }
 0xe3e   : > { %v9328_v39 = vpop.f32.mrb[64].mxu0 }
 0xe3f   : > { %v5080_v49 = vpop.f32.mrb[65].mxu0  ;;  %v5128_v35 = vadd.f32 %v9328_v39, %v8516_v59 }
 0xe40   : > { %v5126_v47 = vadd.f32 %v8516_v59, %v5080_v49  ;;  %v9329_v56 = vpop.f32.mrb[66].mxu0 }
 0xe41   : > { %v5083_v7 = vpop.f32.mrb[67].mxu0  ;;  %v5136_v9 = vadd.f32 %v5128_v35, %v1074_v62  ;;  %v5129_v10 = vadd.f32 %v9329_v56, %v8516_v59 }
 0xe42   : > { %v5134_v0 = vadd.f32 %v5126_v47, %v1072_v63  ;;  %v5127_v61 = vadd.f32 %v8516_v59, %v5083_v7 }
 0xe43   : > { %v5137_v12 = vadd.f32 %v5129_v10, %v1075_v8  ;;  %v5150_v17 = vsel %vm1123_vm0, %v5136_v9, 0.0 }
 0xe44   : > { %v5135_v13 = vadd.f32 %v5127_v61, %v1073_v4  ;;  %v5144_v19 = vsel %vm1123_vm0, %v5134_v0, 0.0 }
 0xe45   : > { %5145 = vadd.xlane.f32.xlu0 %v5144_v19  ;;  %v5153_v23 = vsel %vm1123_vm0, %v5137_v12, 0.0 }
 0xe46   : > { %v5147_v15 = vsel %vm1123_vm0, %v5135_v13, 0.0 }
 0xe47   : > { %5148 = vadd.xlane.f32.xlu1 %v5147_v15 }
 0xe49   : > { %5151 = vadd.xlane.f32.xlu0 %v5150_v17 }
 0xe4d   : > { %5154 = vadd.xlane.f32.xlu0 %v5153_v23  ;;  %v9679_v23 = vld [vmem:[%s10045_s8] sm:$0xff]  }
 0xe4e   : > { %v9332_v46 = vpop.f32.mrb[68].mxu0  ;;  %9334 = vmatprep.subr.bf16.mxu1 %v9679_v23 }
 0xe4f   : > { %v5096_v53 = vpop.f32.mrb[69].mxu0  ;;  %v5132_v34 = vadd.f32 %v9332_v46, %v8516_v59  ;;  %9335 = vmatpush3.bf16.msra.mxu1 %v9679_v23  ;;  %v9682_v46 = vld [vmem:[%s10055_s19 + $0x8] sm:$0xff]  }
 0xe50   : > { %v5130_v38 = vadd.f32 %v8516_v59, %v5096_v53  ;;  %v9333_v37 = vpop.f32.mrb[70].mxu0  ;;  %9336 = vmatprep.subr.bf16.mxu1 %v9680_v29 }
 0xe51   : > { %v5099_v1 = vpop.f32.mrb[71].mxu0  ;;  %v5133_v27 = vadd.f32 %v9333_v37, %v8516_v59  ;;  %v5140_v20 = vadd.f32 %v5132_v34, %v1078_v33 }
 0xe52   : > { %v5138_v14 = vadd.f32 %v5130_v38, %v1076_v32  ;;  %v5131_v51 = vadd.f32 %v8516_v59, %v5099_v1  ;;  %v9681_v32 = vld [vmem:[%s10055_s19] sm:$0xff]  }
 0xe53   : > { %v5141_v43 = vadd.f32 %v5133_v27, %v1079_v16  ;;  %v5162_v54 = vsel %vm1123_vm0, %v5140_v20, 0.0  ;;  %9337 = vmatpush3.bf16.msra.mxu1 %v9680_v29  ;;  %9346 = vmatprep.subr.bf16.mxu0 %v9681_v32 }
 0xe54   : > { %v5139_v41 = vadd.f32 %v5131_v51, %v1077_v57  ;;  %v5156_v26 = vsel %vm1123_vm0, %v5138_v14, 0.0  ;;  %9347 = vmatpush3.bf16.msra.mxu0 %v9681_v32 }
 0xe55   : > { %5157 = vadd.xlane.f32.xlu1 %v5156_v26  ;;  %v5165_v52 = vsel %vm1123_vm0, %v5141_v43, 0.0  ;;  %9348 = vmatprep.subr.bf16.mxu0 %v9682_v46 }
 0xe56   : > { %v5159_v50 = vsel %vm1123_vm0, %v5139_v41, 0.0 }
 0xe57   : > { %5160 = vadd.xlane.f32.xlu0 %v5159_v50 }
 0xe58   : > { %9349 = vmatpush3.bf16.msra.mxu0 %v9682_v46 }
 0xe59   : > { %5163 = vadd.xlane.f32.xlu1 %v5162_v54 }
 0xe5b   : > { %5166 = vadd.xlane.f32.xlu0 %v5165_v52 }
 0xed2   : > { %v5146_v44 = vpop.xlane.xlu0 %5145 }
 0xed3   : > { %v5169_v25 = vmul.f32 0.03125, %v5146_v44 }
 0xed4   : > { %v5149_v3 = vpop.xlane.xlu1 %5148 }
 0xed5   : > { %v11073_v42 = vsub.f32 %v5134_v0, %v5169_v25  ;;  %v5170_v5 = vmul.f32 0.03125, %v5149_v3 }
 0xed6   : > { %v5152_v18 = vpop.xlane.xlu0 %5151 }
 0xed7   : > { %v11075_v36 = vsub.f32 %v5135_v13, %v5170_v5  ;;  %v5171_v40 = vmul.f32 0.03125, %v5152_v18  ;;  %v5185_v48 = vmul.f32 %v11073_v42, %v11073_v42 }
 0xed9   : > { %v11079_v21 = vsub.f32 %v5136_v9, %v5171_v40  ;;  %v5193_v30 = vsel %vm1123_vm0, %v5185_v48, 0.0  ;;  %v5186_v55 = vmul.f32 %v11075_v36, %v11075_v36  ;;  %v8518_v40 = vld [vmem:[%s10040_s3] ss:$0 sm:$0xff] }
 0xeda   : > { %5194 = vadd.xlane.f32.xlu1 %v5193_v30  ;;  %v5155_v24 = vpop.xlane.xlu0 %5154 }
 0xedb   : > { %v5172_v58 = vmul.f32 0.03125, %v5155_v24  ;;  %v5196_v11 = vsel %vm1123_vm0, %v5186_v55, 0.0  ;;  %v5187_v28 = vmul.f32 %v11079_v21, %v11079_v21 }
 0xedc   : > { %5197 = vadd.xlane.f32.xlu0 %v5196_v11 }
 0xedd   : > { %v11087_v31 = vsub.f32 %v5137_v12, %v5172_v58  ;;  %v5199_v60 = vsel %vm1123_vm0, %v5187_v28, 0.0 }
 0xede   : > { %5200 = vadd.xlane.f32.xlu1 %v5199_v60 }
 0xedf   : > { %v5188_v59 = vmul.f32 %v11087_v31, %v11087_v31 }
 0xee1   : > { %v5202_v2 = vsel %vm1123_vm0, %v5188_v59, 0.0 }
 0xee2   : > { %v5158_v63 = vpop.xlane.xlu1 %5157  ;;  %5203 = vadd.xlane.f32.xlu0 %v5202_v2 }
 0xee3   : > { %v5173_v39 = vmul.f32 0.03125, %v5158_v63 }
 0xee4   : > { %v5161_v49 = vpop.xlane.xlu0 %5160 }
 0xee5   : > { %v11093_v4 = vsub.f32 %v5138_v14, %v5173_v39  ;;  %v5174_v45 = vmul.f32 0.03125, %v5161_v49 }
 0xee6   : > { %v5164_v62 = vpop.xlane.xlu1 %5163 }
 0xee7   : > { %v11095_v35 = vsub.f32 %v5139_v41, %v5174_v45  ;;  %v5175_v47 = vmul.f32 0.03125, %v5164_v62  ;;  %v5189_v56 = vmul.f32 %v11093_v4, %v11093_v4  ;;  %v8517_v41 = vld [vmem:[%s10035_s29] ss:$0 sm:$0xff] }
 0xee8   : > { %v5167_v7 = vpop.xlane.xlu0 %5166 }
 0xee9   : > { %v11099_v0 = vsub.f32 %v5140_v20, %v5175_v47  ;;  %v5176_v61 = vmul.f32 0.03125, %v5167_v7  ;;  %v5205_v8 = vsel %vm1123_vm0, %v5189_v56, 0.0  ;;  %v5190_v9 = vmul.f32 %v11095_v35, %v11095_v35 }
 0xeea   : > { %5206 = vadd.xlane.f32.xlu1 %v5205_v8 }
 0xeeb   : > { %v11104_v10 = vsub.f32 %v5141_v43, %v5176_v61  ;;  %v5208_v13 = vsel %vm1123_vm0, %v5190_v9, 0.0  ;;  %v5191_v19 = vmul.f32 %v11099_v0, %v11099_v0 }
 0xeec   : > { %5209 = vadd.xlane.f32.xlu0 %v5208_v13 }
 0xeed   : > { %v5211_v15 = vsel %vm1123_vm0, %v5191_v19, 0.0  ;;  %v5192_v12 = vmul.f32 %v11104_v10, %v11104_v10 }
 0xeee   : > { %5212 = vadd.xlane.f32.xlu1 %v5211_v15 }
 0xeef   : > { %v5214_v17 = vsel %vm1123_vm0, %v5192_v12, 0.0 }
 0xef0   : > { %5215 = vadd.xlane.f32.xlu0 %v5214_v17 }
 0xf67   : > { %v5195_v53 = vpop.xlane.xlu1 %5194 }
 0xf68   : > { %v5217_v57 = vmul.f32 0.03125, %v5195_v53  ;;  %v9684_v53 = vld [vmem:[%s10055_s19 + $0x18] sm:$0xff]  }
 0xf69   : > { %v5198_v22 = vpop.xlane.xlu0 %5197 }
 0xf6a   : > { %v5225_v33 = vadd.f32 1e-05, %v5217_v57  ;;  %v5218_v34 = vmul.f32 0.03125, %v5198_v22  ;;  %v8519_v57 = vld [vmem:[%s10050_s14] ss:$0 sm:$0xff] }
 0xf6b   : > { %v5201_v38 = vpop.xlane.xlu1 %5200 }
 0xf6c   : > { %9845 = vrsqrt.f32 %v5225_v33  ;;  %v5226_v37 = vadd.f32 1e-05, %v5218_v34  ;;  %v5219_v1 = vmul.f32 0.03125, %v5201_v38 }
 0xf6e   : > { %9847 = vrsqrt.f32 %v5226_v37  ;;  %v5227_v14 = vadd.f32 1e-05, %v5219_v1 }
 0xf6f   : > { %v5204_v16 = vpop.xlane.xlu0 %5203 }
 0xf70   : > { %9849 = vrsqrt.f32 %v5227_v14  ;;  %v5220_v27 = vmul.f32 0.03125, %v5204_v16 }
 0xf72   : > { %v5228_v51 = vadd.f32 1e-05, %v5220_v27 }
 0xf74   : > { %9851 = vrsqrt.f32 %v5228_v51 }
 0xf76   : > { %v9846_v20 = vpop.eup %9845 }
 0xf77   : > { %v5241_v26 = vmul.f32 %v9846_v20, %v11073_v42  ;;  %v5207_v43 = vpop.xlane.xlu1 %5206 }
 0xf78   : > { %v9848_v50 = vpop.eup %9847  ;;  %v5221_v54 = vmul.f32 0.03125, %v5207_v43 }
 0xf79   : > { %v5242_v52 = vmul.f32 %v9848_v50, %v11075_v36  ;;  %v5210_v44 = vpop.xlane.xlu0 %5209  ;;  %v5255_v25 = vmul.f32 %v8517_v41, %v5241_v26 }
 0xf7a   : > { %v9850_v3 = vpop.eup %9849  ;;  %v5229_v5 = vadd.f32 1e-05, %v5221_v54  ;;  %v5222_v18 = vmul.f32 0.03125, %v5210_v44 }
 0xf7b   : > { %v5243_v48 = vmul.f32 %v9850_v3, %v11079_v21  ;;  %v5213_v30 = vpop.xlane.xlu1 %5212  ;;  %v5256_v55 = vmul.f32 %v8517_v41, %v5242_v52  ;;  %v11122_v42 = vadd.f32 %v8518_v40, %v5255_v25 }
 0xf7c   : > { %9853 = vrsqrt.f32 %v5229_v5  ;;  %v5230_v24 = vadd.f32 1e-05, %v5222_v18  ;;  %v5223_v58 = vmul.f32 0.03125, %v5213_v30 }
 0xf7d   : > { %v5216_v11 = vpop.xlane.xlu0 %5215  ;;  %v11124_v28 = vadd.f32 %v8518_v40, %v5256_v55  ;;  %v5257_v2 = vmul.f32 %v8517_v41, %v5243_v48 }
 0xf7e   : > { %v9852_v60 = vpop.eup %9851  ;;  %9855 = vrsqrt.f32 %v5230_v24  ;;  %v5231_v36 = vadd.f32 1e-05, %v5223_v58  ;;  %v5224_v59 = vmul.f32 0.03125, %v5216_v11  ;;  %v8526_v11 = vld [vmem:[%s10060_s24] ss:$0 sm:$0xff] }
 0xf7f   : > { %v5244_v63 = vmul.f32 %v9852_v60, %v11087_v31  ;;  %v5277_v21 = vpack.c.bf16 %v11124_v28, %v11122_v42  ;;  %v11130_v45 = vadd.f32 %v8518_v40, %v5257_v2 }
 0xf80   : > { %9857 = vrsqrt.f32 %v5231_v36  ;;  %v5232_v39 = vadd.f32 1e-05, %v5224_v59 }
 0xf81   : > { %v5258_v49 = vmul.f32 %v8517_v41, %v5244_v63  ;;  %9338 = vmatprep.mubr.msk.bf16.mxu1 %vm1123_vm0, %v5277_v21 }
 0xf82   : > { %9859 = vrsqrt.f32 %v5232_v39 }
 0xf83   : > { %v11132_v62 = vadd.f32 %v8518_v40, %v5258_v49 }
 0xf85   : > { %v5278_v47 = vpack.c.bf16 %v11132_v62, %v11130_v45 }
 0xf86   : > { %v9854_v56 = vpop.eup %9853 }
 0xf87   : > { %v5245_v7 = vmul.f32 %v9854_v56, %v11093_v4  ;;  %9339 = vmatmul.mubr.msk.bf16.vlgmr.msra.gmra.mrb[148].mxu1 %vm1123_vm0, %v5278_v47 }
 0xf88   : > { %v9856_v31 = vpop.eup %9855 }
 0xf89   : > { %v5246_v61 = vmul.f32 %v9856_v31, %v11095_v35  ;;  %v5259_v8 = vmul.f32 %v8517_v41, %v5245_v7 }
 0xf8a   : > { %v9858_v9 = vpop.eup %9857 }
 0xf8b   : > { %v5247_v13 = vmul.f32 %v9858_v9, %v11099_v0  ;;  %v5260_v19 = vmul.f32 %v8517_v41, %v5246_v61  ;;  %v11141_v17 = vadd.f32 %v8518_v40, %v5259_v8 }
 0xf8c   : > { %v9860_v15 = vpop.eup %9859 }
 0xf8d   : > { %v5248_v12 = vmul.f32 %v9860_v15, %v11104_v10  ;;  %v11143_v23 = vadd.f32 %v8518_v40, %v5260_v19  ;;  %v5261_v4 = vmul.f32 %v8517_v41, %v5247_v13  ;;  %v9683_v10 = vld [vmem:[%s10055_s19 + $0x10] sm:$0xff]  }
 0xf8e   : > { %9350 = vmatprep.subr.bf16.mxu0 %v9683_v10 }
 0xf8f   : > { %v5279_v29 = vpack.c.bf16 %v11143_v23, %v11141_v17  ;;  %v5262_v35 = vmul.f32 %v8517_v41, %v5248_v12  ;;  %v11148_v32 = vadd.f32 %v8518_v40, %v5261_v4  ;;  %9351 = vmatpush3.bf16.msra.mxu0 %v9683_v10 }
 0xf90   : > { %9352 = vmatprep.subr.bf16.mxu0 %v9684_v53 }
 0xf91   : > { %9342 = vmatprep.mubr.msk.bf16.mxu1 %vm1123_vm0, %v5279_v29  ;;  %v11150_v0 = vadd.f32 %v8518_v40, %v5262_v35 }
 0xf93   : > { %v5280_v46 = vpack.c.bf16 %v11150_v0, %v11148_v32  ;;  %9353 = vmatpush3.bf16.msra.mxu0 %v9684_v53 }
 0xf95   : > { %9343 = vmatmul.mubr.msk.bf16.gmra.mrb[152].mxu1 %vm1123_vm0, %v5280_v46 }
0x105a   : > { %v9340_v22 = vpop.f32.mrb[148].mxu1 }
0x105b   : > { %v5359_v33 = vadd.f32 %v9340_v22, %v8519_v57  ;;  %v5350_v34 = vpop.f32.mrb[149].mxu1 }
0x105c   : > { %v5351_v38 = vadd.f32 %v8519_v57, %v5350_v34  ;;  %v9341_v37 = vpop.f32.mrb[150].mxu1 }
0x105d   : > { %v5362_v1 = vadd.f32 %v9341_v37, %v8519_v57  ;;  %v5353_v14 = vpop.f32.mrb[151].mxu1  ;;  %v5383_v27 = vmax.f32 %v5359_v33, 0.0 }
0x105e   : > { %v5354_v16 = vadd.f32 %v8519_v57, %v5353_v14  ;;  %v5381_v20 = vmax.f32 %v5351_v38, 0.0 }
0x105f   : > { %v5384_v51 = vmax.f32 %v5362_v1, 0.0 }
0x1060   : > { %v5382_v41 = vmax.f32 %v5354_v16, 0.0 }
0x1061   : > { %v5390_v26 = vpack.c.bf16 %v5384_v51, %v5383_v27 }
0x1062   : > { %v5389_v43 = vpack.c.bf16 %v5382_v41, %v5381_v20 }
0x1064   : > { %9354 = vmatprep.mubr.msk.bf16.mxu0 %vm5432_vm4, %v5389_v43 }
0x1065   : > { %9355 = vmatmul.mubr.msk.bf16.vlgmr.msra.gmra.mrb[124].mxu0 %vm5432_vm4, %v5390_v26 }
0x1068   : > { %v9344_v50 = vpop.f32.mrb[152].mxu1 }
0x1069   : > { %v5375_v54 = vadd.f32 %v9344_v50, %v8519_v57  ;;  %v5366_v52 = vpop.f32.mrb[153].mxu1 }
0x106a   : > { %v5367_v44 = vadd.f32 %v8519_v57, %v5366_v52  ;;  %v9345_v25 = vpop.f32.mrb[154].mxu1 }
0x106b   : > { %v5378_v3 = vadd.f32 %v9345_v25, %v8519_v57  ;;  %v5369_v5 = vpop.f32.mrb[155].mxu1  ;;  %v5387_v40 = vmax.f32 %v5375_v54, 0.0 }
0x106c   : > { %v5370_v18 = vadd.f32 %v8519_v57, %v5369_v5  ;;  %v5385_v30 = vmax.f32 %v5367_v44, 0.0 }
0x106d   : > { %v5388_v48 = vmax.f32 %v5378_v3, 0.0 }
0x106e   : > { %v5386_v55 = vmax.f32 %v5370_v18, 0.0 }
0x106f   : > { %v5392_v24 = vpack.c.bf16 %v5388_v48, %v5387_v40 }
0x1070   : > { %v5391_v58 = vpack.c.bf16 %v5386_v55, %v5385_v30 }
0x1072   : > { %9358 = vmatprep.mubr.msk.bf16.mxu0 %vm5432_vm4, %v5391_v58 }
0x1073   : > { %9359 = vmatmul.mubr.msk.bf16.gmra.mrb[128].mxu0 %vm5432_vm4, %v5392_v24 }
0x1138   : > { %v9356_v60 = vpop.f32.mrb[124].mxu0 }
0x1139   : > { %v5479_v36 = vpop.f32.mrb[125].mxu0  ;;  %v5488_v59 = vadd.f32 %v9356_v60, %v8526_v11 }
0x113a   : > { %v5480_v2 = vadd.f32 %v8526_v11, %v5479_v36  ;;  %v9357_v63 = vpop.f32.mrb[126].mxu0 }
0x113b   : > { %v5482_v21 = vpop.f32.mrb[127].mxu0  ;;  %v5491_v49 = vadd.f32 %v9357_v63, %v8526_v11  ;;  %v5512_v56 = vadd.f32 %v5488_v59, %v11130_v45 }
0x113c   : > { %v5510_v39 = vadd.f32 %v5480_v2, %v11122_v42  ;;  %v5483_v47 = vadd.f32 %v8526_v11, %v5482_v21 }
0x113d   : > { %v5513_v61 = vadd.f32 %v5491_v49, %v11132_v62  ;;  %v5526_v9 = vsel %vm1123_vm0, %v5512_v56, 0.0 }
0x113e   : > { %v5511_v7 = vadd.f32 %v5483_v47, %v11124_v28  ;;  %v5520_v31 = vsel %vm1123_vm0, %v5510_v39, 0.0 }
0x113f   : > { %5521 = vadd.xlane.f32.xlu1 %v5520_v31  ;;  %v5529_v13 = vsel %vm1123_vm0, %v5513_v61, 0.0  ;;  %v9687_v31 = vld [vmem:[%s10095_s6] sm:$0xff]  }
0x1140   : > { %v5523_v8 = vsel %vm1123_vm0, %v5511_v7, 0.0 }
0x1141   : > { %5524 = vadd.xlane.f32.xlu0 %v5523_v8 }
0x1143   : > { %5527 = vadd.xlane.f32.xlu1 %v5526_v9 }
0x1145   : > { %5530 = vadd.xlane.f32.xlu0 %v5529_v13 }
0x1146   : > { %v9360_v42 = vpop.f32.mrb[128].mxu0 }
0x1147   : > { %v5495_v19 = vpop.f32.mrb[129].mxu0  ;;  %v5504_v15 = vadd.f32 %v9360_v42, %v8526_v11 }
0x1148   : > { %v5496_v45 = vadd.f32 %v8526_v11, %v5495_v19  ;;  %v9361_v12 = vpop.f32.mrb[130].mxu0 }
0x1149   : > { %v5498_v28 = vpop.f32.mrb[131].mxu0  ;;  %v5507_v29 = vadd.f32 %v9361_v12, %v8526_v11  ;;  %v5516_v62 = vadd.f32 %v5504_v15, %v11148_v32 }
0x114a   : > { %v5514_v4 = vadd.f32 %v5496_v45, %v11141_v17  ;;  %v5499_v35 = vadd.f32 %v8526_v11, %v5498_v28 }
0x114b   : > { %v5517_v53 = vadd.f32 %v5507_v29, %v11150_v0  ;;  %v5538_v22 = vsel %vm1123_vm0, %v5516_v62, 0.0 }
0x114c   : > { %v5515_v46 = vadd.f32 %v5499_v35, %v11143_v23  ;;  %v5532_v10 = vsel %vm1123_vm0, %v5514_v4, 0.0 }
0x114d   : > { %5533 = vadd.xlane.f32.xlu1 %v5532_v10  ;;  %v5541_v33 = vsel %vm1123_vm0, %v5517_v53, 0.0 }
0x114e   : > { %v5535_v57 = vsel %vm1123_vm0, %v5515_v46, 0.0 }
0x114f   : > { %5536 = vadd.xlane.f32.xlu0 %v5535_v57 }
0x1151   : > { %5539 = vadd.xlane.f32.xlu1 %v5538_v22 }
0x1153   : > { %5542 = vadd.xlane.f32.xlu0 %v5541_v33 }
0x11cc   : > { %v5522_v17 = vpop.xlane.xlu1 %5521 }
0x11cd   : > { %v5544_v34 = vmul.f32 0.03125, %v5522_v17 }
0x11ce   : > { %v5525_v38 = vpop.xlane.xlu0 %5524 }
0x11cf   : > { %v11179_v32 = vsub.f32 %v5510_v39, %v5544_v34  ;;  %v5545_v23 = vmul.f32 0.03125, %v5525_v38 }
0x11d0   : > { %v5528_v37 = vpop.xlane.xlu1 %5527 }
0x11d1   : > { %v11181_v1 = vsub.f32 %v5511_v7, %v5545_v23  ;;  %v5546_v14 = vmul.f32 0.03125, %v5528_v37  ;;  %v5560_v0 = vmul.f32 %v11179_v32, %v11179_v32  ;;  %v9686_v7 = vld [vmem:[%s10075_s12 + $0x8] sm:$0xff]  }
0x11d2   : > { %v5531_v16 = vpop.xlane.xlu0 %5530 }
0x11d3   : > { %v11185_v27 = vsub.f32 %v5512_v56, %v5546_v14  ;;  %v5547_v51 = vmul.f32 0.03125, %v5531_v16  ;;  %v5568_v20 = vsel %vm1123_vm0, %v5560_v0, 0.0  ;;  %v5561_v41 = vmul.f32 %v11181_v1, %v11181_v1  ;;  %v9685_v56 = vld [vmem:[%s10075_s12] sm:$0xff]  }
0x11d4   : > { %5569 = vadd.xlane.f32.xlu1 %v5568_v20  ;;  %9362 = vmatprep.subr.bf16.mxu1 %v9685_v56  ;;  %v8536_v14 = vld [vmem:[%s11817_s1] ss:$0 sm:$0xff]  ;;  %s11818_s1 = sld [smem:[#allocation8_spill]] }
0x11d5   : > { %v11190_v26 = vsub.f32 %v5513_v61, %v5547_v51  ;;  %v5571_v43 = vsel %vm1123_vm0, %v5561_v41, 0.0  ;;  %v5562_v50 = vmul.f32 %v11185_v27, %v11185_v27  ;;  %9363 = vmatpush3.bf16.msra.mxu1 %v9685_v56 }
0x11d6   : > { %5572 = vadd.xlane.f32.xlu0 %v5571_v43  ;;  %9364 = vmatprep.subr.bf16.mxu1 %v9686_v7 }
0x11d7   : > { %v5574_v54 = vsel %vm1123_vm0, %v5562_v50, 0.0  ;;  %v5563_v52 = vmul.f32 %v11190_v26, %v11190_v26 }
0x11d8   : > { %5575 = vadd.xlane.f32.xlu1 %v5574_v54 }
0x11d9   : > { %v5577_v44 = vsel %vm1123_vm0, %v5563_v52, 0.0  ;;  %9365 = vmatpush3.bf16.msra.mxu1 %v9686_v7 }
0x11da   : > { %v5534_v25 = vpop.xlane.xlu1 %5533  ;;  %5578 = vadd.xlane.f32.xlu0 %v5577_v44  ;;  %9390 = vmatprep.subr.bf16.mxu1 %v9687_v31 }
0x11db   : > { %v5548_v3 = vmul.f32 0.03125, %v5534_v25 }
0x11dc   : > { %v5537_v5 = vpop.xlane.xlu0 %5536 }
0x11dd   : > { %v11199_v18 = vsub.f32 %v5514_v4, %v5548_v3  ;;  %v5549_v40 = vmul.f32 0.03125, %v5537_v5 }
0x11de   : > { %v5540_v48 = vpop.xlane.xlu1 %5539 }
0x11df   : > { %v11201_v30 = vsub.f32 %v5515_v46, %v5549_v40  ;;  %v5550_v55 = vmul.f32 0.03125, %v5540_v48  ;;  %v5564_v24 = vmul.f32 %v11199_v18, %v11199_v18  ;;  %v8535_v46 = vld [vmem:[%s11816_s2] ss:$0 sm:$0xff]  ;;  %v9688_v48 = vld [vmem:[%s10095_s6 + $0x8] sm:$0xff]   ;;  %s11819_s2 = sld [smem:[#allocation7_spill]] }
0x11e0   : > { %v5543_v58 = vpop.xlane.xlu0 %5542 }
0x11e1   : > { %v11205_v11 = vsub.f32 %v5516_v62, %v5550_v55  ;;  %v5551_v60 = vmul.f32 0.03125, %v5543_v58  ;;  %v5580_v36 = vsel %vm1123_vm0, %v5564_v24, 0.0  ;;  %v5565_v59 = vmul.f32 %v11201_v30, %v11201_v30 }
0x11e2   : > { %5581 = vadd.xlane.f32.xlu1 %v5580_v36 }
0x11e3   : > { %v11210_v2 = vsub.f32 %v5517_v53, %v5551_v60  ;;  %v5583_v63 = vsel %vm1123_vm0, %v5565_v59, 0.0  ;;  %v5566_v21 = vmul.f32 %v11205_v11, %v11205_v11  ;;  %v9689_v59 = vld [vmem:[%s10095_s6 + $0x10] sm:$0xff]  }
0x11e4   : > { %5584 = vadd.xlane.f32.xlu0 %v5583_v63 }
0x11e5   : > { %v5586_v39 = vsel %vm1123_vm0, %v5566_v21, 0.0  ;;  %v5567_v49 = vmul.f32 %v11210_v2, %v11210_v2 }
0x11e6   : > { %5587 = vadd.xlane.f32.xlu1 %v5586_v39 }
0x11e7   : > { %v5589_v47 = vsel %vm1123_vm0, %v5567_v49, 0.0 }
0x11e8   : > { %5590 = vadd.xlane.f32.xlu0 %v5589_v47 }
0x1261   : > { %v5570_v61 = vpop.xlane.xlu1 %5569 }
0x1262   : > { %v5592_v8 = vmul.f32 0.03125, %v5570_v61 }
0x1263   : > { %v5573_v9 = vpop.xlane.xlu0 %5572 }
0x1264   : > { %v5600_v13 = vadd.f32 1e-05, %v5592_v8  ;;  %v5593_v42 = vmul.f32 0.03125, %v5573_v9  ;;  %v9690_v8 = vld [vmem:[%s10095_s6 + $0x18] sm:$0xff]   ;;  %v9691_v9 = vld [vmem:[%s10095_s6 + $0x20] sm:$0xff]  }
0x1265   : > { %v5576_v19 = vpop.xlane.xlu1 %5575 }
0x1266   : > { %9861 = vrsqrt.f32 %v5600_v13  ;;  %v5601_v15 = vadd.f32 1e-05, %v5593_v42  ;;  %v5594_v45 = vmul.f32 0.03125, %v5576_v19  ;;  %v9692_v13 = vld [vmem:[%s11818_s1] sm:$0xff]   ;;  %v9693_v42 = vld [vmem:[%s10095_s6 + $0x28] sm:$0xff]  }
0x1267   : > { %v5579_v12 = vpop.xlane.xlu0 %5578  ;;  %9374 = vmatprep.subr.bf16.mxu0 %v9692_v13  ;;  %v9694_v19 = vld [vmem:[%s11818_s1 + $0x8] sm:$0xff]  }
0x1268   : > { %9863 = vrsqrt.f32 %v5601_v15  ;;  %v5602_v28 = vadd.f32 1e-05, %v5594_v45  ;;  %v5595_v4 = vmul.f32 0.03125, %v5579_v12  ;;  %9375 = vmatpush3.bf16.msra.mxu0 %v9692_v13  ;;  %v9695_v15 = vld [vmem:[%s11818_s1 + $0x10] sm:$0xff]   ;;  %v9696_v45 = vld [vmem:[%s11818_s1 + $0x18] sm:$0xff]   ;;  %v9697_v12 = vld [vmem:[%s11818_s1 + $0x20] sm:$0xff]  }
0x1269   : > { %9376 = vmatprep.subr.bf16.mxu0 %v9694_v19 }
0x126a   : > { %9865 = vrsqrt.f32 %v5602_v28  ;;  %v5603_v29 = vadd.f32 1e-05, %v5595_v4  ;;  %v9698_v28 = vld [vmem:[%s11818_s1 + $0x28] sm:$0xff]   ;;  %v8537_v4 = vld [vmem:[%s11819_s2] ss:$0 sm:$0xff]  ;;  %s8407_s2 = sld [smem:[#allocation2 + $0x1]] }
0x126c   : > { %9867 = vrsqrt.f32 %v5603_v29  ;;  %9377 = vmatpush3.bf16.msra.mxu0 %v9694_v19 }
0x126d   : > { %9378 = vmatprep.subr.bf16.mxu0 %v9695_v15 }
0x126f   : > { %v5582_v35 = vpop.xlane.xlu1 %5581 }
0x1270   : > { %v9862_v62 = vpop.eup %9861  ;;  %v5596_v10 = vmul.f32 0.03125, %v5582_v35  ;;  %9379 = vmatpush3.bf16.msra.mxu0 %v9695_v15  ;;  %v5764_v35 = vstv %s1061_s26  ;;  %s11820_s26 = sld [smem:[#allocation9_spill]] }
0x1271   : > { %v5616_v53 = vmul.f32 %v9862_v62, %v11179_v32  ;;  %v5585_v57 = vpop.xlane.xlu0 %5584  ;;  %9380 = vmatprep.subr.bf16.mxu0 %v9696_v45 }
0x1272   : > { %v9864_v22 = vpop.eup %9863  ;;  %v5604_v33 = vadd.f32 1e-05, %v5596_v10  ;;  %v5597_v17 = vmul.f32 0.03125, %v5585_v57 }
0x1273   : > { %v5617_v34 = vmul.f32 %v9864_v22, %v11181_v1  ;;  %v5588_v38 = vpop.xlane.xlu1 %5587  ;;  %v5630_v23 = vmul.f32 %v8535_v46, %v5616_v53 }
0x1274   : > { %v9866_v37 = vpop.eup %9865  ;;  %9869 = vrsqrt.f32 %v5604_v33  ;;  %v5605_v0 = vadd.f32 1e-05, %v5597_v17  ;;  %v5598_v16 = vmul.f32 0.03125, %v5588_v38  ;;  %9381 = vmatpush3.bf16.msra.mxu0 %v9696_v45 }
0x1275   : > { %v5618_v51 = vmul.f32 %v9866_v37, %v11185_v27  ;;  %v5591_v20 = vpop.xlane.xlu0 %5590  ;;  %v5631_v41 = vmul.f32 %v8535_v46, %v5617_v34  ;;  %v11228_v1 = vadd.f32 %v8536_v14, %v5630_v23  ;;  %9382 = vmatprep.subr.bf16.mxu0 %v9697_v12 }
0x1276   : > { %v9868_v43 = vpop.eup %9867  ;;  %9871 = vrsqrt.f32 %v5605_v0  ;;  %v5606_v32 = vadd.f32 1e-05, %v5598_v16  ;;  %v5599_v50 = vmul.f32 0.03125, %v5591_v20 }
0x1277   : > { %v5632_v54 = vmul.f32 %v8535_v46, %v5618_v51  ;;  %v5619_v52 = vmul.f32 %v9868_v43, %v11190_v26  ;;  %v11230_v44 = vadd.f32 %v8536_v14, %v5631_v41 }
0x1278   : > { %9873 = vrsqrt.f32 %v5606_v32  ;;  %v5607_v25 = vadd.f32 1e-05, %v5599_v50  ;;  %9383 = vmatpush3.bf16.msra.mxu0 %v9697_v12 }
0x1279   : > { %v5633_v3 = vmul.f32 %v8535_v46, %v5619_v52  ;;  %v5652_v27 = vpack.c.bf16 %v11230_v44, %v11228_v1  ;;  %v11234_v5 = vadd.f32 %v8536_v14, %v5632_v54  ;;  %9384 = vmatprep.subr.bf16.mxu0 %v9698_v28 }
0x127a   : > { %9875 = vrsqrt.f32 %v5607_v25 }
0x127b   : > { %v11236_v40 = vadd.f32 %v8536_v14, %v5633_v3  ;;  %9366 = vmatprep.mubr.msk.bf16.mxu1 %vm1123_vm0, %v5652_v27 }
0x127c   : > { %9385 = vmatpush3.bf16.msra.mxu0 %v9698_v28 }
0x127d   : > { %v5653_v26 = vpack.c.bf16 %v11236_v40, %v11234_v5 }
0x127e   : > { %v9870_v55 = vpop.eup %9869 }
0x127f   : > { %v5620_v24 = vmul.f32 %v9870_v55, %v11199_v18  ;;  %9367 = vmatmul.mubr.msk.bf16.vlgmr.msra.gmra.mrb[156].mxu1 %vm1123_vm0, %v5653_v26 }
0x1280   : > { %v9872_v58 = vpop.eup %9871  ;;  %9391 = vmatpush3.bf16.msra.mxu1 %v9687_v31 }
0x1281   : > { %v5621_v60 = vmul.f32 %v9872_v58, %v11201_v30  ;;  %v5634_v36 = vmul.f32 %v8535_v46, %v5620_v24  ;;  %9392 = vmatprep.subr.bf16.mxu1 %v9688_v48 }
0x1282   : > { %v9874_v63 = vpop.eup %9873 }
0x1283   : > { %v5622_v21 = vmul.f32 %v9874_v63, %v11205_v11  ;;  %v5635_v39 = vmul.f32 %v8535_v46, %v5621_v60  ;;  %v11248_v18 = vadd.f32 %v8536_v14, %v5634_v36 }
0x1284   : > { %v9876_v49 = vpop.eup %9875  ;;  %9393 = vmatpush3.bf16.msra.mxu1 %v9688_v48 }
0x1285   : > { %v5623_v47 = vmul.f32 %v9876_v49, %v11210_v2  ;;  %v11250_v56 = vadd.f32 %v8536_v14, %v5635_v39  ;;  %v5636_v7 = vmul.f32 %v8535_v46, %v5622_v21  ;;  %9394 = vmatprep.subr.bf16.mxu1 %v9689_v59 }
0x1287   : > { %v5654_v30 = vpack.c.bf16 %v11250_v56, %v11248_v18  ;;  %v5637_v31 = vmul.f32 %v8535_v46, %v5623_v47  ;;  %v11255_v11 = vadd.f32 %v8536_v14, %v5636_v7 }
0x1288   : > { %9395 = vmatpush3.bf16.msra.mxu1 %v9689_v59 }
0x1289   : > { %9370 = vmatprep.mubr.msk.bf16.mxu1 %vm1123_vm0, %v5654_v30  ;;  %v11257_v2 = vadd.f32 %v8536_v14, %v5637_v31  ;;  %9396 = vmatprep.subr.bf16.mxu1 %v9690_v8 }
0x128b   : > { %v5655_v61 = vpack.c.bf16 %v11257_v2, %v11255_v11 }
0x128c   : > { %9397 = vmatpush3.bf16.msra.mxu1 %v9690_v8 }
0x128d   : > { %9371 = vmatmul.mubr.msk.bf16.gmra.mrb[160].mxu1 %vm1123_vm0, %v5655_v61  ;;  %9398 = vmatprep.subr.bf16.mxu1 %v9691_v9 }
0x1290   : > { %9399 = vmatpush3.bf16.msra.mxu1 %v9691_v9 }
0x1291   : > { %9400 = vmatprep.subr.bf16.mxu1 %v9693_v42 }
0x1294   : > { %9401 = vmatpush3.bf16.msra.mxu1 %v9693_v42 }
0x1295   : > { %9426 = vmatprep.subr.bf16.mxu1 %v9983_v6 }
0x1352   : > { %v9368_v29 = vpop.f32.mrb[156].mxu1 }
0x1353   : > { %v5734_v62 = vadd.f32 %v9368_v29, %v8537_v4  ;;  %v5725_v46 = vpop.f32.mrb[157].mxu1  ;;  %v9699_v29 = vld [vmem:[%s10095_s6 + $0x30] sm:$0xff]  }
0x1354   : > { %v5726_v10 = vadd.f32 %v8537_v4, %v5725_v46  ;;  %v9369_v53 = vpop.f32.mrb[158].mxu1  ;;  %9410 = vmatprep.subr.bf16.mxu0 %v9699_v29  ;;  %v9702_v46 = vld [vmem:[%s10095_s6 + $0x48] sm:$0xff]  }
0x1355   : > { %v5767_v57 = vmul.f32 %v5764_v35, %v5734_v62  ;;  %v5737_v22 = vadd.f32 %v9369_v53, %v8537_v4  ;;  %v5728_v33 = vpop.f32.mrb[159].mxu1  ;;  %vm5758_vm5 = vcmp.ge.f32.partialorder %v5734_v62, 0.0  ;;  %v9704_v53 = vld [vmem:[%s10095_s6 + $0x58] sm:$0xff]  }
0x1356   : > { %v5765_v17 = vmul.f32 %v5764_v35, %v5726_v10  ;;  %v5729_v34 = vadd.f32 %v8537_v4, %v5728_v33  ;;  %vm5756_vm6 = vcmp.ge.f32.partialorder %v5726_v10, 0.0 }
0x1357   : > { %vm5759_vm7 = vcmp.ge.f32.partialorder %v5737_v22, 0.0  ;;  %v5768_v38 = vmul.f32 %v5764_v35, %v5737_v22  ;;  %v5775_v37 = vsel %vm5758_vm5, %v5734_v62, %v5767_v57  ;;  %v9701_v62 = vld [vmem:[%s10095_s6 + $0x40] sm:$0xff]  }
0x1358   : > { %vm5757_vm8 = vcmp.ge.f32.partialorder %v5729_v34, 0.0  ;;  %v5766_v23 = vmul.f32 %v5764_v35, %v5729_v34  ;;  %v5773_v0 = vsel %vm5756_vm6, %v5726_v10, %v5765_v17  ;;  %v5788_v27 = vsel %vm5781_vm9, %v5775_v37, 0.0  ;;  %v9703_v10 = vld [vmem:[%s10095_s6 + $0x50] sm:$0xff]  }
0x1359   : > { %v5776_v14 = vsel %vm5759_vm7, %v5737_v22, %v5768_v38  ;;  %v5782_v55 = vsel %vm5781_vm9, %v5773_v0, 0.0 }
0x135a   : > { %v5949_v16 = vpack.c.bf16 %v5776_v14, %v5775_v37  ;;  %v5774_v51 = vsel %vm5757_vm8, %v5729_v34, %v5766_v23  ;;  %v5791_v63 = vsel %vm5781_vm9, %v5776_v14, 0.0  ;;  %v8544_v14 = vld [vmem:[%s11820_s26] ss:$0 sm:$0xff]  ;;  %s8408_s26 = sld [smem:[#allocation2 + $0x2]] }
0x135b   : > { %v5948_v20 = vpack.c.bf16 %v5774_v51, %v5773_v0  ;;  %v5785_v61 = vsel %vm5781_vm9, %v5774_v51, 0.0 }
0x135d   : > { %9402 = vmatprep.mubr.msk.bf16.mxu1 %vm5781_vm9, %v5948_v20 }
0x135e   : > { %9403 = vmatmul.mubr.msk.bf16.vlgmr.msra.gmra.mrb[164].mxu1 %vm5781_vm9, %v5949_v16  ;;  %v5915_v16 = vstv %s8407_s2  ;;  %s11823_s2 = sld [smem:[#allocation11_spill]] }
0x1360   : > { %v9372_v41 = vpop.f32.mrb[160].mxu1 }
0x1361   : > { %v5750_v43 = vadd.f32 %v9372_v41, %v8537_v4  ;;  %v5741_v32 = vpop.f32.mrb[161].mxu1 }
0x1362   : > { %v5742_v50 = vadd.f32 %v8537_v4, %v5741_v32  ;;  %v9373_v54 = vpop.f32.mrb[162].mxu1 }
0x1363   : > { %vm5762_vm10 = vcmp.ge.f32.partialorder %v5750_v43, 0.0  ;;  %v5771_v52 = vmul.f32 %v5764_v35, %v5750_v43  ;;  %v5753_v25 = vadd.f32 %v9373_v54, %v8537_v4  ;;  %v5744_v3 = vpop.f32.mrb[163].mxu1 }
0x1364   : > { %vm5760_vm11 = vcmp.ge.f32.partialorder %v5742_v50, 0.0  ;;  %v5769_v26 = vmul.f32 %v5764_v35, %v5742_v50  ;;  %v5745_v48 = vadd.f32 %v8537_v4, %v5744_v3 }
0x1365   : > { %v5779_v24 = vsel %vm5762_vm10, %v5750_v43, %v5771_v52  ;;  %vm5763_vm12 = vcmp.ge.f32.partialorder %v5753_v25, 0.0  ;;  %v5772_v58 = vmul.f32 %v5764_v35, %v5753_v25 }
0x1366   : > { %v5789_v60 = vsel %vm5781_vm9, %v5779_v24, 0.0  ;;  %v5777_v36 = vsel %vm5760_vm11, %v5742_v50, %v5769_v26  ;;  %vm5761_vm13 = vcmp.ge.f32.partialorder %v5745_v48, 0.0  ;;  %v5770_v59 = vmul.f32 %v5764_v35, %v5745_v48  ;;  %v9700_v35 = vld [vmem:[%s10095_s6 + $0x38] sm:$0xff]  }
0x1367   : > { %v5790_v21 = vadd.f32 %v5789_v60, %v5788_v27  ;;  %v5783_v39 = vsel %vm5781_vm9, %v5777_v36, 0.0  ;;  %v5780_v49 = vsel %vm5763_vm12, %v5753_v25, %v5772_v58 }
0x1368   : > { %v5784_v47 = vadd.f32 %v5783_v39, %v5782_v55  ;;  %v5792_v7 = vsel %vm5781_vm9, %v5780_v49, 0.0  ;;  %v5951_v30 = vpack.c.bf16 %v5780_v49, %v5779_v24  ;;  %v5778_v31 = vsel %vm5761_vm13, %v5745_v48, %v5770_v59  ;;  %v8571_v59 = vld [vmem:[%s11821_s23] ss:$0 sm:$0xff]  ;;  %s11822_s23 = sld [smem:[#allocation13_spill]] }
0x1369   : > { %v5793_v8 = vadd.f32 %v5792_v7, %v5791_v63  ;;  %v5786_v9 = vsel %vm5781_vm9, %v5778_v31, 0.0  ;;  %v5950_v13 = vpack.c.bf16 %v5778_v31, %v5777_v36  ;;  %v5797_v19 = vmul.f32 0.5, %v5790_v21 }
0x136a   : > { %v5787_v42 = vadd.f32 %v5786_v9, %v5785_v61  ;;  %v5795_v45 = vmul.f32 0.5, %v5784_v47 }
0x136b   : > { %v5798_v15 = vmul.f32 0.5, %v5793_v8  ;;  %9406 = vmatprep.mubr.msk.bf16.mxu1 %vm5781_vm9, %v5950_v13 }
0x136c   : > { %v5796_v12 = vmul.f32 0.5, %v5787_v42  ;;  %9407 = vmatmul.mubr.msk.bf16.gmra.mrb[168].mxu1 %vm5781_vm9, %v5951_v30  ;;  %v6189_v30 = vstv %s8408_s26  ;;  %s11824_s26 = sld [smem:[#allocation12_spill]] }
0x136d   : > { %v5800_v28 = vpack.c.bf16 %v5798_v15, %v5797_v19  ;;  %9430 = vmatprep.mubr.msk.bf16.mxu1 %vm9984_vm1, %v9983_v6 }
0x136e   : > { %v5799_v4 = vpack.c.bf16 %v5796_v12, %v5795_v45 }
0x1370   : > { %9386 = vmatprep.mubr.msk.bf16.mxu0 %vm5781_vm9, %v5799_v4 }
0x1371   : > { %9387 = vmatmul.mubr.msk.bf16.vlgmr.msra.gmra.mrb[132].mxu0 %vm5781_vm9, %v5800_v28 }
0x1372   : > { %9411 = vmatpush3.bf16.msra.mxu0 %v9699_v29 }
0x1373   : > { %9412 = vmatprep.subr.bf16.mxu0 %v9700_v35 }
0x1376   : > { %9413 = vmatpush3.bf16.msra.mxu0 %v9700_v35 }
0x1377   : > { %9414 = vmatprep.subr.bf16.mxu0 %v9701_v62 }
0x137a   : > { %9415 = vmatpush3.bf16.msra.mxu0 %v9701_v62 }
0x137b   : > { %9416 = vmatprep.subr.bf16.mxu0 %v9702_v46 }
0x137e   : > { %9417 = vmatpush3.bf16.msra.mxu0 %v9702_v46 }
0x137f   : > { %9418 = vmatprep.subr.bf16.mxu0 %v9703_v10 }
0x1382   : > { %9419 = vmatpush3.bf16.msra.mxu0 %v9703_v10 }
0x1383   : > { %9420 = vmatprep.subr.bf16.mxu0 %v9704_v53 }
0x1386   : > { %9421 = vmatpush3.bf16.msra.mxu0 %v9704_v53 }
0x1387   : > { %9440 = vmatprep.subr.bf16.mxu0 %v9983_v6 }
0x1431   : > { %v9404_v57 = vpop.f32.mrb[164].mxu1 }
0x1432   : > { %v6034_v22 = vpop.f32.mrb[165].mxu1 }
0x1433   : > { %v9405_v33 = vpop.f32.mrb[166].mxu1 }
0x1434   : > { %v6037_v17 = vpop.f32.mrb[167].mxu1 }
0x143f   : > { %v9408_v34 = vpop.f32.mrb[168].mxu1 }
0x1440   : > { %v6050_v38 = vpop.f32.mrb[169].mxu1 }
0x1441   : > { %v9409_v23 = vpop.f32.mrb[170].mxu1 }
0x1442   : > { %v6053_v37 = vpop.f32.mrb[171].mxu1 }
0x1444   : > { %v9388_v0 = vpop.f32.mrb[132].mxu0 }
0x1445   : > { %v5905_v51 = vadd.f32 %v9388_v0, %v8544_v14  ;;  %v5896_v20 = vpop.f32.mrb[133].mxu0 }
0x1446   : > { %v5897_v41 = vadd.f32 %v8544_v14, %v5896_v20  ;;  %v9389_v43 = vpop.f32.mrb[134].mxu0 }
0x1447   : > { %v5918_v32 = vmul.f32 %v5915_v16, %v5905_v51  ;;  %v5908_v50 = vadd.f32 %v9389_v43, %v8544_v14  ;;  %v5899_v54 = vpop.f32.mrb[135].mxu0  ;;  %vm5913_vm14 = vcmp.ge.f32.partialorder %v5905_v51, 0.0 }
0x1448   : > { %v5916_v52 = vmul.f32 %v5915_v16, %v5897_v41  ;;  %v5900_v25 = vadd.f32 %v8544_v14, %v5899_v54  ;;  %vm5911_vm15 = vcmp.ge.f32.partialorder %v5897_v41, 0.0 }
0x1449   : > { %vm5914_vm5 = vcmp.ge.f32.partialorder %v5908_v50, 0.0  ;;  %v5919_v3 = vmul.f32 %v5915_v16, %v5908_v50  ;;  %v5922_v26 = vsel %vm5913_vm14, %v5905_v51, %v5918_v32 }
0x144a   : > { %vm5912_vm6 = vcmp.ge.f32.partialorder %v5900_v25, 0.0  ;;  %v5917_v27 = vmul.f32 %v5915_v16, %v5900_v25  ;;  %v5920_v55 = vsel %vm5911_vm15, %v5897_v41, %v5916_v52  ;;  %vm6476_vm15 = vcmask 1041409  }
0x144b   : > { %v5923_v48 = vsel %vm5914_vm5, %v5908_v50, %v5919_v3  ;;  %vm6478_vm5 = vcmask 1042434  }
0x144c   : > { %v6066_v24 = vpack.c.bf16 %v5923_v48, %v5922_v26  ;;  %v5921_v58 = vsel %vm5912_vm6, %v5900_v25, %v5917_v27  ;;  %vm6480_vm6 = vcmask 1043459  }
0x144d   : > { %v6065_v60 = vpack.c.bf16 %v5921_v58, %v5920_v55 }
0x144f   : > { %9422 = vmatprep.mubr.msk.bf16.mxu0 %vm5781_vm9, %v6065_v60 }
0x1450   : > { %9423 = vmatmul.mubr.msk.bf16.vlgmr.msra.gmra.mrb[136].mxu0 %vm5781_vm9, %v6066_v24 }
0x1451   : > { %9442 = vmatprep.mubr.msk.bf16.mxu0 %vm9984_vm1, %v9983_v6 }
0x1523   : > { %v9424_v36 = vpop.f32.mrb[136].mxu0 }
0x1524   : > { %v6160_v63 = vadd.f32 %v9424_v36, %v9404_v57  ;;  %v6164_v21 = vadd.f32 %v9424_v36, %v9408_v34  ;;  %v6143_v39 = vpop.f32.mrb[137].mxu0 }
0x1525   : > { %v6158_v49 = vadd.f32 %v6143_v39, %v6034_v22  ;;  %v6162_v47 = vadd.f32 %v6143_v39, %v6050_v38  ;;  %v9425_v7 = vpop.f32.mrb[138].mxu0 }
0x1526   : > { %v6175_v31 = vadd.f32 %v8571_v59, %v6160_v63  ;;  %v6161_v61 = vadd.f32 %v9425_v7, %v9405_v33  ;;  %v6165_v8 = vadd.f32 %v9425_v7, %v9409_v23  ;;  %v6146_v9 = vpop.f32.mrb[139].mxu0  ;;  %v6179_v57 = vadd.f32 %v8571_v59, %v6164_v21 }
0x1527   : > { %v6173_v13 = vadd.f32 %v8571_v59, %v6158_v49  ;;  %v6177_v42 = vadd.f32 %v8571_v59, %v6162_v47  ;;  %v6159_v19 = vadd.f32 %v6146_v9, %v6037_v17  ;;  %v6163_v15 = vadd.f32 %v6146_v9, %v6053_v37 }
0x1528   : > { %v6176_v45 = vadd.f32 %v8571_v59, %v6161_v61  ;;  %vm6183_vm7 = vcmp.ge.f32.partialorder %v6175_v31, 0.0  ;;  %v6192_v12 = vmul.f32 %v6189_v30, %v6175_v31  ;;  %v6180_v34 = vadd.f32 %v8571_v59, %v6165_v8 }
0x1529   : > { %v6174_v28 = vadd.f32 %v8571_v59, %v6159_v19  ;;  %v6178_v4 = vadd.f32 %v8571_v59, %v6163_v15  ;;  %vm6185_vm8 = vcmp.ge.f32.partialorder %v6177_v42, 0.0  ;;  %v6194_v29 = vmul.f32 %v6189_v30, %v6177_v42 }
0x152a   : > { %v11302_v35 = vsel %vm6183_vm7, %v6175_v31, %v6192_v12  ;;  %vm6181_vm9 = vcmp.ge.f32.partialorder %v6173_v13, 0.0  ;;  %v6190_v62 = vmul.f32 %v6189_v30, %v6173_v13  ;;  %v6193_v23 = vmul.f32 %v6189_v30, %v6176_v45 }
0x152b   : > { %v6212_v46 = vsel %vm1123_vm0, %v11302_v35, 0.0  ;;  %v11306_v10 = vsel %vm6185_vm8, %v6177_v42, %v6194_v29  ;;  %vm6182_vm10 = vcmp.ge.f32.partialorder %v6174_v28, 0.0  ;;  %v6191_v53 = vmul.f32 %v6189_v30, %v6174_v28 }
0x152c   : > { %6213 = vadd.xlane.f32.xlu1 %v6212_v46  ;;  %v6218_v22 = vsel %vm1123_vm0, %v11306_v10, 0.0  ;;  %v11310_v33 = vsel %vm6181_vm9, %v6173_v13, %v6190_v62  ;;  %v6195_v17 = vmul.f32 %v6189_v30, %v6178_v4  ;;  %vm6186_vm11 = vcmp.ge.f32.partialorder %v6178_v4, 0.0 }
0x152d   : > { %6219 = vadd.xlane.f32.xlu0 %v6218_v22  ;;  %v6199_v38 = vsel %vm6182_vm10, %v6174_v28, %v6191_v53  ;;  %vm6184_vm12 = vcmp.ge.f32.partialorder %v6176_v45, 0.0  ;;  %v6206_v37 = vsel %vm1123_vm0, %v11310_v33, 0.0  ;;  %v6196_v16 = vmul.f32 %v6189_v30, %v6179_v57 }
0x152e   : > { %v6209_v14 = vsel %vm1123_vm0, %v6199_v38, 0.0  ;;  %v11315_v0 = vsel %vm6186_vm11, %v6178_v4, %v6195_v17  ;;  %v6201_v51 = vsel %vm6184_vm12, %v6176_v45, %v6193_v23  ;;  %vm6187_vm13 = vcmp.ge.f32.partialorder %v6179_v57, 0.0 }
0x152f   : > { %v6197_v20 = vmul.f32 %v6189_v30, %v6180_v34  ;;  %vm6188_vm14 = vcmp.ge.f32.partialorder %v6180_v34, 0.0  ;;  %v6221_v41 = vsel %vm1123_vm0, %v11315_v0, 0.0  ;;  %v6215_v43 = vsel %vm1123_vm0, %v6201_v51, 0.0 }
0x1530   : > { %6207 = vadd.xlane.f32.xlu1 %v6206_v37  ;;  %v6204_v32 = vsel %vm6187_vm13, %v6179_v57, %v6196_v16  ;;  %vm6482_vm7 = vcmask 1044484   ;;  %vm6484_vm8 = vcmask 1045509   ;;  %vm6486_vm9 = vcmask 1046534  }
0x1531   : > { %6210 = vadd.xlane.f32.xlu0 %v6209_v14  ;;  %v6205_v50 = vsel %vm6188_vm14, %v6180_v34, %v6197_v20  ;;  %v6224_v54 = vsel %vm1123_vm0, %v6204_v32, 0.0  ;;  %vm6488_vm10 = vcmask 1047559   ;;  %vm6681_vm11 = vcmask 27648  }
0x1532   : > { %v6227_v52 = vsel %vm1123_vm0, %v6205_v50, 0.0  ;;  %vm6712_vm12 = vcmask 1041408   ;;  %vm6708_vm13 = vcmask 31744  }
0x1534   : > { %6222 = vadd.xlane.f32.xlu1 %v6221_v41 }
0x1535   : > { %6216 = vadd.xlane.f32.xlu0 %v6215_v43 }
0x1538   : > { %6225 = vadd.xlane.f32.xlu1 %v6224_v54 }
0x1539   : > { %6228 = vadd.xlane.f32.xlu0 %v6227_v52 }
0x15b9   : > { %v6214_v25 = vpop.xlane.xlu1 %6213 }
0x15ba   : > { %v6220_v3 = vpop.xlane.xlu0 %6219  ;;  %v6232_v24 = vmul.f32 0.03125, %v6214_v25 }
0x15bb   : > { %v6234_v39 = vmul.f32 0.03125, %v6220_v3 }
0x15bd   : > { %v6208_v27 = vpop.xlane.xlu1 %6207 }
0x15be   : > { %v6230_v26 = vmul.f32 0.03125, %v6208_v27  ;;  %v6211_v48 = vpop.xlane.xlu0 %6210 }
0x15bf   : > { %v6231_v55 = vmul.f32 0.03125, %v6211_v48 }
0x15c1   : > { %v6238_v58 = vadd.f32 %v6231_v55, %v6230_v26  ;;  %v6223_v60 = vpop.xlane.xlu1 %6222 }
0x15c2   : > { %v6235_v36 = vmul.f32 0.03125, %v6223_v60  ;;  %v6217_v59 = vpop.xlane.xlu0 %6216 }
0x15c3   : > { %v6239_v63 = vadd.f32 %v6238_v58, %v6232_v24  ;;  %v6233_v21 = vmul.f32 0.03125, %v6217_v59  ;;  %v9706_v24 = vld [vmem:[%s11822_s23 + $0x8] sm:$0xff]  }
0x15c4   : > { %v6247_v7 = vadd.f32 %v6235_v36, %v6234_v39 }
0x15c5   : > { %v6240_v49 = vadd.f32 %v6239_v63, %v6233_v21  ;;  %v6226_v47 = vpop.xlane.xlu1 %6225 }
0x15c6   : > { %v6236_v30 = vmul.f32 0.03125, %v6226_v47  ;;  %v6229_v31 = vpop.xlane.xlu0 %6228 }
0x15c7   : > { %v6241_v61 = vrot.slane %v6240_v49, 4  ;;  %v6237_v8 = vmul.f32 0.03125, %v6229_v31 }
0x15c8   : > { %v6248_v9 = vadd.f32 %v6247_v7, %v6236_v30 }
0x15c9   : > { %v6242_v13 = vadd.f32 %v6241_v61, %v6240_v49 }
0x15ca   : > { %v6249_v42 = vadd.f32 %v6248_v9, %v6237_v8 }
0x15cb   : > { %v6243_v19 = vrot.slane %v6242_v13, 2 }
0x15cc   : > { %v6250_v15 = vrot.slane %v6249_v42, 4 }
0x15cd   : > { %v6244_v45 = vadd.f32 %v6243_v19, %v6242_v13 }
0x15ce   : > { %v6251_v12 = vadd.f32 %v6250_v15, %v6249_v42 }
0x15cf   : > { %v6245_v28 = vrot.slane %v6244_v45, 1 }
0x15d0   : > { %v6252_v4 = vrot.slane %v6251_v12, 2 }
0x15d1   : > { %v6246_v29 = vadd.f32 %v6245_v28, %v6244_v45 }
0x15d2   : > { %v6253_v62 = vadd.f32 %v6252_v4, %v6251_v12 }
0x15d3   : > { %v6256_v46 = vmul.f32 0.03125, %v6246_v29 }
0x15d4   : > { %v6254_v53 = vrot.slane %v6253_v62, 1 }
0x15d5   : > { %v11322_v57 = vsub.f32 %v6199_v38, %v6256_v46  ;;  %v11325_v22 = vsub.f32 %v11310_v33, %v6256_v46  ;;  %v11328_v17 = vsub.f32 %v11302_v35, %v6256_v46  ;;  %v11344_v41 = vsub.f32 %v6201_v51, %v6256_v46 }
0x15d6   : > { %v6255_v34 = vadd.f32 %v6254_v53, %v6253_v62 }
0x15d7   : > { %v6267_v23 = vmul.f32 %v11322_v57, %v11322_v57  ;;  %v6266_v37 = vmul.f32 %v11325_v22, %v11325_v22  ;;  %v6268_v38 = vmul.f32 %v11328_v17, %v11328_v17 }
0x15d8   : > { %v6257_v14 = vmul.f32 0.03125, %v6255_v34 }
0x15d9   : > { %v6277_v16 = vsel %vm1123_vm0, %v6267_v23, 0.0  ;;  %v6274_v20 = vsel %vm1123_vm0, %v6266_v37, 0.0  ;;  %v6280_v54 = vsel %vm1123_vm0, %v6268_v38, 0.0 }
0x15da   : > { %6278 = vadd.xlane.f32.xlu0 %v6277_v16  ;;  %6275 = vadd.xlane.f32.xlu1 %v6274_v20  ;;  %v11339_v35 = vsub.f32 %v11306_v10, %v6257_v14  ;;  %v11342_v33 = vsub.f32 %v11315_v0, %v6257_v14  ;;  %v11351_v25 = vsub.f32 %v6204_v32, %v6257_v14 }
0x15db   : > { %v6269_v0 = vmul.f32 %v11344_v41, %v11344_v41  ;;  %v11356_v51 = vsub.f32 %v6205_v50, %v6257_v14  ;;  %v9705_v50 = vld [vmem:[%s11822_s23] sm:$0xff]  }
0x15dc   : > { %v6270_v43 = vmul.f32 %v11339_v35, %v11339_v35  ;;  %v6271_v52 = vmul.f32 %v11342_v33, %v11342_v33  ;;  %v6272_v27 = vmul.f32 %v11351_v25, %v11351_v25  ;;  %9427 = vmatpush3.bf16.msra.mxu1 %v9705_v50 }
0x15dd   : > { %v6283_v32 = vsel %vm1123_vm0, %v6269_v0, 0.0  ;;  %v6273_v26 = vmul.f32 %v11356_v51, %v11356_v51  ;;  %9428 = vmatprep.subr.bf16.mxu1 %v9983_v6 }
0x15de   : > { %6281 = vadd.xlane.f32.xlu1 %v6280_v54  ;;  %v6286_v10 = vsel %vm1123_vm0, %v6270_v43, 0.0  ;;  %v6289_v3 = vsel %vm1123_vm0, %v6271_v52, 0.0  ;;  %v6292_v48 = vsel %vm1123_vm0, %v6272_v27, 0.0 }
0x15df   : > { %6287 = vadd.xlane.f32.xlu0 %v6286_v10  ;;  %v6295_v55 = vsel %vm1123_vm0, %v6273_v26, 0.0 }
0x15e0   : > { %9429 = vmatpush3.bf16.msra.mxu1 %v9706_v24 }
0x15e1   : > { %9434 = vmatprep.subr.bf16.mxu1 %v9983_v6 }
0x15e2   : > { %6290 = vadd.xlane.f32.xlu1 %v6289_v3  ;;  %v8572_v3 = vld [vmem:[%s11823_s2] ss:$0 sm:$0xff]  ;;  %s11825_s2 = sld [smem:[#allocation14_spill]] }
0x15e3   : > { %6284 = vadd.xlane.f32.xlu0 %v6283_v32 }
0x15e6   : > { %6293 = vadd.xlane.f32.xlu1 %v6292_v48 }
0x15e7   : > { %6296 = vadd.xlane.f32.xlu0 %v6295_v55  ;;  %v8573_v55 = vld [vmem:[%s11824_s26] ss:$0 sm:$0xff]  ;;  %s11833_s26 = sld [smem:[#allocation21_spill]] }
0x1667   : > { %v6276_v58 = vpop.xlane.xlu1 %6275  ;;  %v6279_v60 = vpop.xlane.xlu0 %6278 }
0x1668   : > { %v6298_v36 = vmul.f32 0.03125, %v6276_v58  ;;  %v6299_v59 = vmul.f32 0.03125, %v6279_v60 }
0x166a   : > { %v6306_v49 = vadd.f32 %v6299_v59, %v6298_v36 }
0x166b   : > { %v6282_v63 = vpop.xlane.xlu1 %6281 }
0x166c   : > { %v6288_v21 = vpop.xlane.xlu0 %6287  ;;  %v6300_v39 = vmul.f32 0.03125, %v6282_v63 }
0x166d   : > { %v6302_v8 = vmul.f32 0.03125, %v6288_v21 }
0x166e   : > { %v6307_v31 = vadd.f32 %v6306_v49, %v6300_v39 }
0x166f   : > { %v6291_v47 = vpop.xlane.xlu1 %6290 }
0x1670   : > { %v6303_v7 = vmul.f32 0.03125, %v6291_v47  ;;  %v6285_v30 = vpop.xlane.xlu0 %6284 }
0x1671   : > { %v6301_v61 = vmul.f32 0.03125, %v6285_v30 }
0x1672   : > { %v6315_v42 = vadd.f32 %v6303_v7, %v6302_v8 }
0x1673   : > { %v6308_v9 = vadd.f32 %v6307_v31, %v6301_v61  ;;  %v6294_v13 = vpop.xlane.xlu1 %6293 }
0x1674   : > { %v6304_v19 = vmul.f32 0.03125, %v6294_v13  ;;  %v6297_v15 = vpop.xlane.xlu0 %6296 }
0x1675   : > { %v6309_v45 = vrot.slane %v6308_v9, 4  ;;  %v6305_v12 = vmul.f32 0.03125, %v6297_v15 }
0x1676   : > { %v6316_v28 = vadd.f32 %v6315_v42, %v6304_v19 }
0x1677   : > { %v6310_v4 = vadd.f32 %v6309_v45, %v6308_v9 }
0x1678   : > { %v6317_v29 = vadd.f32 %v6316_v28, %v6305_v12 }
0x1679   : > { %v6311_v62 = vrot.slane %v6310_v4, 2 }
0x167a   : > { %v6318_v46 = vrot.slane %v6317_v29, 4 }
0x167b   : > { %v6312_v53 = vadd.f32 %v6311_v62, %v6310_v4 }
0x167c   : > { %v6319_v34 = vadd.f32 %v6318_v46, %v6317_v29 }
0x167d   : > { %v6313_v23 = vrot.slane %v6312_v53, 1 }
0x167e   : > { %v6320_v37 = vrot.slane %v6319_v34, 2 }
0x167f   : > { %v6314_v14 = vadd.f32 %v6313_v23, %v6312_v53 }
0x1680   : > { %v6321_v16 = vadd.f32 %v6320_v37, %v6319_v34 }
0x1681   : > { %v6324_v20 = vmul.f32 0.03125, %v6314_v14 }
0x1682   : > { %v6322_v38 = vrot.slane %v6321_v16, 1 }
0x1683   : > { %v6326_v43 = vadd.f32 1e-05, %v6324_v20 }
0x1684   : > { %v6323_v54 = vadd.f32 %v6322_v38, %v6321_v16 }
0x1685   : > { %9877 = vrsqrt.f32 %v6326_v43 }
0x1686   : > { %v6325_v52 = vmul.f32 0.03125, %v6323_v54 }
0x1688   : > { %v6327_v10 = vadd.f32 1e-05, %v6325_v52 }
0x168a   : > { %9879 = vrsqrt.f32 %v6327_v10 }
0x168f   : > { %v9878_v0 = vpop.eup %9877 }
0x1690   : > { %v6330_v27 = vmul.f32 %v9878_v0, %v11325_v22  ;;  %v6331_v32 = vmul.f32 %v9878_v0, %v11322_v57  ;;  %v6332_v26 = vmul.f32 %v9878_v0, %v11328_v17  ;;  %v6333_v48 = vmul.f32 %v9878_v0, %v11344_v41 }
0x1692   : > { %v6345_v50 = vmul.f32 %v8572_v3, %v6330_v27  ;;  %v6346_v24 = vmul.f32 %v8572_v3, %v6331_v32  ;;  %v6347_v58 = vmul.f32 %v8572_v3, %v6332_v26  ;;  %v6348_v60 = vmul.f32 %v8572_v3, %v6333_v48 }
0x1694   : > { %v9880_v36 = vpop.eup %9879  ;;  %v6360_v59 = vadd.f32 %v8573_v55, %v6345_v50  ;;  %v6361_v63 = vadd.f32 %v8573_v55, %v6346_v24  ;;  %v6362_v21 = vadd.f32 %v8573_v55, %v6347_v58  ;;  %v6363_v39 = vadd.f32 %v8573_v55, %v6348_v60 }
0x1695   : > { %v6334_v49 = vmul.f32 %v9880_v36, %v11339_v35  ;;  %v6335_v22 = vmul.f32 %v9880_v36, %v11342_v33  ;;  %v6336_v57 = vmul.f32 %v9880_v36, %v11351_v25  ;;  %v6337_v17 = vmul.f32 %v9880_v36, %v11356_v51 }
0x1696   : > { %v11381_v41 = vadd.f32 %v6360_v59, %v11228_v1  ;;  %v11384_v47 = vadd.f32 %v6361_v63, %v11230_v44  ;;  %v11387_v7 = vadd.f32 %v6362_v21, %v11234_v5  ;;  %v11390_v30 = vadd.f32 %v6363_v39, %v11236_v40 }
0x1697   : > { %v6349_v31 = vmul.f32 %v8572_v3, %v6334_v49  ;;  %v6350_v35 = vmul.f32 %v8572_v3, %v6335_v22  ;;  %v6351_v61 = vmul.f32 %v8572_v3, %v6336_v57  ;;  %v6352_v33 = vmul.f32 %v8572_v3, %v6337_v17 }
0x1698   : > { %v6376_v25 = vsel %vm1123_vm0, %v11381_v41, 0.0  ;;  %v6383_v1 = vsel %vm1123_vm0, %v11384_v47, 0.0  ;;  %v6390_v44 = vsel %vm1123_vm0, %v11387_v7, 0.0  ;;  %v6397_v5 = vsel %vm1123_vm0, %v11390_v30, 0.0 }
0x1699   : > { %v6364_v51 = vadd.f32 %v8573_v55, %v6349_v31  ;;  %v6365_v8 = vadd.f32 %v8573_v55, %v6350_v35  ;;  %v6366_v40 = vadd.f32 %v8573_v55, %v6351_v61  ;;  %v6367_v9 = vadd.f32 %v8573_v55, %v6352_v33 }
0x169a   : > { %v6377_v13 = vrot.slane %v6376_v25, 4  ;;  %v6384_v42 = vrot.slane %v6383_v1, 4  ;;  %v6391_v19 = vrot.slane %v6390_v44, 4  ;;  %v6398_v15 = vrot.slane %v6397_v5, 4 }
0x169b   : > { %v11401_v45 = vadd.f32 %v6364_v51, %v11248_v18  ;;  %v11404_v12 = vadd.f32 %v6365_v8, %v11250_v56  ;;  %v11407_v28 = vadd.f32 %v6366_v40, %v11255_v11  ;;  %v11410_v4 = vadd.f32 %v6367_v9, %v11257_v2 }
0x169c   : > { %v6378_v29 = vadd.f32 %v6377_v13, %v6376_v25  ;;  %v6385_v62 = vadd.f32 %v6384_v42, %v6383_v1  ;;  %v6392_v46 = vadd.f32 %v6391_v19, %v6390_v44  ;;  %v6399_v53 = vadd.f32 %v6398_v15, %v6397_v5 }
0x169d   : > { %v6404_v34 = vsel %vm1123_vm0, %v11401_v45, 0.0  ;;  %v6411_v18 = vsel %vm1123_vm0, %v11404_v12, 0.0  ;;  %v6418_v56 = vsel %vm1123_vm0, %v11407_v28, 0.0  ;;  %v6425_v11 = vsel %vm1123_vm0, %v11410_v4, 0.0 }
0x169e   : > { %v6379_v23 = vrot.slane %v6378_v29, 2  ;;  %v6386_v37 = vrot.slane %v6385_v62, 2  ;;  %v6393_v2 = vrot.slane %v6392_v46, 2  ;;  %v6400_v14 = vrot.slane %v6399_v53, 2 }
0x169f   : > { %v6405_v16 = vrot.slane %v6404_v34, 4  ;;  %v6412_v20 = vrot.slane %v6411_v18, 4  ;;  %v6419_v38 = vrot.slane %v6418_v56, 4  ;;  %v6426_v43 = vrot.slane %v6425_v11, 4 }
0x16a0   : > { %v6380_v54 = vadd.f32 %v6379_v23, %v6378_v29  ;;  %v6387_v52 = vadd.f32 %v6386_v37, %v6385_v62  ;;  %v6394_v10 = vadd.f32 %v6393_v2, %v6392_v46  ;;  %v6401_v0 = vadd.f32 %v6400_v14, %v6399_v53 }
0x16a1   : > { %v6406_v3 = vadd.f32 %v6405_v16, %v6404_v34  ;;  %v6413_v27 = vadd.f32 %v6412_v20, %v6411_v18  ;;  %v6420_v32 = vadd.f32 %v6419_v38, %v6418_v56  ;;  %v6427_v26 = vadd.f32 %v6426_v43, %v6425_v11 }
0x16a2   : > { %v6381_v48 = vrot.slane %v6380_v54, 1  ;;  %v6388_v55 = vrot.slane %v6387_v52, 1  ;;  %v6395_v50 = vrot.slane %v6394_v10, 1  ;;  %v6402_v24 = vrot.slane %v6401_v0, 1 }
0x16a3   : > { %v6407_v58 = vrot.slane %v6406_v3, 2  ;;  %v6414_v60 = vrot.slane %v6413_v27, 2  ;;  %v6421_v36 = vrot.slane %v6420_v32, 2  ;;  %v6428_v59 = vrot.slane %v6427_v26, 2 }
0x16a4   : > { %v6382_v63 = vadd.f32 %v6381_v48, %v6380_v54  ;;  %v6389_v21 = vadd.f32 %v6388_v55, %v6387_v52  ;;  %v6396_v39 = vadd.f32 %v6395_v50, %v6394_v10  ;;  %v6403_v49 = vadd.f32 %v6402_v24, %v6401_v0 }
0x16a5   : > { %v6408_v22 = vadd.f32 %v6407_v58, %v6406_v3  ;;  %v6415_v57 = vadd.f32 %v6414_v60, %v6413_v27  ;;  %v6422_v17 = vadd.f32 %v6421_v36, %v6420_v32  ;;  %v6429_v31 = vadd.f32 %v6428_v59, %v6427_v26  ;;  %v8574_v36 = vld [vmem:[%s11825_s2] ss:$0 sm:$0xff]  ;;  %s11834_s2 = sld [smem:[#allocation17_spill]] }
0x16a6   : > { %v11420_v35 = vmul.f32 0.125, %v6382_v63  ;;  %v11422_v61 = vmul.f32 0.125, %v6389_v21  ;;  %v11424_v33 = vmul.f32 0.125, %v6396_v39  ;;  %v11426_v25 = vmul.f32 0.125, %v6403_v49 }
0x16a7   : > { %v6409_v1 = vrot.slane %v6408_v22, 1  ;;  %v6416_v44 = vrot.slane %v6415_v57, 1  ;;  %v6423_v5 = vrot.slane %v6422_v17, 1  ;;  %v6430_v51 = vrot.slane %v6429_v31, 1 }
0x16a8   : > { %v6441_v8 = vpack.c.bf16 %v11420_v35, %v11420_v35  ;;  %v6442_v40 = vpack.c.bf16 %v11422_v61, %v11422_v61  ;;  %v6443_v9 = vpack.c.bf16 %v11424_v33, %v11424_v33  ;;  %v6444_v29 = vpack.c.bf16 %v11426_v25, %v11426_v25 }
0x16a9   : > { %v6410_v13 = vadd.f32 %v6409_v1, %v6408_v22  ;;  %v6417_v42 = vadd.f32 %v6416_v44, %v6415_v57  ;;  %v6424_v19 = vadd.f32 %v6423_v5, %v6422_v17  ;;  %v6431_v15 = vadd.f32 %v6430_v51, %v6429_v31 }
0x16aa   : > { %v6468_v62 = vunpack.c.l.b16 %v6441_v8  ;;  %v6469_v46 = vunpack.c.l.b16 %v6442_v40  ;;  %v6470_v53 = vunpack.c.l.b16 %v6443_v9  ;;  %v6471_v20 = vunpack.c.l.b16 %v6444_v29 }
0x16ab   : > { %v11436_v34 = vmul.f32 0.125, %v6410_v13  ;;  %v11438_v18 = vmul.f32 0.125, %v6417_v42  ;;  %v11440_v56 = vmul.f32 0.125, %v6424_v19  ;;  %v11442_v11 = vmul.f32 0.125, %v6431_v15 }
0x16ac   : > { %v6477_v23 = vsel %vm6476_vm15, %v6469_v46, %v6468_v62  ;;  %v9996_v55 = vmov 1983009808   ;;  %v6557_v24 = vlaneseq }
0x16ad   : > { %v6445_v37 = vpack.c.bf16 %v11436_v34, %v11436_v34  ;;  %v6446_v2 = vpack.c.bf16 %v11438_v18, %v11438_v18  ;;  %v6447_v14 = vpack.c.bf16 %v11440_v56, %v11440_v56  ;;  %v6448_v16 = vpack.c.bf16 %v11442_v11, %v11442_v11 }
0x16ae   : > { %v6479_v38 = vsel %vm6478_vm5, %v6470_v53, %v6477_v23  ;;  %v6555_v50 = vunpack.c.l.s4 %v9996_v55  ;;  %v11462_v60 = vshrl.u32 %v6557_v24, 7 }
0x16af   : > { %v6472_v43 = vunpack.c.l.b16 %v6445_v37  ;;  %v6473_v54 = vunpack.c.l.b16 %v6446_v2  ;;  %v6481_v52 = vsel %vm6480_vm6, %v6471_v20, %v6479_v38  ;;  %v6474_v10 = vunpack.c.l.b16 %v6447_v14 }
0x16b0   : > { %v6475_v3 = vunpack.c.l.b16 %v6448_v16  ;;  %v6556_v58 = vunpack.c.0.s8 %v6555_v50 }
0x16b1   : > { %v6483_v0 = vsel %vm6482_vm7, %v6472_v43, %v6481_v52 }
0x16b2   : > { %v6485_v27 = vsel %vm6484_vm8, %v6473_v54, %v6483_v0  ;;  %v11466_v21 = vsub.s32 %v6556_v58, %v11462_v60 }
0x16b3   : > { %v6487_v32 = vsel %vm6486_vm9, %v6474_v10, %v6485_v27 }
0x16b4   : > { %v6489_v26 = vsel %vm6488_vm10, %v6475_v3, %v6487_v32 }
0x16b5   : > { %v6490_v48 = vpack.c.b16 %v6489_v26, %v6489_v26 }
0x16b7   : > { %9431 = vmatmul.mubr.msk.bf16.vlgmr.msra.gmra.mrb[172].mxu1 %vm1123_vm0, %v6490_v48 }
0x16b8   : > { %9436 = vmatprep.mubr.msk.bf16.mxu1 %vm9984_vm1, %v9983_v6 }
0x178a   : > { %v6540_v59 = vpop.f32.mrb[172].mxu1 }
0x178b   : > { %v6541_v63 = vadd.f32 %v8574_v36, %v6540_v59  ;;  %v9432_v39 = vpop.f32.mrb[173].mxu1 }
0x178c   : > { %v6543_v49 = vpop.f32.mrb[174].mxu1 }
0x178d   : > { %v6546_v22 = vmul.f32 0.35355338, %v6541_v63  ;;  %v6548_v57 = vpack.c.bf16 %v6541_v63, %v6541_v63  ;;  %v9433_v17 = vpop.f32.mrb[175].mxu1 }
0x178f   : > { %v6547_v31 = vpack.c.bf16 %v6546_v22, %v6546_v22  ;;  %v6569_v1 = vrot.slane %v6548_v57, %v11466_v21 }
0x1791   : > { %v6560_v44 = vrot.slane %v6547_v31, %v11466_v21  ;;  %v6570_v5 = vcombine.high %v6569_v1, %v6569_v1  ;;  %v11471_v51 = vrot.slane %v6569_v1, %v11466_v21 }
0x1793   : > { %v11474_v8 = vrot.slane %v6570_v5, %v11466_v21  ;;  %6578 = vrot.lane.b32.xlu1 %v11471_v51, %s9985_s7  ;;  %v6561_v19 = vcombine.high %v6560_v44, %v6560_v44  ;;  %v11510_v50 = vrot.slane %v6560_v44, %v11466_v21 }
0x1795   : > { %6633 = vrot.lane.b32.xlu0 %v11474_v8, %s9985_s7  ;;  %v11503_v55 = vrot.slane %v6561_v19, %v11466_v21  ;;  %s11826_s7 = sld [smem:[#allocation15_spill]] }
0x1805   : > { %v6579_v40 = vpop.permute.xlu1 %6578 }
0x1806   : > { %v6584_v9 = vsel %vm1256_vm2, %v6579_v40, 0 }
0x1807   : > { %9435 = vmatpush3.bf16.xpose.msra.mxu1 %v6584_v9  ;;  %v6634_v13 = vpop.permute.xlu0 %6633 }
0x1808   : > { %v6639_v42 = vsel %vm1256_vm2, %v6634_v13, 0  ;;  %9446 = vmatprep.subr.bf16.mxu1 %v9983_v6 }
0x1809   : > { %9441 = vmatpush3.bf16.xpose.msra.mxu0 %v6639_v42 }
0x180a   : > { %9452 = vmatprep.subr.bf16.mxu0 %v9983_v6 }
0x180e   : > { %9437 = vmatmul.mubr.msk.bf16.vlgmr.msra.gmra.mrb[176].mxu1 %vm1256_vm2, %v6560_v44 }
0x180f   : > { %9448 = vmatprep.mubr.msk.bf16.mxu1 %vm9984_vm1, %v9983_v6 }
0x1810   : > { %9443 = vmatmul.mubr.msk.bf16.vlgmr.msra.gmra.mrb[140].mxu0 %vm1256_vm2, %v6561_v19 }
0x1811   : > { %9454 = vmatprep.mubr.msk.bf16.mxu0 %vm9984_vm1, %v9983_v6 }
0x18e1   : > { %v6620_v15 = vpop.f32.mrb[176].mxu1 }
0x18e2   : > { %v9438_v29 = vpop.f32.mrb[177].mxu1  ;;  %v6682_v62 = vsel %vm6681_vm11, %v6620_v15, -inf }
0x18e3   : > { %v6675_v46 = vpop.f32.mrb[140].mxu0  ;;  %6683 = vmax.xlane.f32.xlu1 %v6682_v62  ;;  %v6623_v53 = vpop.f32.mrb[178].mxu1 }
0x18e4   : > { %v9439_v23 = vpop.f32.mrb[179].mxu1  ;;  %v9444_v37 = vpop.f32.mrb[141].mxu0  ;;  %v6685_v2 = vsel %vm6681_vm11, %v6675_v46, -inf }
0x18e5   : > { %6686 = vmax.xlane.f32.xlu0 %v6685_v2  ;;  %v6678_v14 = vpop.f32.mrb[142].mxu0 }
0x18e6   : > { %v9445_v16 = vpop.f32.mrb[143].mxu0 }
0x18f4   : > { %6706 = vrot.lane.b32.xlu1 %v11471_v51, %s9986_s10 }
0x1970   : > { %v6684_v20 = vpop.xlane.xlu1 %6683 }
0x1971   : > { %v6688_v38 = vsub.f32 %v6620_v15, %v6684_v20 }
0x1972   : > { %v6687_v43 = vpop.xlane.xlu0 %6686 }
0x1973   : > { %v6690_v54 = vmul.f32 1.442695, %v6688_v38  ;;  %v6689_v52 = vsub.f32 %v6675_v46, %v6687_v43 }
0x1974   : > { %v6707_v10 = vpop.permute.xlu1 %6706 }
0x1975   : > { %9881 = vpow2.f32 %v6690_v54  ;;  %v6692_v0 = vmul.f32 1.442695, %v6689_v52  ;;  %v6714_v3 = vsel %vm6712_vm12, %v6707_v10, 0 }
0x1976   : > { %9447 = vmatpush3.bf16.msra.mxu1 %v6714_v3 }
0x1977   : > { %9883 = vpow2.f32 %v6692_v0  ;;  %9458 = vmatprep.subr.bf16.mxu1 %v9983_v6 }
0x197f   : > { %v9882_v27 = vpop.eup %9881 }
0x1980   : > { %v6694_v32 = vsel %vm6681_vm11, %v9882_v27, 0.0 }
0x1981   : > { %v9884_v26 = vpop.eup %9883  ;;  %6695 = vadd.xlane.f32.xlu1 %v6694_v32 }
0x1982   : > { %v6697_v48 = vsel %vm6681_vm11, %v9884_v26, 0.0 }
0x1983   : > { %6698 = vadd.xlane.f32.xlu0 %v6697_v48 }
0x1992   : > { %6818 = vrot.lane.b32.xlu1 %v11471_v51, %s9987_s11 }
0x1996   : > { %6875 = vrot.lane.b32.xlu1 %v11474_v8, %s9987_s11  ;;  %s11828_s11 = smov 72  }
0x1999   : > { %6756 = vrot.lane.b32.xlu0 %v11474_v8, %s9986_s10  ;;  %s11827_s10 = smov 48  }
0x199a   : > { %6873 = vrot.lane.b32.xlu1 %v11503_v55, %s9988_s16 }
0x199d   : > { %6816 = vrot.lane.b32.xlu0 %v11510_v50, %s9988_s16  ;;  %s11829_s16 = smov 104  }
0x1a0e   : > { %v6696_v24 = vpop.xlane.xlu1 %6695 }
0x1a0f   : > { %9885 = vrcp.f32 %v6696_v24 }
0x1a10   : > { %v6699_v58 = vpop.xlane.xlu0 %6698 }
0x1a11   : > { %9887 = vrcp.f32 %v6699_v58 }
0x1a12   : > { %v6819_v63 = vpop.permute.xlu1 %6818 }
0x1a13   : > { %v6824_v31 = vsel %vm1256_vm2, %v6819_v63, 0 }
0x1a14   : > { %v6757_v36 = vpop.permute.xlu0 %6756 }
0x1a15   : > { %v6762_v59 = vsel %vm6712_vm12, %v6757_v36, 0 }
0x1a16   : > { %9453 = vmatpush3.bf16.msra.mxu0 %v6762_v59  ;;  %v6876_v17 = vpop.permute.xlu1 %6875 }
0x1a17   : > { %9464 = vmatprep.subr.bf16.mxu0 %v9983_v6  ;;  %v6881_v44 = vsel %vm1256_vm2, %v6876_v17, 0 }
0x1a18   : > { %v6817_v5 = vpop.permute.xlu0 %6816 }
0x1a19   : > { %v9886_v39 = vpop.eup %9885 }
0x1a1a   : > { %v6702_v49 = vmul.f32 %v9886_v39, %v9882_v27  ;;  %v6874_v40 = vpop.permute.xlu1 %6873 }
0x1a1b   : > { %v9888_v22 = vpop.eup %9887 }
0x1a1c   : > { %v6703_v21 = vmul.f32 %v9888_v22, %v9884_v26  ;;  %v6704_v57 = vpack.c.bf16 %v6702_v49, %v6702_v49 }
0x1a1e   : > { %9449 = vmatmul.mubr.msk.bf16.vlgmr.msra.gmra.mrb[180].mxu1 %vm6708_vm13, %v6704_v57  ;;  %v6705_v1 = vpack.c.bf16 %v6703_v21, %v6703_v21 }
0x1a1f   : > { %9459 = vmatpush3.bf16.xpose.msra.mxu1 %v6824_v31  ;;  %9460 = vmatprep.mubr.msk.bf16.mxu1 %vm9984_vm1, %v9983_v6 }
0x1a20   : > { %9455 = vmatmul.mubr.msk.bf16.vlgmr.msra.gmra.mrb[144].mxu0 %vm6708_vm13, %v6705_v1  ;;  %9470 = vmatprep.subr.bf16.mxu1 %v9983_v6 }
0x1a21   : > { %9465 = vmatpush3.bf16.xpose.msra.mxu0 %v6881_v44  ;;  %9466 = vmatprep.mubr.msk.bf16.mxu0 %vm9984_vm1, %v9983_v6  ;;  %v6549_v44 = vld [vmem:[%s11826_s7] sm:$0xf] }
0x1a22   : > { %9476 = vmatprep.subr.bf16.mxu0 %v9983_v6 }
0x1a26   : > { %9461 = vmatmul.mubr.msk.bf16.vlgmr.msra.gmra.mrb[184].mxu1 %vm1256_vm2, %v6817_v5 }
0x1a27   : > { %9472 = vmatprep.mubr.msk.bf16.mxu1 %vm9984_vm1, %v9983_v6 }
0x1a28   : > { %9467 = vmatmul.mubr.msk.bf16.vlgmr.msra.gmra.mrb[148].mxu0 %vm1256_vm2, %v6874_v40 }
0x1a29   : > { %9478 = vmatprep.mubr.msk.bf16.mxu0 %vm9984_vm1, %v9983_v6 }
0x1af1   : > { %v6750_v9 = vpop.f32.mrb[180].mxu1 }
0x1af2   : > { %v9450_v13 = vpop.f32.mrb[181].mxu1 }
0x1af3   : > { %v6753_v42 = vpop.f32.mrb[182].mxu1  ;;  %v6798_v19 = vpop.f32.mrb[144].mxu0 }
0x1af4   : > { %v11532_v15 = vcombine.low %v6750_v9, %v6798_v19  ;;  %v9451_v29 = vpop.f32.mrb[183].mxu1  ;;  %v9456_v62 = vpop.f32.mrb[145].mxu0  ;;  %v7098_v9 = vsel %vm1747_vm3, %v6549_v44, 0 }
0x1af5   : > { %v6801_v46 = vpop.f32.mrb[146].mxu0 }
0x1af6   : > { %v9457_v53 = vpop.f32.mrb[147].mxu0  ;;  %v6808_v42 = vpack.c.bf16 %v11532_v15, %v11532_v15  ;;  %v6550_v46 = vld [vmem:[%s11826_s7 + $0x4] sm:$0xf] }
0x1af7   : > { %v7052_v15 = vsel %vm1747_vm3, %v6550_v46, 0 }
0x1af9   : > { %v6860_v23 = vpop.f32.mrb[184].mxu1 }
0x1afa   : > { %v9462_v37 = vpop.f32.mrb[185].mxu1  ;;  %v6923_v2 = vsel %vm6681_vm11, %v6860_v23, -inf }
0x1afb   : > { %v6917_v14 = vpop.f32.mrb[148].mxu0  ;;  %6924 = vmax.xlane.f32.xlu0 %v6923_v2  ;;  %v6863_v16 = vpop.f32.mrb[186].mxu1 }
0x1afc   : > { %v9463_v20 = vpop.f32.mrb[187].mxu1  ;;  %v9468_v38 = vpop.f32.mrb[149].mxu0  ;;  %v6926_v43 = vsel %vm6681_vm11, %v6917_v14, -inf }
0x1afd   : > { %6927 = vmax.xlane.f32.xlu1 %v6926_v43  ;;  %v6920_v54 = vpop.f32.mrb[150].mxu0 }
0x1afe   : > { %v9469_v52 = vpop.f32.mrb[151].mxu0 }
0x1b0e   : > { %6947 = vrot.lane.b32.xlu1 %v11471_v51, %s9989_s18 }
0x1b12   : > { %7142 = vrot.lane.b32.xlu1 %v11471_v51, %s9991_s0 }
0x1b16   : > { %7192 = vrot.lane.b32.xlu1 %v11474_v8, %s9991_s0  ;;  %s11832_s0 = sld [smem:[#allocation19_spill]] }
0x1b1a   : > { %7190 = vrot.lane.b32.xlu1 %v11503_v55, %s9990_s22 }
0x1b88   : > { %v6925_v10 = vpop.xlane.xlu0 %6924 }
0x1b89   : > { %v6929_v0 = vsub.f32 %v6860_v23, %v6925_v10 }
0x1b8a   : > { %v6928_v3 = vpop.xlane.xlu1 %6927 }
0x1b8b   : > { %v6931_v27 = vmul.f32 1.442695, %v6929_v0  ;;  %v6930_v32 = vsub.f32 %v6917_v14, %v6928_v3 }
0x1b8d   : > { %9889 = vpow2.f32 %v6931_v27  ;;  %v6933_v26 = vmul.f32 1.442695, %v6930_v32 }
0x1b8e   : > { %v6948_v48 = vpop.permute.xlu1 %6947 }
0x1b8f   : > { %9891 = vpow2.f32 %v6933_v26  ;;  %v6953_v24 = vsel %vm6712_vm12, %v6948_v48, 0 }
0x1b90   : > { %9471 = vmatpush3.bf16.msra.mxu1 %v6953_v24 }
0x1b91   : > { %9482 = vmatprep.subr.bf16.mxu1 %v9983_v6 }
0x1b92   : > { %v7143_v13 = vpop.permute.xlu1 %7142 }
0x1b93   : > { %v7148_v52 = vsel %vm1256_vm2, %v7143_v13, 0 }
0x1b96   : > { %v7193_v19 = vpop.permute.xlu1 %7192 }
0x1b97   : > { %v9890_v58 = vpop.eup %9889  ;;  %v7198_v29 = vsel %vm1256_vm2, %v7193_v19, 0 }
0x1b98   : > { %v6935_v36 = vsel %vm6681_vm11, %v9890_v58, 0.0 }
0x1b99   : > { %v9892_v59 = vpop.eup %9891  ;;  %6936 = vadd.xlane.f32.xlu0 %v6935_v36 }
0x1b9a   : > { %v6938_v63 = vsel %vm6681_vm11, %v9892_v59, 0.0  ;;  %v7191_v62 = vpop.permute.xlu1 %7190 }
0x1b9d   : > { %6939 = vadd.xlane.f32.xlu0 %v6938_v63 }
0x1bb3   : > { %6995 = vrot.lane.b32.xlu0 %v11474_v8, %s9989_s18  ;;  %s11830_s18 = smov 40  }
0x1bb7   : > { %7140 = vrot.lane.b32.xlu0 %v11510_v50, %s9990_s22  ;;  %s11831_s22 = sld [smem:[#allocation16_spill]] }
0x1c26   : > { %v6937_v39 = vpop.xlane.xlu0 %6936 }
0x1c27   : > { %9893 = vrcp.f32 %v6937_v39 }
0x1c2a   : > { %v6940_v49 = vpop.xlane.xlu0 %6939 }
0x1c2b   : > { %9895 = vrcp.f32 %v6940_v49 }
0x1c2e   : > { %v6996_v22 = vpop.permute.xlu0 %6995 }
0x1c2f   : > { %v7001_v21 = vsel %vm6712_vm12, %v6996_v22, 0 }
0x1c30   : > { %9477 = vmatpush3.bf16.msra.mxu0 %v7001_v21 }
0x1c31   : > { %v9894_v57 = vpop.eup %9893  ;;  %9488 = vmatprep.subr.bf16.mxu0 %v9983_v6 }
0x1c32   : > { %v6943_v17 = vmul.f32 %v9894_v57, %v9890_v58  ;;  %v7141_v32 = vpop.permute.xlu0 %7140 }
0x1c34   : > { %v6945_v31 = vpack.c.bf16 %v6943_v17, %v6943_v17 }
0x1c35   : > { %v9896_v1 = vpop.eup %9895 }
0x1c36   : > { %v6944_v5 = vmul.f32 %v9896_v1, %v9892_v59  ;;  %9473 = vmatmul.mubr.msk.bf16.vlgmr.msra.gmra.mrb[188].mxu1 %vm6708_vm13, %v6945_v31 }
0x1c37   : > { %9484 = vmatprep.mubr.msk.bf16.mxu1 %vm9984_vm1, %v9983_v6  ;;  %9483 = vmatpush3.bf16.msra.mxu1 %v7052_v15 }
0x1c38   : > { %v6946_v40 = vpack.c.bf16 %v6944_v5, %v6944_v5  ;;  %9494 = vmatprep.subr.bf16.mxu1 %v9983_v6 }
0x1c3a   : > { %9479 = vmatmul.mubr.msk.bf16.vlgmr.msra.gmra.mrb[152].mxu0 %vm6708_vm13, %v6946_v40 }
0x1c3b   : > { %9489 = vmatpush3.bf16.msra.mxu0 %v7098_v9  ;;  %9490 = vmatprep.mubr.msk.bf16.mxu0 %vm9984_vm1, %v9983_v6 }
0x1c3c   : > { %9500 = vmatprep.subr.bf16.mxu0 %v9983_v6 }
0x1c42   : > { %9491 = vmatmul.mubr.msk.bf16.vlgmr.msra.gmra.mrb[156].mxu0 %vm1256_vm2, %v6808_v42 }
0x1c43   : > { %9502 = vmatprep.mubr.msk.bf16.mxu0 %vm9984_vm1, %v9983_v6 }
0x1c44   : > { %9501 = vmatpush3.bf16.xpose.msra.mxu0 %v7198_v29 }
0x1c45   : > { %9512 = vmatprep.subr.bf16.mxu0 %v9983_v6 }
0x1c4b   : > { %9503 = vmatmul.mubr.msk.bf16.vlgmr.msra.gmra.mrb[160].mxu0 %vm1256_vm2, %v7191_v62 }
0x1c4c   : > { %9514 = vmatprep.mubr.msk.bf16.mxu0 %vm9984_vm1, %v9983_v6 }
0x1d09   : > { %v6989_v53 = vpop.f32.mrb[188].mxu1 }
0x1d0a   : > { %v9474_v23 = vpop.f32.mrb[189].mxu1 }
0x1d0b   : > { %v6992_v37 = vpop.f32.mrb[190].mxu1 }
0x1d0c   : > { %v9475_v2 = vpop.f32.mrb[191].mxu1 }
0x1d0d   : > { %v7037_v14 = vpop.f32.mrb[152].mxu0 }
0x1d0e   : > { %v7045_v16 = vcombine.low %v6989_v53, %v7037_v14  ;;  %v9480_v20 = vpop.f32.mrb[153].mxu0 }
0x1d0f   : > { %v7040_v38 = vpop.f32.mrb[154].mxu0 }
0x1d10   : > { %v7047_v43 = vpack.c.bf16 %v7045_v16, %v7045_v16  ;;  %v9481_v54 = vpop.f32.mrb[155].mxu0 }
0x1d12   : > { %9485 = vmatmul.mubr.msk.bf16.vlgmr.msra.gmra.mrb[192].mxu1 %vm1256_vm2, %v7047_v43 }
0x1d13   : > { %9495 = vmatpush3.bf16.xpose.msra.mxu1 %v7148_v52  ;;  %9496 = vmatprep.mubr.msk.bf16.mxu1 %vm9984_vm1, %v9983_v6 }
0x1d14   : > { %9506 = vmatprep.subr.bf16.mxu1 %v9983_v6 }
0x1d15   : > { %v7134_v10 = vpop.f32.mrb[156].mxu0 }
0x1d16   : > { %v9492_v0 = vpop.f32.mrb[157].mxu0 }
0x1d17   : > { %v7137_v3 = vpop.f32.mrb[158].mxu0  ;;  %v6551_v0 = vld [vmem:[%s11826_s7 + $0x8] sm:$0xf] }
0x1d18   : > { %v9493_v27 = vpop.f32.mrb[159].mxu0  ;;  %v7369_v3 = vsel %vm1747_vm3, %v6551_v0, 0 }
0x1d1a   : > { %9497 = vmatmul.mubr.msk.bf16.vlgmr.msra.gmra.mrb[196].mxu1 %vm1256_vm2, %v7141_v32 }
0x1d1b   : > { %9508 = vmatprep.mubr.msk.bf16.mxu1 %vm9984_vm1, %v9983_v6 }
0x1d1e   : > { %v7234_v26 = vpop.f32.mrb[160].mxu0 }
0x1d1f   : > { %v9504_v48 = vpop.f32.mrb[161].mxu0  ;;  %v7243_v24 = vsel %vm6681_vm11, %v7234_v26, -inf }
0x1d20   : > { %7244 = vmax.xlane.f32.xlu1 %v7243_v24  ;;  %v7237_v58 = vpop.f32.mrb[162].mxu0 }
0x1d21   : > { %v9505_v36 = vpop.f32.mrb[163].mxu0 }
0x1d31   : > { %7264 = vrot.lane.b32.xlu1 %v11471_v51, %s11827_s10 }
0x1d35   : > { %7414 = vrot.lane.b32.xlu1 %v11471_v51, %s11828_s11 }
0x1d39   : > { %7464 = vrot.lane.b32.xlu1 %v11474_v8, %s11828_s11  ;;  %s11836_s11 = sld [smem:[#allocation20_spill]] }
0x1d3d   : > { %7462 = vrot.lane.b32.xlu1 %v11503_v55, %s11829_s16 }
0x1dad   : > { %v7245_v59 = vpop.xlane.xlu1 %7244 }
0x1dae   : > { %v7247_v49 = vsub.f32 %v7234_v26, %v7245_v59 }
0x1db0   : > { %v7250_v22 = vmul.f32 1.442695, %v7247_v49 }
0x1db1   : > { %v7265_v63 = vpop.permute.xlu1 %7264 }
0x1db2   : > { %v7270_v39 = vsel %vm6712_vm12, %v7265_v63, 0  ;;  %9897 = vpow2.f32 %v7250_v22 }
0x1db3   : > { %9507 = vmatpush3.bf16.msra.mxu1 %v7270_v39 }
0x1db4   : > { %9518 = vmatprep.subr.bf16.mxu1 %v9983_v6 }
0x1db5   : > { %v7415_v38 = vpop.permute.xlu1 %7414 }
0x1db6   : > { %v7420_v54 = vsel %vm1256_vm2, %v7415_v38, 0 }
0x1db9   : > { %v7465_v59 = vpop.permute.xlu1 %7464 }
0x1dba   : > { %v7470_v22 = vsel %vm1256_vm2, %v7465_v59, 0 }
0x1dbc   : > { %v9898_v40 = vpop.eup %9897 }
0x1dbd   : > { %v7255_v42 = vsel %vm6681_vm11, %v9898_v40, 0.0 }
0x1de5   : > { %v7088_v21 = vpop.f32.mrb[192].mxu1 }
0x1de6   : > { %v11595_v57 = vadd.f32 %v7134_v10, %v7088_v21  ;;  %v9486_v17 = vpop.f32.mrb[193].mxu1 }
0x1de7   : > { %v7091_v31 = vpop.f32.mrb[194].mxu1 }
0x1de8   : > { %v9487_v1 = vpop.f32.mrb[195].mxu1 }
0x1ded   : > { %v7184_v44 = vpop.f32.mrb[196].mxu1 }
0x1dee   : > { %v9498_v5 = vpop.f32.mrb[197].mxu1  ;;  %v7240_v55 = vsel %vm6681_vm11, %v7184_v44, -inf }
0x1def   : > { %7241 = vmax.xlane.f32.xlu0 %v7240_v55  ;;  %v7187_v9 = vpop.f32.mrb[198].mxu1  ;;  %v7463_v5 = vpop.permute.xlu1 %7462 }
0x1df0   : > { %v9499_v13 = vpop.f32.mrb[199].mxu1 }
0x1df3   : > { %7256 = vadd.xlane.f32.xlu0 %v7255_v42 }
0x1e7c   : > { %v7242_v19 = vpop.xlane.xlu0 %7241 }
0x1e7d   : > { %v7246_v29 = vsub.f32 %v7184_v44, %v7242_v19 }
0x1e7f   : > { %v7248_v62 = vmul.f32 1.442695, %v7246_v29 }
0x1e80   : > { %v7257_v53 = vpop.xlane.xlu0 %7256 }
0x1e81   : > { %9899 = vpow2.f32 %v7248_v62 }
0x1e82   : > { %9901 = vrcp.f32 %v7257_v53 }
0x1e8b   : > { %v9900_v46 = vpop.eup %9899 }
0x1e8c   : > { %v7252_v15 = vsel %vm6681_vm11, %v9900_v46, 0.0  ;;  %v9902_v23 = vpop.eup %9901 }
0x1e8d   : > { %7253 = vadd.xlane.f32.xlu0 %v7252_v15  ;;  %v7261_v2 = vmul.f32 %v9902_v23, %v9898_v40 }
0x1e8f   : > { %v7263_v20 = vpack.c.bf16 %v7261_v2, %v7261_v2 }
0x1ea3   : > { %7312 = vrot.lane.b32.xlu0 %v11474_v8, %s11827_s10  ;;  %s11835_s10 = sld [smem:[#allocation18_spill]] }
0x1ea7   : > { %7412 = vrot.lane.b32.xlu0 %v11510_v50, %s11829_s16  ;;  %s11837_s16 = sshll.u32 %s11839_s28, 2 }
0x1f1a   : > { %v7254_v37 = vpop.xlane.xlu0 %7253 }
0x1f1b   : > { %9903 = vrcp.f32 %v7254_v37 }
0x1f1e   : > { %v7313_v14 = vpop.permute.xlu0 %7312 }
0x1f1f   : > { %v7318_v16 = vsel %vm6712_vm12, %v7313_v14, 0 }
0x1f20   : > { %9513 = vmatpush3.bf16.msra.mxu0 %v7318_v16 }
0x1f21   : > { %9524 = vmatprep.subr.bf16.mxu0 %v9983_v6 }
0x1f22   : > { %v7413_v10 = vpop.permute.xlu0 %7412 }
0x1f23   : > { %9515 = vmatmul.mubr.msk.bf16.vlgmr.msra.gmra.mrb[164].mxu0 %vm6708_vm13, %v7263_v20 }
0x1f24   : > { %9526 = vmatprep.mubr.msk.bf16.mxu0 %vm9984_vm1, %v9983_v6 }
0x1f25   : > { %v9904_v50 = vpop.eup %9903 }
0x1f26   : > { %v7260_v43 = vmul.f32 %v9904_v50, %v9900_v46 }
0x1f28   : > { %v7262_v52 = vpack.c.bf16 %v7260_v43, %v7260_v43 }
0x1f29   : > { %9525 = vmatpush3.bf16.xpose.msra.mxu0 %v7420_v54 }
0x1f2a   : > { %9509 = vmatmul.mubr.msk.bf16.vlgmr.msra.gmra.mrb[200].mxu1 %vm6708_vm13, %v7262_v52  ;;  %9536 = vmatprep.subr.bf16.mxu0 %v9983_v6 }
0x1f2b   : > { %9520 = vmatprep.mubr.msk.bf16.mxu1 %vm9984_vm1, %v9983_v6  ;;  %9519 = vmatpush3.bf16.msra.mxu1 %v7369_v3 }
0x1f2c   : > { %9530 = vmatprep.subr.bf16.mxu1 %v9983_v6 }
0x1f30   : > { %9527 = vmatmul.mubr.msk.bf16.vlgmr.msra.gmra.mrb[168].mxu0 %vm1256_vm2, %v7413_v10 }
0x1f31   : > { %9538 = vmatprep.mubr.msk.bf16.mxu0 %vm9984_vm1, %v9983_v6 }
0x1ff6   : > { %v7354_v27 = vpop.f32.mrb[164].mxu0 }
0x1ff7   : > { %v9516_v32 = vpop.f32.mrb[165].mxu0 }
0x1ff8   : > { %v7357_v26 = vpop.f32.mrb[166].mxu0 }
0x1ff9   : > { %v9517_v48 = vpop.f32.mrb[167].mxu0 }
0x1ffd   : > { %v7306_v24 = vpop.f32.mrb[200].mxu1 }
0x1ffe   : > { %v7362_v58 = vcombine.low %v7306_v24, %v7354_v27  ;;  %v9510_v36 = vpop.f32.mrb[201].mxu1 }
0x1fff   : > { %v7309_v63 = vpop.f32.mrb[202].mxu1 }
0x2000   : > { %v7364_v39 = vpack.c.bf16 %v7362_v58, %v7362_v58  ;;  %v9511_v49 = vpop.f32.mrb[203].mxu1  ;;  %v6552_v63 = vld [vmem:[%s11826_s7 + $0xc] sm:$0xf] }
0x2002   : > { %9521 = vmatmul.mubr.msk.bf16.vlgmr.msra.gmra.mrb[204].mxu1 %vm1256_vm2, %v7364_v39  ;;  %v7641_v39 = vsel %vm1747_vm3, %v6552_v63, 0 }
0x2003   : > { %9531 = vmatpush3.bf16.xpose.msra.mxu1 %v7470_v22  ;;  %v7456_v21 = vpop.f32.mrb[168].mxu0  ;;  %9532 = vmatprep.mubr.msk.bf16.mxu1 %vm9984_vm1, %v9983_v6 }
0x2004   : > { %v9528_v17 = vpop.f32.mrb[169].mxu0  ;;  %v7512_v31 = vsel %vm6681_vm11, %v7456_v21, -inf  ;;  %9542 = vmatprep.subr.bf16.mxu1 %v9983_v6 }
0x2005   : > { %7513 = vmax.xlane.f32.xlu0 %v7512_v31  ;;  %v7459_v1 = vpop.f32.mrb[170].mxu0 }
0x2006   : > { %v9529_v44 = vpop.f32.mrb[171].mxu0 }
0x200a   : > { %9533 = vmatmul.mubr.msk.bf16.vlgmr.msra.gmra.mrb[208].mxu1 %vm1256_vm2, %v7463_v5  ;;  %v8598_v5 = vld [vmem:[%s11831_s22] ss:$0 sm:$0xff] }
0x200b   : > { %9544 = vmatprep.mubr.msk.bf16.mxu1 %vm9984_vm1, %v9983_v6 }
0x2092   : > { %v7514_v55 = vpop.xlane.xlu0 %7513 }
0x2093   : > { %v7518_v40 = vsub.f32 %v7456_v21, %v7514_v55 }
0x2095   : > { %v7520_v9 = vmul.f32 1.442695, %v7518_v40 }
0x2097   : > { %9905 = vpow2.f32 %v7520_v9 }
0x20a1   : > { %v9906_v13 = vpop.eup %9905 }
0x20a2   : > { %v7524_v42 = vsel %vm6681_vm11, %v9906_v13, 0.0 }
0x20a3   : > { %7525 = vadd.xlane.f32.xlu0 %v7524_v42 }
0x20d5   : > { %v7405_v19 = vpop.f32.mrb[204].mxu1 }
0x20d6   : > { %v7411_v29 = vadd.f32 %v7405_v19, %v11595_v57  ;;  %v9522_v62 = vpop.f32.mrb[205].mxu1 }
0x20d7   : > { %v7408_v46 = vpop.f32.mrb[206].mxu1 }
0x20d8   : > { %v9523_v15 = vpop.f32.mrb[207].mxu1 }
0x20dd   : > { %v7506_v53 = vpop.f32.mrb[208].mxu1 }
0x20de   : > { %v9534_v23 = vpop.f32.mrb[209].mxu1  ;;  %v7515_v37 = vsel %vm6681_vm11, %v7506_v53, -inf }
0x20df   : > { %7516 = vmax.xlane.f32.xlu1 %v7515_v37  ;;  %v7509_v2 = vpop.f32.mrb[210].mxu1 }
0x20e0   : > { %v9535_v14 = vpop.f32.mrb[211].mxu1 }
0x20f0   : > { %7536 = vrot.lane.b32.xlu1 %v11471_v51, %s11830_s18 }
0x2130   : > { %v7526_v16 = vpop.xlane.xlu0 %7525 }
0x2131   : > { %9907 = vrcp.f32 %v7526_v16 }
0x213b   : > { %v9908_v20 = vpop.eup %9907 }
0x213c   : > { %v7532_v43 = vmul.f32 %v9908_v20, %v9906_v13 }
0x213e   : > { %v7534_v10 = vpack.c.bf16 %v7532_v43, %v7532_v43 }
0x216c   : > { %v7517_v50 = vpop.xlane.xlu1 %7516 }
0x216d   : > { %v7519_v38 = vsub.f32 %v7506_v53, %v7517_v50 }
0x216f   : > { %v7522_v57 = vmul.f32 1.442695, %v7519_v38 }
0x2170   : > { %v7537_v54 = vpop.permute.xlu1 %7536 }
0x2171   : > { %9909 = vpow2.f32 %v7522_v57  ;;  %v7542_v52 = vsel %vm6712_vm12, %v7537_v54, 0 }
0x2172   : > { %9537 = vmatpush3.bf16.msra.mxu0 %v7542_v52 }
0x2173   : > { %9548 = vmatprep.subr.bf16.mxu0 %v9983_v6 }
0x2175   : > { %9539 = vmatmul.mubr.msk.bf16.vlgmr.msra.gmra.mrb[172].mxu0 %vm6708_vm13, %v7534_v10 }
0x2176   : > { %9550 = vmatprep.mubr.msk.bf16.mxu0 %vm9984_vm1, %v9983_v6  ;;  %9549 = vmatpush3.bf16.msra.mxu0 %v7641_v39 }
0x2177   : > { %9562 = vmatprep.subr.bf16.mxu0 %v9983_v6 }
0x217b   : > { %v9910_v51 = vpop.eup %9909 }
0x217c   : > { %v7527_v0 = vsel %vm6681_vm11, %v9910_v51, 0.0 }
0x217d   : > { %7528 = vadd.xlane.f32.xlu0 %v7527_v0 }
0x2193   : > { %7584 = vrot.lane.b32.xlu0 %v11474_v8, %s11830_s18  ;;  %s1058_s18 = scalar_lea.vmem %s10175_s30, %s11837_s16 }
0x220a   : > { %v7529_v3 = vpop.xlane.xlu0 %7528 }
0x220b   : > { %9911 = vrcp.f32 %v7529_v3 }
0x220e   : > { %v7585_v27 = vpop.permute.xlu0 %7584 }
0x220f   : > { %v7590_v32 = vsel %vm6712_vm12, %v7585_v27, 0 }
0x2210   : > { %9543 = vmatpush3.bf16.msra.mxu1 %v7590_v32 }
0x2211   : > { %9554 = vmatprep.subr.bf16.mxu1 %v9983_v6 }
0x2215   : > { %v9912_v26 = vpop.eup %9911 }
0x2216   : > { %v7533_v48 = vmul.f32 %v9912_v26, %v9910_v51 }
0x2218   : > { %v7535_v24 = vpack.c.bf16 %v7533_v48, %v7533_v48 }
0x221a   : > { %9545 = vmatmul.mubr.msk.bf16.vlgmr.msra.gmra.mrb[212].mxu1 %vm6708_vm13, %v7535_v24 }
0x221b   : > { %9558 = vmatprep.mubr.msk.bf16.mxu1 %vm9984_vm1, %v9983_v6 }
0x2248   : > { %v7578_v58 = vpop.f32.mrb[172].mxu0 }
0x2249   : > { %v9540_v36 = vpop.f32.mrb[173].mxu0 }
0x224a   : > { %v7581_v8 = vpop.f32.mrb[174].mxu0 }
0x224b   : > { %v9541_v59 = vpop.f32.mrb[175].mxu0 }
0x22ed   : > { %v7626_v49 = vpop.f32.mrb[212].mxu1 }
0x22ee   : > { %v7634_v22 = vcombine.low %v7578_v58, %v7626_v49  ;;  %v9546_v21 = vpop.f32.mrb[213].mxu1 }
0x22ef   : > { %v7629_v17 = vpop.f32.mrb[214].mxu1 }
0x22f0   : > { %v7636_v31 = vpack.c.bf16 %v7634_v22, %v7634_v22  ;;  %v9547_v1 = vpop.f32.mrb[215].mxu1 }
0x22f2   : > { %9551 = vmatmul.mubr.msk.bf16.vlgmr.msra.gmra.mrb[176].mxu0 %vm1256_vm2, %v7636_v31 }
0x22f3   : > { %9570 = vmatprep.mubr.msk.bf16.mxu0 %vm9984_vm1, %v9983_v6 }
0x23c5   : > { %v7677_v44 = vpop.f32.mrb[176].mxu0 }
0x23c6   : > { %v7683_v55 = vadd.f32 %v7677_v44, %v7411_v29  ;;  %v9552_v40 = vpop.f32.mrb[177].mxu0 }
0x23c7   : > { %v7680_v9 = vpop.f32.mrb[178].mxu0 }
0x23c8   : > { %v7691_v13 = vadd.f32 %v8598_v5, %v7683_v55  ;;  %v9553_v42 = vpop.f32.mrb[179].mxu0 }
0x23ca   : > { %v7693_v19 = vrot.slane %v7691_v13, 1  ;;  %v7694_v62 = vrot.slane %v7691_v13, 2  ;;  %v7695_v46 = vrot.slane %v7691_v13, 3  ;;  %v7696_v15 = vrot.slane %v7691_v13, 4 }
0x23cb   : > { %v7697_v53 = vrot.slane %v7691_v13, 5  ;;  %v7698_v23 = vrot.slane %v7691_v13, 6  ;;  %v7699_v37 = vrot.slane %v7691_v13, 7  ;;  %v7708_v29 = vadd.f32 %v7691_v13, %v11420_v35 }
0x23cc   : > { %v7709_v2 = vadd.f32 %v7693_v19, %v11422_v61  ;;  %v7710_v14 = vadd.f32 %v7694_v62, %v11424_v33  ;;  %v7711_v16 = vadd.f32 %v7695_v46, %v11426_v25  ;;  %v7712_v20 = vadd.f32 %v7696_v15, %v11436_v34 }
0x23cd   : > { %v7713_v50 = vadd.f32 %v7697_v53, %v11438_v18  ;;  %v7714_v57 = vadd.f32 %v7698_v23, %v11440_v56  ;;  %v7715_v54 = vadd.f32 %v7699_v37, %v11442_v11 }
0x23ce   : > { %v7726_v38 = vrot.slane %v7709_v2, 7  ;;  %v7728_v43 = vrot.slane %v7710_v14, 6  ;;  %v7730_v10 = vrot.slane %v7711_v16, 5  ;;  %v7732_v33 = vrot.slane %v7712_v20, 4 }
0x23cf   : > { %v7734_v51 = vrot.slane %v7713_v50, 3  ;;  %v7736_v35 = vrot.slane %v7714_v57, 2  ;;  %v7738_v0 = vrot.slane %v7715_v54, 1 }
0x23d0   : > { %v7727_v52 = vsel %vm6476_vm15, %v7726_v38, %v7708_v29 }
0x23d1   : > { %v7729_v61 = vsel %vm6478_vm5, %v7728_v43, %v7727_v52  ;;  %v9708_v52 = vld [vmem:[%s11832_s0 + $0x8] sm:$0xff]  }
0x23d2   : > { %v7731_v25 = vsel %vm6480_vm6, %v7730_v10, %v7729_v61  ;;  %v9709_v10 = vld [vmem:[%s11833_s26] sm:$0xff]   ;;  %v9710_v61 = vld [vmem:[%s11833_s26 + $0x8] sm:$0xff]  }
0x23d3   : > { %v7733_v34 = vsel %vm6482_vm7, %v7732_v33, %v7731_v25  ;;  %9563 = vmatpush3.bf16.msra.mxu0 %v9709_v10 }
0x23d4   : > { %v7735_v18 = vsel %vm6484_vm8, %v7734_v51, %v7733_v34  ;;  %9564 = vmatprep.subr.bf16.mxu0 %v9983_v6 }
0x23d5   : > { %v7737_v3 = vsel %vm6486_vm9, %v7736_v35, %v7735_v18  ;;  %v8599_v35 = vld [vmem:[%s11834_s2] ss:$0 sm:$0xff] }
0x23d6   : > { %v7739_v56 = vsel %vm6488_vm10, %v7738_v0, %v7737_v3 }
0x23d7   : > { %v7741_v11 = vsel %vm1123_vm0, %v7739_v56, 0.0  ;;  %9565 = vmatpush3.bf16.msra.mxu0 %v9710_v61 }
0x23d8   : > { %7742 = vadd.xlane.f32.xlu1 %v7741_v11  ;;  %9566 = vmatprep.subr.bf16.mxu0 %v9983_v6 }
0x2465   : > { %v7743_v27 = vpop.xlane.xlu1 %7742 }
0x2466   : > { %v7744_v32 = vmul.f32 0.03125, %v7743_v27 }
0x2468   : > { %v7746_v26 = vrot.slane %v7744_v32, 1  ;;  %v7747_v48 = vrot.slane %v7744_v32, 2  ;;  %v7748_v24 = vrot.slane %v7744_v32, 3  ;;  %v7749_v58 = vrot.slane %v7744_v32, 4 }
0x2469   : > { %v7750_v36 = vrot.slane %v7744_v32, 5  ;;  %v7751_v8 = vrot.slane %v7744_v32, 6  ;;  %v7752_v59 = vrot.slane %v7744_v32, 7  ;;  %v7761_v63 = vsub.f32 %v7708_v29, %v7744_v32 }
0x246a   : > { %v7762_v39 = vsub.f32 %v7709_v2, %v7746_v26  ;;  %v7763_v49 = vsub.f32 %v7710_v14, %v7747_v48  ;;  %v7764_v22 = vsub.f32 %v7711_v16, %v7748_v24  ;;  %v7765_v21 = vsub.f32 %v7712_v20, %v7749_v58  ;;  %v8600_v48 = vld [vmem:[%s11835_s10] ss:$0 sm:$0xff] }
0x246b   : > { %v7766_v17 = vsub.f32 %v7713_v50, %v7750_v36  ;;  %v7767_v31 = vsub.f32 %v7714_v57, %v7751_v8  ;;  %v7768_v1 = vsub.f32 %v7715_v54, %v7752_v59  ;;  %v7769_v9 = vmul.f32 %v7761_v63, %v7761_v63  ;;  %v9707_v54 = vld [vmem:[%s11832_s0] sm:$0xff]  }
0x246c   : > { %v7770_v44 = vmul.f32 %v7762_v39, %v7762_v39  ;;  %v7771_v5 = vmul.f32 %v7763_v49, %v7763_v49  ;;  %v7772_v55 = vmul.f32 %v7764_v22, %v7764_v22  ;;  %v7773_v40 = vmul.f32 %v7765_v21, %v7765_v21  ;;  %9555 = vmatpush3.bf16.msra.mxu1 %v9707_v54 }
0x246d   : > { %v7774_v13 = vmul.f32 %v7766_v17, %v7766_v17  ;;  %v7775_v62 = vmul.f32 %v7767_v31, %v7767_v31  ;;  %v7776_v46 = vmul.f32 %v7768_v1, %v7768_v1  ;;  %9556 = vmatprep.subr.bf16.mxu1 %v9983_v6 }
0x246e   : > { %v7785_v42 = vrot.slane %v7770_v44, 7  ;;  %v7787_v19 = vrot.slane %v7771_v5, 6  ;;  %v7789_v53 = vrot.slane %v7772_v55, 5  ;;  %v7791_v37 = vrot.slane %v7773_v40, 4 }
0x246f   : > { %v7793_v14 = vrot.slane %v7774_v13, 3  ;;  %v7795_v20 = vrot.slane %v7775_v62, 2  ;;  %v7797_v50 = vrot.slane %v7776_v46, 1 }
0x2470   : > { %v7786_v15 = vsel %vm6476_vm15, %v7785_v42, %v7769_v9  ;;  %9557 = vmatpush3.bf16.msra.mxu1 %v9708_v52 }
0x2471   : > { %v7788_v23 = vsel %vm6478_vm5, %v7787_v19, %v7786_v15 }
0x2472   : > { %v7790_v2 = vsel %vm6480_vm6, %v7789_v53, %v7788_v23 }
0x2473   : > { %v7792_v16 = vsel %vm6482_vm7, %v7791_v37, %v7790_v2 }
0x2474   : > { %v7794_v29 = vsel %vm6484_vm8, %v7793_v14, %v7792_v16 }
0x2475   : > { %v7796_v38 = vsel %vm6486_vm9, %v7795_v20, %v7794_v29 }
0x2476   : > { %v7798_v43 = vsel %vm6488_vm10, %v7797_v50, %v7796_v38 }
0x2477   : > { %v7800_v57 = vsel %vm1123_vm0, %v7798_v43, 0.0 }
0x2478   : > { %7801 = vadd.xlane.f32.xlu0 %v7800_v57 }
0x2505   : > { %v7802_v33 = vpop.xlane.xlu0 %7801 }
0x2506   : > { %v7803_v25 = vmul.f32 0.03125, %v7802_v33 }
0x2508   : > { %v7804_v51 = vadd.f32 1e-05, %v7803_v25 }
0x250a   : > { %9913 = vrsqrt.f32 %v7804_v51 }
0x2514   : > { %v9914_v34 = vpop.eup %9913 }
0x2515   : > { %v7807_v18 = vrot.slane %v9914_v34, 1  ;;  %v7808_v0 = vrot.slane %v9914_v34, 2  ;;  %v7809_v3 = vrot.slane %v9914_v34, 3  ;;  %v7810_v56 = vrot.slane %v9914_v34, 4 }
0x2516   : > { %v7811_v11 = vrot.slane %v9914_v34, 5  ;;  %v7812_v27 = vrot.slane %v9914_v34, 6  ;;  %v7813_v32 = vrot.slane %v9914_v34, 7  ;;  %v7822_v26 = vmul.f32 %v9914_v34, %v7761_v63 }
0x2517   : > { %v7823_v24 = vmul.f32 %v7807_v18, %v7762_v39  ;;  %v7824_v58 = vmul.f32 %v7808_v0, %v7763_v49  ;;  %v7825_v36 = vmul.f32 %v7809_v3, %v7764_v22  ;;  %v7826_v8 = vmul.f32 %v7810_v56, %v7765_v21 }
0x2518   : > { %v7827_v59 = vmul.f32 %v7811_v11, %v7766_v17  ;;  %v7828_v44 = vmul.f32 %v7812_v27, %v7767_v31  ;;  %v7829_v5 = vmul.f32 %v7813_v32, %v7768_v1  ;;  %v7836_v55 = vmul.f32 %v8599_v35, %v7822_v26 }
0x2519   : > { %v7837_v40 = vmul.f32 %v8599_v35, %v7823_v24  ;;  %v7838_v9 = vmul.f32 %v8599_v35, %v7824_v58  ;;  %v7839_v13 = vmul.f32 %v8599_v35, %v7825_v36  ;;  %v7840_v42 = vmul.f32 %v8599_v35, %v7826_v8  ;;  %v9711_v24 = vld [vmem:[%s11833_s26 + $0x10] sm:$0xff]   ;;  %v9712_v58 = vld [vmem:[%s11833_s26 + $0x18] sm:$0xff]   ;;  %v8601_v36 = vld [vmem:[%s11836_s11] ss:$0 sm:$0xff] }
0x251a   : > { %v7841_v19 = vmul.f32 %v8599_v35, %v7827_v59  ;;  %v7842_v62 = vmul.f32 %v8599_v35, %v7828_v44  ;;  %v7843_v46 = vmul.f32 %v8599_v35, %v7829_v5  ;;  %v11687_v15 = vadd.f32 %v8600_v48, %v7836_v55  ;;  %9567 = vmatpush3.bf16.msra.mxu0 %v9711_v24 }
0x251b   : > { %v11689_v53 = vadd.f32 %v8600_v48, %v7837_v40  ;;  %v11691_v63 = vadd.f32 %v8600_v48, %v7838_v9  ;;  %v11693_v39 = vadd.f32 %v8600_v48, %v7839_v13  ;;  %v11695_v49 = vadd.f32 %v8600_v48, %v7840_v42  ;;  %9568 = vmatprep.subr.bf16.mxu0 %v9983_v6  ;;  %v8605_v13 = vld [vmem:[%s10160_s20] ss:$0 sm:$0xff] }
0x251c   : > { %v11697_v22 = vadd.f32 %v8600_v48, %v7841_v19  ;;  %v11699_v21 = vadd.f32 %v8600_v48, %v7842_v62  ;;  %v11701_v17 = vadd.f32 %v8600_v48, %v7843_v46  ;;  %v7858_v31 = vpack.c.bf16 %v11687_v15, %v11687_v15 }
0x251d   : > { %v7859_v1 = vpack.c.bf16 %v11689_v53, %v11689_v53  ;;  %v7860_v23 = vpack.c.bf16 %v11691_v63, %v11691_v63  ;;  %v7861_v37 = vpack.c.bf16 %v11693_v39, %v11693_v39  ;;  %v7862_v2 = vpack.c.bf16 %v11695_v49, %v11695_v49 }
0x251e   : > { %v7863_v14 = vpack.c.bf16 %v11697_v22, %v11697_v22  ;;  %v7864_v16 = vpack.c.bf16 %v11699_v21, %v11699_v21  ;;  %v7865_v20 = vpack.c.bf16 %v11701_v17, %v11701_v17  ;;  %v7885_v57 = vunpack.c.l.b16 %v7858_v31  ;;  %9569 = vmatpush3.bf16.msra.mxu0 %v9712_v58 }
0x251f   : > { %v7886_v29 = vunpack.c.l.b16 %v7859_v1  ;;  %v7887_v50 = vunpack.c.l.b16 %v7860_v23  ;;  %v7888_v38 = vunpack.c.l.b16 %v7861_v37  ;;  %v7889_v43 = vunpack.c.l.b16 %v7862_v2 }
0x2520   : > { %v7890_v54 = vunpack.c.l.b16 %v7863_v14  ;;  %v7891_v61 = vunpack.c.l.b16 %v7864_v16  ;;  %v7892_v33 = vunpack.c.l.b16 %v7865_v20 }
0x2521   : > { %v7893_v52 = vrot.slane %v7886_v29, 7  ;;  %v7895_v10 = vrot.slane %v7887_v50, 6  ;;  %v7897_v51 = vrot.slane %v7888_v38, 5  ;;  %v7899_v35 = vrot.slane %v7889_v43, 4 }
0x2522   : > { %v7901_v0 = vrot.slane %v7890_v54, 3  ;;  %v7903_v56 = vrot.slane %v7891_v61, 2  ;;  %v7905_v27 = vrot.slane %v7892_v33, 1 }
0x2523   : > { %v7894_v25 = vsel %vm6476_vm15, %v7893_v52, %v7885_v57 }
0x2524   : > { %v7896_v34 = vsel %vm6478_vm5, %v7895_v10, %v7894_v25 }
0x2525   : > { %v7898_v18 = vsel %vm6480_vm6, %v7897_v51, %v7896_v34 }
0x2526   : > { %v7900_v3 = vsel %vm6482_vm7, %v7899_v35, %v7898_v18 }
0x2527   : > { %v7902_v11 = vsel %vm6484_vm8, %v7901_v0, %v7900_v3 }
0x2528   : > { %v7904_v32 = vsel %vm6486_vm9, %v7903_v56, %v7902_v11 }
0x2529   : > { %v7906_v26 = vsel %vm6488_vm10, %v7905_v27, %v7904_v32 }
0x252a   : > { %v7907_v48 = vpack.c.b16 %v7906_v26, %v7906_v26 }
0x252c   : > { %9559 = vmatmul.mubr.msk.bf16.vlgmr.msra.gmra.mrb[216].mxu1 %vm1123_vm0, %v7907_v48 }
0x25ff   : > { %v7957_v8 = vpop.f32.mrb[216].mxu1 }
0x2600   : > { %v7958_v59 = vadd.f32 %v8601_v36, %v7957_v8  ;;  %v9560_v44 = vpop.f32.mrb[217].mxu1 }
0x2601   : > { %v7960_v5 = vpop.f32.mrb[218].mxu1 }
0x2602   : > { %v7963_v55 = vmax.f32 %v7958_v59, 0.0  ;;  %v9561_v40 = vpop.f32.mrb[219].mxu1 }
0x2604   : > { %v7964_v9 = vpack.c.bf16 %v7963_v55, %v7963_v55 }
0x2606   : > { %9571 = vmatmul.mubr.msk.bf16.vlgmr.msra.gmra.mrb[180].mxu0 %vm5432_vm4, %v7964_v9 }
0x26d9   : > { %v8041_v42 = vpop.f32.mrb[180].mxu0 }
0x26da   : > { %v8042_v19 = vadd.f32 %v8605_v13, %v8041_v42  ;;  %v9572_v62 = vpop.f32.mrb[181].mxu0 }
0x26db   : > { %v8044_v46 = vpop.f32.mrb[182].mxu0 }
0x26dc   : > { %v9573_v31 = vpop.f32.mrb[183].mxu0  ;;  %v8048_v1 = vrot.slane %v8042_v19, 1  ;;  %v8049_v23 = vrot.slane %v8042_v19, 2  ;;  %v8050_v6 = vrot.slane %v8042_v19, 3  ;;  %v8051_v37 = vrot.slane %v8042_v19, 4 }
0x26dd   : > { %v8052_v2 = vrot.slane %v8042_v19, 5  ;;  %v8053_v14 = vrot.slane %v8042_v19, 6  ;;  %v8054_v16 = vrot.slane %v8042_v19, 7  ;;  %v8063_v43 = vadd.f32 %v8042_v19, %v11687_v15 }
0x26de   : > { %v8064_v20 = vadd.f32 %v8048_v1, %v11689_v53  ;;  %v8065_v29 = vadd.f32 %v8049_v23, %v11691_v63  ;;  %v8066_v50 = vadd.f32 %v8050_v6, %v11693_v39  ;;  %v8067_v38 = vadd.f32 %v8051_v37, %v11695_v49 }
0x26df   : > { %v8068_v57 = vadd.f32 %v8052_v2, %v11697_v22  ;;  %v8069_v10 = vadd.f32 %v8053_v14, %v11699_v21  ;;  %v8070_v61 = vadd.f32 %v8054_v16, %v11701_v17 }
0x26e0   : > { %v8081_v54 = vrot.slane %v8064_v20, 7  ;;  %v8083_v52 = vrot.slane %v8065_v29, 6  ;;  %v8085_v25 = vrot.slane %v8066_v50, 5  ;;  %v8087_v63 = vrot.slane %v8067_v38, 4 }
0x26e1   : > { %v8089_v51 = vrot.slane %v8068_v57, 3  ;;  %v8091_v15 = vrot.slane %v8069_v10, 2  ;;  %v8093_v34 = vrot.slane %v8070_v61, 1 }
0x26e2   : > { %v8082_v33 = vsel %vm6476_vm15, %v8081_v54, %v8063_v43 }
0x26e3   : > { %v8084_v53 = vsel %vm6478_vm5, %v8083_v52, %v8082_v33 }
0x26e4   : > { %v8086_v39 = vsel %vm6480_vm6, %v8085_v25, %v8084_v53  ;;  %v8215_v53 = vsub.s32 0, %v11462_v60 }
0x26e5   : > { %v8088_v49 = vsel %vm6482_vm7, %v8087_v63, %v8086_v39  ;;  %v8611_v63 = vld [vmem:[%s10165_s27] ss:$0 sm:$0xff] }
0x26e6   : > { %v8090_v22 = vsel %vm6484_vm8, %v8089_v51, %v8088_v49 }
0x26e7   : > { %v8092_v35 = vsel %vm6486_vm9, %v8091_v15, %v8090_v22 }
0x26e8   : > { %v8094_v21 = vsel %vm6488_vm10, %v8093_v34, %v8092_v35 }
0x26e9   : > { %v8096_v17 = vsel %vm1123_vm0, %v8094_v21, 0.0 }
0x26ea   : > { %8097 = vadd.xlane.f32.xlu1 %v8096_v17  ;;  %v8612_v17 = vld [vmem:[%s10170_s4] ss:$0 sm:$0xff] }
0x2777   : > { %v8098_v18 = vpop.xlane.xlu1 %8097 }
0x2778   : > { %v8099_v0 = vmul.f32 0.03125, %v8098_v18 }
0x277a   : > { %v8101_v3 = vrot.slane %v8099_v0, 1  ;;  %v8102_v56 = vrot.slane %v8099_v0, 2  ;;  %v8103_v11 = vrot.slane %v8099_v0, 3  ;;  %v8104_v27 = vrot.slane %v8099_v0, 4 }
0x277b   : > { %v8105_v32 = vrot.slane %v8099_v0, 5  ;;  %v8106_v26 = vrot.slane %v8099_v0, 6  ;;  %v8107_v48 = vrot.slane %v8099_v0, 7  ;;  %v8116_v24 = vsub.f32 %v8063_v43, %v8099_v0 }
0x277c   : > { %v8117_v58 = vsub.f32 %v8064_v20, %v8101_v3  ;;  %v8118_v36 = vsub.f32 %v8065_v29, %v8102_v56  ;;  %v8119_v8 = vsub.f32 %v8066_v50, %v8103_v11  ;;  %v8120_v59 = vsub.f32 %v8067_v38, %v8104_v27 }
0x277d   : > { %v8121_v44 = vsub.f32 %v8068_v57, %v8105_v32  ;;  %v8122_v5 = vsub.f32 %v8069_v10, %v8106_v26  ;;  %v8123_v55 = vsub.f32 %v8070_v61, %v8107_v48  ;;  %v8124_v19 = vmul.f32 %v8116_v24, %v8116_v24 }
0x277e   : > { %v8125_v40 = vmul.f32 %v8117_v58, %v8117_v58  ;;  %v8126_v9 = vmul.f32 %v8118_v36, %v8118_v36  ;;  %v8127_v13 = vmul.f32 %v8119_v8, %v8119_v8  ;;  %v8128_v42 = vmul.f32 %v8120_v59, %v8120_v59 }
0x277f   : > { %v8129_v62 = vmul.f32 %v8121_v44, %v8121_v44  ;;  %v8130_v1 = vmul.f32 %v8122_v5, %v8122_v5  ;;  %v8131_v23 = vmul.f32 %v8123_v55, %v8123_v55 }
0x2780   : > { %v8140_v46 = vrot.slane %v8125_v40, 7  ;;  %v8142_v31 = vrot.slane %v8126_v9, 6  ;;  %v8144_v37 = vrot.slane %v8127_v13, 5  ;;  %v8146_v14 = vrot.slane %v8128_v42, 4 }
0x2781   : > { %v8148_v20 = vrot.slane %v8129_v62, 3  ;;  %v8150_v50 = vrot.slane %v8130_v1, 2  ;;  %v8152_v43 = vrot.slane %v8131_v23, 1 }
0x2782   : > { %v8141_v6 = vsel %vm6476_vm15, %v8140_v46, %v8124_v19 }
0x2783   : > { %v8143_v2 = vsel %vm6478_vm5, %v8142_v31, %v8141_v6 }
0x2784   : > { %v8145_v16 = vsel %vm6480_vm6, %v8144_v37, %v8143_v2 }
0x2785   : > { %v8147_v29 = vsel %vm6482_vm7, %v8146_v14, %v8145_v16 }
0x2786   : > { %v8149_v38 = vsel %vm6484_vm8, %v8148_v20, %v8147_v29 }
0x2787   : > { %v8151_v57 = vsel %vm6486_vm9, %v8150_v50, %v8149_v38 }
0x2788   : > { %v8153_v54 = vsel %vm6488_vm10, %v8152_v43, %v8151_v57 }
0x2789   : > { %v8155_v52 = vsel %vm1123_vm0, %v8153_v54, 0.0  ;;  %vm8285_vm0 = vcmask 257024  }
0x278a   : > { %8156 = vadd.xlane.f32.xlu0 %v8155_v52 }
0x2817   : > { %v8157_v10 = vpop.xlane.xlu0 %8156 }
0x2818   : > { %v8158_v61 = vmul.f32 0.03125, %v8157_v10 }
0x281a   : > { %v8159_v33 = vadd.f32 1e-05, %v8158_v61 }
0x281c   : > { %9915 = vrsqrt.f32 %v8159_v33 }
0x2826   : > { %v9916_v25 = vpop.eup %9915 }
0x2827   : > { %v8162_v39 = vrot.slane %v9916_v25, 1  ;;  %v8163_v51 = vrot.slane %v9916_v25, 2  ;;  %v8164_v49 = vrot.slane %v9916_v25, 3  ;;  %v8165_v15 = vrot.slane %v9916_v25, 4 }
0x2828   : > { %v8166_v22 = vrot.slane %v9916_v25, 5  ;;  %v8167_v34 = vrot.slane %v9916_v25, 6  ;;  %v8168_v35 = vrot.slane %v9916_v25, 7  ;;  %v8177_v21 = vmul.f32 %v9916_v25, %v8116_v24 }
0x2829   : > { %v8178_v18 = vmul.f32 %v8162_v39, %v8117_v58  ;;  %v8179_v0 = vmul.f32 %v8163_v51, %v8118_v36  ;;  %v8180_v3 = vmul.f32 %v8164_v49, %v8119_v8  ;;  %v8181_v56 = vmul.f32 %v8165_v15, %v8120_v59 }
0x282a   : > { %v8182_v11 = vmul.f32 %v8166_v22, %v8121_v44  ;;  %v8183_v27 = vmul.f32 %v8167_v34, %v8122_v5  ;;  %v8184_v32 = vmul.f32 %v8168_v35, %v8123_v55  ;;  %v8191_v26 = vmul.f32 %v8611_v63, %v8177_v21 }
0x282b   : > { %v8192_v60 = vmul.f32 %v8611_v63, %v8178_v18  ;;  %v8193_v48 = vmul.f32 %v8611_v63, %v8179_v0  ;;  %v8194_v40 = vmul.f32 %v8611_v63, %v8180_v3  ;;  %v8195_v9 = vmul.f32 %v8611_v63, %v8181_v56 }
0x282c   : > { %v8196_v13 = vmul.f32 %v8611_v63, %v8182_v11  ;;  %v8197_v42 = vmul.f32 %v8611_v63, %v8183_v27  ;;  %v8198_v19 = vmul.f32 %v8611_v63, %v8184_v32  ;;  %v8205_v62 = vadd.f32 %v8612_v17, %v8191_v26 }
0x282d   : > { %v8206_v46 = vadd.f32 %v8612_v17, %v8192_v60  ;;  %v8207_v24 = vadd.f32 %v8612_v17, %v8193_v48  ;;  %v8208_v58 = vadd.f32 %v8612_v17, %v8194_v40  ;;  %v8209_v36 = vadd.f32 %v8612_v17, %v8195_v9 }
0x282e   : > { %v8210_v8 = vadd.f32 %v8612_v17, %v8196_v13  ;;  %v8211_v59 = vadd.f32 %v8612_v17, %v8197_v42  ;;  %v8212_v44 = vadd.f32 %v8612_v17, %v8198_v19  ;;  %v8216_v5 = vrot.slane %v8205_v62, %v8215_v53 }
0x282f   : > { %v8220_v55 = vrot.slane %v8206_v46, %v8215_v53  ;;  %v8224_v31 = vrot.slane %v8207_v24, %v8215_v53  ;;  %v8228_v1 = vrot.slane %v8208_v58, %v8215_v53  ;;  %v8232_v23 = vrot.slane %v8209_v36, %v8215_v53 }
0x2830   : > { %v8236_v6 = vrot.slane %v8210_v8, %v8215_v53  ;;  %v8240_v37 = vrot.slane %v8211_v59, %v8215_v53  ;;  %v8244_v2 = vrot.slane %v8212_v44, %v8215_v53  ;;  %v8245_v14 = vadd.f32 %v8216_v5, %v11381_v41 }
0x2831   : > { %v8246_v16 = vadd.f32 %v8220_v55, %v11384_v47  ;;  %v8247_v20 = vadd.f32 %v8224_v31, %v11387_v7  ;;  %v8248_v29 = vadd.f32 %v8228_v1, %v11390_v30  ;;  %v8249_v50 = vadd.f32 %v8232_v23, %v11401_v45 }
0x2832   : > { %v8250_v38 = vadd.f32 %v8236_v6, %v11404_v12  ;;  %v8251_v43 = vadd.f32 %v8240_v37, %v11407_v28  ;;  %v8252_v57 = vadd.f32 %v8244_v2, %v11410_v4  ;;  %v8639_v54 = vpack.c.bf16 %v8245_v14, %v8245_v14 }
0x2833   : > { %v8640_v52 = vpack.c.bf16 %v8246_v16, %v8246_v16  ;;  %v8641_v10 = vpack.c.bf16 %v8247_v20, %v8247_v20  ;;  %v8642_v41 = vpack.c.bf16 %v8248_v29, %v8248_v29  ;;  %v8643_v61 = vpack.c.bf16 %v8249_v50, %v8249_v50 }
0x2834   : > { %v8644_v33 = vpack.c.bf16 %v8250_v38, %v8250_v38  ;;  %v8645_v25 = vpack.c.bf16 %v8251_v43, %v8251_v43  ;;  %v8646_v47 = vpack.c.bf16 %v8252_v57, %v8252_v57  ;;  %8286 = vst.msk [vmem:[%s1058_s18] sm:$0xf] %vm8285_vm0, %v8639_v54 }
0x2835   : > { %8287 = vst.msk [vmem:[%s1058_s18 + $0x4] sm:$0xf] %vm8285_vm0, %v8640_v52  ;;  %8288 = vst.msk [vmem:[%s1058_s18 + $0x8] sm:$0xf] %vm8285_vm0, %v8641_v10 }
0x2836   : > { %8289 = vst.msk [vmem:[%s1058_s18 + $0xc] sm:$0xf] %vm8285_vm0, %v8642_v41  ;;  %8290 = vst.msk [vmem:[%s1058_s18 + $0x10] sm:$0xf] %vm8285_vm0, %v8643_v61 }
0x2837   : > { %8291 = vst.msk [vmem:[%s1058_s18 + $0x14] sm:$0xf] %vm8285_vm0, %v8644_v33  ;;  %8292 = vst.msk [vmem:[%s1058_s18 + $0x18] sm:$0xf] %vm8285_vm0, %v8645_v25 }
0x2838   : > { %8293 = vst.msk [vmem:[%s1058_s18 + $0x1c] sm:$0xf] %vm8285_vm0, %v8646_v47 }
0x2839 PF: > { %s80_s15 = sadd.s32 1, %s9946_s15  }
0x283a   : > { %p77_p1 = scmp.ge.s32.totalorder %s80_s15, 4  }
0x283c   :  { %79 = sbr.rel (!%p77_p1) target bundleno = 60 (0x3c), region = 225 }
0x2843   :  { %8316 = vsyncpa [#allocation3], 1 }
0x2844   :  { %8318 = vsyncpa [#allocation3 + $0x1], 1 }

</bundles_post_ra>
